<compile_context>
chip_gen: v5e
topology: v5e:2x2
jax: 0.10.0
libtpu: 0.0.40
codegen_flags: <defaults>
</compile_context>

<pallas_src>
import functools

import jax
import jax.numpy as jnp
from jax.experimental import pallas as pl
from jax.experimental.pallas import tpu as pltpu


def _round_up(x, m):
    return (x + m - 1) // m * m


# ----------------------------------------------------------------------------
# Fused kernel: per grid step = one time-chunk.
#   (1) bf16 MXU matmul: x_chunk @ W_ih^T + b_ih            (all Tc steps at once)
#   (2) unrolled sequential GRU recurrence over the chunk   (h kept in VMEM scratch)
#       + in-loop selection of h at t == lens-1
#   (3) on the last grid step: h_last @ W_fc^T + b_fc, masked log-softmax
# ----------------------------------------------------------------------------
def _fused_gru_classifier_kernel(
        maxlen_ref,                         # SMEM (1,) int32   (scalar prefetch)
        x_ref,                              # VMEM (Tc*Bp, K)   bf16  (time chunk)
        w_ih_ref,                           # VMEM (K, 3Hp)     bf16  (resident)
        b_ih_ref,                           # VMEM (1, 3Hp)     f32   (resident)
        w_hh_ref,                           # VMEM (Hp, 3Hp)    f32   (resident)
        b_hh_ref,                           # VMEM (1, 3Hp)     f32   (resident)
        lens_ref,                           # VMEM (Bp, 1)      int32 (resident)
        w_fc_ref,                           # VMEM (Hp, Cp)     f32   (resident)
        b_fc_ref,                           # VMEM (1, Cp)      f32   (resident)
        o_ref,                              # VMEM (Bp, Cp)     f32   (resident output)
        h_scr, hl_scr, gates_scr,           # VMEM scratch
        *, tc, bp, hp, num_classes):
    c = pl.program_id(0)

    @pl.when(c == 0)
    def _():
        h_scr[...] = jnp.zeros_like(h_scr)
        hl_scr[...] = jnp.zeros_like(hl_scr)
        o_ref[...] = jnp.zeros_like(o_ref)

    max_len = maxlen_ref[0]
    chunk_start = c * tc

    # Skip chunks that are entirely past max(lens) (ragged-batch saving).
    @pl.when(chunk_start < max_len)
    def _():
        # (1) Input projection for the whole chunk in one bf16 MXU matmul
        #     (f32 accumulation); gates laid out [r | z | n], each padded to Hp.
        gates_scr[...] = jnp.dot(
            x_ref[...], w_ih_ref[...],
            preferred_element_type=jnp.float32) + b_ih_ref[...]

        w_hh = w_hh_ref[...]
        b_hh = b_hh_ref[...]
        lens_m1 = lens_ref[...] - 1                       # (Bp, 1) int32

        # (2) Sequential recurrence, unrolled over the chunk.  All elementwise
        #     math stays f32 (v5e has no bf16 VPU/EUP).
        def step(i, carry):
            h, hl = carry                                 # (Bp, Hp) f32 each
            t = chunk_start + i
            gx = gates_scr[pl.ds(i * bp, bp), :]          # (Bp, 3Hp)
            gh = jnp.dot(h, w_hh, preferred_element_type=jnp.float32) + b_hh
            r = jax.nn.sigmoid(gx[:, 0:hp] + gh[:, 0:hp])
            z = jax.nn.sigmoid(gx[:, hp:2 * hp] + gh[:, hp:2 * hp])
            n = jnp.tanh(gx[:, 2 * hp:3 * hp] + r * gh[:, 2 * hp:3 * hp])
            h_new = (1.0 - z) * n + z * h
            # Select h at t == lens-1 (padded rows have lens=0 -> never selected;
            # steps past lens[b] keep evolving h but are never selected again).
            hl = jnp.where(lens_m1 == t, h_new, hl)
            return h_new, hl

        h_fin, hl_fin = jax.lax.fori_loop(
            0, tc, step, (h_scr[...], hl_scr[...]), unroll=True)
        h_scr[...] = h_fin
        hl_scr[...] = hl_fin

    # (3) Fused classifier epilogue (Linear + LogSoftmax), last grid step only.
    @pl.when(c == pl.num_programs(0) - 1)
    def _():
        logits = jnp.dot(hl_scr[...], w_fc_ref[...],
                         preferred_element_type=jnp.float32) + b_fc_ref[...]
        lane = jax.lax.broadcasted_iota(jnp.int32, logits.shape, 1)
        masked = jnp.where(lane < num_classes, logits, jnp.float32(-1e30))
        m = jnp.max(masked, axis=-1, keepdims=True)
        s = jnp.sum(jnp.exp(masked - m), axis=-1, keepdims=True)
        o_ref[...] = (masked - m - jnp.log(s)).astype(o_ref.dtype)


# ----------------------------------------------------------------------------
# One-time parameter packing (hoisted out of the forward hot path)
# ----------------------------------------------------------------------------
def _pack_gate_matrix(w, hp):
    """PyTorch (3H, K) stacked [r;z;n] -> (K, 3*Hp), each gate padded to Hp lanes."""
    three_h, k = w.shape
    h = three_h // 3
    out = jnp.zeros((k, 3 * hp), jnp.float32)
    for g in range(3):
        out = out.at[:, g * hp:g * hp + h].set(w[g * h:(g + 1) * h].T)
    return out


def _pack_gate_bias(b, hp):
    h = b.shape[0] // 3
    out = jnp.zeros((3 * hp,), jnp.float32)
    for g in range(3):
        out = out.at[g * hp:g * hp + h].set(b[g * h:(g + 1) * h])
    return out


def prepare_params(params):
    """Pack PyTorch-layout GRU/Linear weights into lane-aligned kernel layouts.

    Call once; the zero padding keeps padded hidden units exactly 0 through the
    recurrence and padded classes are masked in-kernel.
    """
    H = params["w_hh"].shape[1]
    C = params["w_fc"].shape[0]
    Hp = _round_up(H, 128)
    Cp = _round_up(C, 128)
    return {
        # bf16 MXU operand (dominant HBM stream), f32 everything else.
        "w_ih": _pack_gate_matrix(params["w_ih"], Hp).astype(jnp.bfloat16),
        "b_ih": _pack_gate_bias(params["b_ih"], Hp).reshape(1, 3 * Hp),
        "w_hh": jnp.pad(_pack_gate_matrix(params["w_hh"], Hp),
                        ((0, Hp - H), (0, 0))),
        "b_hh": _pack_gate_bias(params["b_hh"], Hp).reshape(1, 3 * Hp),
        "w_fc": jnp.zeros((Hp, Cp), jnp.float32).at[:H, :C].set(params["w_fc"].T),
        "b_fc": jnp.zeros((1, Cp), jnp.float32).at[0, :C].set(params["b_fc"]),
    }


def init_params(key, input_size=4096, hidden_size=110, num_classes=20):
    ks = jax.random.split(key, 6)
    s = float(hidden_size) ** -0.5
    return {
        "w_ih": jax.random.uniform(ks[0], (3 * hidden_size, input_size), jnp.float32, -s, s),
        "w_hh": jax.random.uniform(ks[1], (3 * hidden_size, hidden_size), jnp.float32, -s, s),
        "b_ih": jax.random.uniform(ks[2], (3 * hidden_size,), jnp.float32, -s, s),
        "b_hh": jax.random.uniform(ks[3], (3 * hidden_size,), jnp.float32, -s, s),
        "w_fc": jax.random.uniform(ks[4], (num_classes, hidden_size), jnp.float32, -s, s),
        "b_fc": jax.random.uniform(ks[5], (num_classes,), jnp.float32, -s, s),
    }


# ----------------------------------------------------------------------------
# GRUClassifier forward (single fused pallas_call)
# ----------------------------------------------------------------------------
def gru_classifier_forward(x, lens, packed, *, num_classes, time_chunk=8):
    """x: (B, T, input_size) zero-padded batch-first; lens: (B,) int, 1 <= lens <= T."""
    B, T, K = x.shape
    Hp = packed["w_hh"].shape[0]
    Cp = packed["w_fc"].shape[1]
    Bp = _round_up(B, 8)
    Tc = min(time_chunk, T)
    T_pad = _round_up(T, Tc)
    num_chunks = T_pad // Tc

    # Time-major, batch padded to a sublane multiple, flattened to a lane-dense
    # (T_pad*Bp, K) bf16 slab so each time-chunk is one aligned 2-D MXU operand.
    x_tm = jnp.transpose(x.astype(jnp.bfloat16), (1, 0, 2))
    x_tm = jnp.pad(x_tm, ((0, T_pad - T), (0, Bp - B), (0, 0)))
    x2d = x_tm.reshape(T_pad * Bp, K)

    lens_i = lens.astype(jnp.int32)
    lens_col = jnp.pad(lens_i.reshape(B, 1), ((0, Bp - B), (0, 0)))
    # Scalar-prefetch loop bound: skip chunks past max(lens).
    max_len = jnp.minimum(jnp.max(lens_i), T).astype(jnp.int32).reshape(1)

    out = pl.pallas_call(
        functools.partial(_fused_gru_classifier_kernel,
                          tc=Tc, bp=Bp, hp=Hp, num_classes=num_classes),
        out_shape=jax.ShapeDtypeStruct((Bp, Cp), jnp.float32),
        grid_spec=pltpu.PrefetchScalarGridSpec(
            num_scalar_prefetch=1,
            grid=(num_chunks,),
            in_specs=[
                pl.BlockSpec((Tc * Bp, K), lambda c, ml: (c, 0)),    # x chunk
                pl.BlockSpec((K, 3 * Hp), lambda c, ml: (0, 0)),     # W_ih^T (resident)
                pl.BlockSpec((1, 3 * Hp), lambda c, ml: (0, 0)),     # b_ih
                pl.BlockSpec((Hp, 3 * Hp), lambda c, ml: (0, 0)),    # W_hh^T (resident)
                pl.BlockSpec((1, 3 * Hp), lambda c, ml: (0, 0)),     # b_hh
                pl.BlockSpec((Bp, 1), lambda c, ml: (0, 0)),         # lens
                pl.BlockSpec((Hp, Cp), lambda c, ml: (0, 0)),        # W_fc^T (resident)
                pl.BlockSpec((1, Cp), lambda c, ml: (0, 0)),         # b_fc
            ],
            out_specs=pl.BlockSpec((Bp, Cp), lambda c, ml: (0, 0)),
            scratch_shapes=[
                pltpu.VMEM((Bp, Hp), jnp.float32),                   # h (persists over chunks)
                pltpu.VMEM((Bp, Hp), jnp.float32),                   # h at t == lens-1
                pltpu.VMEM((Tc * Bp, 3 * Hp), jnp.float32),          # chunk x-gates
            ]),
        compiler_params=pltpu.CompilerParams(
            dimension_semantics=("arbitrary",)),                      # true time recurrence
    )(max_len, x2d, packed["w_ih"], packed["b_ih"], packed["w_hh"],
      packed["b_hh"], lens_col, packed["w_fc"], packed["b_fc"])

    return out[:B, :num_classes]


# ----------------------------------------------------------------------------
# Pure-JAX reference (for validation)
# ----------------------------------------------------------------------------
def reference_forward(x, lens, params):
    B, T, _ = x.shape
    H = params["w_hh"].shape[1]

    def step(h, x_t):
        gi = x_t @ params["w_ih"].T + params["b_ih"]
        gh = h @ params["w_hh"].T + params["b_hh"]
        i_r, i_z, i_n = jnp.split(gi, 3, axis=-1)
        h_r, h_z, h_n = jnp.split(gh, 3, axis=-1)
        r = jax.nn.sigmoid(i_r + h_r)
        z = jax.nn.sigmoid(i_z + h_z)
        n = jnp.tanh(i_n + r * h_n)
        h_new = (1.0 - z) * n + z * h
        return h_new, h_new

    h0 = jnp.zeros((B, H), jnp.float32)
    _, hs = jax.lax.scan(step, h0, jnp.transpose(x, (1, 0, 2)))   # (T, B, H)
    h_last = hs[lens - 1, jnp.arange(B)]
    logits = h_last @ params["w_fc"].T + params["b_fc"]
    return jax.nn.log_softmax(logits, axis=-1)


if __name__ == "__main__":
    key = jax.random.PRNGKey(0)
    pkey, xkey = jax.random.split(key)

    B, T, INPUT, HIDDEN, CLASSES = 2, 8, 4096, 110, 20
    params = init_params(pkey, INPUT, HIDDEN, CLASSES)
    packed = prepare_params(params)          # one-time packing, outside the hot path
    x = jax.random.normal(xkey, (B, T, INPUT), jnp.float32)
    lens = jnp.array([T, 5], jnp.int32)      # ragged sequence lengths (1 <= lens <= T)

    fwd = jax.jit(functools.partial(gru_classifier_forward, num_classes=CLASSES))
    out = jax.block_until_ready(fwd(x, lens, packed))

    assert out.shape == (B, CLASSES), out.shape
    assert bool(jnp.all(jnp.isfinite(out)))
    # Each row must be a valid log-softmax distribution.
    assert bool(jnp.allclose(jnp.sum(jnp.exp(out), axis=-1), 1.0, atol=1e-4))
    # Numerical check against the pure-JAX f32 reference (bf16 MXU tolerance).
    ref = jax.block_until_ready(reference_forward(x, lens, params))
    assert float(jnp.max(jnp.abs(out - ref))) < 5e-2

    print("KERNEL_OK")
</pallas_src>

<mosaic_0001>
module attributes {stable_mosaic.version = 11 : i64} {
  func.func @_fused_gru_classifier_kernel(%arg0: i32, %arg1: memref<1xi32, #tpu.memory_space<smem>>, %arg2: memref<64x4096xbf16, #tpu.memory_space<vmem>>, %arg3: memref<4096x384xbf16, #tpu.memory_space<vmem>>, %arg4: memref<1x384xf32, #tpu.memory_space<vmem>>, %arg5: memref<128x384xf32, #tpu.memory_space<vmem>>, %arg6: memref<1x384xf32, #tpu.memory_space<vmem>>, %arg7: memref<8x1xi32, #tpu.memory_space<vmem>>, %arg8: memref<128x128xf32, #tpu.memory_space<vmem>>, %arg9: memref<1x128xf32, #tpu.memory_space<vmem>>, %arg10: memref<8x128xf32, #tpu.memory_space<vmem>>, %arg11: memref<8x128xf32, #tpu.memory_space<vmem>>, %arg12: memref<8x128xf32, #tpu.memory_space<vmem>>, %arg13: memref<64x384xf32, #tpu.memory_space<vmem>>) attributes {dimension_semantics = [#tpu.dimension_semantics<arbitrary>], iteration_bounds = array<i64: 1>, scalar_prefetch = 1 : i64, scratch_operands = 3 : i64, tpu.core_type = #tpu.core_type<tc>, window_params = [{transform_indices = @transform_0, window_bounds = array<i64: 64, 4096>}, {pipeline_mode = #tpu.pipeline_mode<synchronous>, transform_indices = @transform_1, window_bounds = array<i64: 4096, 384>}, {pipeline_mode = #tpu.pipeline_mode<synchronous>, transform_indices = @transform_2, window_bounds = array<i64: 1, 384>}, {pipeline_mode = #tpu.pipeline_mode<synchronous>, transform_indices = @transform_3, window_bounds = array<i64: 128, 384>}, {pipeline_mode = #tpu.pipeline_mode<synchronous>, transform_indices = @transform_4, window_bounds = array<i64: 1, 384>}, {pipeline_mode = #tpu.pipeline_mode<synchronous>, transform_indices = @transform_5, window_bounds = array<i64: 8, 1>}, {pipeline_mode = #tpu.pipeline_mode<synchronous>, transform_indices = @transform_6, window_bounds = array<i64: 128, 128>}, {pipeline_mode = #tpu.pipeline_mode<synchronous>, transform_indices = @transform_7, window_bounds = array<i64: 1, 128>}, {pipeline_mode = #tpu.pipeline_mode<synchronous>, transform_indices = @transform_8, window_bounds = array<i64: 8, 128>}]} {
    %c0_i32 = arith.constant 0 : i32
    %0 = arith.cmpi eq, %arg0, %c0_i32 : i32
    %1 = arith.extui %0 : i1 to i32
    %c0_i32_0 = arith.constant 0 : i32
    %2 = arith.cmpi ne, %1, %c0_i32_0 : i32
    scf.if %2 {
      %cst = arith.constant 0.000000e+00 : f32
      %11 = vector.broadcast %cst : f32 to vector<8x128xf32>
      %c0_4 = arith.constant 0 : index
      %c0_5 = arith.constant 0 : index
      %12 = vector.load %arg11[%c0_4, %c0_5] : memref<8x128xf32, #tpu.memory_space<vmem>>, vector<8x128xf32>
      tpu.vector_store %arg11[%c0_4, %c0_5], %11 {strides = array<i32>} : memref<8x128xf32, #tpu.memory_space<vmem>>, vector<8x128xf32>,
      %cst_6 = arith.constant 0.000000e+00 : f32
      %13 = vector.broadcast %cst_6 : f32 to vector<8x128xf32>
      %c0_7 = arith.constant 0 : index
      %c0_8 = arith.constant 0 : index
      %14 = vector.load %arg12[%c0_7, %c0_8] : memref<8x128xf32, #tpu.memory_space<vmem>>, vector<8x128xf32>
      tpu.vector_store %arg12[%c0_7, %c0_8], %13 {strides = array<i32>} : memref<8x128xf32, #tpu.memory_space<vmem>>, vector<8x128xf32>,
      %cst_9 = arith.constant 0.000000e+00 : f32
      %15 = vector.broadcast %cst_9 : f32 to vector<8x128xf32>
      %c0_10 = arith.constant 0 : index
      %c0_11 = arith.constant 0 : index
      %16 = vector.load %arg10[%c0_10, %c0_11] : memref<8x128xf32, #tpu.memory_space<vmem>>, vector<8x128xf32>
      tpu.vector_store %arg10[%c0_10, %c0_11], %15 {strides = array<i32>} : memref<8x128xf32, #tpu.memory_space<vmem>>, vector<8x128xf32>,
    } else {
    }
    %c0 = arith.constant 0 : index
    %3 = memref.load %arg1[%c0] : memref<1xi32, #tpu.memory_space<smem>>
    %c8_i32 = arith.constant 8 : i32
    %4 = arith.muli %arg0, %c8_i32 : i32
    %5 = arith.cmpi slt, %4, %3 : i32
    %6 = arith.extui %5 : i1 to i32
    %c0_i32_1 = arith.constant 0 : i32
    %7 = arith.cmpi ne, %6, %c0_i32_1 : i32
    scf.if %7 {
      %c0_4 = arith.constant 0 : index
      %c0_5 = arith.constant 0 : index
      %11 = vector.load %arg2[%c0_4, %c0_5] : memref<64x4096xbf16, #tpu.memory_space<vmem>>, vector<64x4096xbf16>
      %c0_6 = arith.constant 0 : index
      %c0_7 = arith.constant 0 : index
      %12 = vector.load %arg3[%c0_6, %c0_7] : memref<4096x384xbf16, #tpu.memory_space<vmem>>, vector<4096x384xbf16>
      %cst = arith.constant dense<0.000000e+00> : vector<64x384xf32>
      %13 = tpu.matmul %11, %12, %cst {dimension_numbers = #tpu.dot_dimension_numbers<[1], [0], [0], [1], [0, 0, 1, 1], [], []>} : vector<64x4096xbf16>, vector<4096x384xbf16>, vector<64x384xf32> -> vector<64x384xf32>
      %c0_8 = arith.constant 0 : index
      %c0_9 = arith.constant 0 : index
      %14 = vector.load %arg4[%c0_8, %c0_9] : memref<1x384xf32, #tpu.memory_space<vmem>>, vector<1x384xf32>
      %15 = vector.broadcast %14 : vector<1x384xf32> to vector<64x384xf32>
      %16 = arith.addf %13, %15 : vector<64x384xf32>
      %c0_10 = arith.constant 0 : index
      %c0_11 = arith.constant 0 : index
      %17 = vector.load %arg13[%c0_10, %c0_11] : memref<64x384xf32, #tpu.memory_space<vmem>>, vector<64x384xf32>
      tpu.vector_store %arg13[%c0_10, %c0_11], %16 {strides = array<i32>} : memref<64x384xf32, #tpu.memory_space<vmem>>, vector<64x384xf32>,
      %c0_12 = arith.constant 0 : index
      %c0_13 = arith.constant 0 : index
      %18 = vector.load %arg5[%c0_12, %c0_13] : memref<128x384xf32, #tpu.memory_space<vmem>>, vector<128x384xf32>
      %c0_14 = arith.constant 0 : index
      %c0_15 = arith.constant 0 : index
      %19 = vector.load %arg6[%c0_14, %c0_15] : memref<1x384xf32, #tpu.memory_space<vmem>>, vector<1x384xf32>
      %c0_16 = arith.constant 0 : index
      %c0_17 = arith.constant 0 : index
      %20 = vector.load %arg7[%c0_16, %c0_17] : memref<8x1xi32, #tpu.memory_space<vmem>>, vector<8x1xi32>
      %c1_i32 = arith.constant 1 : i32
      %21 = vector.broadcast %c1_i32 : i32 to vector<8x1xi32>
      %22 = arith.subi %20, %21 : vector<8x1xi32>
      %c0_18 = arith.constant 0 : index
      %c0_19 = arith.constant 0 : index
      %23 = vector.load %arg11[%c0_18, %c0_19] : memref<8x128xf32, #tpu.memory_space<vmem>>, vector<8x128xf32>
      %c0_20 = arith.constant 0 : index
      %c0_21 = arith.constant 0 : index
      %24 = vector.load %arg12[%c0_20, %c0_21] : memref<8x128xf32, #tpu.memory_space<vmem>>, vector<8x128xf32>
      %c0_i32_22 = arith.constant 0 : i32
      %25 = arith.addi %4, %c0_i32_22 : i32
      %c8_i32_23 = arith.constant 8 : i32
      %26 = arith.muli %c0_i32_22, %c8_i32_23 : i32
      %27 = arith.index_cast %26 : i32 to index
      %c0_24 = arith.constant 0 : index
      %28 = vector.load %arg13[%27, %c0_24] : memref<64x384xf32, #tpu.memory_space<vmem>>, vector<8x384xf32>
      %cst_25 = arith.constant dense<0.000000e+00> : vector<8x384xf32>
      %29 = tpu.matmul %23, %18, %cst_25 {dimension_numbers = #tpu.dot_dimension_numbers<[1], [0], [0], [1], [0, 0, 1, 1], [], []>} : vector<8x128xf32>, vector<128x384xf32>, vector<8x384xf32> -> vector<8x384xf32>
      %30 = vector.broadcast %19 : vector<1x384xf32> to vector<8x384xf32>
      %31 = arith.addf %29, %30 : vector<8x384xf32>
      %32 = vector.extract_strided_slice %28 {offsets = [0, 0], sizes = [8, 128], strides = [1, 1]} : vector<8x384xf32> to vector<8x128xf32>
      %33 = vector.extract_strided_slice %31 {offsets = [0, 0], sizes = [8, 128], strides = [1, 1]} : vector<8x384xf32> to vector<8x128xf32>
      %34 = arith.addf %32, %33 : vector<8x128xf32>
      %35 = arith.negf %34 : vector<8x128xf32>
      %36 = math.exp %35 : vector<8x128xf32>
      %cst_26 = arith.constant 1.000000e+00 : f32
      %37 = vector.broadcast %cst_26 : f32 to vector<8x128xf32>
      %38 = arith.addf %37, %36 : vector<8x128xf32>
      %39 = arith.divf %37, %38 : vector<8x128xf32>
      %40 = vector.extract_strided_slice %28 {offsets = [0, 128], sizes = [8, 128], strides = [1, 1]} : vector<8x384xf32> to vector<8x128xf32>
      %41 = vector.extract_strided_slice %31 {offsets = [0, 128], sizes = [8, 128], strides = [1, 1]} : vector<8x384xf32> to vector<8x128xf32>
      %42 = arith.addf %40, %41 : vector<8x128xf32>
      %43 = arith.negf %42 : vector<8x128xf32>
      %44 = math.exp %43 : vector<8x128xf32>
      %cst_27 = arith.constant 1.000000e+00 : f32
      %45 = vector.broadcast %cst_27 : f32 to vector<8x128xf32>
      %46 = arith.addf %45, %44 : vector<8x128xf32>
      %47 = arith.divf %45, %46 : vector<8x128xf32>
      %48 = vector.extract_strided_slice %28 {offsets = [0, 256], sizes = [8, 128], strides = [1, 1]} : vector<8x384xf32> to vector<8x128xf32>
      %49 = vector.extract_strided_slice %31 {offsets = [0, 256], sizes = [8, 128], strides = [1, 1]} : vector<8x384xf32> to vector<8x128xf32>
      %50 = arith.mulf %39, %49 : vector<8x128xf32>
      %51 = arith.addf %48, %50 : vector<8x128xf32>
      %52 = math.tanh %51 : vector<8x128xf32>
      %cst_28 = arith.constant 1.000000e+00 : f32
      %53 = vector.broadcast %cst_28 : f32 to vector<8x128xf32>
      %54 = arith.subf %53, %47 : vector<8x128xf32>
      %55 = arith.mulf %54, %52 : vector<8x128xf32>
      %56 = arith.mulf %47, %23 : vector<8x128xf32>
      %57 = arith.addf %55, %56 : vector<8x128xf32>
      %58 = vector.broadcast %25 : i32 to vector<8x1xi32>
      %59 = arith.cmpi eq, %22, %58 : vector<8x1xi32>
      %60 = vector.shape_cast %59 : vector<8x1xi1> to vector<8x1xi1>
      %61 = vector.broadcast %60 : vector<8x1xi1> to vector<8x128xi1>
      %62 = arith.select %61, %57, %24 : vector<8x128xi1>, vector<8x128xf32>
      %c1_i32_29 = arith.constant 1 : i32
      %63 = arith.addi %4, %c1_i32_29 : i32
      %c8_i32_30 = arith.constant 8 : i32
      %64 = arith.muli %c1_i32_29, %c8_i32_30 : i32
      %65 = arith.index_cast %64 : i32 to index
      %c0_31 = arith.constant 0 : index
      %66 = vector.load %arg13[%65, %c0_31] : memref<64x384xf32, #tpu.memory_space<vmem>>, vector<8x384xf32>
      %cst_32 = arith.constant dense<0.000000e+00> : vector<8x384xf32>
      %67 = tpu.matmul %57, %18, %cst_32 {dimension_numbers = #tpu.dot_dimension_numbers<[1], [0], [0], [1], [0, 0, 1, 1], [], []>} : vector<8x128xf32>, vector<128x384xf32>, vector<8x384xf32> -> vector<8x384xf32>
      %68 = vector.broadcast %19 : vector<1x384xf32> to vector<8x384xf32>
      %69 = arith.addf %67, %68 : vector<8x384xf32>
      %70 = vector.extract_strided_slice %66 {offsets = [0, 0], sizes = [8, 128], strides = [1, 1]} : vector<8x384xf32> to vector<8x128xf32>
      %71 = vector.extract_strided_slice %69 {offsets = [0, 0], sizes = [8, 128], strides = [1, 1]} : vector<8x384xf32> to vector<8x128xf32>
      %72 = arith.addf %70, %71 : vector<8x128xf32>
      %73 = arith.negf %72 : vector<8x128xf32>
      %74 = math.exp %73 : vector<8x128xf32>
      %cst_33 = arith.constant 1.000000e+00 : f32
      %75 = vector.broadcast %cst_33 : f32 to vector<8x128xf32>
      %76 = arith.addf %75, %74 : vector<8x128xf32>
      %77 = arith.divf %75, %76 : vector<8x128xf32>
      %78 = vector.extract_strided_slice %66 {offsets = [0, 128], sizes = [8, 128], strides = [1, 1]} : vector<8x384xf32> to vector<8x128xf32>
      %79 = vector.extract_strided_slice %69 {offsets = [0, 128], sizes = [8, 128], strides = [1, 1]} : vector<8x384xf32> to vector<8x128xf32>
      %80 = arith.addf %78, %79 : vector<8x128xf32>
      %81 = arith.negf %80 : vector<8x128xf32>
      %82 = math.exp %81 : vector<8x128xf32>
      %cst_34 = arith.constant 1.000000e+00 : f32
      %83 = vector.broadcast %cst_34 : f32 to vector<8x128xf32>
      %84 = arith.addf %83, %82 : vector<8x128xf32>
      %85 = arith.divf %83, %84 : vector<8x128xf32>
      %86 = vector.extract_strided_slice %66 {offsets = [0, 256], sizes = [8, 128], strides = [1, 1]} : vector<8x384xf32> to vector<8x128xf32>
      %87 = vector.extract_strided_slice %69 {offsets = [0, 256], sizes = [8, 128], strides = [1, 1]} : vector<8x384xf32> to vector<8x128xf32>
      %88 = arith.mulf %77, %87 : vector<8x128xf32>
      %89 = arith.addf %86, %88 : vector<8x128xf32>
      %90 = math.tanh %89 : vector<8x128xf32>
      %cst_35 = arith.constant 1.000000e+00 : f32
      %91 = vector.broadcast %cst_35 : f32 to vector<8x128xf32>
      %92 = arith.subf %91, %85 : vector<8x128xf32>
      %93 = arith.mulf %92, %90 : vector<8x128xf32>
      %94 = arith.mulf %85, %57 : vector<8x128xf32>
      %95 = arith.addf %93, %94 : vector<8x128xf32>
      %96 = vector.broadcast %63 : i32 to vector<8x1xi32>
      %97 = arith.cmpi eq, %22, %96 : vector<8x1xi32>
      %98 = vector.shape_cast %97 : vector<8x1xi1> to vector<8x1xi1>
      %99 = vector.broadcast %98 : vector<8x1xi1> to vector<8x128xi1>
      %100 = arith.select %99, %95, %62 : vector<8x128xi1>, vector<8x128xf32>
      %c2_i32 = arith.constant 2 : i32
      %101 = arith.addi %4, %c2_i32 : i32
      %c8_i32_36 = arith.constant 8 : i32
      %102 = arith.muli %c2_i32, %c8_i32_36 : i32
      %103 = arith.index_cast %102 : i32 to index
      %c0_37 = arith.constant 0 : index
      %104 = vector.load %arg13[%103, %c0_37] : memref<64x384xf32, #tpu.memory_space<vmem>>, vector<8x384xf32>
      %cst_38 = arith.constant dense<0.000000e+00> : vector<8x384xf32>
      %105 = tpu.matmul %95, %18, %cst_38 {dimension_numbers = #tpu.dot_dimension_numbers<[1], [0], [0], [1], [0, 0, 1, 1], [], []>} : vector<8x128xf32>, vector<128x384xf32>, vector<8x384xf32> -> vector<8x384xf32>
      %106 = vector.broadcast %19 : vector<1x384xf32> to vector<8x384xf32>
      %107 = arith.addf %105, %106 : vector<8x384xf32>
      %108 = vector.extract_strided_slice %104 {offsets = [0, 0], sizes = [8, 128], strides = [1, 1]} : vector<8x384xf32> to vector<8x128xf32>
      %109 = vector.extract_strided_slice %107 {offsets = [0, 0], sizes = [8, 128], strides = [1, 1]} : vector<8x384xf32> to vector<8x128xf32>
      %110 = arith.addf %108, %109 : vector<8x128xf32>
      %111 = arith.negf %110 : vector<8x128xf32>
      %112 = math.exp %111 : vector<8x128xf32>
      %cst_39 = arith.constant 1.000000e+00 : f32
      %113 = vector.broadcast %cst_39 : f32 to vector<8x128xf32>
      %114 = arith.addf %113, %112 : vector<8x128xf32>
      %115 = arith.divf %113, %114 : vector<8x128xf32>
      %116 = vector.extract_strided_slice %104 {offsets = [0, 128], sizes = [8, 128], strides = [1, 1]} : vector<8x384xf32> to vector<8x128xf32>
      %117 = vector.extract_strided_slice %107 {offsets = [0, 128], sizes = [8, 128], strides = [1, 1]} : vector<8x384xf32> to vector<8x128xf32>
      %118 = arith.addf %116, %117 : vector<8x128xf32>
      %119 = arith.negf %118 : vector<8x128xf32>
      %120 = math.exp %119 : vector<8x128xf32>
      %cst_40 = arith.constant 1.000000e+00 : f32
      %121 = vector.broadcast %cst_40 : f32 to vector<8x128xf32>
      %122 = arith.addf %121, %120 : vector<8x128xf32>
      %123 = arith.divf %121, %122 : vector<8x128xf32>
      %124 = vector.extract_strided_slice %104 {offsets = [0, 256], sizes = [8, 128], strides = [1, 1]} : vector<8x384xf32> to vector<8x128xf32>
      %125 = vector.extract_strided_slice %107 {offsets = [0, 256], sizes = [8, 128], strides = [1, 1]} : vector<8x384xf32> to vector<8x128xf32>
      %126 = arith.mulf %115, %125 : vector<8x128xf32>
      %127 = arith.addf %124, %126 : vector<8x128xf32>
      %128 = math.tanh %127 : vector<8x128xf32>
      %cst_41 = arith.constant 1.000000e+00 : f32
      %129 = vector.broadcast %cst_41 : f32 to vector<8x128xf32>
      %130 = arith.subf %129, %123 : vector<8x128xf32>
      %131 = arith.mulf %130, %128 : vector<8x128xf32>
      %132 = arith.mulf %123, %95 : vector<8x128xf32>
      %133 = arith.addf %131, %132 : vector<8x128xf32>
      %134 = vector.broadcast %101 : i32 to vector<8x1xi32>
      %135 = arith.cmpi eq, %22, %134 : vector<8x1xi32>
      %136 = vector.shape_cast %135 : vector<8x1xi1> to vector<8x1xi1>
      %137 = vector.broadcast %136 : vector<8x1xi1> to vector<8x128xi1>
      %138 = arith.select %137, %133, %100 : vector<8x128xi1>, vector<8x128xf32>
      %c3_i32 = arith.constant 3 : i32
      %139 = arith.addi %4, %c3_i32 : i32
      %c8_i32_42 = arith.constant 8 : i32
      %140 = arith.muli %c3_i32, %c8_i32_42 : i32
      %141 = arith.index_cast %140 : i32 to index
      %c0_43 = arith.constant 0 : index
      %142 = vector.load %arg13[%141, %c0_43] : memref<64x384xf32, #tpu.memory_space<vmem>>, vector<8x384xf32>
      %cst_44 = arith.constant dense<0.000000e+00> : vector<8x384xf32>
      %143 = tpu.matmul %133, %18, %cst_44 {dimension_numbers = #tpu.dot_dimension_numbers<[1], [0], [0], [1], [0, 0, 1, 1], [], []>} : vector<8x128xf32>, vector<128x384xf32>, vector<8x384xf32> -> vector<8x384xf32>
      %144 = vector.broadcast %19 : vector<1x384xf32> to vector<8x384xf32>
      %145 = arith.addf %143, %144 : vector<8x384xf32>
      %146 = vector.extract_strided_slice %142 {offsets = [0, 0], sizes = [8, 128], strides = [1, 1]} : vector<8x384xf32> to vector<8x128xf32>
      %147 = vector.extract_strided_slice %145 {offsets = [0, 0], sizes = [8, 128], strides = [1, 1]} : vector<8x384xf32> to vector<8x128xf32>
      %148 = arith.addf %146, %147 : vector<8x128xf32>
      %149 = arith.negf %148 : vector<8x128xf32>
      %150 = math.exp %149 : vector<8x128xf32>
      %cst_45 = arith.constant 1.000000e+00 : f32
      %151 = vector.broadcast %cst_45 : f32 to vector<8x128xf32>
      %152 = arith.addf %151, %150 : vector<8x128xf32>
      %153 = arith.divf %151, %152 : vector<8x128xf32>
      %154 = vector.extract_strided_slice %142 {offsets = [0, 128], sizes = [8, 128], strides = [1, 1]} : vector<8x384xf32> to vector<8x128xf32>
      %155 = vector.extract_strided_slice %145 {offsets = [0, 128], sizes = [8, 128], strides = [1, 1]} : vector<8x384xf32> to vector<8x128xf32>
      %156 = arith.addf %154, %155 : vector<8x128xf32>
      %157 = arith.negf %156 : vector<8x128xf32>
      %158 = math.exp %157 : vector<8x128xf32>
      %cst_46 = arith.constant 1.000000e+00 : f32
      %159 = vector.broadcast %cst_46 : f32 to vector<8x128xf32>
      %160 = arith.addf %159, %158 : vector<8x128xf32>
      %161 = arith.divf %159, %160 : vector<8x128xf32>
      %162 = vector.extract_strided_slice %142 {offsets = [0, 256], sizes = [8, 128], strides = [1, 1]} : vector<8x384xf32> to vector<8x128xf32>
      %163 = vector.extract_strided_slice %145 {offsets = [0, 256], sizes = [8, 128], strides = [1, 1]} : vector<8x384xf32> to vector<8x128xf32>
      %164 = arith.mulf %153, %163 : vector<8x128xf32>
      %165 = arith.addf %162, %164 : vector<8x128xf32>
      %166 = math.tanh %165 : vector<8x128xf32>
      %cst_47 = arith.constant 1.000000e+00 : f32
      %167 = vector.broadcast %cst_47 : f32 to vector<8x128xf32>
      %168 = arith.subf %167, %161 : vector<8x128xf32>
      %169 = arith.mulf %168, %166 : vector<8x128xf32>
      %170 = arith.mulf %161, %133 : vector<8x128xf32>
      %171 = arith.addf %169, %170 : vector<8x128xf32>
      %172 = vector.broadcast %139 : i32 to vector<8x1xi32>
      %173 = arith.cmpi eq, %22, %172 : vector<8x1xi32>
      %174 = vector.shape_cast %173 : vector<8x1xi1> to vector<8x1xi1>
      %175 = vector.broadcast %174 : vector<8x1xi1> to vector<8x128xi1>
      %176 = arith.select %175, %171, %138 : vector<8x128xi1>, vector<8x128xf32>
      %c4_i32 = arith.constant 4 : i32
      %177 = arith.addi %4, %c4_i32 : i32
      %c8_i32_48 = arith.constant 8 : i32
      %178 = arith.muli %c4_i32, %c8_i32_48 : i32
      %179 = arith.index_cast %178 : i32 to index
      %c0_49 = arith.constant 0 : index
      %180 = vector.load %arg13[%179, %c0_49] : memref<64x384xf32, #tpu.memory_space<vmem>>, vector<8x384xf32>
      %cst_50 = arith.constant dense<0.000000e+00> : vector<8x384xf32>
      %181 = tpu.matmul %171, %18, %cst_50 {dimension_numbers = #tpu.dot_dimension_numbers<[1], [0], [0], [1], [0, 0, 1, 1], [], []>} : vector<8x128xf32>, vector<128x384xf32>, vector<8x384xf32> -> vector<8x384xf32>
      %182 = vector.broadcast %19 : vector<1x384xf32> to vector<8x384xf32>
      %183 = arith.addf %181, %182 : vector<8x384xf32>
      %184 = vector.extract_strided_slice %180 {offsets = [0, 0], sizes = [8, 128], strides = [1, 1]} : vector<8x384xf32> to vector<8x128xf32>
      %185 = vector.extract_strided_slice %183 {offsets = [0, 0], sizes = [8, 128], strides = [1, 1]} : vector<8x384xf32> to vector<8x128xf32>
      %186 = arith.addf %184, %185 : vector<8x128xf32>
      %187 = arith.negf %186 : vector<8x128xf32>
      %188 = math.exp %187 : vector<8x128xf32>
      %cst_51 = arith.constant 1.000000e+00 : f32
      %189 = vector.broadcast %cst_51 : f32 to vector<8x128xf32>
      %190 = arith.addf %189, %188 : vector<8x128xf32>
      %191 = arith.divf %189, %190 : vector<8x128xf32>
      %192 = vector.extract_strided_slice %180 {offsets = [0, 128], sizes = [8, 128], strides = [1, 1]} : vector<8x384xf32> to vector<8x128xf32>
      %193 = vector.extract_strided_slice %183 {offsets = [0, 128], sizes = [8, 128], strides = [1, 1]} : vector<8x384xf32> to vector<8x128xf32>
      %194 = arith.addf %192, %193 : vector<8x128xf32>
      %195 = arith.negf %194 : vector<8x128xf32>
      %196 = math.exp %195 : vector<8x128xf32>
      %cst_52 = arith.constant 1.000000e+00 : f32
      %197 = vector.broadcast %cst_52 : f32 to vector<8x128xf32>
      %198 = arith.addf %197, %196 : vector<8x128xf32>
      %199 = arith.divf %197, %198 : vector<8x128xf32>
      %200 = vector.extract_strided_slice %180 {offsets = [0, 256], sizes = [8, 128], strides = [1, 1]} : vector<8x384xf32> to vector<8x128xf32>
      %201 = vector.extract_strided_slice %183 {offsets = [0, 256], sizes = [8, 128], strides = [1, 1]} : vector<8x384xf32> to vector<8x128xf32>
      %202 = arith.mulf %191, %201 : vector<8x128xf32>
      %203 = arith.addf %200, %202 : vector<8x128xf32>
      %204 = math.tanh %203 : vector<8x128xf32>
      %cst_53 = arith.constant 1.000000e+00 : f32
      %205 = vector.broadcast %cst_53 : f32 to vector<8x128xf32>
      %206 = arith.subf %205, %199 : vector<8x128xf32>
      %207 = arith.mulf %206, %204 : vector<8x128xf32>
      %208 = arith.mulf %199, %171 : vector<8x128xf32>
      %209 = arith.addf %207, %208 : vector<8x128xf32>
      %210 = vector.broadcast %177 : i32 to vector<8x1xi32>
      %211 = arith.cmpi eq, %22, %210 : vector<8x1xi32>
      %212 = vector.shape_cast %211 : vector<8x1xi1> to vector<8x1xi1>
      %213 = vector.broadcast %212 : vector<8x1xi1> to vector<8x128xi1>
      %214 = arith.select %213, %209, %176 : vector<8x128xi1>, vector<8x128xf32>
      %c5_i32 = arith.constant 5 : i32
      %215 = arith.addi %4, %c5_i32 : i32
      %c8_i32_54 = arith.constant 8 : i32
      %216 = arith.muli %c5_i32, %c8_i32_54 : i32
      %217 = arith.index_cast %216 : i32 to index
      %c0_55 = arith.constant 0 : index
      %218 = vector.load %arg13[%217, %c0_55] : memref<64x384xf32, #tpu.memory_space<vmem>>, vector<8x384xf32>
      %cst_56 = arith.constant dense<0.000000e+00> : vector<8x384xf32>
      %219 = tpu.matmul %209, %18, %cst_56 {dimension_numbers = #tpu.dot_dimension_numbers<[1], [0], [0], [1], [0, 0, 1, 1], [], []>} : vector<8x128xf32>, vector<128x384xf32>, vector<8x384xf32> -> vector<8x384xf32>
      %220 = vector.broadcast %19 : vector<1x384xf32> to vector<8x384xf32>
      %221 = arith.addf %219, %220 : vector<8x384xf32>
      %222 = vector.extract_strided_slice %218 {offsets = [0, 0], sizes = [8, 128], strides = [1, 1]} : vector<8x384xf32> to vector<8x128xf32>
      %223 = vector.extract_strided_slice %221 {offsets = [0, 0], sizes = [8, 128], strides = [1, 1]} : vector<8x384xf32> to vector<8x128xf32>
      %224 = arith.addf %222, %223 : vector<8x128xf32>
      %225 = arith.negf %224 : vector<8x128xf32>
      %226 = math.exp %225 : vector<8x128xf32>
      %cst_57 = arith.constant 1.000000e+00 : f32
      %227 = vector.broadcast %cst_57 : f32 to vector<8x128xf32>
      %228 = arith.addf %227, %226 : vector<8x128xf32>
      %229 = arith.divf %227, %228 : vector<8x128xf32>
      %230 = vector.extract_strided_slice %218 {offsets = [0, 128], sizes = [8, 128], strides = [1, 1]} : vector<8x384xf32> to vector<8x128xf32>
      %231 = vector.extract_strided_slice %221 {offsets = [0, 128], sizes = [8, 128], strides = [1, 1]} : vector<8x384xf32> to vector<8x128xf32>
      %232 = arith.addf %230, %231 : vector<8x128xf32>
      %233 = arith.negf %232 : vector<8x128xf32>
      %234 = math.exp %233 : vector<8x128xf32>
      %cst_58 = arith.constant 1.000000e+00 : f32
      %235 = vector.broadcast %cst_58 : f32 to vector<8x128xf32>
      %236 = arith.addf %235, %234 : vector<8x128xf32>
      %237 = arith.divf %235, %236 : vector<8x128xf32>
      %238 = vector.extract_strided_slice %218 {offsets = [0, 256], sizes = [8, 128], strides = [1, 1]} : vector<8x384xf32> to vector<8x128xf32>
      %239 = vector.extract_strided_slice %221 {offsets = [0, 256], sizes = [8, 128], strides = [1, 1]} : vector<8x384xf32> to vector<8x128xf32>
      %240 = arith.mulf %229, %239 : vector<8x128xf32>
      %241 = arith.addf %238, %240 : vector<8x128xf32>
      %242 = math.tanh %241 : vector<8x128xf32>
      %cst_59 = arith.constant 1.000000e+00 : f32
      %243 = vector.broadcast %cst_59 : f32 to vector<8x128xf32>
      %244 = arith.subf %243, %237 : vector<8x128xf32>
      %245 = arith.mulf %244, %242 : vector<8x128xf32>
      %246 = arith.mulf %237, %209 : vector<8x128xf32>
      %247 = arith.addf %245, %246 : vector<8x128xf32>
      %248 = vector.broadcast %215 : i32 to vector<8x1xi32>
      %249 = arith.cmpi eq, %22, %248 : vector<8x1xi32>
      %250 = vector.shape_cast %249 : vector<8x1xi1> to vector<8x1xi1>
      %251 = vector.broadcast %250 : vector<8x1xi1> to vector<8x128xi1>
      %252 = arith.select %251, %247, %214 : vector<8x128xi1>, vector<8x128xf32>
      %c6_i32 = arith.constant 6 : i32
      %253 = arith.addi %4, %c6_i32 : i32
      %c8_i32_60 = arith.constant 8 : i32
      %254 = arith.muli %c6_i32, %c8_i32_60 : i32
      %255 = arith.index_cast %254 : i32 to index
      %c0_61 = arith.constant 0 : index
      %256 = vector.load %arg13[%255, %c0_61] : memref<64x384xf32, #tpu.memory_space<vmem>>, vector<8x384xf32>
      %cst_62 = arith.constant dense<0.000000e+00> : vector<8x384xf32>
      %257 = tpu.matmul %247, %18, %cst_62 {dimension_numbers = #tpu.dot_dimension_numbers<[1], [0], [0], [1], [0, 0, 1, 1], [], []>} : vector<8x128xf32>, vector<128x384xf32>, vector<8x384xf32> -> vector<8x384xf32>
      %258 = vector.broadcast %19 : vector<1x384xf32> to vector<8x384xf32>
      %259 = arith.addf %257, %258 : vector<8x384xf32>
      %260 = vector.extract_strided_slice %256 {offsets = [0, 0], sizes = [8, 128], strides = [1, 1]} : vector<8x384xf32> to vector<8x128xf32>
      %261 = vector.extract_strided_slice %259 {offsets = [0, 0], sizes = [8, 128], strides = [1, 1]} : vector<8x384xf32> to vector<8x128xf32>
      %262 = arith.addf %260, %261 : vector<8x128xf32>
      %263 = arith.negf %262 : vector<8x128xf32>
      %264 = math.exp %263 : vector<8x128xf32>
      %cst_63 = arith.constant 1.000000e+00 : f32
      %265 = vector.broadcast %cst_63 : f32 to vector<8x128xf32>
      %266 = arith.addf %265, %264 : vector<8x128xf32>
      %267 = arith.divf %265, %266 : vector<8x128xf32>
      %268 = vector.extract_strided_slice %256 {offsets = [0, 128], sizes = [8, 128], strides = [1, 1]} : vector<8x384xf32> to vector<8x128xf32>
      %269 = vector.extract_strided_slice %259 {offsets = [0, 128], sizes = [8, 128], strides = [1, 1]} : vector<8x384xf32> to vector<8x128xf32>
      %270 = arith.addf %268, %269 : vector<8x128xf32>
      %271 = arith.negf %270 : vector<8x128xf32>
      %272 = math.exp %271 : vector<8x128xf32>
      %cst_64 = arith.constant 1.000000e+00 : f32
      %273 = vector.broadcast %cst_64 : f32 to vector<8x128xf32>
      %274 = arith.addf %273, %272 : vector<8x128xf32>
      %275 = arith.divf %273, %274 : vector<8x128xf32>
      %276 = vector.extract_strided_slice %256 {offsets = [0, 256], sizes = [8, 128], strides = [1, 1]} : vector<8x384xf32> to vector<8x128xf32>
      %277 = vector.extract_strided_slice %259 {offsets = [0, 256], sizes = [8, 128], strides = [1, 1]} : vector<8x384xf32> to vector<8x128xf32>
      %278 = arith.mulf %267, %277 : vector<8x128xf32>
      %279 = arith.addf %276, %278 : vector<8x128xf32>
      %280 = math.tanh %279 : vector<8x128xf32>
      %cst_65 = arith.constant 1.000000e+00 : f32
      %281 = vector.broadcast %cst_65 : f32 to vector<8x128xf32>
      %282 = arith.subf %281, %275 : vector<8x128xf32>
      %283 = arith.mulf %282, %280 : vector<8x128xf32>
      %284 = arith.mulf %275, %247 : vector<8x128xf32>
      %285 = arith.addf %283, %284 : vector<8x128xf32>
      %286 = vector.broadcast %253 : i32 to vector<8x1xi32>
      %287 = arith.cmpi eq, %22, %286 : vector<8x1xi32>
      %288 = vector.shape_cast %287 : vector<8x1xi1> to vector<8x1xi1>
      %289 = vector.broadcast %288 : vector<8x1xi1> to vector<8x128xi1>
      %290 = arith.select %289, %285, %252 : vector<8x128xi1>, vector<8x128xf32>
      %c7_i32 = arith.constant 7 : i32
      %291 = arith.addi %4, %c7_i32 : i32
      %c8_i32_66 = arith.constant 8 : i32
      %292 = arith.muli %c7_i32, %c8_i32_66 : i32
      %293 = arith.index_cast %292 : i32 to index
      %c0_67 = arith.constant 0 : index
      %294 = vector.load %arg13[%293, %c0_67] : memref<64x384xf32, #tpu.memory_space<vmem>>, vector<8x384xf32>
      %cst_68 = arith.constant dense<0.000000e+00> : vector<8x384xf32>
      %295 = tpu.matmul %285, %18, %cst_68 {dimension_numbers = #tpu.dot_dimension_numbers<[1], [0], [0], [1], [0, 0, 1, 1], [], []>} : vector<8x128xf32>, vector<128x384xf32>, vector<8x384xf32> -> vector<8x384xf32>
      %296 = vector.broadcast %19 : vector<1x384xf32> to vector<8x384xf32>
      %297 = arith.addf %295, %296 : vector<8x384xf32>
      %298 = vector.extract_strided_slice %294 {offsets = [0, 0], sizes = [8, 128], strides = [1, 1]} : vector<8x384xf32> to vector<8x128xf32>
      %299 = vector.extract_strided_slice %297 {offsets = [0, 0], sizes = [8, 128], strides = [1, 1]} : vector<8x384xf32> to vector<8x128xf32>
      %300 = arith.addf %298, %299 : vector<8x128xf32>
      %301 = arith.negf %300 : vector<8x128xf32>
      %302 = math.exp %301 : vector<8x128xf32>
      %cst_69 = arith.constant 1.000000e+00 : f32
      %303 = vector.broadcast %cst_69 : f32 to vector<8x128xf32>
      %304 = arith.addf %303, %302 : vector<8x128xf32>
      %305 = arith.divf %303, %304 : vector<8x128xf32>
      %306 = vector.extract_strided_slice %294 {offsets = [0, 128], sizes = [8, 128], strides = [1, 1]} : vector<8x384xf32> to vector<8x128xf32>
      %307 = vector.extract_strided_slice %297 {offsets = [0, 128], sizes = [8, 128], strides = [1, 1]} : vector<8x384xf32> to vector<8x128xf32>
      %308 = arith.addf %306, %307 : vector<8x128xf32>
      %309 = arith.negf %308 : vector<8x128xf32>
      %310 = math.exp %309 : vector<8x128xf32>
      %cst_70 = arith.constant 1.000000e+00 : f32
      %311 = vector.broadcast %cst_70 : f32 to vector<8x128xf32>
      %312 = arith.addf %311, %310 : vector<8x128xf32>
      %313 = arith.divf %311, %312 : vector<8x128xf32>
      %314 = vector.extract_strided_slice %294 {offsets = [0, 256], sizes = [8, 128], strides = [1, 1]} : vector<8x384xf32> to vector<8x128xf32>
      %315 = vector.extract_strided_slice %297 {offsets = [0, 256], sizes = [8, 128], strides = [1, 1]} : vector<8x384xf32> to vector<8x128xf32>
      %316 = arith.mulf %305, %315 : vector<8x128xf32>
      %317 = arith.addf %314, %316 : vector<8x128xf32>
      %318 = math.tanh %317 : vector<8x128xf32>
      %cst_71 = arith.constant 1.000000e+00 : f32
      %319 = vector.broadcast %cst_71 : f32 to vector<8x128xf32>
      %320 = arith.subf %319, %313 : vector<8x128xf32>
      %321 = arith.mulf %320, %318 : vector<8x128xf32>
      %322 = arith.mulf %313, %285 : vector<8x128xf32>
      %323 = arith.addf %321, %322 : vector<8x128xf32>
      %324 = vector.broadcast %291 : i32 to vector<8x1xi32>
      %325 = arith.cmpi eq, %22, %324 : vector<8x1xi32>
      %326 = vector.shape_cast %325 : vector<8x1xi1> to vector<8x1xi1>
      %327 = vector.broadcast %326 : vector<8x1xi1> to vector<8x128xi1>
      %328 = arith.select %327, %323, %290 : vector<8x128xi1>, vector<8x128xf32>
      %c8_i32_72 = arith.constant 8 : i32
      %c0_73 = arith.constant 0 : index
      %c0_74 = arith.constant 0 : index
      %329 = vector.load %arg11[%c0_73, %c0_74] : memref<8x128xf32, #tpu.memory_space<vmem>>, vector<8x128xf32>
      tpu.vector_store %arg11[%c0_73, %c0_74], %323 {strides = array<i32>} : memref<8x128xf32, #tpu.memory_space<vmem>>, vector<8x128xf32>,
      %c0_75 = arith.constant 0 : index
      %c0_76 = arith.constant 0 : index
      %330 = vector.load %arg12[%c0_75, %c0_76] : memref<8x128xf32, #tpu.memory_space<vmem>>, vector<8x128xf32>
      tpu.vector_store %arg12[%c0_75, %c0_76], %328 {strides = array<i32>} : memref<8x128xf32, #tpu.memory_space<vmem>>, vector<8x128xf32>,
    } else {
    }
    %c0_i32_2 = arith.constant 0 : i32
    %8 = arith.cmpi eq, %arg0, %c0_i32_2 : i32
    %9 = arith.extui %8 : i1 to i32
    %c0_i32_3 = arith.constant 0 : i32
    %10 = arith.cmpi ne, %9, %c0_i32_3 : i32
    scf.if %10 {
      %c0_4 = arith.constant 0 : index
      %c0_5 = arith.constant 0 : index
      %11 = vector.load %arg12[%c0_4, %c0_5] : memref<8x128xf32, #tpu.memory_space<vmem>>, vector<8x128xf32>
      %c0_6 = arith.constant 0 : index
      %c0_7 = arith.constant 0 : index
      %12 = vector.load %arg8[%c0_6, %c0_7] : memref<128x128xf32, #tpu.memory_space<vmem>>, vector<128x128xf32>
      %cst = arith.constant dense<0.000000e+00> : vector<8x128xf32>
      %13 = tpu.matmul %11, %12, %cst {dimension_numbers = #tpu.dot_dimension_numbers<[1], [0], [0], [1], [0, 0, 1, 1], [], []>} : vector<8x128xf32>, vector<128x128xf32>, vector<8x128xf32> -> vector<8x128xf32>
      %c0_8 = arith.constant 0 : index
      %c0_9 = arith.constant 0 : index
      %14 = vector.load %arg9[%c0_8, %c0_9] : memref<1x128xf32, #tpu.memory_space<vmem>>, vector<1x128xf32>
      %15 = vector.broadcast %14 : vector<1x128xf32> to vector<8x128xf32>
      %16 = arith.addf %13, %15 : vector<8x128xf32>
      %17 = tpu.iota {dimensions = array<i32: 1>} : vector<8x128xi32>
      %c20_i32 = arith.constant 20 : i32
      %18 = vector.broadcast %c20_i32 : i32 to vector<8x128xi32>
      %19 = arith.cmpi slt, %17, %18 : vector<8x128xi32>
      %cst_10 = arith.constant -1.000000e+30 : f32
      %20 = vector.broadcast %cst_10 : f32 to vector<8x128xf32>
      %21 = arith.select %19, %16, %20 : vector<8x128xi1>, vector<8x128xf32>
      %cst_11 = arith.constant dense<0xFF800000> : vector<8xf32>
      %22 = vector.multi_reduction <maximumf>, %21, %cst_11 [1] : vector<8x128xf32> to vector<8xf32>
      %23 = vector.shape_cast %22 : vector<8xf32> to vector<8x1xf32>
      %24 = vector.broadcast %23 : vector<8x1xf32> to vector<8x128xf32>
      %25 = arith.subf %21, %24 : vector<8x128xf32>
      %26 = math.exp %25 : vector<8x128xf32>
      %cst_12 = arith.constant dense<0.000000e+00> : vector<8xf32>
      %27 = vector.multi_reduction <add>, %26, %cst_12 [1] : vector<8x128xf32> to vector<8xf32>
      %28 = vector.shape_cast %27 : vector<8xf32> to vector<8x1xf32>
      %29 = vector.broadcast %23 : vector<8x1xf32> to vector<8x128xf32>
      %30 = arith.subf %21, %29 : vector<8x128xf32>
      %31 = math.log %28 : vector<8x1xf32>
      %32 = vector.broadcast %31 : vector<8x1xf32> to vector<8x128xf32>
      %33 = arith.subf %30, %32 : vector<8x128xf32>
      %c0_13 = arith.constant 0 : index
      %c0_14 = arith.constant 0 : index
      %34 = vector.load %arg10[%c0_13, %c0_14] : memref<8x128xf32, #tpu.memory_space<vmem>>, vector<8x128xf32>
      tpu.vector_store %arg10[%c0_13, %c0_14], %33 {strides = array<i32>} : memref<8x128xf32, #tpu.memory_space<vmem>>, vector<8x128xf32>,
    } else {
    }
    return
  }
  func.func @transform_0(%arg0: i32, %arg1: memref<1xi32, #tpu.memory_space<smem>>) -> (i32, i32) {
    %c0_i32 = arith.constant 0 : i32
    %c0_i32_0 = arith.constant 0 : i32
    return %arg0, %c0_i32 : i32, i32
  }
  func.func @transform_1(%arg0: i32, %arg1: memref<1xi32, #tpu.memory_space<smem>>) -> (i32, i32) {
    %c0_i32 = arith.constant 0 : i32
    %c0_i32_0 = arith.constant 0 : i32
    %c0_i32_1 = arith.constant 0 : i32
    return %c0_i32, %c0_i32_0 : i32, i32
  }
  func.func @transform_2(%arg0: i32, %arg1: memref<1xi32, #tpu.memory_space<smem>>) -> (i32, i32) {
    %c0_i32 = arith.constant 0 : i32
    %c0_i32_0 = arith.constant 0 : i32
    %c0_i32_1 = arith.constant 0 : i32
    return %c0_i32, %c0_i32_0 : i32, i32
  }
  func.func @transform_3(%arg0: i32, %arg1: memref<1xi32, #tpu.memory_space<smem>>) -> (i32, i32) {
    %c0_i32 = arith.constant 0 : i32
    %c0_i32_0 = arith.constant 0 : i32
    %c0_i32_1 = arith.constant 0 : i32
    return %c0_i32, %c0_i32_0 : i32, i32
  }
  func.func @transform_4(%arg0: i32, %arg1: memref<1xi32, #tpu.memory_space<smem>>) -> (i32, i32) {
    %c0_i32 = arith.constant 0 : i32
    %c0_i32_0 = arith.constant 0 : i32
    %c0_i32_1 = arith.constant 0 : i32
    return %c0_i32, %c0_i32_0 : i32, i32
  }
  func.func @transform_5(%arg0: i32, %arg1: memref<1xi32, #tpu.memory_space<smem>>) -> (i32, i32) {
    %c0_i32 = arith.constant 0 : i32
    %c0_i32_0 = arith.constant 0 : i32
    %c0_i32_1 = arith.constant 0 : i32
    return %c0_i32, %c0_i32_0 : i32, i32
  }
  func.func @transform_6(%arg0: i32, %arg1: memref<1xi32, #tpu.memory_space<smem>>) -> (i32, i32) {
    %c0_i32 = arith.constant 0 : i32
    %c0_i32_0 = arith.constant 0 : i32
    %c0_i32_1 = arith.constant 0 : i32
    return %c0_i32, %c0_i32_0 : i32, i32
  }
  func.func @transform_7(%arg0: i32, %arg1: memref<1xi32, #tpu.memory_space<smem>>) -> (i32, i32) {
    %c0_i32 = arith.constant 0 : i32
    %c0_i32_0 = arith.constant 0 : i32
    %c0_i32_1 = arith.constant 0 : i32
    return %c0_i32, %c0_i32_0 : i32, i32
  }
  func.func @transform_8(%arg0: i32, %arg1: memref<1xi32, #tpu.memory_space<smem>>) -> (i32, i32) {
    %c0_i32 = arith.constant 0 : i32
    %c0_i32_0 = arith.constant 0 : i32
    %c0_i32_1 = arith.constant 0 : i32
    return %c0_i32, %c0_i32_0 : i32, i32
  }
}

</mosaic_0001>

<bundles_post_ra>
// kernel: gru_classifier_forward.1
= control target key start
LH: loop header
LB: loop body
LE: loop exit
PB: predicated region body
PF: predicated region fallthrough
CT: control target
= control target key end

     0   :  { %15 = vsyncpa [#allocation8], 0  ;;  %s17557_s0 = inlined_call_operand.<no memory space> [shape: s32[1], index: 0, kind: input, shape index: {}]   ;;  %s17558_s1 = inlined_call_operand.vmem [shape: bf16[64,4096], index: 1, kind: input, shape index: {}]   ;;  %s17559_s2 = inlined_call_operand.hbm [shape: bf16[4096,384], index: 2, kind: input, shape index: {}]   ;;  %s17560_s3 = inlined_call_operand.hbm [shape: f32[1,384], index: 3, kind: input, shape index: {}]   ;;  %s17561_s4 = inlined_call_operand.hbm [shape: f32[128,384], index: 4, kind: input, shape index: {}]   ;;  %s17562_s5 = inlined_call_operand.hbm [shape: f32[1,384], index: 5, kind: input, shape index: {}]   ;;  %s17563_s6 = inlined_call_operand.vmem [shape: s32[8,1], index: 6, kind: input, shape index: {}]   ;;  %s17564_s7 = inlined_call_operand.hbm [shape: f32[128,128], index: 7, kind: input, shape index: {}]   ;;  %s17565_s8 = inlined_call_operand.hbm [shape: f32[1,128], index: 8, kind: input, shape index: {}]   ;;  %s17566_s9 = inlined_call_operand.vmem [shape: f32[8,128], index: 9, kind: output, shape index: {}]  }
   0x1   :  { %16 = vsyncpa [#allocation10], 0 }
   0x2   :  { %17 = vsyncpa [#allocation13], 0  ;;  %s39_s11 = sshll.u32 %s17560_s3, 4  ;;  %s40_s11 = int_to_ptr.hbm [resolvable:$true] %s39_s11 }
   0x3   :  { %18 = vsyncpa [#allocation16], 0  ;;  %s14719_s12 = smov [#allocation9]   ;;  %s63_s16 = sshll.u32 %s17562_s5, 4  ;;  %s64_s16 = int_to_ptr.hbm [resolvable:$true] %s63_s16 }
   0x4   :  { %s41_s13 = sshll.u32 %s14719_s12, 4  ;;  %s14720_s17 = smov [#allocation12]   ;;  %s42_s13 = int_to_ptr.vmem [resolvable:$true] %s41_s13 }
   0x5   :  { %44 = dma.hbm_to_vmem [thread:$0]  %s40_s11, 48, %s42_s13, [#allocation10]  }
   0x6   :  { %s65_s18 = sshll.u32 %s14720_s17, 4  ;;  %s25_s21 = sshll.u32 %s17559_s2, 4  ;;  %s66_s18 = int_to_ptr.vmem [resolvable:$true] %s65_s18  ;;  %s26_s21 = int_to_ptr.hbm [resolvable:$true] %s25_s21 }
   0x7   :  { %68 = dma.hbm_to_vmem [thread:$0]  %s64_s16, 48, %s66_s18, [#allocation13]  }
   0x8   :  { %s14721_s3 = smov [#allocation7]   ;;  %s49_s25 = sshll.u32 %s17561_s4, 4  ;;  %s50_s25 = int_to_ptr.hbm [resolvable:$true] %s49_s25 }
   0x9   :  { %s27_s22 = sshll.u32 %s14721_s3, 4  ;;  %s14722_s26 = smov 192   ;;  %s28_s22 = int_to_ptr.vmem [resolvable:$true] %s27_s22 }
   0xa   :  { %s14723_s5 = smov 12   ;;  %s14724_s27 = smov [#allocation11]  }
   0xb   :  { %33 = dma.hbm_to_vmem [thread:$0]  %s26_s21, 98304, %s28_s22, [#allocation8], %s14722_s26, %s14722_s26, %s14723_s5  }
   0xc   :  { %s51_s28 = sshll.u32 %s14724_s27, 4  ;;  %s14725_s29 = smov 384   ;;  %s52_s28 = int_to_ptr.vmem [resolvable:$true] %s51_s28 }
   0xd   :  { %s14726_s30 = smov 24   ;;  %s75_s11 = sshll.u32 %s17564_s7, 4  ;;  %s76_s11 = int_to_ptr.hbm [resolvable:$true] %s75_s11 }
   0xe   :  { %57 = dma.hbm_to_vmem [thread:$0]  %s50_s25, 6144, %s52_s28, [#allocation10], %s14725_s29, %s14725_s29, %s14726_s30  }
   0xf   :  { %s14727_s12 = smov [#allocation14]   ;;  %s89_s15 = sshll.u32 %s17565_s8, 4  ;;  %s90_s15 = int_to_ptr.hbm [resolvable:$true] %s89_s15 }
  0x10   :  { %s77_s13 = sshll.u32 %s14727_s12, 4  ;;  %s14728_s16 = smov 128   ;;  %s78_s13 = int_to_ptr.vmem [resolvable:$true] %s77_s13 }
  0x11   :  { %s14729_s17 = smov 8   ;;  %s14730_s18 = smov [#allocation15]  }
  0x12   :  { %83 = dma.hbm_to_vmem [thread:$0]  %s76_s11, 2048, %s78_s13, [#allocation13], %s14728_s16, %s14728_s16, %s14729_s17  }
  0x13   :  { %s91_s19 = sshll.u32 %s14730_s18, 4  ;;  %s92_s19 = int_to_ptr.vmem [resolvable:$true] %s91_s19 }
  0x14   :  { %94 = dma.hbm_to_vmem [thread:$0]  %s90_s15, 16, %s92_s19, [#allocation16]  }
  0x15   :  { %14711 = dma.done.wait [#allocation8], 98304  }
  0x16   :  { %14712 = vsyncadd [#allocation8], 4294868992 }
  0x17   :  { %14713 = dma.done.wait [#allocation10], 6192  }
  0x18   :  { %14714 = vsyncadd [#allocation10], 4294961104 }
  0x19   :  { %14715 = dma.done.wait [#allocation13], 2096  }
  0x1a   :  { %14716 = vsyncadd [#allocation13], 4294965200 }
  0x1b   :  { %14717 = dma.done.wait [#allocation16], 16  }
  0x1c   :  { %14718 = vsyncadd [#allocation16], 4294967280  ;;  %v14731_v0 = vmov 0.0   ;;  %p9917_p0 = scmp.le.s32.totalorder %s17557_s0, 0 }
  0x1d   :  { %123 = vst [vmem:[#allocation2] sm:$0xff] %v14731_v0 }
  0x1e   :  { %124 = vst [vmem:[#allocation3] sm:$0xff] %v14731_v0  ;;  %131 = sbr.rel (%p9917_p0) target bundleno = 3015 (0xbc7), region = 65 }
  0x1f   :  { %125 = vst [vmem:[%s17566_s9] sm:$0xff] %v14731_v0 }
  0x23   :  { %v10516_v1 = vld [vmem:[#allocation7 + $0xa8] sm:$0xf]  ;;  %v13669_v2 = vld [vmem:[#allocation7 + $0xb0] sm:$0xf0]  ;;  %v10504_v12 = vld [vmem:[#allocation7 + $0x90] sm:$0xf] }
  0x24   :  { %v10612_v3 = vld [vmem:[#allocation7 + $0x168] sm:$0xf]  ;;  %v10517_v4 = vor.u32 %v13669_v2, %v10516_v1  ;;  %v13693_v5 = vld [vmem:[#allocation7 + $0x170] sm:$0xf0]  ;;  %v13666_v14 = vld [vmem:[#allocation7 + $0x98] sm:$0xf0] }
  0x25   :  { %v10708_v6 = vld [vmem:[#allocation7 + $0x228] sm:$0xf]  ;;  %v13717_v7 = vld [vmem:[#allocation7 + $0x230] sm:$0xf0]  ;;  %v10613_v8 = vor.u32 %v13693_v5, %v10612_v3  ;;  %v10600_v15 = vld [vmem:[#allocation7 + $0x150] sm:$0xf]  ;;  %v10505_v17 = vor.u32 %v13666_v14, %v10504_v12 }
  0x26   :  { %v10709_v9 = vor.u32 %v13717_v7, %v10708_v6  ;;  %v10804_v10 = vld [vmem:[#allocation7 + $0x2e8] sm:$0xf]  ;;  %v13741_v11 = vld [vmem:[#allocation7 + $0x2f0] sm:$0xf0]  ;;  %6028 = vmatpush.bf16.msra.mxu0 %v10517_v4  ;;  %v13690_v16 = vld [vmem:[#allocation7 + $0x158] sm:$0xf0] }
  0x27   :  { %v10805_v13 = vor.u32 %v13741_v11, %v10804_v10  ;;  %6057 = vmatpush.bf16.msra.mxu1 %v10613_v8  ;;  %v10601_v18 = vor.u32 %v13690_v16, %v10600_v15  ;;  %v10696_v19 = vld [vmem:[#allocation7 + $0x210] sm:$0xf]  ;;  %v13714_v20 = vld [vmem:[#allocation7 + $0x218] sm:$0xf0]  ;;  %v10492_v24 = vld [vmem:[#allocation7 + $0x78] sm:$0xf] }
  0x28   :  { %6086 = vmatpush.bf16.msra.mxu2 %v10709_v9  ;;  %v10792_v21 = vld [vmem:[#allocation7 + $0x2d0] sm:$0xf]  ;;  %v10697_v22 = vor.u32 %v13714_v20, %v10696_v19  ;;  %v13738_v23 = vld [vmem:[#allocation7 + $0x2d8] sm:$0xf0]  ;;  %v13663_v25 = vld [vmem:[#allocation7 + $0x80] sm:$0xf0] }
  0x29   :  { %6115 = vmatpush.bf16.msra.mxu3 %v10805_v13  ;;  %v10793_v26 = vor.u32 %v13738_v23, %v10792_v21  ;;  %v10588_v27 = vld [vmem:[#allocation7 + $0x138] sm:$0xf]  ;;  %v13687_v28 = vld [vmem:[#allocation7 + $0x140] sm:$0xf0]  ;;  %v10493_v30 = vor.u32 %v13663_v25, %v10492_v24  ;;  %v10480_v36 = vld [vmem:[#allocation7 + $0x60] sm:$0xf] }
  0x2a   :  { %v10684_v29 = vld [vmem:[#allocation7 + $0x1f8] sm:$0xf]  ;;  %6029 = vmatpush.bf16.msra.mxu0 %v10505_v17  ;;  %v13711_v31 = vld [vmem:[#allocation7 + $0x200] sm:$0xf0]  ;;  %v10589_v34 = vor.u32 %v13687_v28, %v10588_v27  ;;  %v13660_v37 = vld [vmem:[#allocation7 + $0x68] sm:$0xf0] }
  0x2b   :  { %v10780_v32 = vld [vmem:[#allocation7 + $0x2b8] sm:$0xf]  ;;  %v13735_v33 = vld [vmem:[#allocation7 + $0x2c0] sm:$0xf0]  ;;  %6058 = vmatpush.bf16.msra.mxu1 %v10601_v18  ;;  %v10685_v35 = vor.u32 %v13711_v31, %v10684_v29  ;;  %v10576_v38 = vld [vmem:[#allocation7 + $0x120] sm:$0xf]  ;;  %v10481_v45 = vor.u32 %v13660_v37, %v10480_v36 }
  0x2c   :  { %6087 = vmatpush.bf16.msra.mxu2 %v10697_v22  ;;  %v10781_v39 = vor.u32 %v13735_v33, %v10780_v32  ;;  %v13684_v40 = vld [vmem:[#allocation7 + $0x128] sm:$0xf0]  ;;  %v10672_v41 = vld [vmem:[#allocation7 + $0x1e0] sm:$0xf]  ;;  %v10468_v48 = vld [vmem:[#allocation7 + $0x48] sm:$0xf] }
  0x2d   :  { %6116 = vmatpush.bf16.msra.mxu3 %v10793_v26  ;;  %v13708_v42 = vld [vmem:[#allocation7 + $0x1e8] sm:$0xf0]  ;;  %v10768_v43 = vld [vmem:[#allocation7 + $0x2a0] sm:$0xf]  ;;  %v10577_v46 = vor.u32 %v13684_v40, %v10576_v38  ;;  %v13657_v49 = vld [vmem:[#allocation7 + $0x50] sm:$0xf0] }
  0x2e   :  { %v13732_v44 = vld [vmem:[#allocation7 + $0x2a8] sm:$0xf0]  ;;  %6030 = vmatpush.bf16.msra.mxu0 %v10493_v30  ;;  %v10673_v47 = vor.u32 %v13708_v42, %v10672_v41  ;;  %v10564_v50 = vld [vmem:[#allocation7 + $0x108] sm:$0xf]  ;;  %v13681_v52 = vld [vmem:[#allocation7 + $0x110] sm:$0xf0]  ;;  %v10469_v57 = vor.u32 %v13657_v49, %v10468_v48 }
  0x2f   :  { %6059 = vmatpush.bf16.msra.mxu1 %v10589_v34  ;;  %v10769_v51 = vor.u32 %v13732_v44, %v10768_v43  ;;  %v10660_v53 = vld [vmem:[#allocation7 + $0x1c8] sm:$0xf]  ;;  %v13705_v54 = vld [vmem:[#allocation7 + $0x1d0] sm:$0xf0]  ;;  %v10565_v58 = vor.u32 %v13681_v52, %v10564_v50  ;;  %v10456_v60 = vld [vmem:[#allocation7 + $0x30] sm:$0xf] }
  0x30   :  { %6088 = vmatpush.bf16.msra.mxu2 %v10685_v35  ;;  %v10756_v55 = vld [vmem:[#allocation7 + $0x288] sm:$0xf]  ;;  %v13729_v56 = vld [vmem:[#allocation7 + $0x290] sm:$0xf0]  ;;  %v10661_v59 = vor.u32 %v13705_v54, %v10660_v53  ;;  %v13654_v61 = vld [vmem:[#allocation7 + $0x38] sm:$0xf0] }
  0x31   :  { %6117 = vmatpush.bf16.msra.mxu3 %v10781_v39  ;;  %v10552_v62 = vld [vmem:[#allocation7 + $0xf0] sm:$0xf]  ;;  %v10757_v63 = vor.u32 %v13729_v56, %v10756_v55  ;;  %v13678_v0 = vld [vmem:[#allocation7 + $0xf8] sm:$0xf0]  ;;  %v10457_v5 = vor.u32 %v13654_v61, %v10456_v60  ;;  %v10444_v8 = vld [vmem:[#allocation7 + $0x18] sm:$0xf] }
  0x32   :  { %6031 = vmatpush.bf16.msra.mxu0 %v10481_v45  ;;  %v10648_v1 = vld [vmem:[#allocation7 + $0x1b0] sm:$0xf]  ;;  %v13702_v2 = vld [vmem:[#allocation7 + $0x1b8] sm:$0xf0]  ;;  %v10553_v6 = vor.u32 %v13678_v0, %v10552_v62  ;;  %v13651_v9 = vld [vmem:[#allocation7 + $0x20] sm:$0xf0] }
  0x33   :  { %6060 = vmatpush.bf16.msra.mxu1 %v10577_v46  ;;  %v10744_v3 = vld [vmem:[#allocation7 + $0x270] sm:$0xf]  ;;  %v13726_v4 = vld [vmem:[#allocation7 + $0x278] sm:$0xf0]  ;;  %v10649_v7 = vor.u32 %v13702_v2, %v10648_v1  ;;  %v10540_v10 = vld [vmem:[#allocation7 + $0xd8] sm:$0xf]  ;;  %v10445_v17 = vor.u32 %v13651_v9, %v10444_v8 }
  0x34   :  { %6089 = vmatpush.bf16.msra.mxu2 %v10673_v47  ;;  %v10745_v11 = vor.u32 %v13726_v4, %v10744_v3  ;;  %v13675_v12 = vld [vmem:[#allocation7 + $0xe0] sm:$0xf0]  ;;  %v10636_v13 = vld [vmem:[#allocation7 + $0x198] sm:$0xf]  ;;  %v10432_v18 = vld [vmem:[#allocation7] sm:$0xf] }
  0x35   :  { %6118 = vmatpush.bf16.msra.mxu3 %v10769_v51  ;;  %v13699_v14 = vld [vmem:[#allocation7 + $0x1a0] sm:$0xf0]  ;;  %v10732_v15 = vld [vmem:[#allocation7 + $0x258] sm:$0xf]  ;;  %v13648_v19 = vld [vmem:[#allocation7 + $0x8] sm:$0xf0]  ;;  %v10541_v21 = vor.u32 %v13675_v12, %v10540_v10 }
  0x36   :  { %6032 = vmatpush.bf16.msra.mxu0 %v10469_v57  ;;  %v13723_v16 = vld [vmem:[#allocation7 + $0x260] sm:$0xf0]  ;;  %v10528_v20 = vld [vmem:[#allocation7 + $0xc0] sm:$0xf]  ;;  %v10637_v22 = vor.u32 %v13699_v14, %v10636_v13  ;;  %v13672_v23 = vld [vmem:[#allocation7 + $0xc8] sm:$0xf0]  ;;  %v10433_v33 = vor.u32 %v13648_v19, %v10432_v18 }
  0x37   :  { %6061 = vmatpush.bf16.msra.mxu1 %v10565_v58  ;;  %v10624_v24 = vld [vmem:[#allocation7 + $0x180] sm:$0xf]  ;;  %v13696_v25 = vld [vmem:[#allocation7 + $0x188] sm:$0xf0]  ;;  %v10733_v26 = vor.u32 %v13723_v16, %v10732_v15  ;;  %v9920_v29 = vld [vmem:[%s17558_s1] sm:$0xf]  ;;  %v10529_v37 = vor.u32 %v13672_v23, %v10528_v20 }
  0x38   :  { %6090 = vmatpush.bf16.msra.mxu2 %v10661_v59  ;;  %v10720_v27 = vld [vmem:[#allocation7 + $0x240] sm:$0xf]  ;;  %v13720_v28 = vld [vmem:[#allocation7 + $0x248] sm:$0xf0]  ;;  %v13535_v30 = vld [vmem:[%s17558_s1 + $0x7c] sm:$0xf0]  ;;  %v10625_v38 = vor.u32 %v13696_v25, %v10624_v24 }
  0x39   :  { %6119 = vmatpush.bf16.msra.mxu3 %v10757_v63  ;;  %v10900_v31 = vld [vmem:[#allocation7 + $0x3a8] sm:$0xf]  ;;  %v13765_v32 = vld [vmem:[#allocation7 + $0x3b0] sm:$0xf0]  ;;  %v9928_v40 = vld [vmem:[%s17558_s1 + $0x8] sm:$0xf]  ;;  %v10721_v42 = vor.u32 %v13720_v28, %v10720_v27  ;;  %v14831_v46 = vor.u32 %v13535_v30, %v9920_v29 }
  0x3a   :  { %6033 = vmatpush.bf16.msra.mxu0 %v10457_v5  ;;  %v13519_v34 = vld [vmem:[%s17558_s1 + $0x4] sm:$0xf]  ;;  %v10996_v35 = vld [vmem:[#allocation7 + $0x468] sm:$0xf]  ;;  %v13536_v41 = vld [vmem:[%s17558_s1 + $0x84] sm:$0xf0]  ;;  %v10901_v43 = vor.u32 %v13765_v32, %v10900_v31 }
  0x3b   :  { %6062 = vmatpush.bf16.msra.mxu1 %v10553_v6  ;;  %v13789_v36 = vld [vmem:[#allocation7 + $0x470] sm:$0xf0]  ;;  %v13520_v44 = vld [vmem:[%s17558_s1 + $0xc] sm:$0xf]  ;;  %v10888_v47 = vld [vmem:[#allocation7 + $0x390] sm:$0xf]  ;;  %v14835_v52 = vor.u32 %v13536_v41, %v9928_v40 }
  0x3c   :  { %6091 = vmatpush.bf16.msra.mxu2 %v10649_v7  ;;  %v9922_v39 = vld [vmem:[%s17558_s1 + $0x80] sm:$0xf0]  ;;  %v9930_v45 = vld [vmem:[%s17558_s1 + $0x88] sm:$0xf0]  ;;  %v10997_v49 = vor.u32 %v13789_v36, %v10996_v35  ;;  %v11092_v50 = vld [vmem:[#allocation7 + $0x528] sm:$0xf] }
  0x3d   :  { %6120 = vmatpush.bf16.msra.mxu3 %v10745_v11  ;;  %v13762_v48 = vld [vmem:[#allocation7 + $0x398] sm:$0xf0]  ;;  %v14833_v51 = vor.u32 %v13519_v34, %v9922_v39  ;;  %v10984_v53 = vld [vmem:[#allocation7 + $0x450] sm:$0xf]  ;;  %v13813_v55 = vld [vmem:[#allocation7 + $0x530] sm:$0xf0]  ;;  %v14837_v56 = vor.u32 %v13520_v44, %v9930_v45 }
  0x3e   :  { %6034 = vmatpush.bf16.msra.mxu0 %v10445_v17  ;;  %v13786_v54 = vld [vmem:[#allocation7 + $0x458] sm:$0xf0]  ;;  %v11093_v57 = vor.u32 %v13813_v55, %v11092_v50  ;;  %v10889_v58 = vor.u32 %v13762_v48, %v10888_v47  ;;  %v10876_v59 = vld [vmem:[#allocation7 + $0x378] sm:$0xf]  ;;  %v13759_v60 = vld [vmem:[#allocation7 + $0x380] sm:$0xf0] }
  0x3f   :  { %6063 = vmatpush.bf16.msra.mxu1 %v10541_v21  ;;  %17799 = vst [vmem:[#allocation21_spill] sm:$0xff] %v14837_v56  ;;  %v10985_v61 = vor.u32 %v13786_v54, %v10984_v53  ;;  %v10972_v62 = vld [vmem:[#allocation7 + $0x438] sm:$0xf]  ;;  %v13783_v63 = vld [vmem:[#allocation7 + $0x440] sm:$0xf0]  ;;  %v10877_v3 = vor.u32 %v13759_v60, %v10876_v59 }
  0x40   :  { %6092 = vmatpush.bf16.msra.mxu2 %v10637_v22  ;;  %v11080_v0 = vld [vmem:[#allocation7 + $0x510] sm:$0xf]  ;;  %v10864_v1 = vld [vmem:[#allocation7 + $0x360] sm:$0xf]  ;;  %v13810_v2 = vld [vmem:[#allocation7 + $0x518] sm:$0xf0]  ;;  %v10973_v9 = vor.u32 %v13783_v63, %v10972_v62 }
  0x41   :  { %6121 = vmatpush.bf16.msra.mxu3 %v10733_v26  ;;  %v11081_v4 = vor.u32 %v13810_v2, %v11080_v0  ;;  %v11188_v5 = vld [vmem:[#allocation7 + $0x5e8] sm:$0xf]  ;;  %v13837_v6 = vld [vmem:[#allocation7 + $0x5f0] sm:$0xf0]  ;;  %v11176_v7 = vld [vmem:[#allocation7 + $0x5d0] sm:$0xf] }
  0x42   :  { %6035 = vmatpush.bf16.msra.mxu0 %v10433_v33  ;;  %v13756_v8 = vld [vmem:[#allocation7 + $0x368] sm:$0xf0]  ;;  %v10960_v10 = vld [vmem:[#allocation7 + $0x420] sm:$0xf]  ;;  %v11189_v11 = vor.u32 %v13837_v6, %v11188_v5  ;;  %v13834_v12 = vld [vmem:[#allocation7 + $0x5d8] sm:$0xf0] }
  0x43   :  { %6064 = vmatpush.bf16.msra.mxu1 %v10529_v37  ;;  %v13780_v13 = vld [vmem:[#allocation7 + $0x428] sm:$0xf0]  ;;  %v11068_v14 = vld [vmem:[#allocation7 + $0x4f8] sm:$0xf]  ;;  %v13807_v15 = vld [vmem:[#allocation7 + $0x500] sm:$0xf0]  ;;  %v11177_v16 = vor.u32 %v13834_v12, %v11176_v7  ;;  %v10865_v20 = vor.u32 %v13756_v8, %v10864_v1 }
  0x44   :  { %6093 = vmatpush.bf16.msra.mxu2 %v10625_v38  ;;  %v11069_v17 = vor.u32 %v13807_v15, %v11068_v14  ;;  %v11164_v18 = vld [vmem:[#allocation7 + $0x5b8] sm:$0xf]  ;;  %v10048_v19 = vld [vmem:[%s17558_s1 + $0x100] sm:$0xf]  ;;  %v13831_v21 = vld [vmem:[#allocation7 + $0x5c0] sm:$0xf0]  ;;  %v10961_v27 = vor.u32 %v13780_v13, %v10960_v10 }
  0x45   :  { %6122 = vmatpush.bf16.msra.mxu3 %v10721_v42  ;;  %6036 = vmatmul.bf16.vlgmr.msra.gmra.mxu0 %v14831_v46  ;;  %v11056_v22 = vld [vmem:[#allocation7 + $0x4e0] sm:$0xf]  ;;  %v13804_v23 = vld [vmem:[#allocation7 + $0x4e8] sm:$0xf0]  ;;  %v13567_v24 = vld [vmem:[%s17558_s1 + $0x17c] sm:$0xf0]  ;;  %v11165_v34 = vor.u32 %v13831_v21, %v11164_v18 }
  0x46   :  { %6144 = vmatpush.bf16.msrb.mxu0 %v10901_v43  ;;  %6065 = vmatmul.bf16.vlgmr.msra.gmra.mxu1 %v14833_v51  ;;  %v10852_v25 = vld [vmem:[#allocation7 + $0x348] sm:$0xf]  ;;  %v13753_v26 = vld [vmem:[#allocation7 + $0x350] sm:$0xf0]  ;;  %v10056_v32 = vld [vmem:[%s17558_s1 + $0x108] sm:$0xf]  ;;  %v11057_v35 = vor.u32 %v13804_v23, %v11056_v22  ;;  %v14867_v40 = vor.u32 %v13567_v24, %v10048_v19 }
  0x47   :  { %6173 = vmatpush.bf16.msrb.mxu1 %v10997_v49  ;;  %6094 = vmatmul.bf16.vlgmr.msra.gmra.mxu2 %v14835_v52  ;;  %v13551_v28 = vld [vmem:[%s17558_s1 + $0x104] sm:$0xf]  ;;  %v10948_v29 = vld [vmem:[#allocation7 + $0x408] sm:$0xf]  ;;  %v13568_v33 = vld [vmem:[%s17558_s1 + $0x184] sm:$0xf0]  ;;  %v10853_v38 = vor.u32 %v13753_v26, %v10852_v25 }
  0x48   :  { %6123 = vmatmul.bf16.vlgmr.msra.gmra.mxu3 %v14837_v56  ;;  %6202 = vmatpush.bf16.msrb.mxu2 %v11093_v57  ;;  %v13777_v30 = vld [vmem:[#allocation7 + $0x410] sm:$0xf0]  ;;  %v13552_v36 = vld [vmem:[%s17558_s1 + $0x10c] sm:$0xf]  ;;  %v10840_v39 = vld [vmem:[#allocation7 + $0x330] sm:$0xf]  ;;  %v14871_v47 = vor.u32 %v13568_v33, %v10056_v32 }
  0x49   :  { %6231 = vmatpush.bf16.msrb.mxu3 %v11189_v11  ;;  %v10050_v31 = vld [vmem:[%s17558_s1 + $0x180] sm:$0xf0]  ;;  %v10058_v37 = vld [vmem:[%s17558_s1 + $0x188] sm:$0xf0]  ;;  %v10949_v42 = vor.u32 %v13777_v30, %v10948_v29  ;;  %v11152_v43 = vld [vmem:[#allocation7 + $0x5a0] sm:$0xf] }
  0x4a   :  { %6145 = vmatpush.bf16.msrb.mxu0 %v10889_v58  ;;  %v13750_v41 = vld [vmem:[#allocation7 + $0x338] sm:$0xf0]  ;;  %v13828_v44 = vld [vmem:[#allocation7 + $0x5a8] sm:$0xf0]  ;;  %v14869_v45 = vor.u32 %v13551_v28, %v10050_v31  ;;  %v14873_v48 = vor.u32 %v13552_v36, %v10058_v37  ;;  %v11044_v53 = vld [vmem:[#allocation7 + $0x4c8] sm:$0xf] }
  0x4b   :  { %6174 = vmatpush.bf16.msrb.mxu1 %v10985_v61  ;;  %v10841_v49 = vor.u32 %v13750_v41, %v10840_v39  ;;  %v11153_v50 = vor.u32 %v13828_v44, %v11152_v43  ;;  %v13801_v54 = vld [vmem:[#allocation7 + $0x4d0] sm:$0xf0]  ;;  %v10828_v57 = vld [vmem:[#allocation7 + $0x318] sm:$0xf]  ;;  %v13747_v58 = vld [vmem:[#allocation7 + $0x320] sm:$0xf0] }
  0x4c   :  { %6203 = vmatpush.bf16.msrb.mxu2 %v11081_v4  ;;  %17800 = vst [vmem:[#allocation22_spill] sm:$0xff] %v14873_v48  ;;  %v11045_v55 = vor.u32 %v13801_v54, %v11044_v53  ;;  %v10936_v59 = vld [vmem:[#allocation7 + $0x3f0] sm:$0xf]  ;;  %v13774_v60 = vld [vmem:[#allocation7 + $0x3f8] sm:$0xf0]  ;;  %v10829_v63 = vor.u32 %v13747_v58, %v10828_v57 }
  0x4d   :  { %6232 = vmatpush.bf16.msrb.mxu3 %v11177_v16  ;;  %v11140_v61 = vld [vmem:[#allocation7 + $0x588] sm:$0xf]  ;;  %v13825_v62 = vld [vmem:[#allocation7 + $0x590] sm:$0xf0]  ;;  %v10937_v0 = vor.u32 %v13774_v60, %v10936_v59  ;;  %v11032_v2 = vld [vmem:[#allocation7 + $0x4b0] sm:$0xf] }
  0x4e   :  { %6146 = vmatpush.bf16.msrb.mxu0 %v10877_v3  ;;  %v11141_v1 = vor.u32 %v13825_v62, %v11140_v61  ;;  %v13798_v3 = vld [vmem:[#allocation7 + $0x4b8] sm:$0xf0]  ;;  %v11128_v4 = vld [vmem:[#allocation7 + $0x570] sm:$0xf]  ;;  %v10816_v7 = vld [vmem:[#allocation7 + $0x300] sm:$0xf] }
  0x4f   :  { %6175 = vmatpush.bf16.msrb.mxu1 %v10973_v9  ;;  %v11033_v5 = vor.u32 %v13798_v3, %v11032_v2  ;;  %v13822_v6 = vld [vmem:[#allocation7 + $0x578] sm:$0xf0]  ;;  %v13744_v8 = vld [vmem:[#allocation7 + $0x308] sm:$0xf0]  ;;  %v10924_v9 = vld [vmem:[#allocation7 + $0x3d8] sm:$0xf] }
  0x50   :  { %6204 = vmatpush.bf16.msrb.mxu2 %v11069_v17  ;;  %v13771_v10 = vld [vmem:[#allocation7 + $0x3e0] sm:$0xf0]  ;;  %v11020_v11 = vld [vmem:[#allocation7 + $0x498] sm:$0xf]  ;;  %v11129_v14 = vor.u32 %v13822_v6, %v11128_v4  ;;  %v10817_v15 = vor.u32 %v13744_v8, %v10816_v7  ;;  %v10912_v17 = vld [vmem:[#allocation7 + $0x3c0] sm:$0xf] }
  0x51   :  { %6233 = vmatpush.bf16.msrb.mxu3 %v11165_v34  ;;  %v10925_v12 = vor.u32 %v13771_v10, %v10924_v9  ;;  %v13795_v13 = vld [vmem:[#allocation7 + $0x4a0] sm:$0xf0]  ;;  %v13768_v18 = vld [vmem:[#allocation7 + $0x3c8] sm:$0xf0]  ;;  %v11008_v19 = vld [vmem:[#allocation7 + $0x480] sm:$0xf] }
  0x52   :  { %6147 = vmatpush.bf16.msrb.mxu0 %v10865_v20  ;;  %v11021_v16 = vor.u32 %v13795_v13, %v11020_v11  ;;  %v11116_v20 = vld [vmem:[#allocation7 + $0x558] sm:$0xf]  ;;  %v13819_v21 = vld [vmem:[#allocation7 + $0x560] sm:$0xf0]  ;;  %v13792_v22 = vld [vmem:[#allocation7 + $0x488] sm:$0xf0]  ;;  %v10913_v26 = vor.u32 %v13768_v18, %v10912_v17 }
  0x53   :  { %6176 = vmatpush.bf16.msrb.mxu1 %v10961_v27  ;;  %v10176_v23 = vld [vmem:[%s17558_s1 + $0x200] sm:$0xf]  ;;  %v13583_v25 = vld [vmem:[%s17558_s1 + $0x204] sm:$0xf]  ;;  %v10184_v28 = vld [vmem:[%s17558_s1 + $0x208] sm:$0xf]  ;;  %v11009_v30 = vor.u32 %v13792_v22, %v11008_v19  ;;  %v11117_v33 = vor.u32 %v13819_v21, %v11116_v20 }
  0x54   :  { %6205 = vmatpush.bf16.msrb.mxu2 %v11057_v35  ;;  %v13599_v24 = vld [vmem:[%s17558_s1 + $0x27c] sm:$0xf0]  ;;  %v10178_v27 = vld [vmem:[%s17558_s1 + $0x280] sm:$0xf0]  ;;  %v13600_v29 = vld [vmem:[%s17558_s1 + $0x284] sm:$0xf0] }
  0x55   :  { %6041 = vmatmul.bf16.gmra.mxu0 %v14867_v40  ;;  %6234 = vmatpush.bf16.msrb.mxu3 %v11153_v50  ;;  %v13584_v31 = vld [vmem:[%s17558_s1 + $0x20c] sm:$0xf]  ;;  %v14903_v34 = vor.u32 %v13599_v24, %v10176_v23  ;;  %v11104_v35 = vld [vmem:[#allocation7 + $0x540] sm:$0xf]  ;;  %v13816_v36 = vld [vmem:[#allocation7 + $0x548] sm:$0xf0]  ;;  %v14905_v37 = vor.u32 %v13583_v25, %v10178_v27 }
  0x56   :  { %6148 = vmatpush.bf16.msrb.mxu0 %v10853_v38  ;;  %6070 = vmatmul.bf16.gmra.mxu1 %v14869_v45  ;;  %v10186_v32 = vld [vmem:[%s17558_s1 + $0x288] sm:$0xf0]  ;;  %v14907_v38 = vor.u32 %v13600_v29, %v10184_v28  ;;  %v11105_v41 = vor.u32 %v13816_v36, %v11104_v35  ;;  %v13861_v43 = vld [vmem:[#allocation7 + $0x6b0] sm:$0xf0]  ;;  %v11380_v53 = vld [vmem:[#allocation7 + $0x768] sm:$0xf] }
  0x57   :  { %6177 = vmatpush.bf16.msrb.mxu1 %v10949_v42  ;;  %6099 = vmatmul.bf16.gmra.mxu2 %v14871_v47  ;;  %v14909_v39 = vor.u32 %v13584_v31, %v10186_v32  ;;  %v11284_v42 = vld [vmem:[#allocation7 + $0x6a8] sm:$0xf]  ;;  %v13858_v50 = vld [vmem:[#allocation7 + $0x698] sm:$0xf0]  ;;  %v13885_v54 = vld [vmem:[#allocation7 + $0x770] sm:$0xf0] }
  0x58   :  { %6128 = vmatmul.bf16.gmra.mxu3 %v14873_v48  ;;  %6206 = vmatpush.bf16.msrb.mxu2 %v11045_v55  ;;  %v11285_v44 = vor.u32 %v13861_v43, %v11284_v42  ;;  %v11381_v57 = vor.u32 %v13885_v54, %v11380_v53  ;;  %v10304_v58 = vld [vmem:[%s17558_s1 + $0x300] sm:$0xf]  ;;  %v13615_v60 = vld [vmem:[%s17558_s1 + $0x304] sm:$0xf]  ;;  %v10312_v62 = vld [vmem:[%s17558_s1 + $0x308] sm:$0xf] }
  0x59   :  { %6235 = vmatpush.bf16.msrb.mxu3 %v11141_v1  ;;  %v13631_v59 = vld [vmem:[%s17558_s1 + $0x37c] sm:$0xf0]  ;;  %v10306_v61 = vld [vmem:[%s17558_s1 + $0x380] sm:$0xf0]  ;;  %v10314_v1 = vld [vmem:[%s17558_s1 + $0x388] sm:$0xf0] }
  0x5a   :  { %6149 = vmatpush.bf16.msrb.mxu0 %v10841_v49  ;;  %v11272_v49 = vld [vmem:[#allocation7 + $0x690] sm:$0xf]  ;;  %v14939_v2 = vor.u32 %v13631_v59, %v10304_v58  ;;  %v14941_v3 = vor.u32 %v13615_v60, %v10306_v61  ;;  %v11260_v6 = vld [vmem:[#allocation7 + $0x678] sm:$0xf]  ;;  %v13855_v7 = vld [vmem:[#allocation7 + $0x680] sm:$0xf0] }
  0x5b   :  { %6178 = vmatpush.bf16.msrb.mxu1 %v10937_v0  ;;  %v11273_v55 = vor.u32 %v13858_v50, %v11272_v49  ;;  %v13616_v0 = vld [vmem:[%s17558_s1 + $0x30c] sm:$0xf]  ;;  %v11368_v8 = vld [vmem:[#allocation7 + $0x750] sm:$0xf]  ;;  %v11261_v9 = vor.u32 %v13855_v7, %v11260_v6  ;;  %v11248_v11 = vld [vmem:[#allocation7 + $0x660] sm:$0xf] }
  0x5c   :  { %6207 = vmatpush.bf16.msrb.mxu2 %v11033_v5  ;;  %v14945_v5 = vor.u32 %v13616_v0, %v10314_v1  ;;  %v13882_v10 = vld [vmem:[#allocation7 + $0x758] sm:$0xf0]  ;;  %v13879_v19 = vld [vmem:[#allocation7 + $0x740] sm:$0xf0]  ;;  %v9936_v21 = vld [vmem:[%s17558_s1 + $0x10] sm:$0xf] }
  0x5d   :  { %6236 = vmatpush.bf16.msrb.mxu3 %v11129_v14  ;;  %v11369_v13 = vor.u32 %v13882_v10, %v11368_v8  ;;  %v11476_v14 = vld [vmem:[#allocation7 + $0x828] sm:$0xf]  ;;  %v13537_v22 = vld [vmem:[%s17558_s1 + $0x8c] sm:$0xf0]  ;;  %v13521_v23 = vld [vmem:[%s17558_s1 + $0x14] sm:$0xf] }
  0x5e   :  { %6150 = vmatpush.bf16.msrb.mxu0 %v10829_v63  ;;  %v13632_v63 = vld [vmem:[%s17558_s1 + $0x384] sm:$0xf0]  ;;  %v9938_v24 = vld [vmem:[%s17558_s1 + $0x90] sm:$0xf0]  ;;  %v9944_v25 = vld [vmem:[%s17558_s1 + $0x18] sm:$0xf]  ;;  %v14975_v29 = vor.u32 %v13537_v22, %v9936_v21 }
  0x5f   :  { %6179 = vmatpush.bf16.msrb.mxu1 %v10925_v12  ;;  %v14943_v4 = vor.u32 %v13632_v63, %v10312_v62  ;;  %v13852_v12 = vld [vmem:[#allocation7 + $0x668] sm:$0xf0]  ;;  %v13849_v35 = vld [vmem:[#allocation7 + $0x650] sm:$0xf0]  ;;  %v11464_v36 = vld [vmem:[#allocation7 + $0x810] sm:$0xf] }
  0x60   :  { %6208 = vmatpush.bf16.msrb.mxu2 %v11021_v16  ;;  %v11356_v16 = vld [vmem:[#allocation7 + $0x738] sm:$0xf]  ;;  %v11249_v17 = vor.u32 %v13852_v12, %v11248_v11  ;;  %v13522_v27 = vld [vmem:[%s17558_s1 + $0x1c] sm:$0xf]  ;;  %v13906_v42 = vld [vmem:[#allocation7 + $0x818] sm:$0xf0] }
  0x61   :  { %6237 = vmatpush.bf16.msrb.mxu3 %v11117_v33  ;;  %v11357_v20 = vor.u32 %v13879_v19, %v11356_v16  ;;  %v9946_v28 = vld [vmem:[%s17558_s1 + $0x98] sm:$0xf0]  ;;  %v11236_v33 = vld [vmem:[#allocation7 + $0x648] sm:$0xf]  ;;  %v11344_v43 = vld [vmem:[#allocation7 + $0x720] sm:$0xf]  ;;  %v11465_v49 = vor.u32 %v13906_v42, %v11464_v36 }
  0x62   :  { %6151 = vmatpush.bf16.msrb.mxu0 %v10817_v15  ;;  %v13909_v15 = vld [vmem:[#allocation7 + $0x830] sm:$0xf0]  ;;  %v14981_v32 = vor.u32 %v13522_v27, %v9946_v28  ;;  %v11572_v53 = vld [vmem:[#allocation7 + $0x8e8] sm:$0xf]  ;;  %v13930_v58 = vld [vmem:[#allocation7 + $0x8d8] sm:$0xf0] }
  0x63   :  { %6180 = vmatpush.bf16.msrb.mxu1 %v10913_v26  ;;  %v11477_v18 = vor.u32 %v13909_v15, %v11476_v14  ;;  %v13538_v26 = vld [vmem:[%s17558_s1 + $0x94] sm:$0xf0]  ;;  %v13933_v54 = vld [vmem:[#allocation7 + $0x8f0] sm:$0xf0]  ;;  %v11224_v59 = vld [vmem:[#allocation7 + $0x630] sm:$0xf] }
  0x64   :  { %6209 = vmatpush.bf16.msrb.mxu2 %v11009_v30  ;;  %v14977_v30 = vor.u32 %v13521_v23, %v9938_v24  ;;  %v14979_v31 = vor.u32 %v13538_v26, %v9944_v25  ;;  %v13846_v60 = vld [vmem:[#allocation7 + $0x638] sm:$0xf0]  ;;  %v11452_v62 = vld [vmem:[#allocation7 + $0x7f8] sm:$0xf]  ;;  %v13903_v63 = vld [vmem:[#allocation7 + $0x800] sm:$0xf0] }
  0x65   :  { %6046 = vmatmul.bf16.gmra.mxu0 %v14903_v34  ;;  %6238 = vmatpush.bf16.msrb.mxu3 %v11105_v41  ;;  %v11237_v41 = vor.u32 %v13849_v35, %v11236_v33  ;;  %v11225_v61 = vor.u32 %v13846_v60, %v11224_v59  ;;  %v11332_v0 = vld [vmem:[#allocation7 + $0x708] sm:$0xf]  ;;  %v11453_v6 = vor.u32 %v13903_v63, %v11452_v62  ;;  %v13873_v7 = vld [vmem:[#allocation7 + $0x710] sm:$0xf0]  ;;  %v11548_v8 = vld [vmem:[#allocation7 + $0x8b8] sm:$0xf] }
  0x66   :  { %6075 = vmatmul.bf16.gmra.mxu1 %v14905_v37  ;;  %6260 = vmatpush.bf16.msra.mxu0 %v11285_v44  ;;  %v13876_v44 = vld [vmem:[#allocation7 + $0x728] sm:$0xf0]  ;;  %v13927_v10 = vld [vmem:[#allocation7 + $0x8c0] sm:$0xf0]  ;;  %v11440_v11 = vld [vmem:[#allocation7 + $0x7e0] sm:$0xf] }
  0x67   :  { %6104 = vmatmul.bf16.gmra.mxu2 %v14907_v38  ;;  %6289 = vmatpush.bf16.msra.mxu1 %v11381_v57  ;;  %v11345_v50 = vor.u32 %v13876_v44, %v11344_v43  ;;  %v11573_v57 = vor.u32 %v13933_v54, %v11572_v53  ;;  %v13900_v12 = vld [vmem:[#allocation7 + $0x7e8] sm:$0xf0]  ;;  %v13569_v14 = vld [vmem:[%s17558_s1 + $0x18c] sm:$0xf0]  ;;  %v13553_v15 = vld [vmem:[%s17558_s1 + $0x114] sm:$0xf] }
  0x68   :  { %6133 = vmatmul.bf16.gmra.mxu3 %v14909_v39  ;;  %6318 = vmatpush.bf16.msra.mxu2 %v11477_v18  ;;  %v11441_v16 = vor.u32 %v13900_v12, %v11440_v11  ;;  %v10072_v18 = vld [vmem:[%s17558_s1 + $0x118] sm:$0xf]  ;;  %v13554_v21 = vld [vmem:[%s17558_s1 + $0x11c] sm:$0xf]  ;;  %v11536_v24 = vld [vmem:[#allocation7 + $0x8a0] sm:$0xf] }
  0x69   :  { %6347 = vmatpush.bf16.msra.mxu3 %v11573_v57  ;;  %v13570_v19 = vld [vmem:[%s17558_s1 + $0x194] sm:$0xf0]  ;;  %v10074_v22 = vld [vmem:[%s17558_s1 + $0x198] sm:$0xf0]  ;;  %v13897_v36 = vld [vmem:[#allocation7 + $0x7d0] sm:$0xf0] }
  0x6a   :  { %6261 = vmatpush.bf16.msra.mxu0 %v11273_v55  ;;  %v11560_v55 = vld [vmem:[#allocation7 + $0x8d0] sm:$0xf]  ;;  %v13924_v25 = vld [vmem:[#allocation7 + $0x8a8] sm:$0xf0]  ;;  %v15015_v27 = vor.u32 %v13570_v19, %v10072_v18  ;;  %v15017_v28 = vor.u32 %v13554_v21, %v10074_v22  ;;  %v11428_v35 = vld [vmem:[#allocation7 + $0x7c8] sm:$0xf] }
  0x6b   :  { %6290 = vmatpush.bf16.msra.mxu1 %v11369_v13  ;;  %v11561_v1 = vor.u32 %v13930_v58, %v11560_v55  ;;  %v10064_v13 = vld [vmem:[%s17558_s1 + $0x110] sm:$0xf]  ;;  %v11537_v33 = vor.u32 %v13924_v25, %v11536_v24  ;;  %v11212_v42 = vld [vmem:[#allocation7 + $0x618] sm:$0xf]  ;;  %v13843_v43 = vld [vmem:[#allocation7 + $0x620] sm:$0xf0] }
  0x6c   :  { %6319 = vmatpush.bf16.msra.mxu2 %v11465_v49  ;;  %v15011_v23 = vor.u32 %v13569_v14, %v10064_v13  ;;  %v11320_v44 = vld [vmem:[#allocation7 + $0x6f0] sm:$0xf]  ;;  %v11213_v49 = vor.u32 %v13843_v43, %v11212_v42  ;;  %v11524_v53 = vld [vmem:[#allocation7 + $0x888] sm:$0xf]  ;;  %v13921_v54 = vld [vmem:[#allocation7 + $0x890] sm:$0xf0] }
  0x6d   :  { %6348 = vmatpush.bf16.msra.mxu3 %v11561_v1  ;;  %v11525_v57 = vor.u32 %v13921_v54, %v11524_v53  ;;  %v11416_v58 = vld [vmem:[#allocation7 + $0x7b0] sm:$0xf]  ;;  %v13894_v59 = vld [vmem:[#allocation7 + $0x7b8] sm:$0xf0]  ;;  %v11200_v63 = vld [vmem:[#allocation7 + $0x600] sm:$0xf] }
  0x6e   :  { %6262 = vmatpush.bf16.msra.mxu0 %v11261_v9  ;;  %v11333_v9 = vor.u32 %v13873_v7, %v11332_v0  ;;  %v11512_v60 = vld [vmem:[#allocation7 + $0x870] sm:$0xf]  ;;  %v13918_v62 = vld [vmem:[#allocation7 + $0x878] sm:$0xf0]  ;;  %v13840_v0 = vld [vmem:[#allocation7 + $0x608] sm:$0xf0] }
  0x6f   :  { %6291 = vmatpush.bf16.msra.mxu1 %v11357_v20  ;;  %v11549_v20 = vor.u32 %v13927_v10, %v11548_v8  ;;  %v11201_v1 = vor.u32 %v13840_v0, %v11200_v63  ;;  %v13867_v7 = vld [vmem:[#allocation7 + $0x6e0] sm:$0xf0]  ;;  %v11404_v8 = vld [vmem:[#allocation7 + $0x798] sm:$0xf]  ;;  %v10192_v11 = vld [vmem:[%s17558_s1 + $0x210] sm:$0xf]  ;;  %v11513_v12 = vor.u32 %v13918_v62, %v11512_v60 }
  0x70   :  { %6320 = vmatpush.bf16.msra.mxu2 %v11453_v6  ;;  %v11308_v6 = vld [vmem:[#allocation7 + $0x6d8] sm:$0xf]  ;;  %v13891_v10 = vld [vmem:[#allocation7 + $0x7a0] sm:$0xf0]  ;;  %v13601_v14 = vld [vmem:[%s17558_s1 + $0x28c] sm:$0xf0] }
  0x71   :  { %6349 = vmatpush.bf16.msra.mxu3 %v11549_v20  ;;  %v11405_v13 = vor.u32 %v13891_v10, %v11404_v8  ;;  %v10194_v18 = vld [vmem:[%s17558_s1 + $0x290] sm:$0xf0]  ;;  %v10200_v19 = vld [vmem:[%s17558_s1 + $0x218] sm:$0xf]  ;;  %v13586_v21 = vld [vmem:[%s17558_s1 + $0x21c] sm:$0xf] }
  0x72   :  { %6263 = vmatpush.bf16.msra.mxu0 %v11249_v17  ;;  %v10066_v17 = vld [vmem:[%s17558_s1 + $0x190] sm:$0xf0]  ;;  %v13602_v20 = vld [vmem:[%s17558_s1 + $0x294] sm:$0xf0]  ;;  %v10202_v22 = vld [vmem:[%s17558_s1 + $0x298] sm:$0xf0] }
  0x73   :  { %6292 = vmatpush.bf16.msra.mxu1 %v11345_v50  ;;  %v15013_v26 = vor.u32 %v13553_v15, %v10066_v17  ;;  %v13870_v50 = vld [vmem:[#allocation7 + $0x6f8] sm:$0xf0]  ;;  %v11500_v15 = vld [vmem:[#allocation7 + $0x858] sm:$0xf]  ;;  %v13585_v17 = vld [vmem:[%s17558_s1 + $0x214] sm:$0xf]  ;;  %v15053_v54 = vor.u32 %v13586_v21, %v10202_v22 }
  0x74   :  { %6321 = vmatpush.bf16.msra.mxu2 %v11441_v16  ;;  %v11321_v55 = vor.u32 %v13870_v50, %v11320_v44  ;;  %v13915_v16 = vld [vmem:[#allocation7 + $0x860] sm:$0xf0]  ;;  %v11296_v25 = vld [vmem:[#allocation7 + $0x6c0] sm:$0xf]  ;;  %v13888_v42 = vld [vmem:[#allocation7 + $0x788] sm:$0xf0]  ;;  %v15049_v43 = vor.u32 %v13585_v17, %v10194_v18  ;;  %v15051_v44 = vor.u32 %v13602_v20, %v10200_v19 }
  0x75   :  { %6051 = vmatmul.bf16.gmra.mxu0 %v14939_v2  ;;  %6350 = vmatpush.bf16.msra.mxu3 %v11537_v33  ;;  %v11501_v24 = vor.u32 %v13915_v16, %v11500_v15  ;;  %v13864_v33 = vld [vmem:[#allocation7 + $0x6c8] sm:$0xf0]  ;;  %v11488_v50 = vld [vmem:[#allocation7 + $0x840] sm:$0xf]  ;;  %v13954_v62 = vld [vmem:[#allocation7 + $0x998] sm:$0xf0] }
  0x76   :  { %6080 = vmatmul.bf16.gmra.mxu1 %v14941_v3  ;;  %6264 = vmatpush.bf16.msra.mxu0 %v11237_v41  ;;  %v11429_v41 = vor.u32 %v13897_v36, %v11428_v35  ;;  %v11392_v35 = vld [vmem:[#allocation7 + $0x780] sm:$0xf]  ;;  %v15047_v36 = vor.u32 %v13601_v14, %v10192_v11  ;;  %v13912_v53 = vld [vmem:[#allocation7 + $0x848] sm:$0xf0]  ;;  %v11764_v63 = vld [vmem:[#allocation7 + $0xa68] sm:$0xf] }
  0x77   :  { %6109 = vmatmul.bf16.gmra.mxu2 %v14943_v4  ;;  %6293 = vmatpush.bf16.msra.mxu1 %v11333_v9  ;;  %v11309_v9 = vor.u32 %v13867_v7, %v11308_v6  ;;  %v10320_v60 = vld [vmem:[%s17558_s1 + $0x310] sm:$0xf]  ;;  %v13981_v7 = vld [vmem:[#allocation7 + $0xa70] sm:$0xf0]  ;;  %v10322_v8 = vld [vmem:[%s17558_s1 + $0x390] sm:$0xf0] }
  0x78   :  { %6138 = vmatmul.bf16.gmra.mxu3 %v14945_v5  ;;  %6322 = vmatpush.bf16.msra.mxu2 %v11429_v41  ;;  %v11297_v41 = vor.u32 %v13864_v33, %v11296_v25  ;;  %v13633_v0 = vld [vmem:[%s17558_s1 + $0x38c] sm:$0xf0]  ;;  %v13634_v10 = vld [vmem:[%s17558_s1 + $0x394] sm:$0xf0]  ;;  %v11765_v11 = vor.u32 %v13981_v7, %v11764_v63  ;;  %v11644_v18 = vld [vmem:[#allocation7 + $0x978] sm:$0xf] }
  0x79   :  { %6351 = vmatpush.bf16.msra.mxu3 %v11525_v57  ;;  %v11668_v57 = vld [vmem:[#allocation7 + $0x9a8] sm:$0xf]  ;;  %v15083_v14 = vor.u32 %v13633_v0, %v10320_v60  ;;  %v13951_v19 = vld [vmem:[#allocation7 + $0x980] sm:$0xf0]  ;;  %v11752_v20 = vld [vmem:[#allocation7 + $0xa50] sm:$0xf] }
  0x7a   :  { %6265 = vmatpush.bf16.msra.mxu0 %v11225_v61  ;;  %v11417_v61 = vor.u32 %v13894_v59, %v11416_v58  ;;  %v13957_v58 = vld [vmem:[#allocation7 + $0x9b0] sm:$0xf0]  ;;  %v11645_v21 = vor.u32 %v13951_v19, %v11644_v18  ;;  %v13978_v22 = vld [vmem:[#allocation7 + $0xa58] sm:$0xf0]  ;;  %v1284_v25 = vld [vmem:[#allocation9] sm:$0x7] }
  0x7b   :  { %6294 = vmatpush.bf16.msra.mxu1 %v11321_v55  ;;  %v11489_v55 = vor.u32 %v13912_v53, %v11488_v50  ;;  %v11669_v59 = vor.u32 %v13957_v58, %v11668_v57  ;;  %17801 = vst [vmem:[#allocation23_spill] sm:$0xff] %v15083_v14  ;;  %v15095_v33 = vperm.slane %v1284_v25, 0  ;;  %v13948_v50 = vld [vmem:[#allocation7 + $0x968] sm:$0xf0]  ;;  %v11860_v53 = vld [vmem:[#allocation7 + $0xb28] sm:$0xf] }
  0x7c   :  { %6323 = vmatpush.bf16.msra.mxu2 %v11417_v61  ;;  %v11656_v61 = vld [vmem:[#allocation7 + $0x990] sm:$0xf]  ;;  %v14005_v57 = vld [vmem:[#allocation7 + $0xb30] sm:$0xf0]  ;;  %v11740_v58 = vld [vmem:[#allocation7 + $0xa38] sm:$0xf] }
  0x7d   :  { %6352 = vmatpush.bf16.msra.mxu3 %v11513_v12  ;;  %v11657_v6 = vor.u32 %v13954_v62, %v11656_v61  ;;  %v13618_v12 = vld [vmem:[%s17558_s1 + $0x31c] sm:$0xf]  ;;  %v9954_v60 = vld [vmem:[%s17558_s1 + $0xa0] sm:$0xf0]  ;;  %v9960_v61 = vld [vmem:[%s17558_s1 + $0x28] sm:$0xf]  ;;  %v11861_v63 = vor.u32 %v14005_v57, %v11860_v53 }
  0x7e   :  { %6266 = vmatpush.bf16.msra.mxu0 %v11213_v49  ;;  %v11393_v49 = vor.u32 %v13888_v42, %v11392_v35  ;;  %v9952_v35 = vld [vmem:[%s17558_s1 + $0x20] sm:$0xf]  ;;  %v13523_v42 = vld [vmem:[%s17558_s1 + $0x24] sm:$0xf]  ;;  %v13540_v62 = vld [vmem:[%s17558_s1 + $0xa4] sm:$0xf0] }
  0x7f   :  { %6295 = vmatpush.bf16.msra.mxu1 %v11309_v9  ;;  %v10328_v9 = vld [vmem:[%s17558_s1 + $0x318] sm:$0xf]  ;;  %v11728_v25 = vld [vmem:[#allocation7 + $0xa20] sm:$0xf] }
  0x80   :  { %6324 = vmatpush.bf16.msra.mxu2 %v11405_v13  ;;  %v10330_v13 = vld [vmem:[%s17558_s1 + $0x398] sm:$0xf0]  ;;  %v15087_v16 = vor.u32 %v13634_v10, %v10328_v9  ;;  %v15123_v9 = vor.u32 %v13523_v42, %v9954_v60  ;;  %v15125_v10 = vor.u32 %v13540_v62, %v9960_v61  ;;  %v11620_v19 = vld [vmem:[#allocation7 + $0x948] sm:$0xf]  ;;  %v11944_v60 = vld [vmem:[#allocation7 + $0xbd0] sm:$0xf] }
  0x81   :  { %6353 = vmatpush.bf16.msra.mxu3 %v11501_v24  ;;  %v15089_v17 = vor.u32 %v13618_v12, %v10330_v13  ;;  %v11753_v24 = vor.u32 %v13978_v22, %v11752_v20  ;;  %v13945_v20 = vld [vmem:[#allocation7 + $0x950] sm:$0xf0]  ;;  %v14026_v61 = vld [vmem:[#allocation7 + $0xbd8] sm:$0xf0] }
  0x82   :  { %6267 = vmatpush.bf16.msra.mxu0 %v11201_v1  ;;  %v13617_v1 = vld [vmem:[%s17558_s1 + $0x314] sm:$0xf]  ;;  %17803 = vst [vmem:[#allocation25_spill] sm:$0xff] %v15087_v16  ;;  %v11621_v22 = vor.u32 %v13945_v20, %v11620_v19  ;;  %v13555_v19 = vld [vmem:[%s17558_s1 + $0x124] sm:$0xf] }
  0x83   :  { %6296 = vmatpush.bf16.msra.mxu1 %v11297_v41  ;;  %v15085_v15 = vor.u32 %v13617_v1, %v10322_v8  ;;  %17804 = vst [vmem:[#allocation26_spill] sm:$0xff] %v15089_v17  ;;  %v13539_v41 = vld [vmem:[%s17558_s1 + $0x9c] sm:$0xf0]  ;;  %v13524_v1 = vld [vmem:[%s17558_s1 + $0x2c] sm:$0xf] }
  0x84   :  { %6325 = vmatpush.bf16.msra.mxu2 %v11393_v49  ;;  %v11632_v49 = vld [vmem:[#allocation7 + $0x960] sm:$0xf]  ;;  %v15121_v7 = vor.u32 %v13539_v41, %v9952_v35  ;;  %17806 = vst [vmem:[#allocation28_spill] sm:$0xff] %v15123_v9  ;;  %v13972_v35 = vld [vmem:[#allocation7 + $0xa28] sm:$0xf0] }
  0x85   :  { %6152 = vmatmul.bf16.vlgmr.msrb.gmra.mxu0 %v14975_v29  ;;  %6354 = vmatpush.bf16.msra.mxu3 %v11489_v55  ;;  %17802 = vst [vmem:[#allocation24_spill] sm:$0xff] %v15085_v15  ;;  %v11633_v55 = vor.u32 %v13948_v50, %v11632_v49  ;;  %v11729_v42 = vor.u32 %v13972_v35, %v11728_v25  ;;  %v11956_v49 = vld [vmem:[#allocation7 + $0xbe8] sm:$0xf]  ;;  %v14029_v50 = vld [vmem:[#allocation7 + $0xbf0] sm:$0xf0] }
  0x86   :  { %6181 = vmatmul.bf16.vlgmr.msrb.gmra.mxu1 %v14977_v30  ;;  %6376 = vmatpush.bf16.msrb.mxu0 %v11669_v59  ;;  %v13975_v59 = vld [vmem:[#allocation7 + $0xa40] sm:$0xf0]  ;;  %17805 = vst [vmem:[#allocation27_spill] sm:$0xff] %v15121_v7  ;;  %v10082_v20 = vld [vmem:[%s17558_s1 + $0x1a0] sm:$0xf0] }
  0x87   :  { %6210 = vmatmul.bf16.vlgmr.msrb.gmra.mxu2 %v14979_v31  ;;  %6405 = vmatpush.bf16.msrb.mxu1 %v11765_v11  ;;  %v11741_v0 = vor.u32 %v13975_v59, %v11740_v58  ;;  %17807 = vst [vmem:[#allocation29_spill] sm:$0xff] %v15125_v10  ;;  %v11716_v25 = vld [vmem:[#allocation7 + $0xa08] sm:$0xf] }
  0x88   :  { %6239 = vmatmul.bf16.vlgmr.msrb.gmra.mxu3 %v14981_v32  ;;  %6434 = vmatpush.bf16.msrb.mxu2 %v11861_v63 }
  0x8a   :  { %6377 = vmatpush.bf16.msrb.mxu0 %v11657_v6  ;;  %v9962_v6 = vld [vmem:[%s17558_s1 + $0xa8] sm:$0xf0] }
  0x8b   :  { %6406 = vmatpush.bf16.msrb.mxu1 %v11753_v24  ;;  %v15128_v13 = vor.u32 %v13524_v1, %v9962_v6  ;;  %v14002_v24 = vld [vmem:[#allocation7 + $0xb18] sm:$0xf0]  ;;  %v10080_v6 = vld [vmem:[%s17558_s1 + $0x120] sm:$0xf] }
  0x8d   :  { %17808 = vst [vmem:[#allocation30_spill] sm:$0xff] %v15128_v13 }
  0x8e   :  { %6378 = vmatpush.bf16.msrb.mxu0 %v11645_v21  ;;  %v11848_v21 = vld [vmem:[#allocation7 + $0xb10] sm:$0xf] }
  0x8f   :  { %6407 = vmatpush.bf16.msrb.mxu1 %v11741_v0  ;;  %v11849_v41 = vor.u32 %v14002_v24, %v11848_v21  ;;  %v11945_v0 = vor.u32 %v14026_v61, %v11944_v60  ;;  %v11608_v21 = vld [vmem:[#allocation7 + $0x930] sm:$0xf]  ;;  %v11824_v60 = vld [vmem:[#allocation7 + $0xae0] sm:$0xf]  ;;  %v13996_v61 = vld [vmem:[#allocation7 + $0xae8] sm:$0xf0] }
  0x91   :  { %6435 = vmatpush.bf16.msrb.mxu2 %v11849_v41  ;;  %v13969_v41 = vld [vmem:[#allocation7 + $0xa10] sm:$0xf0] }
  0x92   :  { %6379 = vmatpush.bf16.msrb.mxu0 %v11633_v55  ;;  %v11957_v55 = vor.u32 %v14029_v50, %v11956_v49  ;;  %v14023_v49 = vld [vmem:[#allocation7 + $0xbc0] sm:$0xf0]  ;;  %v10088_v50 = vld [vmem:[%s17558_s1 + $0x128] sm:$0xf] }
  0x93   :  { %6408 = vmatpush.bf16.msrb.mxu1 %v11729_v42  ;;  %v11932_v42 = vld [vmem:[#allocation7 + $0xbb8] sm:$0xf] }
  0x94   :  { %6463 = vmatpush.bf16.msrb.mxu3 %v11957_v55  ;;  %v13556_v55 = vld [vmem:[%s17558_s1 + $0x12c] sm:$0xf] }
  0x95   :  { %6157 = vmatmul.bf16.gmra.mxu0 %v15011_v23 }
  0x96   :  { %6186 = vmatmul.bf16.gmra.mxu1 %v15013_v26  ;;  %6380 = vmatpush.bf16.msrb.mxu0 %v11621_v22  ;;  %v13942_v22 = vld [vmem:[#allocation7 + $0x938] sm:$0xf0] }
  0x97   :  { %6215 = vmatmul.bf16.gmra.mxu2 %v15015_v27  ;;  %v11609_v35 = vor.u32 %v13942_v22, %v11608_v21 }
  0x98   :  { %6244 = vmatmul.bf16.gmra.mxu3 %v15017_v28 }
  0x99   :  { %6464 = vmatpush.bf16.msrb.mxu3 %v11945_v0 }
  0x9a   :  { %6381 = vmatpush.bf16.msrb.mxu0 %v11609_v35 }
  0xa5   :  { %6162 = vmatmul.bf16.gmra.mxu0 %v15047_v36 }
  0xa6   :  { %6191 = vmatmul.bf16.gmra.mxu1 %v15049_v43 }
  0xa7   :  { %6220 = vmatmul.bf16.gmra.mxu2 %v15051_v44 }
  0xa8   :  { %6249 = vmatmul.bf16.gmra.mxu3 %v15053_v54 }
  0xb5   :  { %6167 = vmatmul.bf16.gmra.mxu0 %v15083_v14 }
  0xb6   :  { %6196 = vmatmul.bf16.gmra.mxu1 %v15085_v15 }
  0xb7   :  { %6225 = vmatmul.bf16.gmra.mxu2 %v15087_v16 }
  0xb8   :  { %6254 = vmatmul.bf16.gmra.mxu3 %v15089_v17 }
  0xc2   :  { %v6037_v8 = vpop.f32.mrf.mxu0 }
  0xc3   :  { %v6038_v11 = vadd.f32 %v6037_v8, %v15095_v33  ;;  %v6066_v12 = vpop.f32.mrf.mxu1  ;;  %v13571_v8 = vld [vmem:[%s17558_s1 + $0x19c] sm:$0xf0] }
  0xc5   :  { %v6067_v18 = vadd.f32 %v6066_v12, %v6038_v11  ;;  %6268 = vmatmul.bf16.vlgmr.msra.gmra.mxu0 %v15121_v7  ;;  %v11836_v11 = vld [vmem:[#allocation7 + $0xaf8] sm:$0xf]  ;;  %v13999_v12 = vld [vmem:[#allocation7 + $0xb00] sm:$0xf0] }
  0xc6   :  { %6297 = vmatmul.bf16.vlgmr.msra.gmra.mxu1 %v15123_v9  ;;  %v11837_v24 = vor.u32 %v13999_v12, %v11836_v11  ;;  %v11825_v11 = vor.u32 %v13996_v61, %v11824_v60  ;;  %v14017_v61 = vld [vmem:[#allocation7 + $0xb90] sm:$0xf0] }
  0xc7   :  { %6326 = vmatmul.bf16.vlgmr.msra.gmra.mxu2 %v15125_v10 }
  0xc8   :  { %6355 = vmatmul.bf16.vlgmr.msra.gmra.mxu3 %v15128_v13  ;;  %6436 = vmatpush.bf16.msrb.mxu2 %v11837_v24  ;;  %v15163_v13 = vor.u32 %v13555_v19, %v10082_v20  ;;  %v11920_v24 = vld [vmem:[#allocation7 + $0xba0] sm:$0xf]  ;;  %v13993_v19 = vld [vmem:[#allocation7 + $0xad0] sm:$0xf0]  ;;  %v11596_v20 = vld [vmem:[#allocation7 + $0x918] sm:$0xf] }
  0xca   :  { %v6095_v53 = vpop.f32.mrf.mxu2  ;;  %v6039_v58 = vpop.f32.mrf.mxu0  ;;  %17810 = vst [vmem:[#allocation32_spill] sm:$0xff] %v15163_v13 }
  0xcb   :  { %v6096_v57 = vadd.f32 %v6095_v53, %v6067_v18  ;;  %v6124_v59 = vpop.f32.mrf.mxu3  ;;  %v6040_v62 = vadd.f32 %v6039_v58, %v15095_v33  ;;  %v6068_v63 = vpop.f32.mrf.mxu1  ;;  %v13572_v53 = vld [vmem:[%s17558_s1 + $0x1a4] sm:$0xf0]  ;;  %v11933_v58 = vor.u32 %v14023_v49, %v11932_v42 }
  0xcc   :  { %v15165_v0 = vor.u32 %v13572_v53, %v10088_v50  ;;  %6437 = vmatpush.bf16.msrb.mxu2 %v11825_v11  ;;  %v13939_v50 = vld [vmem:[#allocation7 + $0x920] sm:$0xf0]  ;;  %v11704_v53 = vld [vmem:[#allocation7 + $0x9f0] sm:$0xf]  ;;  %v13990_v11 = vld [vmem:[#allocation7 + $0xab8] sm:$0xf0] }
  0xcd   :  { %v15135_v1 = vadd.f32 %v6124_v59, %v6096_v57  ;;  %v6069_v18 = vadd.f32 %v6068_v63, %v6040_v62  ;;  %v11717_v57 = vor.u32 %v13969_v41, %v11716_v25  ;;  %v10090_v59 = vld [vmem:[%s17558_s1 + $0x1a8] sm:$0xf0]  ;;  %v15161_v63 = vor.u32 %v13571_v8, %v10080_v6  ;;  %v14020_v25 = vld [vmem:[#allocation7 + $0xba8] sm:$0xf0]  ;;  %6465 = vmatpush.bf16.msrb.mxu3 %v11933_v58 }
  0xce   :  { %17811 = vst [vmem:[#allocation33_spill] sm:$0xff] %v15165_v0  ;;  %v15168_v35 = vor.u32 %v13556_v55, %v10090_v59  ;;  %v11921_v8 = vor.u32 %v14020_v25, %v11920_v24  ;;  %v11597_v55 = vor.u32 %v13939_v50, %v11596_v20  ;;  %v13966_v58 = vld [vmem:[#allocation7 + $0x9f8] sm:$0xf0]  ;;  %v11908_v59 = vld [vmem:[#allocation7 + $0xb88] sm:$0xf] }
  0xcf   :  { %17809 = vst [vmem:[#allocation31_spill] sm:$0xff] %v15161_v63  ;;  %6409 = vmatpush.bf16.msrb.mxu1 %v11717_v57  ;;  %v11705_v60 = vor.u32 %v13966_v58, %v11704_v53  ;;  %v13603_v53 = vld [vmem:[%s17558_s1 + $0x29c] sm:$0xf0]  ;;  %v11788_v58 = vld [vmem:[#allocation7 + $0xa98] sm:$0xf] }
  0xd0   :  { %17812 = vst [vmem:[#allocation34_spill] sm:$0xff] %v15168_v35  ;;  %6382 = vmatpush.bf16.msrb.mxu0 %v11597_v55  ;;  %v13963_v55 = vld [vmem:[#allocation7 + $0x9e0] sm:$0xf0] }
  0xd1   :  { %6466 = vmatpush.bf16.msrb.mxu3 %v11921_v8  ;;  %v10208_v8 = vld [vmem:[%s17558_s1 + $0x220] sm:$0xf] }
  0xd2   :  { %v6097_v62 = vpop.f32.mrf.mxu2  ;;  %v6042_v21 = vpop.f32.mrf.mxu0 }
  0xd3   :  { %v6098_v12 = vadd.f32 %v6097_v62, %v6069_v18  ;;  %v6126_v22 = vpop.f32.mrf.mxu3  ;;  %v6043_v41 = vadd.f32 %v6042_v21, %v15095_v33  ;;  %v6071_v42 = vpop.f32.mrf.mxu1  ;;  %v11812_v18 = vld [vmem:[#allocation7 + $0xac8] sm:$0xf]  ;;  %v11800_v62 = vld [vmem:[#allocation7 + $0xab0] sm:$0xf]  ;;  %v11909_v21 = vor.u32 %v14017_v61, %v11908_v59  ;;  %6410 = vmatpush.bf16.msrb.mxu1 %v11705_v60  ;;  %v13587_v60 = vld [vmem:[%s17558_s1 + $0x224] sm:$0xf] }
  0xd4   :  { %v11813_v57 = vor.u32 %v13993_v19, %v11812_v18  ;;  %v14014_v18 = vld [vmem:[#allocation7 + $0xb78] sm:$0xf0]  ;;  %v10210_v61 = vld [vmem:[%s17558_s1 + $0x2a0] sm:$0xf0] }
  0xd5   :  { %v15170_v6 = vadd.f32 %v6126_v22, %v6098_v12  ;;  %v6072_v49 = vadd.f32 %v6071_v42, %v6043_v41  ;;  %6273 = vmatmul.bf16.gmra.mxu0 %v15161_v63  ;;  %v11801_v22 = vor.u32 %v13990_v11, %v11800_v62  ;;  %v11896_v42 = vld [vmem:[#allocation7 + $0xb70] sm:$0xf]  ;;  %6467 = vmatpush.bf16.msrb.mxu3 %v11909_v21  ;;  %v11584_v62 = vld [vmem:[#allocation7 + $0x900] sm:$0xf]  ;;  %v13936_v11 = vld [vmem:[#allocation7 + $0x908] sm:$0xf0] }
  0xd6   :  { %6302 = vmatmul.bf16.gmra.mxu1 %v15163_v13  ;;  %6438 = vmatpush.bf16.msrb.mxu2 %v11813_v57  ;;  %v11692_v57 = vld [vmem:[#allocation7 + $0x9d8] sm:$0xf]  ;;  %v15205_v9 = vor.u32 %v13587_v60, %v10210_v61  ;;  %v14053_v60 = vld [vmem:[#allocation7 + $0xcb0] sm:$0xf0] }
  0xd7   :  { %6331 = vmatmul.bf16.gmra.mxu2 %v15165_v0  ;;  %v10216_v21 = vld [vmem:[%s17558_s1 + $0x228] sm:$0xf]  ;;  %v13984_v0 = vld [vmem:[#allocation7 + $0xa88] sm:$0xf0] }
  0xd8   :  { %6360 = vmatmul.bf16.gmra.mxu3 %v15168_v35  ;;  %17814 = vst [vmem:[#allocation36_spill] sm:$0xff] %v15205_v9 }
  0xda   :  { %v6100_v12 = vpop.f32.mrf.mxu2  ;;  %v6044_v25 = vpop.f32.mrf.mxu0  ;;  %6439 = vmatpush.bf16.msrb.mxu2 %v11801_v22  ;;  %v11585_v22 = vor.u32 %v13936_v11, %v11584_v62  ;;  %v11776_v62 = vld [vmem:[#allocation7 + $0xa80] sm:$0xf] }
  0xdb   :  { %v6101_v24 = vadd.f32 %v6100_v12, %v6072_v49  ;;  %v6129_v41 = vpop.f32.mrf.mxu3  ;;  %v6045_v19 = vadd.f32 %v6044_v25, %v15095_v33  ;;  %v6073_v20 = vpop.f32.mrf.mxu1  ;;  %v11897_v49 = vor.u32 %v14014_v18, %v11896_v42  ;;  %v11693_v12 = vor.u32 %v13963_v55, %v11692_v57  ;;  %v14011_v42 = vld [vmem:[#allocation7 + $0xb60] sm:$0xf0]  ;;  %v13604_v18 = vld [vmem:[%s17558_s1 + $0x2a4] sm:$0xf0]  ;;  %v11680_v55 = vld [vmem:[#allocation7 + $0x9c0] sm:$0xf] }
  0xdc   :  { %6383 = vmatpush.bf16.msrb.mxu0 %v11585_v22  ;;  %v15207_v7 = vor.u32 %v13604_v18, %v10216_v21  ;;  %v14008_v22 = vld [vmem:[#allocation7 + $0xb48] sm:$0xf0] }
  0xdd   :  { %v15177_v50 = vadd.f32 %v6129_v41, %v6101_v24  ;;  %v6074_v59 = vadd.f32 %v6073_v20, %v6045_v19  ;;  %v13987_v24 = vld [vmem:[#allocation7 + $0xaa0] sm:$0xf0]  ;;  %v11884_v41 = vld [vmem:[#allocation7 + $0xb58] sm:$0xf]  ;;  %v13588_v19 = vld [vmem:[%s17558_s1 + $0x22c] sm:$0xf]  ;;  %6411 = vmatpush.bf16.msrb.mxu1 %v11693_v12  ;;  %6468 = vmatpush.bf16.msrb.mxu3 %v11897_v49  ;;  %v11777_v12 = vor.u32 %v13984_v0, %v11776_v62 }
  0xde   :  { %v11789_v25 = vor.u32 %v13987_v24, %v11788_v58  ;;  %v10218_v20 = vld [vmem:[%s17558_s1 + $0x2a8] sm:$0xf0]  ;;  %v11885_v57 = vor.u32 %v14011_v42, %v11884_v41  ;;  %v13960_v58 = vld [vmem:[#allocation7 + $0x9c8] sm:$0xf0]  ;;  %v15203_v24 = vor.u32 %v13603_v53, %v10208_v8  ;;  %17815 = vst [vmem:[#allocation37_spill] sm:$0xff] %v15207_v7 }
  0xdf   :  { %v11681_v35 = vor.u32 %v13960_v58, %v11680_v55  ;;  %v11872_v49 = vld [vmem:[#allocation7 + $0xb40] sm:$0xf]  ;;  %v15210_v17 = vor.u32 %v13588_v19, %v10218_v20  ;;  %v12052_v0 = vld [vmem:[#allocation7 + $0xca8] sm:$0xf]  ;;  %v10336_v19 = vld [vmem:[%s17558_s1 + $0x320] sm:$0xf] }
  0xe0   :  { %17813 = vst [vmem:[#allocation35_spill] sm:$0xff] %v15203_v24  ;;  %6440 = vmatpush.bf16.msrb.mxu2 %v11789_v25  ;;  %v11873_v53 = vor.u32 %v14008_v22, %v11872_v49  ;;  %v14050_v55 = vld [vmem:[#allocation7 + $0xc98] sm:$0xf0]  ;;  %v12148_v58 = vld [vmem:[#allocation7 + $0xd68] sm:$0xf] }
  0xe1   :  { %17816 = vst [vmem:[#allocation38_spill] sm:$0xff] %v15210_v17  ;;  %6412 = vmatpush.bf16.msrb.mxu1 %v11681_v35  ;;  %6469 = vmatpush.bf16.msrb.mxu3 %v11885_v57  ;;  %v12040_v57 = vld [vmem:[#allocation7 + $0xc90] sm:$0xf]  ;;  %v14077_v49 = vld [vmem:[#allocation7 + $0xd70] sm:$0xf0] }
  0xe2   :  { %v6102_v11 = vpop.f32.mrf.mxu2  ;;  %v6047_v63 = vpop.f32.mrf.mxu0  ;;  %v13635_v62 = vld [vmem:[%s17558_s1 + $0x39c] sm:$0xf0]  ;;  %v10338_v22 = vld [vmem:[%s17558_s1 + $0x3a0] sm:$0xf0] }
  0xe3   :  { %v6103_v13 = vadd.f32 %v6102_v11, %v6074_v59  ;;  %v6131_v10 = vpop.f32.mrf.mxu3  ;;  %v6048_v41 = vadd.f32 %v6047_v63, %v15095_v33  ;;  %v6076_v42 = vpop.f32.mrf.mxu1  ;;  %v12053_v63 = vor.u32 %v14053_v60, %v12052_v0  ;;  %v13619_v11 = vld [vmem:[%s17558_s1 + $0x324] sm:$0xf]  ;;  %v10346_v0 = vld [vmem:[%s17558_s1 + $0x3a8] sm:$0xf0] }
  0xe4   :  { %6441 = vmatpush.bf16.msrb.mxu2 %v11777_v12  ;;  %v12041_v12 = vor.u32 %v14050_v55, %v12040_v57 }
  0xe5   :  { %v15212_v8 = vadd.f32 %v6131_v10, %v6103_v13  ;;  %v6077_v59 = vadd.f32 %v6076_v42, %v6048_v41  ;;  %6278 = vmatmul.bf16.gmra.mxu0 %v15203_v24  ;;  %6470 = vmatpush.bf16.msrb.mxu3 %v11873_v53  ;;  %v10344_v41 = vld [vmem:[%s17558_s1 + $0x328] sm:$0xf]  ;;  %v12149_v53 = vor.u32 %v14077_v49, %v12148_v58 }
  0xe6   :  { %6307 = vmatmul.bf16.gmra.mxu1 %v15205_v9  ;;  %6492 = vmatpush.bf16.msra.mxu0 %v12053_v63  ;;  %v13636_v42 = vld [vmem:[%s17558_s1 + $0x3a4] sm:$0xf0]  ;;  %v15245_v63 = vor.u32 %v13635_v62, %v10336_v19  ;;  %v12136_v62 = vld [vmem:[#allocation7 + $0xd50] sm:$0xf] }
  0xe7   :  { %6336 = vmatmul.bf16.gmra.mxu2 %v15207_v7  ;;  %6521 = vmatpush.bf16.msra.mxu1 %v12149_v53  ;;  %v12028_v19 = vld [vmem:[#allocation7 + $0xc78] sm:$0xf] }
  0xe8   :  { %6365 = vmatmul.bf16.gmra.mxu3 %v15210_v17  ;;  %17817 = vst [vmem:[#allocation39_spill] sm:$0xff] %v15245_v63 }
  0xea   :  { %v6105_v61 = vpop.f32.mrf.mxu2  ;;  %v6049_v13 = vpop.f32.mrf.mxu0  ;;  %6493 = vmatpush.bf16.msra.mxu0 %v12041_v12  ;;  %v14074_v12 = vld [vmem:[#allocation7 + $0xd58] sm:$0xf0] }
  0xeb   :  { %v6106_v10 = vadd.f32 %v6105_v61, %v6077_v59  ;;  %v6134_v35 = vpop.f32.mrf.mxu3  ;;  %v6050_v21 = vadd.f32 %v6049_v13, %v15095_v33  ;;  %v6078_v25 = vpop.f32.mrf.mxu1  ;;  %v13620_v59 = vld [vmem:[%s17558_s1 + $0x32c] sm:$0xf] }
  0xec   :  { %v15252_v55 = vor.u32 %v13620_v59, %v10346_v0 }
  0xed   :  { %v15219_v18 = vadd.f32 %v6134_v35, %v6106_v10  ;;  %v6079_v20 = vadd.f32 %v6078_v25, %v6050_v21  ;;  %v15247_v35 = vor.u32 %v13619_v11, %v10338_v22  ;;  %v15249_v21 = vor.u32 %v13636_v42, %v10344_v41 }
  0xee   :  { %17820 = vst [vmem:[#allocation42_spill] sm:$0xff] %v15252_v55  ;;  %v12137_v22 = vor.u32 %v14074_v12, %v12136_v62  ;;  %v14101_v62 = vld [vmem:[#allocation7 + $0xe30] sm:$0xf0]  ;;  %v14071_v12 = vld [vmem:[#allocation7 + $0xd40] sm:$0xf0] }
  0xef   :  { %17818 = vst [vmem:[#allocation40_spill] sm:$0xff] %v15247_v35 }
  0xf0   :  { %17819 = vst [vmem:[#allocation41_spill] sm:$0xff] %v15249_v21  ;;  %6522 = vmatpush.bf16.msra.mxu1 %v12137_v22  ;;  %v9970_v22 = vld [vmem:[%s17558_s1 + $0xb0] sm:$0xf0] }
  0xf2   :  { %v6107_v60 = vpop.f32.mrf.mxu2  ;;  %v6052_v10 = vpop.f32.mrf.mxu0 }
  0xf3   :  { %v6108_v61 = vadd.f32 %v6107_v60, %v6079_v20  ;;  %v6136_v13 = vpop.f32.mrf.mxu3  ;;  %v6053_v25 = vadd.f32 %v6052_v10, %v15095_v33  ;;  %v6081_v57 = vpop.f32.mrf.mxu1  ;;  %v14047_v20 = vld [vmem:[#allocation7 + $0xc80] sm:$0xf0]  ;;  %v9968_v10 = vld [vmem:[%s17558_s1 + $0x30] sm:$0xf] }
  0xf4   :  { %v12029_v11 = vor.u32 %v14047_v20, %v12028_v19  ;;  %v14044_v19 = vld [vmem:[#allocation7 + $0xc68] sm:$0xf0]  ;;  %v12244_v20 = vld [vmem:[#allocation7 + $0xe28] sm:$0xf] }
  0xf5   :  { %v15254_v58 = vadd.f32 %v6136_v13, %v6108_v61  ;;  %v6082_v49 = vadd.f32 %v6081_v57, %v6053_v25  ;;  %6283 = vmatmul.bf16.gmra.mxu0 %v15245_v63  ;;  %v13541_v13 = vld [vmem:[%s17558_s1 + $0xac] sm:$0xf0]  ;;  %v13525_v57 = vld [vmem:[%s17558_s1 + $0x34] sm:$0xf] }
  0xf6   :  { %6312 = vmatmul.bf16.gmra.mxu1 %v15247_v35  ;;  %6494 = vmatpush.bf16.msra.mxu0 %v12029_v11  ;;  %v12124_v11 = vld [vmem:[#allocation7 + $0xd38] sm:$0xf]  ;;  %v15289_v63 = vor.u32 %v13525_v57, %v9970_v22  ;;  %v14098_v22 = vld [vmem:[#allocation7 + $0xe18] sm:$0xf0] }
  0xf7   :  { %6341 = vmatmul.bf16.gmra.mxu2 %v15249_v21 }
  0xf8   :  { %6370 = vmatmul.bf16.gmra.mxu3 %v15252_v55  ;;  %17822 = vst [vmem:[#allocation44_spill] sm:$0xff] %v15289_v63 }
  0xfa   :  { %v6110_v41 = vpop.f32.mrf.mxu2  ;;  %v6054_v53 = vpop.f32.mrf.mxu0 }
  0xfb   :  { %v6111_v42 = vadd.f32 %v6110_v41, %v6082_v49  ;;  %v6139_v59 = vpop.f32.mrf.mxu3  ;;  %v6055_v0 = vadd.f32 %v6054_v53, %v15095_v33  ;;  %v6083_v60 = vpop.f32.mrf.mxu1  ;;  %v12016_v49 = vld [vmem:[#allocation7 + $0xc60] sm:$0xf]  ;;  %v9976_v41 = vld [vmem:[%s17558_s1 + $0x38] sm:$0xf]  ;;  %v12245_v53 = vor.u32 %v14101_v62, %v12244_v20 }
  0xfc   :  { %v12017_v33 = vor.u32 %v14044_v19, %v12016_v49  ;;  %v15287_v19 = vor.u32 %v13541_v13, %v9968_v10  ;;  %v12004_v10 = vld [vmem:[#allocation7 + $0xc48] sm:$0xf]  ;;  %v14041_v13 = vld [vmem:[#allocation7 + $0xc50] sm:$0xf0] }
  0xfd   :  { %v15261_v61 = vadd.f32 %v6139_v59, %v6111_v42  ;;  %v6084_v25 = vadd.f32 %v6083_v60, %v6055_v0  ;;  %v13542_v42 = vld [vmem:[%s17558_s1 + $0xb4] sm:$0xf0]  ;;  %v12125_v59 = vor.u32 %v14071_v12, %v12124_v11  ;;  %v13526_v0 = vld [vmem:[%s17558_s1 + $0x3c] sm:$0xf]  ;;  %6550 = vmatpush.bf16.msra.mxu2 %v12245_v53  ;;  %v12005_v57 = vor.u32 %v14041_v13, %v12004_v10 }
  0xfe   :  { %v9978_v60 = vld [vmem:[%s17558_s1 + $0xb8] sm:$0xf0]  ;;  %6495 = vmatpush.bf16.msra.mxu0 %v12017_v33  ;;  %17821 = vst [vmem:[#allocation43_spill] sm:$0xff] %v15287_v19  ;;  %v15291_v20 = vor.u32 %v13542_v42, %v9976_v41 }
  0xff   :  { %6523 = vmatpush.bf16.msra.mxu1 %v12125_v59  ;;  %v15294_v12 = vor.u32 %v13526_v0, %v9978_v60 }
 0x100   :  { %17823 = vst [vmem:[#allocation45_spill] sm:$0xff] %v15291_v20 }
 0x101   :  { %17824 = vst [vmem:[#allocation46_spill] sm:$0xff] %v15294_v12 }
 0x102   :  { %v6112_v49 = vpop.f32.mrf.mxu2  ;;  %v6153_v35 = vpop.f32.mrf.mxu0  ;;  %6496 = vmatpush.bf16.msra.mxu0 %v12005_v57  ;;  %v12220_v57 = vld [vmem:[#allocation7 + $0xdf8] sm:$0xf] }
 0x103   :  { %v6113_v55 = vadd.f32 %v6112_v49, %v6084_v25  ;;  %v6141_v21 = vpop.f32.mrf.mxu3  ;;  %v6154_v62 = vadd.f32 %v6153_v35, %v15135_v1  ;;  %v6182_v11 = vpop.f32.mrf.mxu1  ;;  %v12232_v25 = vld [vmem:[#allocation7 + $0xe10] sm:$0xf]  ;;  %v12112_v1 = vld [vmem:[#allocation7 + $0xd20] sm:$0xf]  ;;  %v14068_v35 = vld [vmem:[#allocation7 + $0xd28] sm:$0xf0] }
 0x104   :  { %v12233_v41 = vor.u32 %v14098_v22, %v12232_v25  ;;  %v12113_v42 = vor.u32 %v14068_v35, %v12112_v1  ;;  %v10096_v25 = vld [vmem:[%s17558_s1 + $0x130] sm:$0xf]  ;;  %v14095_v22 = vld [vmem:[#allocation7 + $0xe00] sm:$0xf0] }
 0x105   :  { %v15296_v17 = vadd.f32 %v6141_v21, %v6113_v55  ;;  %v6183_v33 = vadd.f32 %v6182_v11, %v6154_v62  ;;  %6384 = vmatmul.bf16.vlgmr.msrb.gmra.mxu0 %v15287_v19  ;;  %v12340_v21 = vld [vmem:[#allocation7 + $0xee8] sm:$0xf]  ;;  %v14125_v55 = vld [vmem:[#allocation7 + $0xef0] sm:$0xf0]  ;;  %v12328_v62 = vld [vmem:[#allocation7 + $0xed0] sm:$0xf] }
 0x106   :  { %6413 = vmatmul.bf16.vlgmr.msrb.gmra.mxu1 %v15289_v63  ;;  %v12341_v59 = vor.u32 %v14125_v55, %v12340_v21  ;;  %6551 = vmatpush.bf16.msra.mxu2 %v12233_v41  ;;  %v14122_v11 = vld [vmem:[#allocation7 + $0xed8] sm:$0xf0]  ;;  %v10098_v35 = vld [vmem:[%s17558_s1 + $0x1b0] sm:$0xf0]  ;;  %v11992_v41 = vld [vmem:[#allocation7 + $0xc30] sm:$0xf]  ;;  %v12221_v21 = vor.u32 %v14095_v22, %v12220_v57 }
 0x107   :  { %6442 = vmatmul.bf16.vlgmr.msrb.gmra.mxu2 %v15291_v20  ;;  %6524 = vmatpush.bf16.msra.mxu1 %v12113_v42  ;;  %v12329_v13 = vor.u32 %v14122_v11, %v12328_v62  ;;  %v14038_v42 = vld [vmem:[#allocation7 + $0xc38] sm:$0xf0]  ;;  %v12100_v55 = vld [vmem:[#allocation7 + $0xd08] sm:$0xf]  ;;  %v13558_v62 = vld [vmem:[%s17558_s1 + $0x13c] sm:$0xf] }
 0x108   :  { %6471 = vmatmul.bf16.vlgmr.msrb.gmra.mxu3 %v15294_v12  ;;  %v10106_v57 = vld [vmem:[%s17558_s1 + $0x1b8] sm:$0xf0]  ;;  %v12208_v22 = vld [vmem:[#allocation7 + $0xde0] sm:$0xf] }
 0x109   :  { %6579 = vmatpush.bf16.msra.mxu3 %v12341_v59  ;;  %v14065_v59 = vld [vmem:[#allocation7 + $0xd10] sm:$0xf0] }
 0x10a   :  { %v6211_v53 = vpop.f32.mrf.mxu2  ;;  %v6155_v60 = vpop.f32.mrf.mxu0  ;;  %6552 = vmatpush.bf16.msra.mxu2 %v12221_v21  ;;  %v12101_v11 = vor.u32 %v14065_v59, %v12100_v55  ;;  %v12304_v21 = vld [vmem:[#allocation7 + $0xea0] sm:$0xf]  ;;  %v14116_v55 = vld [vmem:[#allocation7 + $0xea8] sm:$0xf0] }
 0x10b   :  { %v6212_v0 = vadd.f32 %v6211_v53, %v6183_v33  ;;  %v6240_v49 = vpop.f32.mrf.mxu3  ;;  %v6156_v12 = vadd.f32 %v6155_v60, %v15170_v6  ;;  %v6184_v10 = vpop.f32.mrf.mxu1  ;;  %v13573_v33 = vld [vmem:[%s17558_s1 + $0x1ac] sm:$0xf0]  ;;  %v13557_v6 = vld [vmem:[%s17558_s1 + $0x134] sm:$0xf]  ;;  %v11993_v53 = vor.u32 %v14038_v42, %v11992_v41  ;;  %v14092_v41 = vld [vmem:[#allocation7 + $0xde8] sm:$0xf0] }
 0x10c   :  { %v14119_v60 = vld [vmem:[#allocation7 + $0xec0] sm:$0xf0]  ;;  %v15329_v63 = vor.u32 %v13573_v33, %v10096_v25  ;;  %6525 = vmatpush.bf16.msra.mxu1 %v12101_v11  ;;  %v12209_v19 = vor.u32 %v14092_v41, %v12208_v22  ;;  %v15331_v16 = vor.u32 %v13557_v6, %v10098_v35  ;;  %v12305_v33 = vor.u32 %v14116_v55, %v12304_v21  ;;  %v14089_v6 = vld [vmem:[#allocation7 + $0xdd0] sm:$0xf0]  ;;  %v11980_v35 = vld [vmem:[#allocation7 + $0xc18] sm:$0xf] }
 0x10d   :  { %v15303_v20 = vadd.f32 %v6240_v49, %v6212_v0  ;;  %v6185_v1 = vadd.f32 %v6184_v10, %v6156_v12  ;;  %v12316_v0 = vld [vmem:[#allocation7 + $0xeb8] sm:$0xf]  ;;  %v10104_v12 = vld [vmem:[%s17558_s1 + $0x138] sm:$0xf]  ;;  %6580 = vmatpush.bf16.msra.mxu3 %v12329_v13  ;;  %6497 = vmatpush.bf16.msra.mxu0 %v11993_v53  ;;  %v15336_v53 = vor.u32 %v13558_v62, %v10106_v57  ;;  %v14113_v62 = vld [vmem:[#allocation7 + $0xe90] sm:$0xf0] }
 0x10e   :  { %v13574_v49 = vld [vmem:[%s17558_s1 + $0x1b4] sm:$0xf0]  ;;  %v12317_v10 = vor.u32 %v14119_v60, %v12316_v0  ;;  %17825 = vst [vmem:[#allocation47_spill] sm:$0xff] %v15329_v63  ;;  %6553 = vmatpush.bf16.msra.mxu2 %v12209_v19  ;;  %v14062_v19 = vld [vmem:[#allocation7 + $0xcf8] sm:$0xf0] }
 0x10f   :  { %17826 = vst [vmem:[#allocation48_spill] sm:$0xff] %v15331_v16  ;;  %v15333_v13 = vor.u32 %v13574_v49, %v10104_v12  ;;  %v14035_v12 = vld [vmem:[#allocation7 + $0xc20] sm:$0xf0]  ;;  %v12184_v11 = vld [vmem:[#allocation7 + $0xdb0] sm:$0xf] }
 0x110   :  { %17828 = vst [vmem:[#allocation50_spill] sm:$0xff] %v15336_v53  ;;  %v11981_v49 = vor.u32 %v14035_v12, %v11980_v35  ;;  %v13605_v12 = vld [vmem:[%s17558_s1 + $0x2ac] sm:$0xf0] }
 0x111   :  { %17827 = vst [vmem:[#allocation49_spill] sm:$0xff] %v15333_v13  ;;  %6581 = vmatpush.bf16.msra.mxu3 %v12317_v10  ;;  %v14086_v10 = vld [vmem:[#allocation7 + $0xdb8] sm:$0xf0] }
 0x112   :  { %v6213_v42 = vpop.f32.mrf.mxu2  ;;  %v6158_v9 = vpop.f32.mrf.mxu0  ;;  %6498 = vmatpush.bf16.msra.mxu0 %v11981_v49  ;;  %v12185_v41 = vor.u32 %v14086_v10, %v12184_v11  ;;  %v12172_v49 = vld [vmem:[#allocation7 + $0xd98] sm:$0xf]  ;;  %v14083_v10 = vld [vmem:[#allocation7 + $0xda0] sm:$0xf0] }
 0x113   :  { %v6214_v7 = vadd.f32 %v6213_v42, %v6185_v1  ;;  %v6242_v24 = vpop.f32.mrf.mxu3  ;;  %v6159_v59 = vadd.f32 %v6158_v9, %v15177_v50  ;;  %v6187_v0 = vpop.f32.mrf.mxu1  ;;  %v12196_v1 = vld [vmem:[#allocation7 + $0xdc8] sm:$0xf]  ;;  %v12088_v9 = vld [vmem:[#allocation7 + $0xcf0] sm:$0xf] }
 0x114   :  { %v12197_v50 = vor.u32 %v14089_v6, %v12196_v1 }
 0x115   :  { %v15338_v25 = vadd.f32 %v6242_v24, %v6214_v7  ;;  %v6188_v60 = vadd.f32 %v6187_v0, %v6159_v59  ;;  %6389 = vmatmul.bf16.gmra.mxu0 %v15329_v63  ;;  %v12292_v7 = vld [vmem:[#allocation7 + $0xe88] sm:$0xf]  ;;  %6582 = vmatpush.bf16.msra.mxu3 %v12305_v33  ;;  %v12089_v24 = vor.u32 %v14062_v19, %v12088_v9  ;;  %v12280_v59 = vld [vmem:[#allocation7 + $0xe70] sm:$0xf]  ;;  %v14110_v0 = vld [vmem:[#allocation7 + $0xe78] sm:$0xf0] }
 0x116   :  { %6418 = vmatmul.bf16.gmra.mxu1 %v15331_v16  ;;  %6554 = vmatpush.bf16.msra.mxu2 %v12197_v50  ;;  %v12293_v22 = vor.u32 %v14113_v62, %v12292_v7  ;;  %v10224_v33 = vld [vmem:[%s17558_s1 + $0x230] sm:$0xf]  ;;  %v12076_v9 = vld [vmem:[#allocation7 + $0xcd8] sm:$0xf]  ;;  %v14059_v50 = vld [vmem:[#allocation7 + $0xce0] sm:$0xf0] }
 0x117   :  { %6447 = vmatmul.bf16.gmra.mxu2 %v15333_v13  ;;  %6526 = vmatpush.bf16.msra.mxu1 %v12089_v24  ;;  %v10226_v7 = vld [vmem:[%s17558_s1 + $0x2b0] sm:$0xf0]  ;;  %v11968_v24 = vld [vmem:[#allocation7 + $0xc00] sm:$0xf]  ;;  %v14032_v62 = vld [vmem:[#allocation7 + $0xc08] sm:$0xf0]  ;;  %v12077_v11 = vor.u32 %v14059_v50, %v12076_v9 }
 0x118   :  { %6476 = vmatmul.bf16.gmra.mxu3 %v15336_v53  ;;  %v14056_v9 = vld [vmem:[#allocation7 + $0xcc8] sm:$0xf0]  ;;  %v12160_v50 = vld [vmem:[#allocation7 + $0xd80] sm:$0xf] }
 0x119   :  { %6583 = vmatpush.bf16.msra.mxu3 %v12293_v22  ;;  %v11969_v22 = vor.u32 %v14032_v62, %v11968_v24  ;;  %v15371_v24 = vor.u32 %v13605_v12, %v10224_v33 }
 0x11a   :  { %v6216_v57 = vpop.f32.mrf.mxu2  ;;  %v6160_v21 = vpop.f32.mrf.mxu0  ;;  %6555 = vmatpush.bf16.msra.mxu2 %v12185_v41  ;;  %v12173_v41 = vor.u32 %v14083_v10, %v12172_v49  ;;  %v14080_v10 = vld [vmem:[#allocation7 + $0xd88] sm:$0xf0] }
 0x11b   :  { %v6217_v42 = vadd.f32 %v6216_v57, %v6188_v60  ;;  %v6245_v55 = vpop.f32.mrf.mxu3  ;;  %v6161_v1 = vadd.f32 %v6160_v21, %v15212_v8  ;;  %v6189_v6 = vpop.f32.mrf.mxu1  ;;  %v12281_v60 = vor.u32 %v14110_v0, %v12280_v59  ;;  %v13589_v8 = vld [vmem:[%s17558_s1 + $0x234] sm:$0xf]  ;;  %v10232_v57 = vld [vmem:[%s17558_s1 + $0x238] sm:$0xf]  ;;  %v13590_v59 = vld [vmem:[%s17558_s1 + $0x23c] sm:$0xf]  ;;  %6527 = vmatpush.bf16.msra.mxu1 %v12077_v11  ;;  %6499 = vmatpush.bf16.msra.mxu0 %v11969_v22 }
 0x11c   :  { %v14107_v21 = vld [vmem:[#allocation7 + $0xe60] sm:$0xf0]  ;;  %v10234_v0 = vld [vmem:[%s17558_s1 + $0x2b8] sm:$0xf0]  ;;  %17829 = vst [vmem:[#allocation51_spill] sm:$0xff] %v15371_v24  ;;  %v15373_v63 = vor.u32 %v13589_v8, %v10226_v7  ;;  %v12161_v11 = vor.u32 %v14080_v10, %v12160_v50 }
 0x11d   :  { %v15345_v35 = vadd.f32 %v6245_v55, %v6217_v42  ;;  %v6190_v19 = vadd.f32 %v6189_v6, %v6161_v1  ;;  %v12268_v42 = vld [vmem:[#allocation7 + $0xe58] sm:$0xf]  ;;  %v13606_v55 = vld [vmem:[%s17558_s1 + $0x2b4] sm:$0xf0]  ;;  %6584 = vmatpush.bf16.msra.mxu3 %v12281_v60  ;;  %v12064_v6 = vld [vmem:[#allocation7 + $0xcc0] sm:$0xf]  ;;  %v15378_v14 = vor.u32 %v13590_v59, %v10234_v0 }
 0x11e   :  { %v12269_v1 = vor.u32 %v14107_v21, %v12268_v42  ;;  %6556 = vmatpush.bf16.msra.mxu2 %v12173_v41  ;;  %v12065_v62 = vor.u32 %v14056_v9, %v12064_v6  ;;  %17830 = vst [vmem:[#allocation52_spill] sm:$0xff] %v15373_v63  ;;  %v15375_v15 = vor.u32 %v13606_v55, %v10232_v57  ;;  %v12256_v60 = vld [vmem:[#allocation7 + $0xe40] sm:$0xf]  ;;  %v14104_v22 = vld [vmem:[#allocation7 + $0xe48] sm:$0xf0] }
 0x11f   :  { %17832 = vst [vmem:[#allocation54_spill] sm:$0xff] %v15378_v14  ;;  %v12257_v12 = vor.u32 %v14104_v22, %v12256_v60  ;;  %v12436_v8 = vld [vmem:[#allocation7 + $0xfa8] sm:$0xf]  ;;  %v14149_v7 = vld [vmem:[#allocation7 + $0xfb0] sm:$0xf0] }
 0x120   :  { %17831 = vst [vmem:[#allocation53_spill] sm:$0xff] %v15375_v15  ;;  %6528 = vmatpush.bf16.msra.mxu1 %v12065_v62  ;;  %v10352_v0 = vld [vmem:[%s17558_s1 + $0x330] sm:$0xf]  ;;  %v12424_v6 = vld [vmem:[#allocation7 + $0xf90] sm:$0xf] }
 0x121   :  { %6585 = vmatpush.bf16.msra.mxu3 %v12269_v1  ;;  %v14146_v9 = vld [vmem:[#allocation7 + $0xf98] sm:$0xf0]  ;;  %v12532_v50 = vld [vmem:[#allocation7 + $0x1068] sm:$0xf]  ;;  %v13621_v62 = vld [vmem:[%s17558_s1 + $0x334] sm:$0xf] }
 0x122   :  { %v6218_v49 = vpop.f32.mrf.mxu2  ;;  %v6163_v13 = vpop.f32.mrf.mxu0  ;;  %6557 = vmatpush.bf16.msra.mxu2 %v12161_v11  ;;  %v14173_v10 = vld [vmem:[#allocation7 + $0x1070] sm:$0xf0]  ;;  %v10354_v11 = vld [vmem:[%s17558_s1 + $0x3b0] sm:$0xf0]  ;;  %v10360_v60 = vld [vmem:[%s17558_s1 + $0x338] sm:$0xf] }
 0x123   :  { %v6219_v53 = vadd.f32 %v6218_v49, %v6190_v19  ;;  %v6247_v16 = vpop.f32.mrf.mxu3  ;;  %v6164_v42 = vadd.f32 %v6163_v13, %v15219_v18  ;;  %v6192_v21 = vpop.f32.mrf.mxu1  ;;  %v12437_v18 = vor.u32 %v14149_v7, %v12436_v8  ;;  %v13637_v49 = vld [vmem:[%s17558_s1 + $0x3ac] sm:$0xf0]  ;;  %v13638_v22 = vld [vmem:[%s17558_s1 + $0x3b4] sm:$0xf0] }
 0x124   :  { %v15413_v8 = vor.u32 %v13637_v49, %v10352_v0  ;;  %v12412_v0 = vld [vmem:[#allocation7 + $0xf78] sm:$0xf] }
 0x125   :  { %v15380_v33 = vadd.f32 %v6247_v16, %v6219_v53  ;;  %v6193_v19 = vadd.f32 %v6192_v21, %v6164_v42  ;;  %6394 = vmatmul.bf16.gmra.mxu0 %v15371_v24  ;;  %6586 = vmatpush.bf16.msra.mxu3 %v12257_v12  ;;  %v12533_v42 = vor.u32 %v14173_v10, %v12532_v50  ;;  %v13622_v21 = vld [vmem:[%s17558_s1 + $0x33c] sm:$0xf]  ;;  %v12520_v50 = vld [vmem:[#allocation7 + $0x1050] sm:$0xf] }
 0x126   :  { %6423 = vmatmul.bf16.gmra.mxu1 %v15373_v63  ;;  %6608 = vmatpush.bf16.msrb.mxu0 %v12437_v18  ;;  %v10362_v12 = vld [vmem:[%s17558_s1 + $0x3b8] sm:$0xf0]  ;;  %17833 = vst [vmem:[#allocation55_spill] sm:$0xff] %v15413_v8 }
 0x127   :  { %6452 = vmatmul.bf16.gmra.mxu2 %v15375_v15  ;;  %6637 = vmatpush.bf16.msrb.mxu1 %v12533_v42 }
 0x128   :  { %6481 = vmatmul.bf16.gmra.mxu3 %v15378_v14 }
 0x12a   :  { %v6221_v13 = vpop.f32.mrf.mxu2  ;;  %v6165_v53 = vpop.f32.mrf.mxu0 }
 0x12b   :  { %v6222_v16 = vadd.f32 %v6221_v13, %v6193_v19  ;;  %v6250_v57 = vpop.f32.mrf.mxu3  ;;  %v6166_v41 = vadd.f32 %v6165_v53, %v15254_v58  ;;  %v6194_v55 = vpop.f32.mrf.mxu1  ;;  %v12425_v58 = vor.u32 %v14146_v9, %v12424_v6  ;;  %v15417_v53 = vor.u32 %v13638_v22, %v10360_v60 }
 0x12d   :  { %v15387_v59 = vadd.f32 %v6250_v57, %v6222_v16  ;;  %v6195_v1 = vadd.f32 %v6194_v55, %v6166_v41  ;;  %6609 = vmatpush.bf16.msrb.mxu0 %v12425_v58  ;;  %v15415_v16 = vor.u32 %v13621_v62, %v10354_v11  ;;  %17835 = vst [vmem:[#allocation57_spill] sm:$0xff] %v15417_v53  ;;  %v14170_v62 = vld [vmem:[#allocation7 + $0x1058] sm:$0xf0] }
 0x12e   :  { %v15420_v55 = vor.u32 %v13622_v21, %v10362_v12  ;;  %v9984_v12 = vld [vmem:[%s17558_s1 + $0x40] sm:$0xf] }
 0x12f   :  { %17834 = vst [vmem:[#allocation56_spill] sm:$0xff] %v15415_v16 }
 0x130   :  { %17836 = vst [vmem:[#allocation58_spill] sm:$0xff] %v15420_v55 }
 0x132   :  { %v6223_v19 = vpop.f32.mrf.mxu2  ;;  %v6168_v18 = vpop.f32.mrf.mxu0 }
 0x133   :  { %v6224_v7 = vadd.f32 %v6223_v19, %v6195_v1  ;;  %v6252_v13 = vpop.f32.mrf.mxu3  ;;  %v6169_v57 = vadd.f32 %v6168_v18, %v15261_v61  ;;  %v6197_v41 = vpop.f32.mrf.mxu1  ;;  %v14143_v1 = vld [vmem:[#allocation7 + $0xf80] sm:$0xf0]  ;;  %v12521_v61 = vor.u32 %v14170_v62, %v12520_v50  ;;  %v13543_v19 = vld [vmem:[%s17558_s1 + $0xbc] sm:$0xf0]  ;;  %v13527_v18 = vld [vmem:[%s17558_s1 + $0x44] sm:$0xf] }
 0x134   :  { %v12413_v49 = vor.u32 %v14143_v1, %v12412_v0  ;;  %v12508_v0 = vld [vmem:[#allocation7 + $0x1038] sm:$0xf]  ;;  %v14167_v1 = vld [vmem:[#allocation7 + $0x1040] sm:$0xf0]  ;;  %v9986_v50 = vld [vmem:[%s17558_s1 + $0xc0] sm:$0xf0] }
 0x135   :  { %v15422_v6 = vadd.f32 %v6252_v13, %v6224_v7  ;;  %v6198_v9 = vadd.f32 %v6197_v41, %v6169_v57  ;;  %6399 = vmatmul.bf16.gmra.mxu0 %v15413_v8  ;;  %6638 = vmatpush.bf16.msrb.mxu1 %v12521_v61  ;;  %v12400_v13 = vld [vmem:[#allocation7 + $0xf60] sm:$0xf]  ;;  %v14140_v57 = vld [vmem:[#allocation7 + $0xf68] sm:$0xf0]  ;;  %v12628_v41 = vld [vmem:[#allocation7 + $0x1128] sm:$0xf] }
 0x136   :  { %6428 = vmatmul.bf16.gmra.mxu1 %v15415_v16  ;;  %6610 = vmatpush.bf16.msrb.mxu0 %v12413_v49  ;;  %v9992_v49 = vld [vmem:[%s17558_s1 + $0x48] sm:$0xf] }
 0x137   :  { %6457 = vmatmul.bf16.gmra.mxu2 %v15417_v53  ;;  %v13544_v62 = vld [vmem:[%s17558_s1 + $0xc4] sm:$0xf0] }
 0x138   :  { %6486 = vmatmul.bf16.gmra.mxu3 %v15420_v55  ;;  %v15457_v55 = vor.u32 %v13527_v18, %v9986_v50  ;;  %v14194_v50 = vld [vmem:[#allocation7 + $0x1118] sm:$0xf0] }
 0x13a   :  { %v6226_v58 = vpop.f32.mrf.mxu2  ;;  %v6170_v11 = vpop.f32.mrf.mxu0  ;;  %17838 = vst [vmem:[#allocation60_spill] sm:$0xff] %v15457_v55 }
 0x13b   :  { %v6227_v10 = vadd.f32 %v6226_v58, %v6198_v9  ;;  %v6255_v60 = vpop.f32.mrf.mxu3  ;;  %v6171_v22 = vadd.f32 %v6170_v11, %v15296_v17  ;;  %v6199_v42 = vpop.f32.mrf.mxu1  ;;  %v12401_v17 = vor.u32 %v14140_v57, %v12400_v13  ;;  %v14197_v9 = vld [vmem:[#allocation7 + $0x1130] sm:$0xf0]  ;;  %v12509_v58 = vor.u32 %v14167_v1, %v12508_v0  ;;  %v9994_v11 = vld [vmem:[%s17558_s1 + $0xc8] sm:$0xf0] }
 0x13c   :  { %v12629_v61 = vor.u32 %v14197_v9, %v12628_v41  ;;  %v15459_v41 = vor.u32 %v13544_v62, %v9992_v49  ;;  %v14164_v49 = vld [vmem:[#allocation7 + $0x1028] sm:$0xf0] }
 0x13d   :  { %v15429_v21 = vadd.f32 %v6255_v60, %v6227_v10  ;;  %v6200_v7 = vadd.f32 %v6199_v42, %v6171_v22  ;;  %v13528_v10 = vld [vmem:[%s17558_s1 + $0x4c] sm:$0xf]  ;;  %6611 = vmatpush.bf16.msrb.mxu0 %v12401_v17  ;;  %v15455_v22 = vor.u32 %v13543_v19, %v9984_v12  ;;  %6639 = vmatpush.bf16.msrb.mxu1 %v12509_v58  ;;  %v12388_v12 = vld [vmem:[#allocation7 + $0xf48] sm:$0xf]  ;;  %v14137_v19 = vld [vmem:[#allocation7 + $0xf50] sm:$0xf0] }
 0x13e   :  { %6666 = vmatpush.bf16.msrb.mxu2 %v12629_v61  ;;  %17839 = vst [vmem:[#allocation61_spill] sm:$0xff] %v15459_v41  ;;  %v15462_v1 = vor.u32 %v13528_v10, %v9994_v11  ;;  %v12389_v18 = vor.u32 %v14137_v19, %v12388_v12  ;;  %v12724_v58 = vld [vmem:[#allocation7 + $0x11e8] sm:$0xf]  ;;  %v14221_v10 = vld [vmem:[#allocation7 + $0x11f0] sm:$0xf0] }
 0x13f   :  { %17837 = vst [vmem:[#allocation59_spill] sm:$0xff] %v15455_v22 }
 0x140   :  { %17840 = vst [vmem:[#allocation62_spill] sm:$0xff] %v15462_v1 }
 0x141   :  { %6612 = vmatpush.bf16.msrb.mxu0 %v12389_v18  ;;  %v12604_v18 = vld [vmem:[#allocation7 + $0x10f8] sm:$0xf] }
 0x142   :  { %v6228_v60 = vpop.f32.mrf.mxu2  ;;  %v6269_v57 = vpop.f32.mrf.mxu0 }
 0x143   :  { %v6229_v42 = vadd.f32 %v6228_v60, %v6200_v7  ;;  %v6257_v13 = vpop.f32.mrf.mxu3  ;;  %v6270_v9 = vadd.f32 %v6269_v57, %v15303_v20  ;;  %v6298_v0 = vpop.f32.mrf.mxu1  ;;  %v12616_v7 = vld [vmem:[#allocation7 + $0x1110] sm:$0xf]  ;;  %v12496_v20 = vld [vmem:[#allocation7 + $0x1020] sm:$0xf]  ;;  %v12725_v60 = vor.u32 %v14221_v10, %v12724_v58  ;;  %v12484_v10 = vld [vmem:[#allocation7 + $0x1008] sm:$0xf] }
 0x144   :  { %v12617_v62 = vor.u32 %v14194_v50, %v12616_v7  ;;  %v12497_v61 = vor.u32 %v14164_v49, %v12496_v20  ;;  %v10112_v7 = vld [vmem:[%s17558_s1 + $0x140] sm:$0xf]  ;;  %v14191_v50 = vld [vmem:[#allocation7 + $0x1100] sm:$0xf0]  ;;  %v10114_v49 = vld [vmem:[%s17558_s1 + $0x1c0] sm:$0xf0] }
 0x145   :  { %v15464_v53 = vadd.f32 %v6257_v13, %v6229_v42  ;;  %v6299_v17 = vadd.f32 %v6298_v0, %v6270_v9  ;;  %6500 = vmatmul.bf16.vlgmr.msra.gmra.mxu0 %v15455_v22  ;;  %v12712_v9 = vld [vmem:[#allocation7 + $0x11d0] sm:$0xf]  ;;  %v14218_v0 = vld [vmem:[#allocation7 + $0x11d8] sm:$0xf0]  ;;  %6695 = vmatpush.bf16.msrb.mxu3 %v12725_v60  ;;  %v12605_v58 = vor.u32 %v14191_v50, %v12604_v18  ;;  %v14161_v60 = vld [vmem:[#allocation7 + $0x1010] sm:$0xf0] }
 0x146   :  { %6529 = vmatmul.bf16.vlgmr.msra.gmra.mxu1 %v15457_v55  ;;  %6667 = vmatpush.bf16.msrb.mxu2 %v12617_v62  ;;  %v12713_v19 = vor.u32 %v14218_v0, %v12712_v9  ;;  %v12376_v62 = vld [vmem:[#allocation7 + $0xf30] sm:$0xf]  ;;  %v13560_v9 = vld [vmem:[%s17558_s1 + $0x14c] sm:$0xf]  ;;  %v12485_v0 = vor.u32 %v14161_v60, %v12484_v10  ;;  %v12592_v50 = vld [vmem:[#allocation7 + $0x10e0] sm:$0xf] }
 0x147   :  { %6558 = vmatmul.bf16.vlgmr.msra.gmra.mxu2 %v15459_v41  ;;  %6640 = vmatpush.bf16.msrb.mxu1 %v12497_v61  ;;  %v14134_v61 = vld [vmem:[#allocation7 + $0xf38] sm:$0xf0]  ;;  %v14212_v10 = vld [vmem:[#allocation7 + $0x11a8] sm:$0xf0] }
 0x148   :  { %6587 = vmatmul.bf16.vlgmr.msra.gmra.mxu3 %v15462_v1  ;;  %v10122_v18 = vld [vmem:[%s17558_s1 + $0x1c8] sm:$0xf0] }
 0x149   :  { %6696 = vmatpush.bf16.msrb.mxu3 %v12713_v19 }
 0x14a   :  { %v6327_v11 = vpop.f32.mrf.mxu2  ;;  %v6271_v13 = vpop.f32.mrf.mxu0  ;;  %6668 = vmatpush.bf16.msrb.mxu2 %v12605_v58  ;;  %v12688_v58 = vld [vmem:[#allocation7 + $0x11a0] sm:$0xf] }
 0x14b   :  { %v6328_v42 = vadd.f32 %v6327_v11, %v6299_v17  ;;  %v6356_v57 = vpop.f32.mrf.mxu3  ;;  %v6272_v1 = vadd.f32 %v6271_v13, %v15338_v25  ;;  %v6300_v12 = vpop.f32.mrf.mxu1  ;;  %v13575_v17 = vld [vmem:[%s17558_s1 + $0x1bc] sm:$0xf0]  ;;  %v13559_v25 = vld [vmem:[%s17558_s1 + $0x144] sm:$0xf]  ;;  %v12377_v11 = vor.u32 %v14134_v61, %v12376_v62  ;;  %v14215_v13 = vld [vmem:[#allocation7 + $0x11c0] sm:$0xf0]  ;;  %6641 = vmatpush.bf16.msrb.mxu1 %v12485_v0 }
 0x14c   :  { %v14188_v62 = vld [vmem:[#allocation7 + $0x10e8] sm:$0xf0]  ;;  %v15497_v55 = vor.u32 %v13575_v17, %v10112_v7  ;;  %v15499_v15 = vor.u32 %v13559_v25, %v10114_v49  ;;  %v12689_v17 = vor.u32 %v14212_v10, %v12688_v58  ;;  %v14185_v25 = vld [vmem:[#allocation7 + $0x10d0] sm:$0xf0]  ;;  %v12364_v49 = vld [vmem:[#allocation7 + $0xf18] sm:$0xf] }
 0x14d   :  { %v15471_v41 = vadd.f32 %v6356_v57, %v6328_v42  ;;  %v6301_v20 = vadd.f32 %v6300_v12, %v6272_v1  ;;  %v12700_v42 = vld [vmem:[#allocation7 + $0x11b8] sm:$0xf]  ;;  %6613 = vmatpush.bf16.msrb.mxu0 %v12377_v11  ;;  %v12593_v22 = vor.u32 %v14188_v62, %v12592_v50  ;;  %v15504_v11 = vor.u32 %v13560_v9, %v10122_v18  ;;  %v14209_v9 = vld [vmem:[#allocation7 + $0x1190] sm:$0xf0]  ;;  %v12568_v0 = vld [vmem:[#allocation7 + $0x10b0] sm:$0xf] }
 0x14e   :  { %v10120_v1 = vld [vmem:[%s17558_s1 + $0x148] sm:$0xf]  ;;  %v12701_v12 = vor.u32 %v14215_v13, %v12700_v42  ;;  %17841 = vst [vmem:[#allocation63_spill] sm:$0xff] %v15497_v55 }
 0x14f   :  { %v13576_v57 = vld [vmem:[%s17558_s1 + $0x1c4] sm:$0xf0]  ;;  %17842 = vst [vmem:[#allocation64_spill] sm:$0xff] %v15499_v15  ;;  %6669 = vmatpush.bf16.msrb.mxu2 %v12593_v22  ;;  %v14158_v22 = vld [vmem:[#allocation7 + $0xff8] sm:$0xf0] }
 0x150   :  { %v15501_v19 = vor.u32 %v13576_v57, %v10120_v1  ;;  %17844 = vst [vmem:[#allocation66_spill] sm:$0xff] %v15504_v11  ;;  %6697 = vmatpush.bf16.msrb.mxu3 %v12701_v12  ;;  %v14131_v1 = vld [vmem:[#allocation7 + $0xf20] sm:$0xf0]  ;;  %v14182_v12 = vld [vmem:[#allocation7 + $0x10b8] sm:$0xf0] }
 0x151   :  { %v12365_v57 = vor.u32 %v14131_v1, %v12364_v49  ;;  %v12569_v62 = vor.u32 %v14182_v12, %v12568_v0  ;;  %v13607_v1 = vld [vmem:[%s17558_s1 + $0x2bc] sm:$0xf0]  ;;  %v14179_v12 = vld [vmem:[#allocation7 + $0x10a0] sm:$0xf0] }
 0x152   :  { %v6329_v61 = vpop.f32.mrf.mxu2  ;;  %v6274_v8 = vpop.f32.mrf.mxu0  ;;  %17843 = vst [vmem:[#allocation65_spill] sm:$0xff] %v15501_v19 }
 0x153   :  { %v6330_v16 = vadd.f32 %v6329_v61, %v6301_v20  ;;  %v6358_v14 = vpop.f32.mrf.mxu3  ;;  %v6275_v60 = vadd.f32 %v6274_v8, %v15345_v35  ;;  %v6303_v42 = vpop.f32.mrf.mxu1  ;;  %v12580_v20 = vld [vmem:[#allocation7 + $0x10c8] sm:$0xf]  ;;  %v12472_v35 = vld [vmem:[#allocation7 + $0xff0] sm:$0xf]  ;;  %6614 = vmatpush.bf16.msrb.mxu0 %v12365_v57  ;;  %v12556_v57 = vld [vmem:[#allocation7 + $0x1098] sm:$0xf] }
 0x154   :  { %v12581_v8 = vor.u32 %v14185_v25, %v12580_v20  ;;  %6698 = vmatpush.bf16.msrb.mxu3 %v12689_v17  ;;  %v10240_v17 = vld [vmem:[%s17558_s1 + $0x240] sm:$0xf] }
 0x155   :  { %v15506_v7 = vadd.f32 %v6358_v14, %v6330_v16  ;;  %v6304_v13 = vadd.f32 %v6303_v42, %v6275_v60  ;;  %6505 = vmatmul.bf16.gmra.mxu0 %v15497_v55  ;;  %v12676_v14 = vld [vmem:[#allocation7 + $0x1188] sm:$0xf]  ;;  %v12473_v16 = vor.u32 %v14158_v22, %v12472_v35  ;;  %v12664_v60 = vld [vmem:[#allocation7 + $0x1170] sm:$0xf]  ;;  %v14206_v42 = vld [vmem:[#allocation7 + $0x1178] sm:$0xf0] }
 0x156   :  { %6534 = vmatmul.bf16.gmra.mxu1 %v15499_v15  ;;  %6670 = vmatpush.bf16.msrb.mxu2 %v12581_v8  ;;  %v12677_v50 = vor.u32 %v14209_v9, %v12676_v14  ;;  %v12460_v35 = vld [vmem:[#allocation7 + $0xfd8] sm:$0xf]  ;;  %v14155_v8 = vld [vmem:[#allocation7 + $0xfe0] sm:$0xf0]  ;;  %v10242_v14 = vld [vmem:[%s17558_s1 + $0x2c0] sm:$0xf0] }
 0x157   :  { %6563 = vmatmul.bf16.gmra.mxu2 %v15501_v19  ;;  %6642 = vmatpush.bf16.msrb.mxu1 %v12473_v16  ;;  %v12352_v16 = vld [vmem:[#allocation7 + $0xf00] sm:$0xf]  ;;  %v14128_v9 = vld [vmem:[#allocation7 + $0xf08] sm:$0xf0]  ;;  %v12461_v0 = vor.u32 %v14155_v8, %v12460_v35 }
 0x158   :  { %6592 = vmatmul.bf16.gmra.mxu3 %v15504_v11  ;;  %v14152_v35 = vld [vmem:[#allocation7 + $0xfc8] sm:$0xf0]  ;;  %v12544_v8 = vld [vmem:[#allocation7 + $0x1080] sm:$0xf] }
 0x159   :  { %6699 = vmatpush.bf16.msrb.mxu3 %v12677_v50  ;;  %v12353_v50 = vor.u32 %v14128_v9, %v12352_v16  ;;  %v15539_v16 = vor.u32 %v13607_v1, %v10240_v17 }
 0x15a   :  { %v6332_v18 = vpop.f32.mrf.mxu2  ;;  %v6276_v58 = vpop.f32.mrf.mxu0  ;;  %6671 = vmatpush.bf16.msrb.mxu2 %v12569_v62  ;;  %v12557_v62 = vor.u32 %v14179_v12, %v12556_v57  ;;  %v14176_v12 = vld [vmem:[#allocation7 + $0x1088] sm:$0xf0] }
 0x15b   :  { %v6333_v61 = vadd.f32 %v6332_v18, %v6304_v13  ;;  %v6361_v10 = vpop.f32.mrf.mxu3  ;;  %v6277_v20 = vadd.f32 %v6276_v58, %v15380_v33  ;;  %v6305_v25 = vpop.f32.mrf.mxu1  ;;  %v12665_v13 = vor.u32 %v14206_v42, %v12664_v60  ;;  %v13591_v33 = vld [vmem:[%s17558_s1 + $0x244] sm:$0xf]  ;;  %v10248_v18 = vld [vmem:[%s17558_s1 + $0x248] sm:$0xf]  ;;  %v14203_v58 = vld [vmem:[#allocation7 + $0x1160] sm:$0xf0]  ;;  %6643 = vmatpush.bf16.msrb.mxu1 %v12461_v0  ;;  %6615 = vmatpush.bf16.msrb.mxu0 %v12353_v50 }
 0x15c   :  { %v13592_v60 = vld [vmem:[%s17558_s1 + $0x24c] sm:$0xf]  ;;  %17845 = vst [vmem:[#allocation67_spill] sm:$0xff] %v15539_v16  ;;  %v15541_v55 = vor.u32 %v13591_v33, %v10242_v14  ;;  %v12545_v0 = vor.u32 %v14176_v12, %v12544_v8  ;;  %v14200_v50 = vld [vmem:[#allocation7 + $0x1148] sm:$0xf0] }
 0x15d   :  { %v15513_v49 = vadd.f32 %v6361_v10, %v6333_v61  ;;  %v6306_v22 = vadd.f32 %v6305_v25, %v6277_v20  ;;  %v12652_v61 = vld [vmem:[#allocation7 + $0x1158] sm:$0xf]  ;;  %v10250_v42 = vld [vmem:[%s17558_s1 + $0x2c8] sm:$0xf0]  ;;  %6700 = vmatpush.bf16.msrb.mxu3 %v12665_v13  ;;  %v12448_v25 = vld [vmem:[#allocation7 + $0xfc0] sm:$0xf] }
 0x15e   :  { %v13608_v10 = vld [vmem:[%s17558_s1 + $0x2c4] sm:$0xf0]  ;;  %v12653_v20 = vor.u32 %v14203_v58, %v12652_v61  ;;  %6672 = vmatpush.bf16.msrb.mxu2 %v12557_v62  ;;  %v12449_v9 = vor.u32 %v14152_v35, %v12448_v25  ;;  %17846 = vst [vmem:[#allocation68_spill] sm:$0xff] %v15541_v55  ;;  %v12640_v13 = vld [vmem:[#allocation7 + $0x1140] sm:$0xf]  ;;  %v15546_v24 = vor.u32 %v13592_v60, %v10250_v42 }
 0x15f   :  { %v15543_v63 = vor.u32 %v13608_v10, %v10248_v18  ;;  %v12641_v1 = vor.u32 %v14200_v50, %v12640_v13  ;;  %v12820_v33 = vld [vmem:[#allocation7 + $0x12a8] sm:$0xf]  ;;  %v14245_v14 = vld [vmem:[#allocation7 + $0x12b0] sm:$0xf0]  ;;  %v10368_v42 = vld [vmem:[%s17558_s1 + $0x340] sm:$0xf] }
 0x160   :  { %17848 = vst [vmem:[#allocation70_spill] sm:$0xff] %v15546_v24  ;;  %6644 = vmatpush.bf16.msrb.mxu1 %v12449_v9  ;;  %v12808_v25 = vld [vmem:[#allocation7 + $0x1290] sm:$0xf]  ;;  %v14242_v35 = vld [vmem:[#allocation7 + $0x1298] sm:$0xf0] }
 0x161   :  { %17847 = vst [vmem:[#allocation69_spill] sm:$0xff] %v15543_v63  ;;  %6701 = vmatpush.bf16.msrb.mxu3 %v12653_v20  ;;  %v12916_v8 = vld [vmem:[#allocation7 + $0x1368] sm:$0xf]  ;;  %v13623_v9 = vld [vmem:[%s17558_s1 + $0x344] sm:$0xf] }
 0x162   :  { %v6334_v57 = vpop.f32.mrf.mxu2  ;;  %v6279_v19 = vpop.f32.mrf.mxu0  ;;  %6673 = vmatpush.bf16.msrb.mxu2 %v12545_v0  ;;  %v14269_v12 = vld [vmem:[#allocation7 + $0x1370] sm:$0xf0]  ;;  %v10376_v13 = vld [vmem:[%s17558_s1 + $0x348] sm:$0xf] }
 0x163   :  { %v6335_v11 = vadd.f32 %v6334_v57, %v6306_v22  ;;  %v6363_v15 = vpop.f32.mrf.mxu3  ;;  %v6280_v61 = vadd.f32 %v6279_v19, %v15387_v59  ;;  %v6308_v58 = vpop.f32.mrf.mxu1  ;;  %v12821_v59 = vor.u32 %v14245_v14, %v12820_v33  ;;  %v13639_v57 = vld [vmem:[%s17558_s1 + $0x3bc] sm:$0xf0]  ;;  %v10370_v0 = vld [vmem:[%s17558_s1 + $0x3c0] sm:$0xf0]  ;;  %v13640_v50 = vld [vmem:[%s17558_s1 + $0x3c4] sm:$0xf0] }
 0x164   :  { %v15581_v33 = vor.u32 %v13639_v57, %v10368_v42  ;;  %v12796_v42 = vld [vmem:[#allocation7 + $0x1278] sm:$0xf] }
 0x165   :  { %v15548_v17 = vadd.f32 %v6363_v15, %v6335_v11  ;;  %v6309_v22 = vadd.f32 %v6308_v58, %v6280_v61  ;;  %6510 = vmatmul.bf16.gmra.mxu0 %v15539_v16  ;;  %6702 = vmatpush.bf16.msrb.mxu3 %v12641_v1  ;;  %v12917_v61 = vor.u32 %v14269_v12, %v12916_v8  ;;  %v13624_v58 = vld [vmem:[%s17558_s1 + $0x34c] sm:$0xf]  ;;  %v12904_v8 = vld [vmem:[#allocation7 + $0x1350] sm:$0xf] }
 0x166   :  { %6539 = vmatmul.bf16.gmra.mxu1 %v15541_v55  ;;  %6724 = vmatpush.bf16.msra.mxu0 %v12821_v59  ;;  %v10378_v1 = vld [vmem:[%s17558_s1 + $0x3c8] sm:$0xf0]  ;;  %17849 = vst [vmem:[#allocation71_spill] sm:$0xff] %v15581_v33 }
 0x167   :  { %6568 = vmatmul.bf16.gmra.mxu2 %v15543_v63  ;;  %6753 = vmatpush.bf16.msra.mxu1 %v12917_v61 }
 0x168   :  { %6597 = vmatmul.bf16.gmra.mxu3 %v15546_v24 }
 0x16a   :  { %v6337_v19 = vpop.f32.mrf.mxu2  ;;  %v6281_v11 = vpop.f32.mrf.mxu0 }
 0x16b   :  { %v6338_v15 = vadd.f32 %v6337_v19, %v6309_v22  ;;  %v6366_v18 = vpop.f32.mrf.mxu3  ;;  %v6282_v62 = vadd.f32 %v6281_v11, %v15422_v6  ;;  %v6310_v10 = vpop.f32.mrf.mxu1  ;;  %v12809_v6 = vor.u32 %v14242_v35, %v12808_v25  ;;  %v15585_v11 = vor.u32 %v13640_v50, %v10376_v13 }
 0x16d   :  { %v15555_v60 = vadd.f32 %v6366_v18, %v6338_v15  ;;  %v6311_v20 = vadd.f32 %v6310_v10, %v6282_v62  ;;  %6725 = vmatpush.bf16.msra.mxu0 %v12809_v6  ;;  %v15583_v15 = vor.u32 %v13623_v9, %v10370_v0  ;;  %17851 = vst [vmem:[#allocation73_spill] sm:$0xff] %v15585_v11  ;;  %v14266_v9 = vld [vmem:[#allocation7 + $0x1358] sm:$0xf0] }
 0x16e   :  { %v15588_v10 = vor.u32 %v13624_v58, %v10378_v1  ;;  %v10000_v1 = vld [vmem:[%s17558_s1 + $0x50] sm:$0xf] }
 0x16f   :  { %17850 = vst [vmem:[#allocation72_spill] sm:$0xff] %v15583_v15 }
 0x170   :  { %17852 = vst [vmem:[#allocation74_spill] sm:$0xff] %v15588_v10 }
 0x172   :  { %v6339_v22 = vpop.f32.mrf.mxu2  ;;  %v6284_v59 = vpop.f32.mrf.mxu0 }
 0x173   :  { %v6340_v14 = vadd.f32 %v6339_v22, %v6311_v20  ;;  %v6368_v19 = vpop.f32.mrf.mxu3  ;;  %v6285_v18 = vadd.f32 %v6284_v59, %v15429_v21  ;;  %v6313_v62 = vpop.f32.mrf.mxu1  ;;  %v14239_v20 = vld [vmem:[#allocation7 + $0x1280] sm:$0xf0]  ;;  %v12905_v21 = vor.u32 %v14266_v9, %v12904_v8  ;;  %v13545_v22 = vld [vmem:[%s17558_s1 + $0xcc] sm:$0xf0]  ;;  %v13546_v9 = vld [vmem:[%s17558_s1 + $0xd4] sm:$0xf0] }
 0x174   :  { %v12797_v57 = vor.u32 %v14239_v20, %v12796_v42  ;;  %v13529_v59 = vld [vmem:[%s17558_s1 + $0x54] sm:$0xf]  ;;  %v12892_v42 = vld [vmem:[#allocation7 + $0x1338] sm:$0xf] }
 0x175   :  { %v15590_v25 = vadd.f32 %v6368_v19, %v6340_v14  ;;  %v6314_v35 = vadd.f32 %v6313_v62, %v6285_v18  ;;  %6515 = vmatmul.bf16.gmra.mxu0 %v15581_v33  ;;  %6754 = vmatpush.bf16.msra.mxu1 %v12905_v21  ;;  %v12784_v19 = vld [vmem:[#allocation7 + $0x1260] sm:$0xf]  ;;  %v14236_v18 = vld [vmem:[#allocation7 + $0x1268] sm:$0xf0]  ;;  %v13012_v62 = vld [vmem:[#allocation7 + $0x1428] sm:$0xf] }
 0x176   :  { %6544 = vmatmul.bf16.gmra.mxu1 %v15583_v15  ;;  %6726 = vmatpush.bf16.msra.mxu0 %v12797_v57  ;;  %v14263_v20 = vld [vmem:[#allocation7 + $0x1340] sm:$0xf0]  ;;  %v10008_v57 = vld [vmem:[%s17558_s1 + $0x58] sm:$0xf] }
 0x177   :  { %6573 = vmatmul.bf16.gmra.mxu2 %v15585_v11  ;;  %v10002_v8 = vld [vmem:[%s17558_s1 + $0xd0] sm:$0xf0] }
 0x178   :  { %6602 = vmatmul.bf16.gmra.mxu3 %v15588_v10  ;;  %v15625_v10 = vor.u32 %v13529_v59, %v10002_v8  ;;  %v14290_v8 = vld [vmem:[#allocation7 + $0x1418] sm:$0xf0] }
 0x17a   :  { %v6342_v6 = vpop.f32.mrf.mxu2  ;;  %v6286_v0 = vpop.f32.mrf.mxu0  ;;  %17854 = vst [vmem:[#allocation76_spill] sm:$0xff] %v15625_v10 }
 0x17b   :  { %v6343_v12 = vadd.f32 %v6342_v6, %v6314_v35  ;;  %v6371_v13 = vpop.f32.mrf.mxu3  ;;  %v6287_v50 = vadd.f32 %v6286_v0, %v15464_v53  ;;  %v6315_v61 = vpop.f32.mrf.mxu1  ;;  %v12785_v53 = vor.u32 %v14236_v18, %v12784_v19  ;;  %v14293_v35 = vld [vmem:[#allocation7 + $0x1430] sm:$0xf0]  ;;  %v12893_v6 = vor.u32 %v14263_v20, %v12892_v42  ;;  %v10010_v0 = vld [vmem:[%s17558_s1 + $0xd8] sm:$0xf0] }
 0x17c   :  { %v13013_v21 = vor.u32 %v14293_v35, %v13012_v62  ;;  %v15627_v62 = vor.u32 %v13546_v9, %v10008_v57  ;;  %v14260_v57 = vld [vmem:[#allocation7 + $0x1328] sm:$0xf0] }
 0x17d   :  { %v15597_v58 = vadd.f32 %v6371_v13, %v6343_v12  ;;  %v6316_v14 = vadd.f32 %v6315_v61, %v6287_v50  ;;  %v13530_v12 = vld [vmem:[%s17558_s1 + $0x5c] sm:$0xf]  ;;  %6727 = vmatpush.bf16.msra.mxu0 %v12785_v53  ;;  %v15623_v50 = vor.u32 %v13545_v22, %v10000_v1  ;;  %6755 = vmatpush.bf16.msra.mxu1 %v12893_v6  ;;  %v12772_v1 = vld [vmem:[#allocation7 + $0x1248] sm:$0xf]  ;;  %v14233_v22 = vld [vmem:[#allocation7 + $0x1250] sm:$0xf0] }
 0x17e   :  { %6782 = vmatpush.bf16.msra.mxu2 %v13013_v21  ;;  %17855 = vst [vmem:[#allocation77_spill] sm:$0xff] %v15627_v62  ;;  %v15630_v20 = vor.u32 %v13530_v12, %v10010_v0  ;;  %v12773_v59 = vor.u32 %v14233_v22, %v12772_v1  ;;  %v13108_v6 = vld [vmem:[#allocation7 + $0x14e8] sm:$0xf]  ;;  %v14317_v12 = vld [vmem:[#allocation7 + $0x14f0] sm:$0xf0] }
 0x17f   :  { %17853 = vst [vmem:[#allocation75_spill] sm:$0xff] %v15623_v50 }
 0x180   :  { %17856 = vst [vmem:[#allocation78_spill] sm:$0xff] %v15630_v20 }
 0x181   :  { %6728 = vmatpush.bf16.msra.mxu0 %v12773_v59  ;;  %v12988_v59 = vld [vmem:[#allocation7 + $0x13f8] sm:$0xf] }
 0x182   :  { %v6344_v13 = vpop.f32.mrf.mxu2  ;;  %v6385_v18 = vpop.f32.mrf.mxu0 }
 0x183   :  { %v6345_v61 = vadd.f32 %v6344_v13, %v6316_v14  ;;  %v6373_v19 = vpop.f32.mrf.mxu3  ;;  %v6386_v35 = vadd.f32 %v6385_v18, %v15471_v41  ;;  %v6414_v42 = vpop.f32.mrf.mxu1  ;;  %v13000_v14 = vld [vmem:[#allocation7 + $0x1410] sm:$0xf]  ;;  %v12880_v41 = vld [vmem:[#allocation7 + $0x1320] sm:$0xf]  ;;  %v13109_v13 = vor.u32 %v14317_v12, %v13108_v6  ;;  %v12868_v12 = vld [vmem:[#allocation7 + $0x1308] sm:$0xf] }
 0x184   :  { %v13001_v9 = vor.u32 %v14290_v8, %v13000_v14  ;;  %v12881_v21 = vor.u32 %v14260_v57, %v12880_v41  ;;  %v10128_v14 = vld [vmem:[%s17558_s1 + $0x150] sm:$0xf]  ;;  %v14287_v8 = vld [vmem:[#allocation7 + $0x1400] sm:$0xf0] }
 0x185   :  { %v15632_v11 = vadd.f32 %v6373_v19, %v6345_v61  ;;  %v6415_v53 = vadd.f32 %v6414_v42, %v6386_v35  ;;  %6616 = vmatmul.bf16.vlgmr.msrb.gmra.mxu0 %v15623_v50  ;;  %v13096_v35 = vld [vmem:[#allocation7 + $0x14d0] sm:$0xf]  ;;  %v14314_v42 = vld [vmem:[#allocation7 + $0x14d8] sm:$0xf0]  ;;  %6811 = vmatpush.bf16.msra.mxu3 %v13109_v13  ;;  %v10130_v57 = vld [vmem:[%s17558_s1 + $0x1d0] sm:$0xf0]  ;;  %v12989_v6 = vor.u32 %v14287_v8, %v12988_v59 }
 0x186   :  { %6645 = vmatmul.bf16.vlgmr.msrb.gmra.mxu1 %v15625_v10  ;;  %6783 = vmatpush.bf16.msra.mxu2 %v13001_v9  ;;  %v13097_v22 = vor.u32 %v14314_v42, %v13096_v35  ;;  %v12760_v9 = vld [vmem:[#allocation7 + $0x1230] sm:$0xf]  ;;  %v14257_v13 = vld [vmem:[#allocation7 + $0x1310] sm:$0xf0]  ;;  %v13562_v35 = vld [vmem:[%s17558_s1 + $0x15c] sm:$0xf] }
 0x187   :  { %6674 = vmatmul.bf16.vlgmr.msrb.gmra.mxu2 %v15627_v62  ;;  %6756 = vmatpush.bf16.msra.mxu1 %v12881_v21  ;;  %v14230_v21 = vld [vmem:[#allocation7 + $0x1238] sm:$0xf0]  ;;  %v12869_v42 = vor.u32 %v14257_v13, %v12868_v12  ;;  %v10138_v59 = vld [vmem:[%s17558_s1 + $0x1d8] sm:$0xf0]  ;;  %v12976_v8 = vld [vmem:[#allocation7 + $0x13e0] sm:$0xf] }
 0x188   :  { %6703 = vmatmul.bf16.vlgmr.msrb.gmra.mxu3 %v15630_v20  ;;  %v14308_v12 = vld [vmem:[#allocation7 + $0x14a8] sm:$0xf0] }
 0x189   :  { %6812 = vmatpush.bf16.msra.mxu3 %v13097_v22 }
 0x18a   :  { %v6443_v0 = vpop.f32.mrf.mxu2  ;;  %v6387_v19 = vpop.f32.mrf.mxu0  ;;  %6784 = vmatpush.bf16.msra.mxu2 %v12989_v6  ;;  %v13072_v6 = vld [vmem:[#allocation7 + $0x14a0] sm:$0xf] }
 0x18b   :  { %v6444_v61 = vadd.f32 %v6443_v0, %v6415_v53  ;;  %v6472_v18 = vpop.f32.mrf.mxu3  ;;  %v6388_v20 = vadd.f32 %v6387_v19, %v15506_v7  ;;  %v6416_v1 = vpop.f32.mrf.mxu1  ;;  %v13577_v53 = vld [vmem:[%s17558_s1 + $0x1cc] sm:$0xf0]  ;;  %v13561_v7 = vld [vmem:[%s17558_s1 + $0x154] sm:$0xf]  ;;  %v12761_v0 = vor.u32 %v14230_v21, %v12760_v9  ;;  %v14284_v9 = vld [vmem:[#allocation7 + $0x13e8] sm:$0xf0]  ;;  %6757 = vmatpush.bf16.msra.mxu1 %v12869_v42 }
 0x18c   :  { %v14311_v19 = vld [vmem:[#allocation7 + $0x14c0] sm:$0xf0]  ;;  %v15665_v10 = vor.u32 %v13577_v53, %v10128_v14  ;;  %v12977_v50 = vor.u32 %v14284_v9, %v12976_v8  ;;  %v15667_v63 = vor.u32 %v13561_v7, %v10130_v57  ;;  %v13073_v53 = vor.u32 %v14308_v12, %v13072_v6  ;;  %v14281_v7 = vld [vmem:[#allocation7 + $0x13d0] sm:$0xf0]  ;;  %v12748_v57 = vld [vmem:[#allocation7 + $0x1218] sm:$0xf] }
 0x18d   :  { %v15639_v62 = vadd.f32 %v6472_v18, %v6444_v61  ;;  %v6417_v41 = vadd.f32 %v6416_v1, %v6388_v20  ;;  %v13084_v61 = vld [vmem:[#allocation7 + $0x14b8] sm:$0xf]  ;;  %v10136_v20 = vld [vmem:[%s17558_s1 + $0x158] sm:$0xf]  ;;  %6729 = vmatpush.bf16.msra.mxu0 %v12761_v0  ;;  %v15672_v0 = vor.u32 %v13562_v35, %v10138_v59  ;;  %v14305_v35 = vld [vmem:[#allocation7 + $0x1490] sm:$0xf0] }
 0x18e   :  { %v13578_v18 = vld [vmem:[%s17558_s1 + $0x1d4] sm:$0xf0]  ;;  %v13085_v1 = vor.u32 %v14311_v19, %v13084_v61  ;;  %17857 = vst [vmem:[#allocation79_spill] sm:$0xff] %v15665_v10  ;;  %6785 = vmatpush.bf16.msra.mxu2 %v12977_v50  ;;  %v14254_v50 = vld [vmem:[#allocation7 + $0x12f8] sm:$0xf0] }
 0x18f   :  { %17858 = vst [vmem:[#allocation80_spill] sm:$0xff] %v15667_v63  ;;  %v15669_v22 = vor.u32 %v13578_v18, %v10136_v20  ;;  %v14227_v20 = vld [vmem:[#allocation7 + $0x1220] sm:$0xf0]  ;;  %v12952_v42 = vld [vmem:[#allocation7 + $0x13b0] sm:$0xf] }
 0x190   :  { %17860 = vst [vmem:[#allocation82_spill] sm:$0xff] %v15672_v0  ;;  %6813 = vmatpush.bf16.msra.mxu3 %v13085_v1  ;;  %v12749_v18 = vor.u32 %v14227_v20, %v12748_v57  ;;  %v14278_v1 = vld [vmem:[#allocation7 + $0x13b8] sm:$0xf0]  ;;  %v13609_v20 = vld [vmem:[%s17558_s1 + $0x2cc] sm:$0xf0] }
 0x191   :  { %17859 = vst [vmem:[#allocation81_spill] sm:$0xff] %v15669_v22  ;;  %v12953_v9 = vor.u32 %v14278_v1, %v12952_v42  ;;  %v14275_v1 = vld [vmem:[#allocation7 + $0x13a0] sm:$0xf0] }
 0x192   :  { %v6445_v21 = vpop.f32.mrf.mxu2  ;;  %v6390_v33 = vpop.f32.mrf.mxu0  ;;  %6730 = vmatpush.bf16.msra.mxu0 %v12749_v18  ;;  %v12940_v18 = vld [vmem:[#allocation7 + $0x1398] sm:$0xf] }
 0x193   :  { %v6446_v15 = vadd.f32 %v6445_v21, %v6417_v41  ;;  %v6474_v24 = vpop.f32.mrf.mxu3  ;;  %v6391_v13 = vadd.f32 %v6390_v33, %v15513_v49  ;;  %v6419_v61 = vpop.f32.mrf.mxu1  ;;  %v12964_v41 = vld [vmem:[#allocation7 + $0x13c8] sm:$0xf]  ;;  %v12856_v49 = vld [vmem:[#allocation7 + $0x12f0] sm:$0xf] }
 0x194   :  { %v12965_v33 = vor.u32 %v14281_v7, %v12964_v41  ;;  %6814 = vmatpush.bf16.msra.mxu3 %v13073_v53  ;;  %v10256_v53 = vld [vmem:[%s17558_s1 + $0x250] sm:$0xf] }
 0x195   :  { %v15674_v14 = vadd.f32 %v6474_v24, %v6446_v15  ;;  %v6420_v19 = vadd.f32 %v6419_v61, %v6391_v13  ;;  %6621 = vmatmul.bf16.gmra.mxu0 %v15665_v10  ;;  %v13060_v24 = vld [vmem:[#allocation7 + $0x1488] sm:$0xf]  ;;  %v12857_v15 = vor.u32 %v14254_v50, %v12856_v49  ;;  %v13048_v13 = vld [vmem:[#allocation7 + $0x1470] sm:$0xf]  ;;  %v14302_v61 = vld [vmem:[#allocation7 + $0x1478] sm:$0xf0] }
 0x196   :  { %6650 = vmatmul.bf16.gmra.mxu1 %v15667_v63  ;;  %6786 = vmatpush.bf16.msra.mxu2 %v12965_v33  ;;  %v13061_v8 = vor.u32 %v14305_v35, %v13060_v24  ;;  %v12844_v49 = vld [vmem:[#allocation7 + $0x12d8] sm:$0xf]  ;;  %v14251_v33 = vld [vmem:[#allocation7 + $0x12e0] sm:$0xf0]  ;;  %v14224_v35 = vld [vmem:[#allocation7 + $0x1208] sm:$0xf0] }
 0x197   :  { %6679 = vmatmul.bf16.gmra.mxu2 %v15669_v22  ;;  %6758 = vmatpush.bf16.msra.mxu1 %v12857_v15  ;;  %v10258_v24 = vld [vmem:[%s17558_s1 + $0x2d0] sm:$0xf0]  ;;  %v12736_v15 = vld [vmem:[#allocation7 + $0x1200] sm:$0xf]  ;;  %v12845_v42 = vor.u32 %v14251_v33, %v12844_v49  ;;  %v14248_v49 = vld [vmem:[#allocation7 + $0x12c8] sm:$0xf0] }
 0x198   :  { %6708 = vmatmul.bf16.gmra.mxu3 %v15672_v0  ;;  %v12928_v33 = vld [vmem:[#allocation7 + $0x1380] sm:$0xf] }
 0x199   :  { %6815 = vmatpush.bf16.msra.mxu3 %v13061_v8  ;;  %v12737_v8 = vor.u32 %v14224_v35, %v12736_v15  ;;  %v15707_v15 = vor.u32 %v13609_v20, %v10256_v53 }
 0x19a   :  { %v6448_v59 = vpop.f32.mrf.mxu2  ;;  %v6392_v6 = vpop.f32.mrf.mxu0  ;;  %6787 = vmatpush.bf16.msra.mxu2 %v12953_v9  ;;  %v12941_v9 = vor.u32 %v14275_v1, %v12940_v18  ;;  %v14272_v1 = vld [vmem:[#allocation7 + $0x1388] sm:$0xf0] }
 0x19b   :  { %v6449_v21 = vadd.f32 %v6448_v59, %v6420_v19  ;;  %v6477_v12 = vpop.f32.mrf.mxu3  ;;  %v6393_v41 = vadd.f32 %v6392_v6, %v15548_v17  ;;  %v6421_v7 = vpop.f32.mrf.mxu1  ;;  %v13049_v19 = vor.u32 %v14302_v61, %v13048_v13  ;;  %v13593_v17 = vld [vmem:[%s17558_s1 + $0x254] sm:$0xf]  ;;  %v10264_v59 = vld [vmem:[%s17558_s1 + $0x258] sm:$0xf]  ;;  %v13594_v13 = vld [vmem:[%s17558_s1 + $0x25c] sm:$0xf]  ;;  %6759 = vmatpush.bf16.msra.mxu1 %v12845_v42  ;;  %6731 = vmatpush.bf16.msra.mxu0 %v12737_v8 }
 0x19c   :  { %v14299_v6 = vld [vmem:[#allocation7 + $0x1460] sm:$0xf0]  ;;  %v10266_v61 = vld [vmem:[%s17558_s1 + $0x2d8] sm:$0xf0]  ;;  %17861 = vst [vmem:[#allocation83_spill] sm:$0xff] %v15707_v15  ;;  %v15709_v10 = vor.u32 %v13593_v17, %v10258_v24  ;;  %v12929_v42 = vor.u32 %v14272_v1, %v12928_v33 }
 0x19d   :  { %v15681_v57 = vadd.f32 %v6477_v12, %v6449_v21  ;;  %v6422_v50 = vadd.f32 %v6421_v7, %v6393_v41  ;;  %v13036_v21 = vld [vmem:[#allocation7 + $0x1458] sm:$0xf]  ;;  %v13610_v12 = vld [vmem:[%s17558_s1 + $0x2d4] sm:$0xf0]  ;;  %6816 = vmatpush.bf16.msra.mxu3 %v13049_v19  ;;  %v12832_v7 = vld [vmem:[#allocation7 + $0x12c0] sm:$0xf]  ;;  %v15714_v16 = vor.u32 %v13594_v13, %v10266_v61 }
 0x19e   :  { %v13037_v41 = vor.u32 %v14299_v6, %v13036_v21  ;;  %6788 = vmatpush.bf16.msra.mxu2 %v12941_v9  ;;  %v12833_v35 = vor.u32 %v14248_v49, %v12832_v7  ;;  %17862 = vst [vmem:[#allocation84_spill] sm:$0xff] %v15709_v10  ;;  %v15711_v55 = vor.u32 %v13610_v12, %v10264_v59  ;;  %v13024_v19 = vld [vmem:[#allocation7 + $0x1440] sm:$0xf]  ;;  %v14296_v8 = vld [vmem:[#allocation7 + $0x1448] sm:$0xf0] }
 0x19f   :  { %17864 = vst [vmem:[#allocation86_spill] sm:$0xff] %v15714_v16  ;;  %v13025_v20 = vor.u32 %v14296_v8, %v13024_v19  ;;  %v13204_v17 = vld [vmem:[#allocation7 + $0x15a8] sm:$0xf]  ;;  %v14341_v24 = vld [vmem:[#allocation7 + $0x15b0] sm:$0xf0] }
 0x1a0   :  { %17863 = vst [vmem:[#allocation85_spill] sm:$0xff] %v15711_v55  ;;  %6760 = vmatpush.bf16.msra.mxu1 %v12833_v35  ;;  %v10384_v61 = vld [vmem:[%s17558_s1 + $0x350] sm:$0xf]  ;;  %v13192_v7 = vld [vmem:[#allocation7 + $0x1590] sm:$0xf] }
 0x1a1   :  { %6817 = vmatpush.bf16.msra.mxu3 %v13037_v41  ;;  %v14338_v49 = vld [vmem:[#allocation7 + $0x1598] sm:$0xf0]  ;;  %v13300_v33 = vld [vmem:[#allocation7 + $0x1668] sm:$0xf]  ;;  %v13625_v35 = vld [vmem:[%s17558_s1 + $0x354] sm:$0xf] }
 0x1a2   :  { %v6450_v18 = vpop.f32.mrf.mxu2  ;;  %v6395_v22 = vpop.f32.mrf.mxu0  ;;  %6789 = vmatpush.bf16.msra.mxu2 %v12929_v42  ;;  %v14365_v1 = vld [vmem:[#allocation7 + $0x1670] sm:$0xf0]  ;;  %v10386_v42 = vld [vmem:[%s17558_s1 + $0x3d0] sm:$0xf0]  ;;  %v10392_v19 = vld [vmem:[%s17558_s1 + $0x358] sm:$0xf] }
 0x1a3   :  { %v6451_v0 = vadd.f32 %v6450_v18, %v6422_v50  ;;  %v6479_v63 = vpop.f32.mrf.mxu3  ;;  %v6396_v21 = vadd.f32 %v6395_v22, %v15555_v60  ;;  %v6424_v6 = vpop.f32.mrf.mxu1  ;;  %v13205_v60 = vor.u32 %v14341_v24, %v13204_v17  ;;  %v13641_v18 = vld [vmem:[%s17558_s1 + $0x3cc] sm:$0xf0]  ;;  %v13642_v8 = vld [vmem:[%s17558_s1 + $0x3d4] sm:$0xf0] }
 0x1a4   :  { %v15749_v17 = vor.u32 %v13641_v18, %v10384_v61  ;;  %v13180_v61 = vld [vmem:[#allocation7 + $0x1578] sm:$0xf] }
 0x1a5   :  { %v15716_v53 = vadd.f32 %v6479_v63, %v6451_v0  ;;  %v6425_v50 = vadd.f32 %v6424_v6, %v6396_v21  ;;  %6626 = vmatmul.bf16.gmra.mxu0 %v15707_v15  ;;  %6818 = vmatpush.bf16.msra.mxu3 %v13025_v20  ;;  %v13301_v21 = vor.u32 %v14365_v1, %v13300_v33  ;;  %v13626_v6 = vld [vmem:[%s17558_s1 + $0x35c] sm:$0xf]  ;;  %v13288_v33 = vld [vmem:[#allocation7 + $0x1650] sm:$0xf] }
 0x1a6   :  { %6655 = vmatmul.bf16.gmra.mxu1 %v15709_v10  ;;  %6840 = vmatpush.bf16.msrb.mxu0 %v13205_v60  ;;  %v10394_v20 = vld [vmem:[%s17558_s1 + $0x3d8] sm:$0xf0]  ;;  %17865 = vst [vmem:[#allocation87_spill] sm:$0xff] %v15749_v17 }
 0x1a7   :  { %6684 = vmatmul.bf16.gmra.mxu2 %v15711_v55  ;;  %6869 = vmatpush.bf16.msrb.mxu1 %v13301_v21 }
 0x1a8   :  { %6713 = vmatmul.bf16.gmra.mxu3 %v15714_v16 }
 0x1aa   :  { %v6453_v22 = vpop.f32.mrf.mxu2  ;;  %v6397_v0 = vpop.f32.mrf.mxu0 }
 0x1ab   :  { %v6454_v63 = vadd.f32 %v6453_v22, %v6425_v50  ;;  %v6482_v59 = vpop.f32.mrf.mxu3  ;;  %v6398_v9 = vadd.f32 %v6397_v0, %v15590_v25  ;;  %v6426_v12 = vpop.f32.mrf.mxu1  ;;  %v13193_v25 = vor.u32 %v14338_v49, %v13192_v7  ;;  %v15753_v0 = vor.u32 %v13642_v8, %v10392_v19 }
 0x1ad   :  { %v15723_v13 = vadd.f32 %v6482_v59, %v6454_v63  ;;  %v6427_v41 = vadd.f32 %v6426_v12, %v6398_v9  ;;  %6841 = vmatpush.bf16.msrb.mxu0 %v13193_v25  ;;  %v15751_v63 = vor.u32 %v13625_v35, %v10386_v42  ;;  %17867 = vst [vmem:[#allocation89_spill] sm:$0xff] %v15753_v0  ;;  %v14362_v35 = vld [vmem:[#allocation7 + $0x1658] sm:$0xf0] }
 0x1ae   :  { %v15756_v12 = vor.u32 %v13626_v6, %v10394_v20  ;;  %v10016_v20 = vld [vmem:[%s17558_s1 + $0x60] sm:$0xf] }
 0x1af   :  { %17866 = vst [vmem:[#allocation88_spill] sm:$0xff] %v15751_v63 }
 0x1b0   :  { %17868 = vst [vmem:[#allocation90_spill] sm:$0xff] %v15756_v12 }
 0x1b2   :  { %v6455_v50 = vpop.f32.mrf.mxu2  ;;  %v6400_v60 = vpop.f32.mrf.mxu0 }
 0x1b3   :  { %v6456_v24 = vadd.f32 %v6455_v50, %v6427_v41  ;;  %v6484_v22 = vpop.f32.mrf.mxu3  ;;  %v6401_v59 = vadd.f32 %v6400_v60, %v15597_v58  ;;  %v6429_v9 = vpop.f32.mrf.mxu1  ;;  %v14335_v41 = vld [vmem:[#allocation7 + $0x1580] sm:$0xf0]  ;;  %v13289_v58 = vor.u32 %v14362_v35, %v13288_v33  ;;  %v13547_v50 = vld [vmem:[%s17558_s1 + $0xdc] sm:$0xf0]  ;;  %v13531_v60 = vld [vmem:[%s17558_s1 + $0x64] sm:$0xf] }
 0x1b4   :  { %v13181_v18 = vor.u32 %v14335_v41, %v13180_v61  ;;  %v13276_v61 = vld [vmem:[#allocation7 + $0x1638] sm:$0xf]  ;;  %v14359_v41 = vld [vmem:[#allocation7 + $0x1640] sm:$0xf0]  ;;  %v10018_v33 = vld [vmem:[%s17558_s1 + $0xe0] sm:$0xf0] }
 0x1b5   :  { %v15758_v7 = vadd.f32 %v6484_v22, %v6456_v24  ;;  %v6430_v49 = vadd.f32 %v6429_v9, %v6401_v59  ;;  %6631 = vmatmul.bf16.gmra.mxu0 %v15749_v17  ;;  %6870 = vmatpush.bf16.msrb.mxu1 %v13289_v58  ;;  %v13168_v22 = vld [vmem:[#allocation7 + $0x1560] sm:$0xf]  ;;  %v14332_v59 = vld [vmem:[#allocation7 + $0x1568] sm:$0xf0]  ;;  %v13396_v9 = vld [vmem:[#allocation7 + $0x1728] sm:$0xf] }
 0x1b6   :  { %6660 = vmatmul.bf16.gmra.mxu1 %v15751_v63  ;;  %6842 = vmatpush.bf16.msrb.mxu0 %v13181_v18  ;;  %v10024_v18 = vld [vmem:[%s17558_s1 + $0x68] sm:$0xf] }
 0x1b7   :  { %6689 = vmatmul.bf16.gmra.mxu2 %v15753_v0  ;;  %v13548_v35 = vld [vmem:[%s17558_s1 + $0xe4] sm:$0xf0] }
 0x1b8   :  { %6718 = vmatmul.bf16.gmra.mxu3 %v15756_v12  ;;  %v15793_v12 = vor.u32 %v13531_v60, %v10018_v33  ;;  %v14386_v33 = vld [vmem:[#allocation7 + $0x1718] sm:$0xf0] }
 0x1ba   :  { %v6458_v25 = vpop.f32.mrf.mxu2  ;;  %v6402_v42 = vpop.f32.mrf.mxu0  ;;  %17870 = vst [vmem:[#allocation92_spill] sm:$0xff] %v15793_v12 }
 0x1bb   :  { %v6459_v1 = vadd.f32 %v6458_v25, %v6430_v49  ;;  %v6487_v19 = vpop.f32.mrf.mxu3  ;;  %v6403_v8 = vadd.f32 %v6402_v42, %v15632_v11  ;;  %v6431_v21 = vpop.f32.mrf.mxu1  ;;  %v13169_v11 = vor.u32 %v14332_v59, %v13168_v22  ;;  %v14389_v49 = vld [vmem:[#allocation7 + $0x1730] sm:$0xf0]  ;;  %v13277_v25 = vor.u32 %v14359_v41, %v13276_v61  ;;  %v10026_v42 = vld [vmem:[%s17558_s1 + $0xe8] sm:$0xf0] }
 0x1bc   :  { %v13397_v58 = vor.u32 %v14389_v49, %v13396_v9  ;;  %v15795_v9 = vor.u32 %v13548_v35, %v10024_v18  ;;  %v14356_v18 = vld [vmem:[#allocation7 + $0x1628] sm:$0xf0] }
 0x1bd   :  { %v15765_v6 = vadd.f32 %v6487_v19, %v6459_v1  ;;  %v6432_v24 = vadd.f32 %v6431_v21, %v6403_v8  ;;  %v13532_v1 = vld [vmem:[%s17558_s1 + $0x6c] sm:$0xf]  ;;  %6843 = vmatpush.bf16.msrb.mxu0 %v13169_v11  ;;  %v15791_v8 = vor.u32 %v13547_v50, %v10016_v20  ;;  %6871 = vmatpush.bf16.msrb.mxu1 %v13277_v25  ;;  %v13156_v20 = vld [vmem:[#allocation7 + $0x1548] sm:$0xf]  ;;  %v14329_v50 = vld [vmem:[#allocation7 + $0x1550] sm:$0xf0] }
 0x1be   :  { %6898 = vmatpush.bf16.msrb.mxu2 %v13397_v58  ;;  %17871 = vst [vmem:[#allocation93_spill] sm:$0xff] %v15795_v9  ;;  %v15798_v41 = vor.u32 %v13532_v1, %v10026_v42  ;;  %v13157_v60 = vor.u32 %v14329_v50, %v13156_v20  ;;  %v13492_v25 = vld [vmem:[#allocation7 + $0x17e8] sm:$0xf]  ;;  %v14413_v1 = vld [vmem:[#allocation7 + $0x17f0] sm:$0xf0] }
 0x1bf   :  { %17869 = vst [vmem:[#allocation91_spill] sm:$0xff] %v15791_v8 }
 0x1c0   :  { %17872 = vst [vmem:[#allocation94_spill] sm:$0xff] %v15798_v41 }
 0x1c1   :  { %6844 = vmatpush.bf16.msrb.mxu0 %v13157_v60  ;;  %v13372_v60 = vld [vmem:[#allocation7 + $0x16f8] sm:$0xf] }
 0x1c2   :  { %v6460_v19 = vpop.f32.mrf.mxu2  ;;  %v6501_v59 = vpop.f32.mrf.mxu0 }
 0x1c3   :  { %v6461_v21 = vadd.f32 %v6460_v19, %v6432_v24  ;;  %v6489_v22 = vpop.f32.mrf.mxu3  ;;  %v6502_v49 = vadd.f32 %v6501_v59, %v15639_v62  ;;  %v6530_v61 = vpop.f32.mrf.mxu1  ;;  %v13384_v24 = vld [vmem:[#allocation7 + $0x1710] sm:$0xf]  ;;  %v13264_v62 = vld [vmem:[#allocation7 + $0x1620] sm:$0xf]  ;;  %v13493_v19 = vor.u32 %v14413_v1, %v13492_v25  ;;  %v13252_v1 = vld [vmem:[#allocation7 + $0x1608] sm:$0xf] }
 0x1c4   :  { %v13385_v35 = vor.u32 %v14386_v33, %v13384_v24  ;;  %v13265_v58 = vor.u32 %v14356_v18, %v13264_v62  ;;  %v10144_v24 = vld [vmem:[%s17558_s1 + $0x160] sm:$0xf]  ;;  %v14383_v33 = vld [vmem:[#allocation7 + $0x1700] sm:$0xf0]  ;;  %v10146_v18 = vld [vmem:[%s17558_s1 + $0x1e0] sm:$0xf0] }
 0x1c5   :  { %v15800_v0 = vadd.f32 %v6489_v22, %v6461_v21  ;;  %v6531_v11 = vadd.f32 %v6530_v61, %v6502_v49  ;;  %6732 = vmatmul.bf16.vlgmr.msra.gmra.mxu0 %v15791_v8  ;;  %v13480_v49 = vld [vmem:[#allocation7 + $0x17d0] sm:$0xf]  ;;  %v14410_v61 = vld [vmem:[#allocation7 + $0x17d8] sm:$0xf0]  ;;  %6927 = vmatpush.bf16.msrb.mxu3 %v13493_v19  ;;  %v13373_v25 = vor.u32 %v14383_v33, %v13372_v60  ;;  %v14353_v19 = vld [vmem:[#allocation7 + $0x1610] sm:$0xf0] }
 0x1c6   :  { %6761 = vmatmul.bf16.vlgmr.msra.gmra.mxu1 %v15793_v12  ;;  %6899 = vmatpush.bf16.msrb.mxu2 %v13385_v35  ;;  %v13481_v50 = vor.u32 %v14410_v61, %v13480_v49  ;;  %v13144_v35 = vld [vmem:[#allocation7 + $0x1530] sm:$0xf]  ;;  %v13564_v49 = vld [vmem:[%s17558_s1 + $0x16c] sm:$0xf]  ;;  %v13253_v61 = vor.u32 %v14353_v19, %v13252_v1  ;;  %v13360_v33 = vld [vmem:[#allocation7 + $0x16e0] sm:$0xf] }
 0x1c7   :  { %6790 = vmatmul.bf16.vlgmr.msra.gmra.mxu2 %v15795_v9  ;;  %6872 = vmatpush.bf16.msrb.mxu1 %v13265_v58  ;;  %v14326_v58 = vld [vmem:[#allocation7 + $0x1538] sm:$0xf0]  ;;  %v14404_v1 = vld [vmem:[#allocation7 + $0x17a8] sm:$0xf0] }
 0x1c8   :  { %6819 = vmatmul.bf16.vlgmr.msra.gmra.mxu3 %v15798_v41  ;;  %v10154_v60 = vld [vmem:[%s17558_s1 + $0x1e8] sm:$0xf0] }
 0x1c9   :  { %6928 = vmatpush.bf16.msrb.mxu3 %v13481_v50 }
 0x1ca   :  { %v6559_v42 = vpop.f32.mrf.mxu2  ;;  %v6503_v22 = vpop.f32.mrf.mxu0  ;;  %6900 = vmatpush.bf16.msrb.mxu2 %v13373_v25  ;;  %v13456_v25 = vld [vmem:[#allocation7 + $0x17a0] sm:$0xf] }
 0x1cb   :  { %v6560_v21 = vadd.f32 %v6559_v42, %v6531_v11  ;;  %v6588_v59 = vpop.f32.mrf.mxu3  ;;  %v6504_v41 = vadd.f32 %v6503_v22, %v15674_v14  ;;  %v6532_v20 = vpop.f32.mrf.mxu1  ;;  %v13579_v11 = vld [vmem:[%s17558_s1 + $0x1dc] sm:$0xf0]  ;;  %v13563_v14 = vld [vmem:[%s17558_s1 + $0x164] sm:$0xf]  ;;  %v13145_v42 = vor.u32 %v14326_v58, %v13144_v35  ;;  %v14407_v22 = vld [vmem:[#allocation7 + $0x17c0] sm:$0xf0]  ;;  %6873 = vmatpush.bf16.msrb.mxu1 %v13253_v61 }
 0x1cc   :  { %v14380_v35 = vld [vmem:[#allocation7 + $0x16e8] sm:$0xf0]  ;;  %v15833_v12 = vor.u32 %v13579_v11, %v10144_v24  ;;  %v15835_v55 = vor.u32 %v13563_v14, %v10146_v18  ;;  %v13457_v11 = vor.u32 %v14404_v1, %v13456_v25  ;;  %v14377_v14 = vld [vmem:[#allocation7 + $0x16d0] sm:$0xf0]  ;;  %v13132_v18 = vld [vmem:[#allocation7 + $0x1518] sm:$0xf] }
 0x1cd   :  { %v15807_v9 = vadd.f32 %v6588_v59, %v6560_v21  ;;  %v6533_v62 = vadd.f32 %v6532_v20, %v6504_v41  ;;  %v13468_v21 = vld [vmem:[#allocation7 + $0x17b8] sm:$0xf]  ;;  %6845 = vmatpush.bf16.msrb.mxu0 %v13145_v42  ;;  %v13361_v8 = vor.u32 %v14380_v35, %v13360_v33  ;;  %v15840_v42 = vor.u32 %v13564_v49, %v10154_v60  ;;  %v14401_v49 = vld [vmem:[#allocation7 + $0x1790] sm:$0xf0]  ;;  %v13336_v61 = vld [vmem:[#allocation7 + $0x16b0] sm:$0xf] }
 0x1ce   :  { %v10152_v41 = vld [vmem:[%s17558_s1 + $0x168] sm:$0xf]  ;;  %v13469_v20 = vor.u32 %v14407_v22, %v13468_v21  ;;  %17873 = vst [vmem:[#allocation95_spill] sm:$0xff] %v15833_v12 }
 0x1cf   :  { %v13580_v59 = vld [vmem:[%s17558_s1 + $0x1e4] sm:$0xf0]  ;;  %17874 = vst [vmem:[#allocation96_spill] sm:$0xff] %v15835_v55  ;;  %6901 = vmatpush.bf16.msrb.mxu2 %v13361_v8  ;;  %v14350_v8 = vld [vmem:[#allocation7 + $0x15f8] sm:$0xf0] }
 0x1d0   :  { %v15837_v50 = vor.u32 %v13580_v59, %v10152_v41  ;;  %17876 = vst [vmem:[#allocation98_spill] sm:$0xff] %v15840_v42  ;;  %6929 = vmatpush.bf16.msrb.mxu3 %v13469_v20  ;;  %v14323_v41 = vld [vmem:[#allocation7 + $0x1520] sm:$0xf0]  ;;  %v14374_v20 = vld [vmem:[#allocation7 + $0x16b8] sm:$0xf0] }
 0x1d1   :  { %v13133_v59 = vor.u32 %v14323_v41, %v13132_v18  ;;  %v13337_v35 = vor.u32 %v14374_v20, %v13336_v61  ;;  %v13611_v41 = vld [vmem:[%s17558_s1 + $0x2dc] sm:$0xf0]  ;;  %v14371_v20 = vld [vmem:[#allocation7 + $0x16a0] sm:$0xf0] }
 0x1d2   :  { %v6561_v58 = vpop.f32.mrf.mxu2  ;;  %v6506_v17 = vpop.f32.mrf.mxu0  ;;  %17875 = vst [vmem:[#allocation97_spill] sm:$0xff] %v15837_v50 }
 0x1d3   :  { %v6562_v63 = vadd.f32 %v6561_v58, %v6533_v62  ;;  %v6590_v16 = vpop.f32.mrf.mxu3  ;;  %v6507_v19 = vadd.f32 %v6506_v17, %v15681_v57  ;;  %v6535_v21 = vpop.f32.mrf.mxu1  ;;  %v13348_v62 = vld [vmem:[#allocation7 + $0x16c8] sm:$0xf]  ;;  %v13240_v57 = vld [vmem:[#allocation7 + $0x15f0] sm:$0xf]  ;;  %6846 = vmatpush.bf16.msrb.mxu0 %v13133_v59  ;;  %v13324_v59 = vld [vmem:[#allocation7 + $0x1698] sm:$0xf] }
 0x1d4   :  { %v13349_v17 = vor.u32 %v14377_v14, %v13348_v62  ;;  %6930 = vmatpush.bf16.msrb.mxu3 %v13457_v11  ;;  %v10272_v11 = vld [vmem:[%s17558_s1 + $0x260] sm:$0xf] }
 0x1d5   :  { %v15842_v24 = vadd.f32 %v6590_v16, %v6562_v63  ;;  %v6536_v22 = vadd.f32 %v6535_v21, %v6507_v19  ;;  %6737 = vmatmul.bf16.gmra.mxu0 %v15833_v12  ;;  %v13444_v16 = vld [vmem:[#allocation7 + $0x1788] sm:$0xf]  ;;  %v13241_v63 = vor.u32 %v14350_v8, %v13240_v57  ;;  %v13432_v19 = vld [vmem:[#allocation7 + $0x1770] sm:$0xf]  ;;  %v14398_v21 = vld [vmem:[#allocation7 + $0x1778] sm:$0xf0] }
 0x1d6   :  { %6766 = vmatmul.bf16.gmra.mxu1 %v15835_v55  ;;  %6902 = vmatpush.bf16.msrb.mxu2 %v13349_v17  ;;  %v13445_v33 = vor.u32 %v14401_v49, %v13444_v16  ;;  %v13228_v57 = vld [vmem:[#allocation7 + $0x15d8] sm:$0xf]  ;;  %v14347_v17 = vld [vmem:[#allocation7 + $0x15e0] sm:$0xf0]  ;;  %v10274_v16 = vld [vmem:[%s17558_s1 + $0x2e0] sm:$0xf0] }
 0x1d7   :  { %6795 = vmatmul.bf16.gmra.mxu2 %v15837_v50  ;;  %6874 = vmatpush.bf16.msrb.mxu1 %v13241_v63  ;;  %v13120_v63 = vld [vmem:[#allocation7 + $0x1500] sm:$0xf]  ;;  %v14320_v49 = vld [vmem:[#allocation7 + $0x1508] sm:$0xf0]  ;;  %v13229_v61 = vor.u32 %v14347_v17, %v13228_v57 }
 0x1d8   :  { %6824 = vmatmul.bf16.gmra.mxu3 %v15840_v42  ;;  %v14344_v57 = vld [vmem:[#allocation7 + $0x15c8] sm:$0xf0]  ;;  %v13312_v17 = vld [vmem:[#allocation7 + $0x1680] sm:$0xf] }
 0x1d9   :  { %6931 = vmatpush.bf16.msrb.mxu3 %v13445_v33  ;;  %v13121_v33 = vor.u32 %v14320_v49, %v13120_v63  ;;  %v15875_v63 = vor.u32 %v13611_v41, %v10272_v11 }
 0x1da   :  { %v6564_v60 = vpop.f32.mrf.mxu2  ;;  %v6508_v25 = vpop.f32.mrf.mxu0  ;;  %6903 = vmatpush.bf16.msrb.mxu2 %v13337_v35  ;;  %v13325_v35 = vor.u32 %v14371_v20, %v13324_v59  ;;  %v14368_v20 = vld [vmem:[#allocation7 + $0x1688] sm:$0xf0] }
 0x1db   :  { %v6565_v58 = vadd.f32 %v6564_v60, %v6536_v22  ;;  %v6593_v1 = vpop.f32.mrf.mxu3  ;;  %v6509_v62 = vadd.f32 %v6508_v25, %v15716_v53  ;;  %v6537_v14 = vpop.f32.mrf.mxu1  ;;  %v13433_v22 = vor.u32 %v14398_v21, %v13432_v19  ;;  %v13595_v53 = vld [vmem:[%s17558_s1 + $0x264] sm:$0xf]  ;;  %v10280_v60 = vld [vmem:[%s17558_s1 + $0x268] sm:$0xf]  ;;  %v14395_v25 = vld [vmem:[#allocation7 + $0x1760] sm:$0xf0]  ;;  %6875 = vmatpush.bf16.msrb.mxu1 %v13229_v61  ;;  %6847 = vmatpush.bf16.msrb.mxu0 %v13121_v33 }
 0x1dc   :  { %v13596_v19 = vld [vmem:[%s17558_s1 + $0x26c] sm:$0xf]  ;;  %17877 = vst [vmem:[#allocation99_spill] sm:$0xff] %v15875_v63  ;;  %v15877_v12 = vor.u32 %v13595_v53, %v10274_v16  ;;  %v13313_v61 = vor.u32 %v14368_v20, %v13312_v17  ;;  %v14392_v33 = vld [vmem:[#allocation7 + $0x1748] sm:$0xf0] }
 0x1dd   :  { %v15849_v18 = vadd.f32 %v6593_v1, %v6565_v58  ;;  %v6538_v8 = vadd.f32 %v6537_v14, %v6509_v62  ;;  %v13420_v58 = vld [vmem:[#allocation7 + $0x1758] sm:$0xf]  ;;  %v10282_v21 = vld [vmem:[%s17558_s1 + $0x2e8] sm:$0xf0]  ;;  %6932 = vmatpush.bf16.msrb.mxu3 %v13433_v22  ;;  %v13216_v14 = vld [vmem:[#allocation7 + $0x15c0] sm:$0xf] }
 0x1de   :  { %v13612_v1 = vld [vmem:[%s17558_s1 + $0x2e4] sm:$0xf0]  ;;  %v13421_v62 = vor.u32 %v14395_v25, %v13420_v58  ;;  %6904 = vmatpush.bf16.msrb.mxu2 %v13325_v35  ;;  %v13217_v49 = vor.u32 %v14344_v57, %v13216_v14  ;;  %17878 = vst [vmem:[#allocation100_spill] sm:$0xff] %v15877_v12  ;;  %v13408_v22 = vld [vmem:[#allocation7 + $0x1740] sm:$0xf]  ;;  %v15882_v15 = vor.u32 %v13596_v19, %v10282_v21 }
 0x1df   :  { %v15879_v10 = vor.u32 %v13612_v1, %v10280_v60  ;;  %v13409_v41 = vor.u32 %v14392_v33, %v13408_v22  ;;  %v13668_v53 = vld [vmem:[#allocation7 + $0xac] sm:$0xf]  ;;  %v10518_v16 = vld [vmem:[#allocation7 + $0xb4] sm:$0xf0]  ;;  %v10400_v21 = vld [vmem:[%s17558_s1 + $0x360] sm:$0xf] }
 0x1e0   :  { %17880 = vst [vmem:[#allocation102_spill] sm:$0xff] %v15882_v15  ;;  %6876 = vmatpush.bf16.msrb.mxu1 %v13217_v49  ;;  %v13665_v14 = vld [vmem:[#allocation7 + $0x94] sm:$0xf]  ;;  %v10506_v57 = vld [vmem:[#allocation7 + $0x9c] sm:$0xf0] }
 0x1e1   :  { %17879 = vst [vmem:[#allocation101_spill] sm:$0xff] %v15879_v10  ;;  %6933 = vmatpush.bf16.msrb.mxu3 %v13421_v62  ;;  %v13692_v17 = vld [vmem:[#allocation7 + $0x16c] sm:$0xf]  ;;  %v13627_v49 = vld [vmem:[%s17558_s1 + $0x364] sm:$0xf] }
 0x1e2   :  { %v6566_v59 = vpop.f32.mrf.mxu2  ;;  %v6511_v50 = vpop.f32.mrf.mxu0  ;;  %6905 = vmatpush.bf16.msrb.mxu2 %v13313_v61  ;;  %v10614_v20 = vld [vmem:[#allocation7 + $0x174] sm:$0xf0]  ;;  %v10402_v61 = vld [vmem:[%s17558_s1 + $0x3e0] sm:$0xf0] }
 0x1e3   :  { %v6567_v42 = vadd.f32 %v6566_v59, %v6538_v8  ;;  %v6595_v55 = vpop.f32.mrf.mxu3  ;;  %v6512_v58 = vadd.f32 %v6511_v50, %v15723_v13  ;;  %v6540_v25 = vpop.f32.mrf.mxu1  ;;  %v10521_v13 = vor.u32 %v13668_v53, %v10518_v16  ;;  %v13643_v59 = vld [vmem:[%s17558_s1 + $0x3dc] sm:$0xf0]  ;;  %v10408_v22 = vld [vmem:[%s17558_s1 + $0x368] sm:$0xf] }
 0x1e4   :  { %v13644_v33 = vld [vmem:[%s17558_s1 + $0x3e4] sm:$0xf0]  ;;  %v15917_v53 = vor.u32 %v13643_v59, %v10400_v21  ;;  %v13662_v21 = vld [vmem:[#allocation7 + $0x7c] sm:$0xf] }
 0x1e5   :  { %v15884_v11 = vadd.f32 %v6595_v55, %v6567_v42  ;;  %v6541_v8 = vadd.f32 %v6540_v25, %v6512_v58  ;;  %6742 = vmatmul.bf16.gmra.mxu0 %v15875_v63  ;;  %6934 = vmatpush.bf16.msrb.mxu3 %v13409_v41  ;;  %v10617_v58 = vor.u32 %v13692_v17, %v10614_v20  ;;  %v13628_v25 = vld [vmem:[%s17558_s1 + $0x36c] sm:$0xf]  ;;  %v13689_v17 = vld [vmem:[#allocation7 + $0x154] sm:$0xf] }
 0x1e6   :  { %6771 = vmatmul.bf16.gmra.mxu1 %v15877_v12  ;;  %6956 = vmatpush.bf16.msra.mxu0 %v10521_v13  ;;  %v10410_v41 = vld [vmem:[%s17558_s1 + $0x3e8] sm:$0xf0]  ;;  %17881 = vst [vmem:[#allocation103_spill] sm:$0xff] %v15917_v53 }
 0x1e7   :  { %6800 = vmatmul.bf16.gmra.mxu2 %v15879_v10  ;;  %6985 = vmatpush.bf16.msra.mxu1 %v10617_v58 }
 0x1e8   :  { %6829 = vmatmul.bf16.gmra.mxu3 %v15882_v15 }
 0x1ea   :  { %v6569_v50 = vpop.f32.mrf.mxu2  ;;  %v6513_v42 = vpop.f32.mrf.mxu0 }
 0x1eb   :  { %v6570_v55 = vadd.f32 %v6569_v50, %v6541_v8  ;;  %v6598_v60 = vpop.f32.mrf.mxu3  ;;  %v6514_v35 = vadd.f32 %v6513_v42, %v15758_v7  ;;  %v6542_v1 = vpop.f32.mrf.mxu1  ;;  %v10509_v7 = vor.u32 %v13665_v14, %v10506_v57  ;;  %v15921_v42 = vor.u32 %v13644_v33, %v10408_v22 }
 0x1ed   :  { %v15891_v19 = vadd.f32 %v6598_v60, %v6570_v55  ;;  %v6543_v62 = vadd.f32 %v6542_v1, %v6514_v35  ;;  %6957 = vmatpush.bf16.msra.mxu0 %v10509_v7  ;;  %v15919_v55 = vor.u32 %v13627_v49, %v10402_v61  ;;  %17883 = vst [vmem:[#allocation105_spill] sm:$0xff] %v15921_v42  ;;  %v10602_v49 = vld [vmem:[#allocation7 + $0x15c] sm:$0xf0] }
 0x1ee   :  { %v15924_v1 = vor.u32 %v13628_v25, %v10410_v41  ;;  %v10032_v41 = vld [vmem:[%s17558_s1 + $0x70] sm:$0xf] }
 0x1ef   :  { %17882 = vst [vmem:[#allocation104_spill] sm:$0xff] %v15919_v55 }
 0x1f0   :  { %17884 = vst [vmem:[#allocation106_spill] sm:$0xff] %v15924_v1 }
 0x1f2   :  { %v6571_v8 = vpop.f32.mrf.mxu2  ;;  %v6516_v13 = vpop.f32.mrf.mxu0 }
 0x1f3   :  { %v6572_v16 = vadd.f32 %v6571_v8, %v6543_v62  ;;  %v6600_v50 = vpop.f32.mrf.mxu3  ;;  %v6517_v60 = vadd.f32 %v6516_v13, %v15765_v6  ;;  %v6545_v35 = vpop.f32.mrf.mxu1  ;;  %v10494_v62 = vld [vmem:[#allocation7 + $0x84] sm:$0xf0]  ;;  %v10605_v6 = vor.u32 %v13689_v17, %v10602_v49  ;;  %v13549_v8 = vld [vmem:[%s17558_s1 + $0xec] sm:$0xf0]  ;;  %v13533_v13 = vld [vmem:[%s17558_s1 + $0x74] sm:$0xf] }
 0x1f4   :  { %v10497_v59 = vor.u32 %v13662_v21, %v10494_v62  ;;  %v13686_v21 = vld [vmem:[#allocation7 + $0x13c] sm:$0xf]  ;;  %v10590_v62 = vld [vmem:[#allocation7 + $0x144] sm:$0xf0]  ;;  %v10034_v17 = vld [vmem:[%s17558_s1 + $0xf0] sm:$0xf0] }
 0x1f5   :  { %v15926_v14 = vadd.f32 %v6600_v50, %v6572_v16  ;;  %v6546_v57 = vadd.f32 %v6545_v35, %v6517_v60  ;;  %6747 = vmatmul.bf16.gmra.mxu0 %v15917_v53  ;;  %6986 = vmatpush.bf16.msra.mxu1 %v10605_v6  ;;  %v13659_v50 = vld [vmem:[#allocation7 + $0x64] sm:$0xf]  ;;  %v10482_v60 = vld [vmem:[#allocation7 + $0x6c] sm:$0xf0]  ;;  %v13716_v35 = vld [vmem:[#allocation7 + $0x22c] sm:$0xf] }
 0x1f6   :  { %6776 = vmatmul.bf16.gmra.mxu1 %v15919_v55  ;;  %6958 = vmatpush.bf16.msra.mxu0 %v10497_v59  ;;  %v10040_v59 = vld [vmem:[%s17558_s1 + $0x78] sm:$0xf] }
 0x1f7   :  { %6805 = vmatmul.bf16.gmra.mxu2 %v15921_v42  ;;  %v13550_v49 = vld [vmem:[%s17558_s1 + $0xf4] sm:$0xf0] }
 0x1f8   :  { %6834 = vmatmul.bf16.gmra.mxu3 %v15924_v1  ;;  %v15961_v1 = vor.u32 %v13533_v13, %v10034_v17  ;;  %v10698_v17 = vld [vmem:[#allocation7 + $0x21c] sm:$0xf0] }
 0x1fa   :  { %v6574_v7 = vpop.f32.mrf.mxu2  ;;  %v6518_v61 = vpop.f32.mrf.mxu0  ;;  %17886 = vst [vmem:[#allocation108_spill] sm:$0xff] %v15961_v1 }
 0x1fb   :  { %v6575_v20 = vadd.f32 %v6574_v7, %v6546_v57  ;;  %v6603_v22 = vpop.f32.mrf.mxu3  ;;  %v6519_v33 = vadd.f32 %v6518_v61, %v15800_v0  ;;  %v6547_v58 = vpop.f32.mrf.mxu1  ;;  %v10485_v0 = vor.u32 %v13659_v50, %v10482_v60  ;;  %v10710_v57 = vld [vmem:[#allocation7 + $0x234] sm:$0xf0]  ;;  %v10593_v7 = vor.u32 %v13686_v21, %v10590_v62  ;;  %v10042_v61 = vld [vmem:[%s17558_s1 + $0xf8] sm:$0xf0] }
 0x1fc   :  { %v10713_v6 = vor.u32 %v13716_v35, %v10710_v57  ;;  %v15963_v35 = vor.u32 %v13550_v49, %v10040_v59  ;;  %v10578_v59 = vld [vmem:[#allocation7 + $0x12c] sm:$0xf0] }
 0x1fd   :  { %v15933_v25 = vadd.f32 %v6603_v22, %v6575_v20  ;;  %v6548_v16 = vadd.f32 %v6547_v58, %v6519_v33  ;;  %v13534_v20 = vld [vmem:[%s17558_s1 + $0x7c] sm:$0xf]  ;;  %6959 = vmatpush.bf16.msra.mxu0 %v10485_v0  ;;  %v15959_v33 = vor.u32 %v13549_v8, %v10032_v41  ;;  %6987 = vmatpush.bf16.msra.mxu1 %v10593_v7  ;;  %v10470_v8 = vld [vmem:[#allocation7 + $0x54] sm:$0xf0] }
 0x1fe   :  { %7014 = vmatpush.bf16.msra.mxu2 %v10713_v6  ;;  %17887 = vst [vmem:[#allocation109_spill] sm:$0xff] %v15963_v35  ;;  %v15966_v62 = vor.u32 %v13534_v20, %v10042_v61  ;;  %v13656_v41 = vld [vmem:[#allocation7 + $0x4c] sm:$0xf]  ;;  %v10806_v20 = vld [vmem:[#allocation7 + $0x2f4] sm:$0xf0] }
 0x1ff   :  { %17885 = vst [vmem:[#allocation107_spill] sm:$0xff] %v15959_v33  ;;  %v10473_v13 = vor.u32 %v13656_v41, %v10470_v8  ;;  %v13740_v7 = vld [vmem:[#allocation7 + $0x2ec] sm:$0xf] }
 0x200   :  { %17888 = vst [vmem:[#allocation110_spill] sm:$0xff] %v15966_v62 }
 0x201   :  { %6960 = vmatpush.bf16.msra.mxu0 %v10473_v13  ;;  %v13710_v13 = vld [vmem:[#allocation7 + $0x1fc] sm:$0xf] }
 0x202   :  { %v6576_v22 = vpop.f32.mrf.mxu2  ;;  %v6617_v60 = vpop.f32.mrf.mxu0 }
 0x203   :  { %v6577_v58 = vadd.f32 %v6576_v22, %v6548_v16  ;;  %v6605_v50 = vpop.f32.mrf.mxu3  ;;  %v6618_v57 = vadd.f32 %v6617_v60, %v15807_v9  ;;  %v6646_v21 = vpop.f32.mrf.mxu1  ;;  %v13713_v16 = vld [vmem:[#allocation7 + $0x214] sm:$0xf]  ;;  %v13683_v9 = vld [vmem:[#allocation7 + $0x124] sm:$0xf]  ;;  %v10809_v22 = vor.u32 %v13740_v7, %v10806_v20  ;;  %v13680_v20 = vld [vmem:[#allocation7 + $0x10c] sm:$0xf] }
 0x204   :  { %v10701_v49 = vor.u32 %v13713_v16, %v10698_v17  ;;  %v10581_v6 = vor.u32 %v13683_v9, %v10578_v59  ;;  %v10160_v16 = vld [vmem:[%s17558_s1 + $0x170] sm:$0xf]  ;;  %v10686_v17 = vld [vmem:[#allocation7 + $0x204] sm:$0xf0]  ;;  %v10162_v59 = vld [vmem:[%s17558_s1 + $0x1f0] sm:$0xf0] }
 0x205   :  { %v15968_v42 = vadd.f32 %v6605_v50, %v6577_v58  ;;  %v6647_v0 = vadd.f32 %v6646_v21, %v6618_v57  ;;  %6848 = vmatmul.bf16.vlgmr.msrb.gmra.mxu0 %v15959_v33  ;;  %v13737_v57 = vld [vmem:[#allocation7 + $0x2d4] sm:$0xf]  ;;  %v10794_v21 = vld [vmem:[#allocation7 + $0x2dc] sm:$0xf0]  ;;  %7043 = vmatpush.bf16.msra.mxu3 %v10809_v22  ;;  %v10689_v7 = vor.u32 %v13710_v13, %v10686_v17  ;;  %v10566_v22 = vld [vmem:[#allocation7 + $0x114] sm:$0xf0] }
 0x206   :  { %6877 = vmatmul.bf16.vlgmr.msrb.gmra.mxu1 %v15961_v1  ;;  %7015 = vmatpush.bf16.msra.mxu2 %v10701_v49  ;;  %v10797_v8 = vor.u32 %v13737_v57, %v10794_v21  ;;  %v13653_v49 = vld [vmem:[#allocation7 + $0x34] sm:$0xf]  ;;  %v13566_v57 = vld [vmem:[%s17558_s1 + $0x17c] sm:$0xf]  ;;  %v10569_v21 = vor.u32 %v13680_v20, %v10566_v22  ;;  %v13707_v17 = vld [vmem:[#allocation7 + $0x1e4] sm:$0xf] }
 0x207   :  { %6906 = vmatmul.bf16.vlgmr.msrb.gmra.mxu2 %v15963_v35  ;;  %6988 = vmatpush.bf16.msra.mxu1 %v10581_v6  ;;  %v10458_v6 = vld [vmem:[#allocation7 + $0x3c] sm:$0xf0]  ;;  %v10170_v13 = vld [vmem:[%s17558_s1 + $0x1f8] sm:$0xf0]  ;;  %v10770_v20 = vld [vmem:[#allocation7 + $0x2ac] sm:$0xf0] }
 0x208   :  { %6935 = vmatmul.bf16.vlgmr.msrb.gmra.mxu3 %v15966_v62 }
 0x209   :  { %7044 = vmatpush.bf16.msra.mxu3 %v10797_v8 }
 0x20a   :  { %v6675_v61 = vpop.f32.mrf.mxu2  ;;  %v6619_v50 = vpop.f32.mrf.mxu0  ;;  %7016 = vmatpush.bf16.msra.mxu2 %v10689_v7  ;;  %v13731_v7 = vld [vmem:[#allocation7 + $0x2a4] sm:$0xf] }
 0x20b   :  { %v6676_v58 = vadd.f32 %v6675_v61, %v6647_v0  ;;  %v6704_v60 = vpop.f32.mrf.mxu3  ;;  %v6620_v62 = vadd.f32 %v6619_v50, %v15842_v24  ;;  %v6648_v41 = vpop.f32.mrf.mxu1  ;;  %v13581_v0 = vld [vmem:[%s17558_s1 + $0x1ec] sm:$0xf0]  ;;  %v13565_v24 = vld [vmem:[%s17558_s1 + $0x174] sm:$0xf]  ;;  %v10461_v61 = vor.u32 %v13653_v49, %v10458_v6  ;;  %v10782_v50 = vld [vmem:[#allocation7 + $0x2c4] sm:$0xf0]  ;;  %6989 = vmatpush.bf16.msra.mxu1 %v10569_v21 }
 0x20c   :  { %v10674_v49 = vld [vmem:[#allocation7 + $0x1ec] sm:$0xf0]  ;;  %v16001_v1 = vor.u32 %v13581_v0, %v10160_v16  ;;  %v16003_v10 = vor.u32 %v13565_v24, %v10162_v59  ;;  %v10773_v0 = vor.u32 %v13731_v7, %v10770_v20  ;;  %v10662_v24 = vld [vmem:[#allocation7 + $0x1d4] sm:$0xf0]  ;;  %v13650_v59 = vld [vmem:[#allocation7 + $0x1c] sm:$0xf] }
 0x20d   :  { %v15975_v35 = vadd.f32 %v6704_v60, %v6676_v58  ;;  %v6649_v9 = vadd.f32 %v6648_v41, %v6620_v62  ;;  %v13734_v58 = vld [vmem:[#allocation7 + $0x2bc] sm:$0xf]  ;;  %v10168_v62 = vld [vmem:[%s17558_s1 + $0x178] sm:$0xf]  ;;  %6961 = vmatpush.bf16.msra.mxu0 %v10461_v61  ;;  %v10677_v33 = vor.u32 %v13707_v17, %v10674_v49  ;;  %v16008_v61 = vor.u32 %v13566_v57, %v10170_v13  ;;  %v10758_v57 = vld [vmem:[#allocation7 + $0x294] sm:$0xf0] }
 0x20e   :  { %v13582_v60 = vld [vmem:[%s17558_s1 + $0x1f4] sm:$0xf0]  ;;  %v10785_v41 = vor.u32 %v13734_v58, %v10782_v50  ;;  %17889 = vst [vmem:[#allocation111_spill] sm:$0xff] %v16001_v1  ;;  %v13701_v21 = vld [vmem:[#allocation7 + $0x1b4] sm:$0xf] }
 0x20f   :  { %17890 = vst [vmem:[#allocation112_spill] sm:$0xff] %v16003_v10  ;;  %v16005_v8 = vor.u32 %v13582_v60, %v10168_v62  ;;  %7017 = vmatpush.bf16.msra.mxu2 %v10677_v33  ;;  %v10446_v62 = vld [vmem:[#allocation7 + $0x24] sm:$0xf0]  ;;  %v10554_v33 = vld [vmem:[#allocation7 + $0xfc] sm:$0xf0] }
 0x210   :  { %17892 = vst [vmem:[#allocation114_spill] sm:$0xff] %v16008_v61  ;;  %7045 = vmatpush.bf16.msra.mxu3 %v10785_v41  ;;  %v10449_v60 = vor.u32 %v13650_v59, %v10446_v62  ;;  %v10650_v41 = vld [vmem:[#allocation7 + $0x1bc] sm:$0xf0] }
 0x211   :  { %17891 = vst [vmem:[#allocation113_spill] sm:$0xff] %v16005_v8  ;;  %v10653_v49 = vor.u32 %v13701_v21, %v10650_v41  ;;  %v13613_v62 = vld [vmem:[%s17558_s1 + $0x2ec] sm:$0xf0]  ;;  %v10638_v41 = vld [vmem:[#allocation7 + $0x1a4] sm:$0xf0] }
 0x212   :  { %v6677_v6 = vpop.f32.mrf.mxu2  ;;  %v6622_v53 = vpop.f32.mrf.mxu0  ;;  %6962 = vmatpush.bf16.msra.mxu0 %v10449_v60  ;;  %v13698_v60 = vld [vmem:[#allocation7 + $0x19c] sm:$0xf] }
 0x213   :  { %v6678_v55 = vadd.f32 %v6677_v6, %v6649_v9  ;;  %v6706_v15 = vpop.f32.mrf.mxu3  ;;  %v6623_v22 = vadd.f32 %v6622_v53, %v15849_v18  ;;  %v6651_v58 = vpop.f32.mrf.mxu1  ;;  %v13704_v9 = vld [vmem:[#allocation7 + $0x1cc] sm:$0xf]  ;;  %v13677_v18 = vld [vmem:[#allocation7 + $0xf4] sm:$0xf] }
 0x214   :  { %v10665_v53 = vor.u32 %v13704_v9, %v10662_v24  ;;  %7046 = vmatpush.bf16.msra.mxu3 %v10773_v0  ;;  %v10288_v0 = vld [vmem:[%s17558_s1 + $0x270] sm:$0xf] }
 0x215   :  { %v16010_v16 = vadd.f32 %v6706_v15, %v6678_v55  ;;  %v6652_v50 = vadd.f32 %v6651_v58, %v6623_v22  ;;  %6853 = vmatmul.bf16.gmra.mxu0 %v16001_v1  ;;  %v13728_v15 = vld [vmem:[#allocation7 + $0x28c] sm:$0xf]  ;;  %v10557_v55 = vor.u32 %v13677_v18, %v10554_v33  ;;  %v13725_v22 = vld [vmem:[#allocation7 + $0x274] sm:$0xf]  ;;  %v10746_v58 = vld [vmem:[#allocation7 + $0x27c] sm:$0xf0] }
 0x216   :  { %6882 = vmatmul.bf16.gmra.mxu1 %v16003_v10  ;;  %7018 = vmatpush.bf16.msra.mxu2 %v10665_v53  ;;  %v10761_v17 = vor.u32 %v13728_v15, %v10758_v57  ;;  %v13674_v18 = vld [vmem:[#allocation7 + $0xdc] sm:$0xf]  ;;  %v10542_v53 = vld [vmem:[#allocation7 + $0xe4] sm:$0xf0]  ;;  %v10290_v15 = vld [vmem:[%s17558_s1 + $0x2f0] sm:$0xf0] }
 0x217   :  { %6911 = vmatmul.bf16.gmra.mxu2 %v16005_v8  ;;  %6990 = vmatpush.bf16.msra.mxu1 %v10557_v55  ;;  %v13647_v55 = vld [vmem:[#allocation7 + $0x4] sm:$0xf]  ;;  %v10434_v57 = vld [vmem:[#allocation7 + $0xc] sm:$0xf0]  ;;  %v10545_v21 = vor.u32 %v13674_v18, %v10542_v53 }
 0x218   :  { %6940 = vmatmul.bf16.gmra.mxu3 %v16008_v61  ;;  %v10530_v18 = vld [vmem:[#allocation7 + $0xcc] sm:$0xf0]  ;;  %v13695_v53 = vld [vmem:[#allocation7 + $0x184] sm:$0xf] }
 0x219   :  { %7047 = vmatpush.bf16.msra.mxu3 %v10761_v17  ;;  %v10437_v17 = vor.u32 %v13647_v55, %v10434_v57  ;;  %v16043_v55 = vor.u32 %v13613_v62, %v10288_v0 }
 0x21a   :  { %v6680_v13 = vpop.f32.mrf.mxu2  ;;  %v6624_v7 = vpop.f32.mrf.mxu0  ;;  %7019 = vmatpush.bf16.msra.mxu2 %v10653_v49  ;;  %v10641_v49 = vor.u32 %v13698_v60, %v10638_v41  ;;  %v10626_v41 = vld [vmem:[#allocation7 + $0x18c] sm:$0xf0] }
 0x21b   :  { %v6681_v6 = vadd.f32 %v6680_v13, %v6652_v50  ;;  %v6709_v20 = vpop.f32.mrf.mxu3  ;;  %v6625_v9 = vadd.f32 %v6624_v7, %v15884_v11  ;;  %v6653_v24 = vpop.f32.mrf.mxu1  ;;  %v10749_v50 = vor.u32 %v13725_v22, %v10746_v58  ;;  %v13597_v11 = vld [vmem:[%s17558_s1 + $0x274] sm:$0xf]  ;;  %v10296_v13 = vld [vmem:[%s17558_s1 + $0x278] sm:$0xf]  ;;  %v13598_v22 = vld [vmem:[%s17558_s1 + $0x27c] sm:$0xf]  ;;  %6991 = vmatpush.bf16.msra.mxu1 %v10545_v21  ;;  %6963 = vmatpush.bf16.msra.mxu0 %v10437_v17 }
 0x21c   :  { %v10734_v7 = vld [vmem:[#allocation7 + $0x264] sm:$0xf0]  ;;  %v10298_v58 = vld [vmem:[%s17558_s1 + $0x2f8] sm:$0xf0]  ;;  %v16045_v1 = vor.u32 %v13597_v11, %v10290_v15  ;;  %v10629_v21 = vor.u32 %v13695_v53, %v10626_v41  ;;  %v10722_v17 = vld [vmem:[#allocation7 + $0x24c] sm:$0xf0] }
 0x21d   :  { %v16017_v59 = vadd.f32 %v6709_v20, %v6681_v6  ;;  %v6654_v33 = vadd.f32 %v6653_v24, %v6625_v9  ;;  %v13722_v6 = vld [vmem:[#allocation7 + $0x25c] sm:$0xf]  ;;  %v13614_v20 = vld [vmem:[%s17558_s1 + $0x2f4] sm:$0xf0]  ;;  %7048 = vmatpush.bf16.msra.mxu3 %v10749_v50  ;;  %v13671_v24 = vld [vmem:[#allocation7 + $0xc4] sm:$0xf]  ;;  %v16050_v63 = vor.u32 %v13598_v22, %v10298_v58 }
 0x21e   :  { %v10737_v9 = vor.u32 %v13722_v6, %v10734_v7  ;;  %7020 = vmatpush.bf16.msra.mxu2 %v10641_v49  ;;  %v10533_v57 = vor.u32 %v13671_v24, %v10530_v18  ;;  %v16047_v12 = vor.u32 %v13614_v20, %v10296_v13  ;;  %v13719_v50 = vld [vmem:[#allocation7 + $0x244] sm:$0xf]  ;;  %v13764_v11 = vld [vmem:[#allocation7 + $0x3ac] sm:$0xf]  ;;  %v10902_v15 = vld [vmem:[#allocation7 + $0x3b4] sm:$0xf0] }
 0x21f   :  { %v10725_v62 = vor.u32 %v13719_v50, %v10722_v17  ;;  %v10416_v58 = vld [vmem:[%s17558_s1 + $0x370] sm:$0xf]  ;;  %v13761_v24 = vld [vmem:[#allocation7 + $0x394] sm:$0xf]  ;;  %v13788_v53 = vld [vmem:[#allocation7 + $0x46c] sm:$0xf] }
 0x220   :  { %6992 = vmatpush.bf16.msra.mxu1 %v10533_v57  ;;  %v10890_v18 = vld [vmem:[#allocation7 + $0x39c] sm:$0xf0]  ;;  %v13629_v57 = vld [vmem:[%s17558_s1 + $0x374] sm:$0xf]  ;;  %v10998_v41 = vld [vmem:[#allocation7 + $0x474] sm:$0xf0] }
 0x221   :  { %7049 = vmatpush.bf16.msra.mxu3 %v10737_v9  ;;  %v10424_v50 = vld [vmem:[%s17558_s1 + $0x378] sm:$0xf] }
 0x222   :  { %v6682_v60 = vpop.f32.mrf.mxu2  ;;  %v6627_v8 = vpop.f32.mrf.mxu0  ;;  %7021 = vmatpush.bf16.msra.mxu2 %v10629_v21  ;;  %v10418_v21 = vld [vmem:[%s17558_s1 + $0x3f0] sm:$0xf0]  ;;  %v13646_v17 = vld [vmem:[%s17558_s1 + $0x3f4] sm:$0xf0] }
 0x223   :  { %v6683_v61 = vadd.f32 %v6682_v60, %v6654_v33  ;;  %v6711_v10 = vpop.f32.mrf.mxu3  ;;  %v6628_v6 = vadd.f32 %v6627_v8, %v15891_v19  ;;  %v6656_v7 = vpop.f32.mrf.mxu1  ;;  %v10905_v19 = vor.u32 %v13764_v11, %v10902_v15  ;;  %v13645_v60 = vld [vmem:[%s17558_s1 + $0x3ec] sm:$0xf0] }
 0x224   :  { %v16085_v11 = vor.u32 %v13645_v60, %v10416_v58  ;;  %v13758_v58 = vld [vmem:[#allocation7 + $0x37c] sm:$0xf] }
 0x225   :  { %v16052_v0 = vadd.f32 %v6711_v10, %v6683_v61  ;;  %v6657_v33 = vadd.f32 %v6656_v7, %v6628_v6  ;;  %6858 = vmatmul.bf16.gmra.mxu0 %v16043_v55  ;;  %7050 = vmatpush.bf16.msra.mxu3 %v10725_v62  ;;  %v11001_v6 = vor.u32 %v13788_v53, %v10998_v41  ;;  %v13630_v7 = vld [vmem:[%s17558_s1 + $0x37c] sm:$0xf]  ;;  %v13785_v53 = vld [vmem:[#allocation7 + $0x454] sm:$0xf] }
 0x226   :  { %6887 = vmatmul.bf16.gmra.mxu1 %v16045_v1  ;;  %7072 = vmatpush.bf16.msrb.mxu0 %v10905_v19  ;;  %v10426_v62 = vld [vmem:[%s17558_s1 + $0x3f8] sm:$0xf0] }
 0x227   :  { %6916 = vmatmul.bf16.gmra.mxu2 %v16047_v12  ;;  %7101 = vmatpush.bf16.msrb.mxu1 %v11001_v6 }
 0x228   :  { %6945 = vmatmul.bf16.gmra.mxu3 %v16050_v63 }
 0x22a   :  { %v6685_v8 = vpop.f32.mrf.mxu2  ;;  %v6629_v61 = vpop.f32.mrf.mxu0 }
 0x22b   :  { %v6686_v10 = vadd.f32 %v6685_v8, %v6657_v33  ;;  %v6714_v13 = vpop.f32.mrf.mxu3  ;;  %v6630_v49 = vadd.f32 %v6629_v61, %v15926_v14  ;;  %v6658_v20 = vpop.f32.mrf.mxu1  ;;  %v10893_v14 = vor.u32 %v13761_v24, %v10890_v18  ;;  %v16089_v61 = vor.u32 %v13646_v17, %v10424_v50 }
 0x22d   :  { %v16059_v22 = vadd.f32 %v6714_v13, %v6686_v10  ;;  %v6659_v9 = vadd.f32 %v6658_v20, %v6630_v49  ;;  %7073 = vmatpush.bf16.msrb.mxu0 %v10893_v14  ;;  %v16087_v10 = vor.u32 %v13629_v57, %v10418_v21  ;;  %v16092_v20 = vor.u32 %v13630_v7, %v10426_v62  ;;  %v10986_v57 = vld [vmem:[#allocation7 + $0x45c] sm:$0xf0] }
 0x232   :  { %v6687_v33 = vpop.f32.mrf.mxu2  ;;  %v6632_v19 = vpop.f32.mrf.mxu0 }
 0x233   :  { %v6688_v15 = vadd.f32 %v6687_v33, %v6659_v9  ;;  %v6716_v8 = vpop.f32.mrf.mxu3  ;;  %v6633_v13 = vadd.f32 %v6632_v19, %v15933_v25  ;;  %v6661_v49 = vpop.f32.mrf.mxu1  ;;  %v10878_v9 = vld [vmem:[#allocation7 + $0x384] sm:$0xf0]  ;;  %v10989_v25 = vor.u32 %v13785_v53, %v10986_v57  ;;  %v13755_v33 = vld [vmem:[#allocation7 + $0x364] sm:$0xf]  ;;  %v13812_v19 = vld [vmem:[#allocation7 + $0x52c] sm:$0xf] }
 0x234   :  { %v10881_v60 = vor.u32 %v13758_v58, %v10878_v9  ;;  %v10974_v58 = vld [vmem:[#allocation7 + $0x444] sm:$0xf0] }
 0x235   :  { %v16094_v24 = vadd.f32 %v6716_v8, %v6688_v15  ;;  %v6662_v18 = vadd.f32 %v6661_v49, %v6633_v13  ;;  %6863 = vmatmul.bf16.gmra.mxu0 %v16085_v11  ;;  %7102 = vmatpush.bf16.msrb.mxu1 %v10989_v25  ;;  %v10866_v15 = vld [vmem:[#allocation7 + $0x36c] sm:$0xf0]  ;;  %v11094_v13 = vld [vmem:[#allocation7 + $0x534] sm:$0xf0]  ;;  %v13782_v49 = vld [vmem:[#allocation7 + $0x43c] sm:$0xf] }
 0x236   :  { %6892 = vmatmul.bf16.gmra.mxu1 %v16087_v10  ;;  %7074 = vmatpush.bf16.msrb.mxu0 %v10881_v60  ;;  %v10869_v8 = vor.u32 %v13755_v33, %v10866_v15  ;;  %v11097_v9 = vor.u32 %v13812_v19, %v11094_v13  ;;  %v10977_v53 = vor.u32 %v13782_v49, %v10974_v58  ;;  %v11082_v33 = vld [vmem:[#allocation7 + $0x51c] sm:$0xf0]  ;;  %v13779_v15 = vld [vmem:[#allocation7 + $0x424] sm:$0xf]  ;;  %v10962_v19 = vld [vmem:[#allocation7 + $0x42c] sm:$0xf0] }
 0x237   :  { %6921 = vmatmul.bf16.gmra.mxu2 %v16089_v61  ;;  %v13836_v13 = vld [vmem:[#allocation7 + $0x5ec] sm:$0xf]  ;;  %v11190_v49 = vld [vmem:[#allocation7 + $0x5f4] sm:$0xf0] }
 0x238   :  { %6950 = vmatmul.bf16.gmra.mxu3 %v16092_v20  ;;  %7130 = vmatpush.bf16.msrb.mxu2 %v11097_v9  ;;  %v11193_v9 = vor.u32 %v13836_v13, %v11190_v49 }
 0x239   :  { %7103 = vmatpush.bf16.msrb.mxu1 %v10977_v53 }
 0x23a   :  { %v6690_v14 = vpop.f32.mrf.mxu2  ;;  %v6634_v21 = vpop.f32.mrf.mxu0  ;;  %7075 = vmatpush.bf16.msrb.mxu0 %v10869_v8  ;;  %v10965_v8 = vor.u32 %v13779_v15, %v10962_v19  ;;  %7159 = vmatpush.bf16.msrb.mxu3 %v11193_v9  ;;  %v13749_v19 = vld [vmem:[#allocation7 + $0x334] sm:$0xf]  ;;  %v13803_v9 = vld [vmem:[#allocation7 + $0x4e4] sm:$0xf] }
 0x23b   :  { %v6691_v41 = vadd.f32 %v6690_v14, %v6662_v18  ;;  %v6719_v50 = vpop.f32.mrf.mxu3  ;;  %v6635_v17 = vadd.f32 %v6634_v21, %v15968_v42  ;;  %v6663_v6 = vpop.f32.mrf.mxu1 }
 0x23d   :  { %v16101_v7 = vadd.f32 %v6719_v50, %v6691_v41  ;;  %v6664_v62 = vadd.f32 %v6663_v6, %v6635_v17  ;;  %v13752_v50 = vld [vmem:[#allocation7 + $0x34c] sm:$0xf]  ;;  %v10854_v17 = vld [vmem:[#allocation7 + $0x354] sm:$0xf0]  ;;  %v13809_v6 = vld [vmem:[#allocation7 + $0x514] sm:$0xf]  ;;  %7104 = vmatpush.bf16.msrb.mxu1 %v10965_v8 }
 0x23e   :  { %v11166_v8 = vld [vmem:[#allocation7 + $0x5c4] sm:$0xf0] }
 0x242   :  { %v6692_v18 = vpop.f32.mrf.mxu2  ;;  %v6733_v42 = vpop.f32.mrf.mxu0 }
 0x243   :  { %v6693_v60 = vadd.f32 %v6692_v18, %v6664_v62  ;;  %v6721_v57 = vpop.f32.mrf.mxu3  ;;  %v6734_v25 = vadd.f32 %v6733_v42, %v15975_v35  ;;  %v6762_v14 = vpop.f32.mrf.mxu1  ;;  %v10857_v62 = vor.u32 %v13752_v50, %v10854_v17  ;;  %v11085_v35 = vor.u32 %v13809_v6, %v11082_v33  ;;  %v11178_v42 = vld [vmem:[#allocation7 + $0x5dc] sm:$0xf0]  ;;  %v13806_v6 = vld [vmem:[#allocation7 + $0x4fc] sm:$0xf]  ;;  %v11070_v33 = vld [vmem:[#allocation7 + $0x504] sm:$0xf0] }
 0x244   :  { %v11073_v13 = vor.u32 %v13806_v6, %v11070_v33  ;;  %v11154_v6 = vld [vmem:[#allocation7 + $0x5ac] sm:$0xf0] }
 0x245   :  { %v16104_v41 = vadd.f32 %v6721_v57, %v6693_v60  ;;  %v6763_v21 = vadd.f32 %v6762_v14, %v6734_v25  ;;  %6964 = vmatmul.bf16.vlgmr.msra.gmra.mxu0 %v14831_v46  ;;  %7131 = vmatpush.bf16.msrb.mxu2 %v11085_v35  ;;  %v13833_v57 = vld [vmem:[#allocation7 + $0x5d4] sm:$0xf]  ;;  %v13830_v35 = vld [vmem:[#allocation7 + $0x5bc] sm:$0xf] }
 0x246   :  { %6993 = vmatmul.bf16.vlgmr.msra.gmra.mxu1 %v14833_v51  ;;  %7076 = vmatpush.bf16.msrb.mxu0 %v10857_v62  ;;  %v11181_v50 = vor.u32 %v13833_v57, %v11178_v42  ;;  %v10842_v62 = vld [vmem:[#allocation7 + $0x33c] sm:$0xf0] }
 0x247   :  { %7022 = vmatmul.bf16.vlgmr.msra.gmra.mxu2 %v14835_v52  ;;  %v10845_v49 = vor.u32 %v13749_v19, %v10842_v62 }
 0x248   :  { %7051 = vmatmul.bf16.vlgmr.msra.gmra.mxu3 %v14837_v56 }
 0x249   :  { %7160 = vmatpush.bf16.msrb.mxu3 %v11181_v50  ;;  %7132 = vmatpush.bf16.msrb.mxu2 %v11073_v13  ;;  %v13800_v13 = vld [vmem:[#allocation7 + $0x4cc] sm:$0xf] }
 0x24a   :  { %v6791_v58 = vpop.f32.mrf.mxu2  ;;  %v6735_v18 = vpop.f32.mrf.mxu0  ;;  %7077 = vmatpush.bf16.msrb.mxu0 %v10845_v49 }
 0x24b   :  { %v6792_v53 = vadd.f32 %v6791_v58, %v6763_v21  ;;  %v6820_v60 = vpop.f32.mrf.mxu3  ;;  %v6736_v25 = vadd.f32 %v6735_v18, %v16010_v16  ;;  %v6764_v14 = vpop.f32.mrf.mxu1  ;;  %v13776_v21 = vld [vmem:[#allocation7 + $0x40c] sm:$0xf]  ;;  %v10950_v58 = vld [vmem:[#allocation7 + $0x414] sm:$0xf0]  ;;  %v11169_v16 = vor.u32 %v13830_v35, %v11166_v8  ;;  %v11058_v18 = vld [vmem:[#allocation7 + $0x4ec] sm:$0xf0] }
 0x24c   :  { %v10953_v56 = vor.u32 %v13776_v21, %v10950_v58  ;;  %v11046_v21 = vld [vmem:[#allocation7 + $0x4d4] sm:$0xf0]  ;;  %v10830_v58 = vld [vmem:[#allocation7 + $0x324] sm:$0xf0]  ;;  %v13773_v35 = vld [vmem:[#allocation7 + $0x3f4] sm:$0xf] }
 0x24d   :  { %v16111_v17 = vadd.f32 %v6820_v60, %v6792_v53  ;;  %v6765_v15 = vadd.f32 %v6764_v14, %v6736_v25  ;;  %v11061_v60 = vor.u32 %v13803_v9, %v11058_v18  ;;  %v13827_v14 = vld [vmem:[#allocation7 + $0x5a4] sm:$0xf]  ;;  %7161 = vmatpush.bf16.msrb.mxu3 %v11169_v16  ;;  %v10938_v8 = vld [vmem:[#allocation7 + $0x3fc] sm:$0xf0]  ;;  %v13824_v16 = vld [vmem:[#allocation7 + $0x58c] sm:$0xf] }
 0x24e   :  { %7105 = vmatpush.bf16.msrb.mxu1 %v10953_v56  ;;  %v11157_v62 = vor.u32 %v13827_v14, %v11154_v6  ;;  %v11049_v56 = vor.u32 %v13800_v13, %v11046_v21  ;;  %v11142_v9 = vld [vmem:[#allocation7 + $0x594] sm:$0xf0]  ;;  %v10941_v18 = vor.u32 %v13773_v35, %v10938_v8  ;;  %v11130_v13 = vld [vmem:[#allocation7 + $0x57c] sm:$0xf0]  ;;  %v10926_v35 = vld [vmem:[#allocation7 + $0x3e4] sm:$0xf0] }
 0x24f   :  { %7133 = vmatpush.bf16.msrb.mxu2 %v11061_v60  ;;  %v13797_v60 = vld [vmem:[#allocation7 + $0x4b4] sm:$0xf]  ;;  %v13794_v8 = vld [vmem:[#allocation7 + $0x49c] sm:$0xf] }
 0x251   :  { %7162 = vmatpush.bf16.msrb.mxu3 %v11157_v62 }
 0x252   :  { %v6793_v53 = vpop.f32.mrf.mxu2  ;;  %v6738_v42 = vpop.f32.mrf.mxu0  ;;  %7106 = vmatpush.bf16.msrb.mxu1 %v10941_v18 }
 0x253   :  { %v6794_v57 = vadd.f32 %v6793_v53, %v6765_v15  ;;  %v6822_v25 = vpop.f32.mrf.mxu3  ;;  %v6739_v33 = vadd.f32 %v6738_v42, %v16017_v59  ;;  %v6767_v19 = vpop.f32.mrf.mxu1  ;;  %v13746_v15 = vld [vmem:[#allocation7 + $0x31c] sm:$0xf]  ;;  %7134 = vmatpush.bf16.msrb.mxu2 %v11049_v56  ;;  %v11145_v53 = vor.u32 %v13824_v16, %v11142_v9  ;;  %v10818_v9 = vld [vmem:[#allocation7 + $0x30c] sm:$0xf0] }
 0x254   :  { %v10833_v59 = vor.u32 %v13746_v15, %v10830_v58  ;;  %v13770_v58 = vld [vmem:[#allocation7 + $0x3dc] sm:$0xf] }
 0x255   :  { %v16114_v50 = vadd.f32 %v6822_v25, %v6794_v57  ;;  %v6768_v49 = vadd.f32 %v6767_v19, %v6739_v33  ;;  %6969 = vmatmul.bf16.gmra.mxu0 %v14867_v40  ;;  %v11034_v57 = vld [vmem:[#allocation7 + $0x4bc] sm:$0xf0]  ;;  %v13821_v19 = vld [vmem:[#allocation7 + $0x574] sm:$0xf]  ;;  %7163 = vmatpush.bf16.msrb.mxu3 %v11145_v53  ;;  %v13791_v53 = vld [vmem:[#allocation7 + $0x484] sm:$0xf] }
 0x256   :  { %6998 = vmatmul.bf16.gmra.mxu1 %v14869_v45  ;;  %7078 = vmatpush.bf16.msrb.mxu0 %v10833_v59  ;;  %v11037_v25 = vor.u32 %v13797_v60, %v11034_v57  ;;  %v11133_v62 = vor.u32 %v13821_v19, %v11130_v13  ;;  %v13743_v59 = vld [vmem:[#allocation7 + $0x304] sm:$0xf]  ;;  %v11022_v60 = vld [vmem:[#allocation7 + $0x4a4] sm:$0xf0]  ;;  %v11010_v19 = vld [vmem:[#allocation7 + $0x48c] sm:$0xf0] }
 0x257   :  { %7027 = vmatmul.bf16.gmra.mxu2 %v14871_v47  ;;  %v10821_v57 = vor.u32 %v13743_v59, %v10818_v9  ;;  %v11025_v18 = vor.u32 %v13794_v8, %v11022_v60  ;;  %v11106_v59 = vld [vmem:[#allocation7 + $0x54c] sm:$0xf0]  ;;  %v11286_v60 = vld [vmem:[#allocation7 + $0x6b4] sm:$0xf0] }
 0x258   :  { %7056 = vmatmul.bf16.gmra.mxu3 %v14873_v48  ;;  %7135 = vmatpush.bf16.msrb.mxu2 %v11037_v25  ;;  %v11118_v48 = vld [vmem:[#allocation7 + $0x564] sm:$0xf0]  ;;  %v13767_v25 = vld [vmem:[#allocation7 + $0x3c4] sm:$0xf] }
 0x259   :  { %7164 = vmatpush.bf16.msrb.mxu3 %v11133_v62 }
 0x25a   :  { %v6796_v42 = vpop.f32.mrf.mxu2  ;;  %v6740_v6 = vpop.f32.mrf.mxu0  ;;  %7079 = vmatpush.bf16.msrb.mxu0 %v10821_v57 }
 0x25b   :  { %v6797_v14 = vadd.f32 %v6796_v42, %v6768_v49  ;;  %v6825_v33 = vpop.f32.mrf.mxu3  ;;  %v6741_v21 = vadd.f32 %v6740_v6, %v16052_v0  ;;  %v6769_v15 = vpop.f32.mrf.mxu1  ;;  %v10929_v49 = vor.u32 %v13770_v58, %v10926_v35  ;;  %v13818_v42 = vld [vmem:[#allocation7 + $0x55c] sm:$0xf]  ;;  %v11013_v58 = vor.u32 %v13791_v53, %v11010_v19  ;;  %v13815_v35 = vld [vmem:[#allocation7 + $0x544] sm:$0xf]  ;;  %v11274_v19 = vld [vmem:[#allocation7 + $0x69c] sm:$0xf0] }
 0x25c   :  { %v11121_v0 = vor.u32 %v13818_v42, %v11118_v48  ;;  %7136 = vmatpush.bf16.msrb.mxu2 %v11025_v18  ;;  %v11109_v48 = vor.u32 %v13815_v35, %v11106_v59 }
 0x25d   :  { %v16121_v56 = vadd.f32 %v6825_v33, %v6797_v14  ;;  %v6770_v16 = vadd.f32 %v6769_v15, %v6741_v21  ;;  %7107 = vmatpush.bf16.msrb.mxu1 %v10929_v49  ;;  %v10914_v14 = vld [vmem:[#allocation7 + $0x3cc] sm:$0xf0] }
 0x25e   :  { %v10917_v33 = vor.u32 %v13767_v25, %v10914_v14  ;;  %7165 = vmatpush.bf16.msrb.mxu3 %v11121_v0 }
 0x260   :  { %7137 = vmatpush.bf16.msrb.mxu2 %v11013_v58 }
 0x261   :  { %7108 = vmatpush.bf16.msrb.mxu1 %v10917_v33  ;;  %v13857_v33 = vld [vmem:[#allocation7 + $0x694] sm:$0xf] }
 0x262   :  { %v6798_v6 = vpop.f32.mrf.mxu2  ;;  %v6743_v21 = vpop.f32.mrf.mxu0  ;;  %7166 = vmatpush.bf16.msrb.mxu3 %v11109_v48 }
 0x263   :  { %v6799_v13 = vadd.f32 %v6798_v6, %v6770_v16  ;;  %v6827_v15 = vpop.f32.mrf.mxu3  ;;  %v6744_v8 = vadd.f32 %v6743_v21, %v16059_v22  ;;  %v6772_v9 = vpop.f32.mrf.mxu1  ;;  %v13860_v16 = vld [vmem:[#allocation7 + $0x6ac] sm:$0xf]  ;;  %v11277_v21 = vor.u32 %v13857_v33, %v11274_v19 }
 0x264   :  { %v11289_v57 = vor.u32 %v13860_v16, %v11286_v60  ;;  %v13854_v60 = vld [vmem:[#allocation7 + $0x67c] sm:$0xf] }
 0x265   :  { %v16124_v62 = vadd.f32 %v6827_v15, %v6799_v13  ;;  %v6773_v49 = vadd.f32 %v6772_v9, %v6744_v8  ;;  %6974 = vmatmul.bf16.gmra.mxu0 %v14903_v34  ;;  %v13884_v13 = vld [vmem:[#allocation7 + $0x76c] sm:$0xf]  ;;  %v11382_v15 = vld [vmem:[#allocation7 + $0x774] sm:$0xf0] }
 0x266   :  { %7003 = vmatmul.bf16.gmra.mxu1 %v14905_v37  ;;  %7188 = vmatpush.bf16.msra.mxu0 %v11289_v57  ;;  %v11385_v58 = vor.u32 %v13884_v13, %v11382_v15  ;;  %v11262_v57 = vld [vmem:[#allocation7 + $0x684] sm:$0xf0]  ;;  %v13851_v15 = vld [vmem:[#allocation7 + $0x664] sm:$0xf] }
 0x267   :  { %7032 = vmatmul.bf16.gmra.mxu2 %v14907_v38 }
 0x268   :  { %7061 = vmatmul.bf16.gmra.mxu3 %v14909_v39  ;;  %7217 = vmatpush.bf16.msra.mxu1 %v11385_v58  ;;  %v11250_v58 = vld [vmem:[#allocation7 + $0x66c] sm:$0xf0] }
 0x26a   :  { %v6801_v22 = vpop.f32.mrf.mxu2  ;;  %v6745_v42 = vpop.f32.mrf.mxu0  ;;  %7189 = vmatpush.bf16.msra.mxu0 %v11277_v21 }
 0x26b   :  { %v6802_v18 = vadd.f32 %v6801_v22, %v6773_v49  ;;  %v6830_v0 = vpop.f32.mrf.mxu3  ;;  %v6746_v25 = vadd.f32 %v6745_v42, %v16094_v24  ;;  %v6774_v14 = vpop.f32.mrf.mxu1  ;;  %v13881_v22 = vld [vmem:[#allocation7 + $0x754] sm:$0xf]  ;;  %v11370_v42 = vld [vmem:[#allocation7 + $0x75c] sm:$0xf0] }
 0x26d   :  { %v16131_v53 = vadd.f32 %v6830_v0, %v6802_v18  ;;  %v6775_v6 = vadd.f32 %v6774_v14, %v6746_v25  ;;  %v11265_v18 = vor.u32 %v13854_v60, %v11262_v57  ;;  %v11373_v0 = vor.u32 %v13881_v22, %v11370_v42 }
 0x26f   :  { %7190 = vmatpush.bf16.msra.mxu0 %v11265_v18  ;;  %7218 = vmatpush.bf16.msra.mxu1 %v11373_v0 }
 0x272   :  { %v6803_v35 = vpop.f32.mrf.mxu2  ;;  %v6748_v8 = vpop.f32.mrf.mxu0 }
 0x273   :  { %v6804_v59 = vadd.f32 %v6803_v35, %v6775_v6  ;;  %v6832_v9 = vpop.f32.mrf.mxu3  ;;  %v6749_v48 = vadd.f32 %v6748_v8, %v16101_v7  ;;  %v6777_v49 = vpop.f32.mrf.mxu1  ;;  %v13908_v35 = vld [vmem:[#allocation7 + $0x82c] sm:$0xf]  ;;  %v11478_v8 = vld [vmem:[#allocation7 + $0x834] sm:$0xf0] }
 0x275   :  { %v16134_v24 = vadd.f32 %v6832_v9, %v6804_v59  ;;  %v6778_v16 = vadd.f32 %v6777_v49, %v6749_v48  ;;  %6979 = vmatmul.bf16.gmra.mxu0 %v14939_v2  ;;  %v11253_v59 = vor.u32 %v13851_v15, %v11250_v58  ;;  %v13878_v9 = vld [vmem:[#allocation7 + $0x73c] sm:$0xf]  ;;  %v11358_v48 = vld [vmem:[#allocation7 + $0x744] sm:$0xf0]  ;;  %v11481_v49 = vor.u32 %v13908_v35, %v11478_v8  ;;  %v11346_v15 = vld [vmem:[#allocation7 + $0x72c] sm:$0xf0] }
 0x276   :  { %7008 = vmatmul.bf16.gmra.mxu1 %v14941_v3  ;;  %v11361_v60 = vor.u32 %v13878_v9, %v11358_v48  ;;  %v13932_v35 = vld [vmem:[#allocation7 + $0x8ec] sm:$0xf] }
 0x277   :  { %7037 = vmatmul.bf16.gmra.mxu2 %v14943_v4  ;;  %7191 = vmatpush.bf16.msra.mxu0 %v11253_v59  ;;  %v11574_v59 = vld [vmem:[#allocation7 + $0x8f4] sm:$0xf0] }
 0x278   :  { %7066 = vmatmul.bf16.gmra.mxu3 %v14945_v5  ;;  %7246 = vmatpush.bf16.msra.mxu2 %v11481_v49  ;;  %v11577_v9 = vor.u32 %v13932_v35, %v11574_v59  ;;  %v11334_v35 = vld [vmem:[#allocation7 + $0x714] sm:$0xf0] }
 0x279   :  { %7219 = vmatpush.bf16.msra.mxu1 %v11361_v60 }
 0x27a   :  { %v6806_v25 = vpop.f32.mrf.mxu2  ;;  %v6750_v14 = vpop.f32.mrf.mxu0  ;;  %7275 = vmatpush.bf16.msra.mxu3 %v11577_v9  ;;  %v11442_v9 = vld [vmem:[#allocation7 + $0x7ec] sm:$0xf0] }
 0x27b   :  { %v6807_v7 = vadd.f32 %v6806_v25, %v6778_v16  ;;  %v6835_v6 = vpop.f32.mrf.mxu3  ;;  %v6751_v33 = vadd.f32 %v6750_v14, %v16104_v41  ;;  %v6779_v19 = vpop.f32.mrf.mxu1  ;;  %v11238_v14 = vld [vmem:[#allocation7 + $0x654] sm:$0xf0] }
 0x27d   :  { %v16141_v13 = vadd.f32 %v6835_v6, %v6807_v7  ;;  %v6780_v21 = vadd.f32 %v6779_v19, %v6751_v33  ;;  %v13848_v7 = vld [vmem:[#allocation7 + $0x64c] sm:$0xf]  ;;  %v13905_v6 = vld [vmem:[#allocation7 + $0x814] sm:$0xf]  ;;  %v11466_v19 = vld [vmem:[#allocation7 + $0x81c] sm:$0xf0] }
 0x27e   :  { %v11241_v33 = vor.u32 %v13848_v7, %v11238_v14  ;;  %v13902_v7 = vld [vmem:[#allocation7 + $0x7fc] sm:$0xf]  ;;  %v11454_v14 = vld [vmem:[#allocation7 + $0x804] sm:$0xf0] }
 0x280   :  { %7192 = vmatpush.bf16.msra.mxu0 %v11241_v33  ;;  %v11226_v33 = vld [vmem:[#allocation7 + $0x63c] sm:$0xf0] }
 0x282   :  { %v6808_v16 = vpop.f32.mrf.mxu2  ;;  %v6849_v41 = vpop.f32.mrf.mxu0 }
 0x283   :  { %v6809_v57 = vadd.f32 %v6808_v16, %v6780_v21  ;;  %v6837_v22 = vpop.f32.mrf.mxu3  ;;  %v6850_v18 = vadd.f32 %v6849_v41, %v16111_v17  ;;  %v6878_v42 = vpop.f32.mrf.mxu1  ;;  %v13875_v21 = vld [vmem:[#allocation7 + $0x724] sm:$0xf]  ;;  %v11469_v17 = vor.u32 %v13905_v6, %v11466_v19  ;;  %v13929_v16 = vld [vmem:[#allocation7 + $0x8d4] sm:$0xf] }
 0x284   :  { %v11349_v58 = vor.u32 %v13875_v21, %v11346_v15  ;;  %v13845_v19 = vld [vmem:[#allocation7 + $0x634] sm:$0xf]  ;;  %v11457_v21 = vor.u32 %v13902_v7, %v11454_v14 }
 0x285   :  { %v16144_v0 = vadd.f32 %v6837_v22, %v6809_v57  ;;  %v6879_v25 = vadd.f32 %v6878_v42, %v6850_v18  ;;  %7080 = vmatmul.bf16.vlgmr.msrb.gmra.mxu0 %v14975_v29  ;;  %7247 = vmatpush.bf16.msra.mxu2 %v11469_v17  ;;  %v11562_v57 = vld [vmem:[#allocation7 + $0x8dc] sm:$0xf0]  ;;  %v11229_v15 = vor.u32 %v13845_v19, %v11226_v33  ;;  %v13926_v17 = vld [vmem:[#allocation7 + $0x8bc] sm:$0xf]  ;;  %v13896_v33 = vld [vmem:[#allocation7 + $0x7cc] sm:$0xf] }
 0x286   :  { %7109 = vmatmul.bf16.vlgmr.msrb.gmra.mxu1 %v14977_v30  ;;  %v11565_v18 = vor.u32 %v13929_v16, %v11562_v57 }
 0x287   :  { %7138 = vmatmul.bf16.vlgmr.msrb.gmra.mxu2 %v14979_v31  ;;  %7220 = vmatpush.bf16.msra.mxu1 %v11349_v58  ;;  %v11550_v58 = vld [vmem:[#allocation7 + $0x8c4] sm:$0xf0] }
 0x288   :  { %7167 = vmatmul.bf16.vlgmr.msrb.gmra.mxu3 %v14981_v32  ;;  %7193 = vmatpush.bf16.msra.mxu0 %v11229_v15 }
 0x289   :  { %7276 = vmatpush.bf16.msra.mxu3 %v11565_v18  ;;  %7248 = vmatpush.bf16.msra.mxu2 %v11457_v21  ;;  %v11430_v21 = vld [vmem:[#allocation7 + $0x7d4] sm:$0xf0] }
 0x28a   :  { %v6907_v8 = vpop.f32.mrf.mxu2  ;;  %v6851_v49 = vpop.f32.mrf.mxu0  ;;  %v11433_v15 = vor.u32 %v13896_v33, %v11430_v21 }
 0x28b   :  { %v6908_v48 = vadd.f32 %v6907_v8, %v6879_v25  ;;  %v6936_v60 = vpop.f32.mrf.mxu3  ;;  %v6852_v22 = vadd.f32 %v6851_v49, %v16114_v50  ;;  %v6880_v41 = vpop.f32.mrf.mxu1  ;;  %v13872_v25 = vld [vmem:[#allocation7 + $0x70c] sm:$0xf]  ;;  %v11553_v50 = vor.u32 %v13926_v17, %v11550_v58  ;;  %v13899_v8 = vld [vmem:[#allocation7 + $0x7e4] sm:$0xf]  ;;  %v13869_v17 = vld [vmem:[#allocation7 + $0x6f4] sm:$0xf] }
 0x28c   :  { %v11337_v59 = vor.u32 %v13872_v25, %v11334_v35  ;;  %v11445_v49 = vor.u32 %v13899_v8, %v11442_v9  ;;  %v11214_v35 = vld [vmem:[#allocation7 + $0x624] sm:$0xf0]  ;;  %v11322_v58 = vld [vmem:[#allocation7 + $0x6fc] sm:$0xf0] }
 0x28d   :  { %v16151_v42 = vadd.f32 %v6936_v60, %v6908_v48  ;;  %v6881_v6 = vadd.f32 %v6880_v41, %v6852_v22  ;;  %v13923_v22 = vld [vmem:[#allocation7 + $0x8a4] sm:$0xf]  ;;  %v11538_v41 = vld [vmem:[#allocation7 + $0x8ac] sm:$0xf0]  ;;  %7277 = vmatpush.bf16.msra.mxu3 %v11553_v50  ;;  %v11526_v50 = vld [vmem:[#allocation7 + $0x894] sm:$0xf0]  ;;  %v11325_v8 = vor.u32 %v13869_v17, %v11322_v58 }
 0x28e   :  { %7221 = vmatpush.bf16.msra.mxu1 %v11337_v59  ;;  %7249 = vmatpush.bf16.msra.mxu2 %v11445_v49  ;;  %v11541_v19 = vor.u32 %v13923_v22, %v11538_v41  ;;  %v13920_v59 = vld [vmem:[#allocation7 + $0x88c] sm:$0xf]  ;;  %v11418_v49 = vld [vmem:[#allocation7 + $0x7bc] sm:$0xf0]  ;;  %v13890_v17 = vld [vmem:[#allocation7 + $0x79c] sm:$0xf] }
 0x28f   :  { %17893 = vst [vmem:[#allocation115_spill] sm:$0xff] %v16151_v42  ;;  %v11529_v9 = vor.u32 %v13920_v59, %v11526_v50  ;;  %v11202_v59 = vld [vmem:[#allocation7 + $0x60c] sm:$0xf0]  ;;  %v11406_v50 = vld [vmem:[#allocation7 + $0x7a4] sm:$0xf0] }
 0x291   :  { %7278 = vmatpush.bf16.msra.mxu3 %v11541_v19 }
 0x292   :  { %v6909_v48 = vpop.f32.mrf.mxu2  ;;  %v6854_v16 = vpop.f32.mrf.mxu0  ;;  %7250 = vmatpush.bf16.msra.mxu2 %v11433_v15  ;;  %7222 = vmatpush.bf16.msra.mxu1 %v11325_v8  ;;  %v11409_v8 = vor.u32 %v13890_v17, %v11406_v50 }
 0x293   :  { %v6910_v60 = vadd.f32 %v6909_v48, %v6881_v6  ;;  %v6938_v57 = vpop.f32.mrf.mxu3  ;;  %v6855_v7 = vadd.f32 %v6854_v16, %v16121_v56  ;;  %v6883_v14 = vpop.f32.mrf.mxu1  ;;  %v13842_v6 = vld [vmem:[#allocation7 + $0x61c] sm:$0xf]  ;;  %v13893_v48 = vld [vmem:[#allocation7 + $0x7b4] sm:$0xf] }
 0x294   :  { %v11217_v56 = vor.u32 %v13842_v6, %v11214_v35  ;;  %v11421_v16 = vor.u32 %v13893_v48, %v11418_v49  ;;  %v13866_v6 = vld [vmem:[#allocation7 + $0x6dc] sm:$0xf]  ;;  %v11310_v35 = vld [vmem:[#allocation7 + $0x6e4] sm:$0xf0] }
 0x295   :  { %v16154_v18 = vadd.f32 %v6938_v57, %v6910_v60  ;;  %v6884_v25 = vadd.f32 %v6883_v14, %v6855_v7  ;;  %7085 = vmatmul.bf16.gmra.mxu0 %v15011_v23  ;;  %v13917_v7 = vld [vmem:[#allocation7 + $0x874] sm:$0xf]  ;;  %v11514_v14 = vld [vmem:[#allocation7 + $0x87c] sm:$0xf0]  ;;  %7279 = vmatpush.bf16.msra.mxu3 %v11529_v9  ;;  %v13914_v49 = vld [vmem:[#allocation7 + $0x85c] sm:$0xf] }
 0x296   :  { %7114 = vmatmul.bf16.gmra.mxu1 %v15013_v26  ;;  %7194 = vmatpush.bf16.msra.mxu0 %v11217_v56  ;;  %v11517_v19 = vor.u32 %v13917_v7, %v11514_v14  ;;  %v13839_v56 = vld [vmem:[#allocation7 + $0x604] sm:$0xf]  ;;  %v11394_v7 = vld [vmem:[#allocation7 + $0x78c] sm:$0xf0] }
 0x297   :  { %17894 = vst [vmem:[#allocation116_spill] sm:$0xff] %v16154_v18  ;;  %7143 = vmatmul.bf16.gmra.mxu2 %v15015_v27  ;;  %v11205_v48 = vor.u32 %v13839_v56, %v11202_v59  ;;  %v13887_v9 = vld [vmem:[#allocation7 + $0x784] sm:$0xf]  ;;  %v11490_v56 = vld [vmem:[#allocation7 + $0x84c] sm:$0xf0] }
 0x298   :  { %7172 = vmatmul.bf16.gmra.mxu3 %v15017_v28  ;;  %7251 = vmatpush.bf16.msra.mxu2 %v11421_v16  ;;  %v13863_v16 = vld [vmem:[#allocation7 + $0x6c4] sm:$0xf] }
 0x299   :  { %7280 = vmatpush.bf16.msra.mxu3 %v11517_v19 }
 0x29a   :  { %v6912_v60 = vpop.f32.mrf.mxu2  ;;  %v6856_v22 = vpop.f32.mrf.mxu0  ;;  %7195 = vmatpush.bf16.msra.mxu0 %v11205_v48  ;;  %v11670_v48 = vld [vmem:[#allocation7 + $0x9b4] sm:$0xf0] }
 0x29b   :  { %v6913_v57 = vadd.f32 %v6912_v60, %v6884_v25  ;;  %v6941_v41 = vpop.f32.mrf.mxu3  ;;  %v6857_v33 = vadd.f32 %v6856_v22, %v16124_v62  ;;  %v6885_v21 = vpop.f32.mrf.mxu1  ;;  %v11313_v25 = vor.u32 %v13866_v6, %v11310_v35  ;;  %v11502_v60 = vld [vmem:[#allocation7 + $0x864] sm:$0xf0]  ;;  %v11397_v6 = vor.u32 %v13887_v9, %v11394_v7  ;;  %v13911_v35 = vld [vmem:[#allocation7 + $0x844] sm:$0xf]  ;;  %v11658_v7 = vld [vmem:[#allocation7 + $0x99c] sm:$0xf0] }
 0x29c   :  { %v11505_v62 = vor.u32 %v13914_v49, %v11502_v60  ;;  %7252 = vmatpush.bf16.msra.mxu2 %v11409_v8 }
 0x29d   :  { %v16161_v15 = vadd.f32 %v6941_v41, %v6913_v57  ;;  %v6886_v58 = vadd.f32 %v6885_v21, %v6857_v33  ;;  %7223 = vmatpush.bf16.msra.mxu1 %v11313_v25  ;;  %v11298_v57 = vld [vmem:[#allocation7 + $0x6cc] sm:$0xf0]  ;;  %v11493_v25 = vor.u32 %v13911_v35, %v11490_v56 }
 0x29e   :  { %v11301_v41 = vor.u32 %v13863_v16, %v11298_v57  ;;  %7281 = vmatpush.bf16.msra.mxu3 %v11505_v62 }
 0x29f   :  { %17895 = vst [vmem:[#allocation117_spill] sm:$0xff] %v16161_v15  ;;  %v11946_v15 = vld [vmem:[#allocation7 + $0xbdc] sm:$0xf0] }
 0x2a0   :  { %7253 = vmatpush.bf16.msra.mxu2 %v11397_v6 }
 0x2a1   :  { %7224 = vmatpush.bf16.msra.mxu1 %v11301_v41  ;;  %v13953_v41 = vld [vmem:[#allocation7 + $0x994] sm:$0xf] }
 0x2a2   :  { %v6914_v22 = vpop.f32.mrf.mxu2  ;;  %v6859_v33 = vpop.f32.mrf.mxu0  ;;  %7282 = vmatpush.bf16.msra.mxu3 %v11493_v25 }
 0x2a3   :  { %v6915_v14 = vadd.f32 %v6914_v22, %v6886_v58  ;;  %v6943_v21 = vpop.f32.mrf.mxu3  ;;  %v6860_v17 = vadd.f32 %v6859_v33, %v16131_v53  ;;  %v6888_v59 = vpop.f32.mrf.mxu1  ;;  %v13956_v58 = vld [vmem:[#allocation7 + $0x9ac] sm:$0xf]  ;;  %v11661_v33 = vor.u32 %v13953_v41, %v11658_v7 }
 0x2a4   :  { %v11673_v8 = vor.u32 %v13956_v58, %v11670_v48  ;;  %v17899_v48 = vld [vmem:[#allocation23_spill] sm:$0xff] }
 0x2a5   :  { %v16164_v19 = vadd.f32 %v6943_v21, %v6915_v14  ;;  %v6889_v50 = vadd.f32 %v6888_v59, %v6860_v17  ;;  %7090 = vmatmul.bf16.gmra.mxu0 %v15047_v36  ;;  %v13980_v14 = vld [vmem:[#allocation7 + $0xa6c] sm:$0xf]  ;;  %v11766_v21 = vld [vmem:[#allocation7 + $0xa74] sm:$0xf0] }
 0x2a6   :  { %7119 = vmatmul.bf16.gmra.mxu1 %v15049_v43  ;;  %7304 = vmatpush.bf16.msrb.mxu0 %v11673_v8  ;;  %v11769_v6 = vor.u32 %v13980_v14, %v11766_v21  ;;  %v17900_v8 = vld [vmem:[#allocation24_spill] sm:$0xff] }
 0x2a7   :  { %17896 = vst [vmem:[#allocation118_spill] sm:$0xff] %v16164_v19  ;;  %7148 = vmatmul.bf16.gmra.mxu2 %v15051_v44  ;;  %v14025_v19 = vld [vmem:[#allocation7 + $0xbd4] sm:$0xf] }
 0x2a8   :  { %7177 = vmatmul.bf16.gmra.mxu3 %v15053_v54  ;;  %7333 = vmatpush.bf16.msrb.mxu1 %v11769_v6 }
 0x2aa   :  { %v6917_v53 = vpop.f32.mrf.mxu2  ;;  %v6861_v60 = vpop.f32.mrf.mxu0  ;;  %7305 = vmatpush.bf16.msrb.mxu0 %v11661_v33 }
 0x2ab   :  { %v6918_v49 = vadd.f32 %v6917_v53, %v6889_v50  ;;  %v6946_v62 = vpop.f32.mrf.mxu3  ;;  %v6862_v16 = vadd.f32 %v6861_v60, %v16134_v24  ;;  %v6890_v57 = vpop.f32.mrf.mxu1  ;;  %v17901_v53 = vld [vmem:[#allocation25_spill] sm:$0xff] }
 0x2ac   :  { %v11646_v60 = vld [vmem:[#allocation7 + $0x984] sm:$0xf0] }
 0x2ad   :  { %v16171_v9 = vadd.f32 %v6946_v62, %v6918_v49  ;;  %v6891_v22 = vadd.f32 %v6890_v57, %v6862_v16  ;;  %v13950_v49 = vld [vmem:[#allocation7 + $0x97c] sm:$0xf]  ;;  %v13977_v62 = vld [vmem:[#allocation7 + $0xa54] sm:$0xf] }
 0x2ae   :  { %v17902_v16 = vld [vmem:[#allocation26_spill] sm:$0xff]  ;;  %v11649_v57 = vor.u32 %v13950_v49, %v11646_v60  ;;  %v13974_v49 = vld [vmem:[#allocation7 + $0xa3c] sm:$0xf]  ;;  %v11742_v60 = vld [vmem:[#allocation7 + $0xa44] sm:$0xf0] }
 0x2af   :  { %17897 = vst [vmem:[#allocation119_spill] sm:$0xff] %v16171_v9 }
 0x2b0   :  { %7306 = vmatpush.bf16.msrb.mxu0 %v11649_v57  ;;  %v11745_v57 = vor.u32 %v13974_v49, %v11742_v60  ;;  %v17908_v49 = vld [vmem:[#allocation30_spill] sm:$0xff]  ;;  %v11850_v60 = vld [vmem:[#allocation7 + $0xb1c] sm:$0xf0] }
 0x2b2   :  { %v6919_v35 = vpop.f32.mrf.mxu2  ;;  %v6864_v17 = vpop.f32.mrf.mxu0 }
 0x2b3   :  { %v6920_v56 = vadd.f32 %v6919_v35, %v6891_v22  ;;  %v6948_v59 = vpop.f32.mrf.mxu3  ;;  %v6865_v25 = vadd.f32 %v6864_v17, %v16141_v13  ;;  %v6893_v50 = vpop.f32.mrf.mxu1  ;;  %v11754_v22 = vld [vmem:[#allocation7 + $0xa5c] sm:$0xf0]  ;;  %v13947_v17 = vld [vmem:[#allocation7 + $0x964] sm:$0xf] }
 0x2b4   :  { %v11757_v41 = vor.u32 %v13977_v62, %v11754_v22  ;;  %v14512_v62 = vld [vmem:[#allocation9] sm:$0x7] }
 0x2b5   :  { %v16174_v24 = vadd.f32 %v6948_v59, %v6920_v56  ;;  %v6894_v58 = vadd.f32 %v6893_v50, %v6865_v25  ;;  %7095 = vmatmul.bf16.gmra.mxu0 %v17899_v48  ;;  %v11634_v59 = vld [vmem:[#allocation7 + $0x96c] sm:$0xf0]  ;;  %v14004_v25 = vld [vmem:[#allocation7 + $0xb2c] sm:$0xf]  ;;  %v16183_v22 = vperm.slane %v14512_v62, 1 }
 0x2b6   :  { %7124 = vmatmul.bf16.gmra.mxu1 %v17900_v8  ;;  %v11637_v50 = vor.u32 %v13947_v17, %v11634_v59  ;;  %v17905_v17 = vld [vmem:[#allocation27_spill] sm:$0xff]  ;;  %v17906_v59 = vld [vmem:[#allocation28_spill] sm:$0xff]  ;;  %v17907_v62 = vld [vmem:[#allocation29_spill] sm:$0xff] }
 0x2b7   :  { %17898 = vst [vmem:[#allocation120_spill] sm:$0xff] %v16174_v24  ;;  %7153 = vmatmul.bf16.gmra.mxu2 %v17901_v53  ;;  %7334 = vmatpush.bf16.msrb.mxu1 %v11757_v41  ;;  %v11862_v24 = vld [vmem:[#allocation7 + $0xb34] sm:$0xf0]  ;;  %v12270_v48 = vld [vmem:[#allocation7 + $0xe64] sm:$0xf0] }
 0x2b8   :  { %7182 = vmatmul.bf16.gmra.mxu3 %v17902_v16  ;;  %7307 = vmatpush.bf16.msrb.mxu0 %v11637_v50  ;;  %v14001_v50 = vld [vmem:[#allocation7 + $0xb14] sm:$0xf] }
 0x2ba   :  { %v6922_v7 = vpop.f32.mrf.mxu2  ;;  %v6866_v14 = vpop.f32.mrf.mxu0 }
 0x2bb   :  { %v6923_v13 = vadd.f32 %v6922_v7, %v6894_v58  ;;  %v6951_v33 = vpop.f32.mrf.mxu3  ;;  %v6867_v21 = vadd.f32 %v6866_v14, %v16144_v0  ;;  %v6895_v6 = vpop.f32.mrf.mxu1  ;;  %v11865_v58 = vor.u32 %v14004_v25, %v11862_v24  ;;  %7335 = vmatpush.bf16.msrb.mxu1 %v11745_v57  ;;  %v13944_v24 = vld [vmem:[#allocation7 + $0x94c] sm:$0xf]  ;;  %v11622_v25 = vld [vmem:[#allocation7 + $0x954] sm:$0xf0]  ;;  %v11730_v57 = vld [vmem:[#allocation7 + $0xa2c] sm:$0xf0] }
 0x2bd   :  { %v16181_v35 = vadd.f32 %v6951_v33, %v6923_v13  ;;  %v6896_v56 = vadd.f32 %v6895_v6, %v6867_v21  ;;  %7362 = vmatpush.bf16.msrb.mxu2 %v11865_v58  ;;  %v13971_v58 = vld [vmem:[#allocation7 + $0xa24] sm:$0xf] }
 0x2bf   :  { %17903 = vst [vmem:[#allocation121_spill] sm:$0xff] %v16181_v35 }
 0x2c2   :  { %v6924_v41 = vpop.f32.mrf.mxu2  ;;  %v6965_v13 = vpop.f32.mrf.mxu0 }
 0x2c3   :  { %v6925_v0 = vadd.f32 %v6924_v41, %v6896_v56  ;;  %v6953_v7 = vpop.f32.mrf.mxu3  ;;  %v6966_v14 = vadd.f32 %v6965_v13, %v16183_v22  ;;  %v6994_v33 = vpop.f32.mrf.mxu1  ;;  %v11625_v56 = vor.u32 %v13944_v24, %v11622_v25  ;;  %v11853_v41 = vor.u32 %v14001_v50, %v11850_v60  ;;  %v13998_v50 = vld [vmem:[#allocation7 + $0xafc] sm:$0xf]  ;;  %v11838_v60 = vld [vmem:[#allocation7 + $0xb04] sm:$0xf0] }
 0x2c4   :  { %v11733_v13 = vor.u32 %v13971_v58, %v11730_v57  ;;  %v11949_v25 = vor.u32 %v14025_v19, %v11946_v15  ;;  %v13941_v57 = vld [vmem:[#allocation7 + $0x934] sm:$0xf]  ;;  %v11826_v15 = vld [vmem:[#allocation7 + $0xaec] sm:$0xf0] }
 0x2c5   :  { %v16186_v21 = vadd.f32 %v6953_v7, %v6925_v0  ;;  %v6995_v6 = vadd.f32 %v6994_v33, %v6966_v14  ;;  %7196 = vmatmul.bf16.vlgmr.msra.gmra.mxu0 %v17905_v17  ;;  %v14028_v0 = vld [vmem:[#allocation7 + $0xbec] sm:$0xf]  ;;  %v11958_v7 = vld [vmem:[#allocation7 + $0xbf4] sm:$0xf0]  ;;  %7363 = vmatpush.bf16.msrb.mxu2 %v11853_v41  ;;  %v14022_v41 = vld [vmem:[#allocation7 + $0xbbc] sm:$0xf] }
 0x2c6   :  { %7225 = vmatmul.bf16.vlgmr.msra.gmra.mxu1 %v17906_v59  ;;  %7308 = vmatpush.bf16.msrb.mxu0 %v11625_v56  ;;  %v11961_v33 = vor.u32 %v14028_v0, %v11958_v7  ;;  %v11610_v56 = vld [vmem:[#allocation7 + $0x93c] sm:$0xf0]  ;;  %v11841_v0 = vor.u32 %v13998_v50, %v11838_v60  ;;  %v11922_v50 = vld [vmem:[#allocation7 + $0xbac] sm:$0xf0]  ;;  %v11886_v17 = vld [vmem:[#allocation7 + $0xb64] sm:$0xf0] }
 0x2c7   :  { %17904 = vst [vmem:[#allocation122_spill] sm:$0xff] %v16186_v21  ;;  %7254 = vmatmul.bf16.vlgmr.msra.gmra.mxu2 %v17907_v62  ;;  %7336 = vmatpush.bf16.msrb.mxu1 %v11733_v13  ;;  %v11613_v7 = vor.u32 %v13941_v57, %v11610_v56  ;;  %v11934_v13 = vld [vmem:[#allocation7 + $0xbc4] sm:$0xf0]  ;;  %v14019_v62 = vld [vmem:[#allocation7 + $0xba4] sm:$0xf] }
 0x2c8   :  { %7283 = vmatmul.bf16.vlgmr.msra.gmra.mxu3 %v17908_v49  ;;  %v11925_v56 = vor.u32 %v14019_v62, %v11922_v50  ;;  %v11910_v62 = vld [vmem:[#allocation7 + $0xb94] sm:$0xf0]  ;;  %v13989_v50 = vld [vmem:[#allocation7 + $0xab4] sm:$0xf]  ;;  %v11898_v59 = vld [vmem:[#allocation7 + $0xb7c] sm:$0xf0] }
 0x2c9   :  { %7391 = vmatpush.bf16.msrb.mxu3 %v11961_v33  ;;  %7364 = vmatpush.bf16.msrb.mxu2 %v11841_v0  ;;  %v13995_v33 = vld [vmem:[#allocation7 + $0xae4] sm:$0xf]  ;;  %v13992_v0 = vld [vmem:[#allocation7 + $0xacc] sm:$0xf] }
 0x2ca   :  { %v7023_v14 = vpop.f32.mrf.mxu2  ;;  %v6967_v35 = vpop.f32.mrf.mxu0  ;;  %7309 = vmatpush.bf16.msrb.mxu0 %v11613_v7 }
 0x2cb   :  { %v7024_v21 = vadd.f32 %v7023_v14, %v6995_v6  ;;  %v7052_v9 = vpop.f32.mrf.mxu3  ;;  %v6968_v18 = vadd.f32 %v6967_v35, %v16183_v22  ;;  %v6996_v24 = vpop.f32.mrf.mxu1  ;;  %v13968_v6 = vld [vmem:[#allocation7 + $0xa0c] sm:$0xf]  ;;  %v11718_v14 = vld [vmem:[#allocation7 + $0xa14] sm:$0xf0]  ;;  %v11937_v35 = vor.u32 %v14022_v41, %v11934_v13  ;;  %v17910_v41 = vld [vmem:[#allocation32_spill] sm:$0xff] }
 0x2cc   :  { %v11721_v49 = vor.u32 %v13968_v6, %v11718_v14  ;;  %v11814_v6 = vld [vmem:[#allocation7 + $0xad4] sm:$0xf0]  ;;  %v13938_v13 = vld [vmem:[#allocation7 + $0x91c] sm:$0xf] }
 0x2cd   :  { %v16193_v42 = vadd.f32 %v7052_v9, %v7024_v21  ;;  %v6997_v58 = vadd.f32 %v6996_v24, %v6968_v18  ;;  %7392 = vmatpush.bf16.msrb.mxu3 %v11949_v25  ;;  %v11829_v9 = vor.u32 %v13995_v33, %v11826_v15  ;;  %v17909_v14 = vld [vmem:[#allocation31_spill] sm:$0xff]  ;;  %v11598_v33 = vld [vmem:[#allocation7 + $0x924] sm:$0xf0]  ;;  %v13965_v15 = vld [vmem:[#allocation7 + $0x9f4] sm:$0xf] }
 0x2ce   :  { %7337 = vmatpush.bf16.msrb.mxu1 %v11721_v49  ;;  %v11817_v49 = vor.u32 %v13992_v0, %v11814_v6 }
 0x2cf   :  { %7365 = vmatpush.bf16.msrb.mxu2 %v11829_v9  ;;  %v11706_v9 = vld [vmem:[#allocation7 + $0x9fc] sm:$0xf0] }
 0x2d1   :  { %7393 = vmatpush.bf16.msrb.mxu3 %v11937_v35  ;;  %v11601_v35 = vor.u32 %v13938_v13, %v11598_v33 }
 0x2d2   :  { %v7025_v19 = vpop.f32.mrf.mxu2  ;;  %v6970_v18 = vpop.f32.mrf.mxu0 }
 0x2d3   :  { %v7026_v21 = vadd.f32 %v7025_v19, %v6997_v58  ;;  %v7054_v24 = vpop.f32.mrf.mxu3  ;;  %v6971_v60 = vadd.f32 %v6970_v18, %v16183_v22  ;;  %v6999_v57 = vpop.f32.mrf.mxu1  ;;  %v17911_v58 = vld [vmem:[#allocation33_spill] sm:$0xff]  ;;  %v17912_v19 = vld [vmem:[#allocation34_spill] sm:$0xff]  ;;  %7366 = vmatpush.bf16.msrb.mxu2 %v11817_v49  ;;  %v11709_v18 = vor.u32 %v13965_v15, %v11706_v9  ;;  %7310 = vmatpush.bf16.msrb.mxu0 %v11601_v35  ;;  %v13962_v15 = vld [vmem:[#allocation7 + $0x9dc] sm:$0xf] }
 0x2d4   :  { %v11694_v9 = vld [vmem:[#allocation7 + $0x9e4] sm:$0xf0]  ;;  %v13935_v35 = vld [vmem:[#allocation7 + $0x904] sm:$0xf] }
 0x2d5   :  { %v16196_v25 = vadd.f32 %v7054_v24, %v7026_v21  ;;  %v7000_v7 = vadd.f32 %v6999_v57, %v6971_v60  ;;  %7201 = vmatmul.bf16.gmra.mxu0 %v17909_v14  ;;  %v14016_v21 = vld [vmem:[#allocation7 + $0xb8c] sm:$0xf]  ;;  %7394 = vmatpush.bf16.msrb.mxu3 %v11925_v56  ;;  %v11802_v60 = vld [vmem:[#allocation7 + $0xabc] sm:$0xf0]  ;;  %v14013_v14 = vld [vmem:[#allocation7 + $0xb74] sm:$0xf] }
 0x2d6   :  { %7230 = vmatmul.bf16.gmra.mxu1 %v17910_v41  ;;  %v11913_v24 = vor.u32 %v14016_v21, %v11910_v62  ;;  %v11805_v0 = vor.u32 %v13989_v50, %v11802_v60  ;;  %v11901_v56 = vor.u32 %v14013_v14, %v11898_v59  ;;  %v13986_v21 = vld [vmem:[#allocation7 + $0xa9c] sm:$0xf]  ;;  %v11586_v50 = vld [vmem:[#allocation7 + $0x90c] sm:$0xf0]  ;;  %v11790_v60 = vld [vmem:[#allocation7 + $0xaa4] sm:$0xf0] }
 0x2d7   :  { %7259 = vmatmul.bf16.gmra.mxu2 %v17911_v58  ;;  %7338 = vmatpush.bf16.msrb.mxu1 %v11709_v18  ;;  %v11793_v18 = vor.u32 %v13986_v21, %v11790_v60  ;;  %v17914_v60 = vld [vmem:[#allocation36_spill] sm:$0xff] }
 0x2d8   :  { %7288 = vmatmul.bf16.gmra.mxu3 %v17912_v19  ;;  %7367 = vmatpush.bf16.msrb.mxu2 %v11805_v0  ;;  %v14010_v19 = vld [vmem:[#allocation7 + $0xb5c] sm:$0xf]  ;;  %v11682_v0 = vld [vmem:[#allocation7 + $0x9cc] sm:$0xf0] }
 0x2d9   :  { %7395 = vmatpush.bf16.msrb.mxu3 %v11913_v24  ;;  %v13983_v24 = vld [vmem:[#allocation7 + $0xa84] sm:$0xf] }
 0x2da   :  { %v7028_v57 = vpop.f32.mrf.mxu2  ;;  %v6972_v58 = vpop.f32.mrf.mxu0 }
 0x2db   :  { %v7029_v6 = vadd.f32 %v7028_v57, %v7000_v7  ;;  %v7057_v41 = vpop.f32.mrf.mxu3  ;;  %v6973_v13 = vadd.f32 %v6972_v58, %v16183_v22  ;;  %v7001_v33 = vpop.f32.mrf.mxu1  ;;  %v11697_v7 = vor.u32 %v13962_v15, %v11694_v9  ;;  %v11589_v57 = vor.u32 %v13935_v35, %v11586_v50  ;;  %v14007_v9 = vld [vmem:[#allocation7 + $0xb44] sm:$0xf]  ;;  %v11874_v35 = vld [vmem:[#allocation7 + $0xb4c] sm:$0xf0] }
 0x2dc   :  { %v11889_v58 = vor.u32 %v14010_v19, %v11886_v17  ;;  %7368 = vmatpush.bf16.msrb.mxu2 %v11793_v18  ;;  %v11877_v17 = vor.u32 %v14007_v9, %v11874_v35  ;;  %v12054_v18 = vld [vmem:[#allocation7 + $0xcb4] sm:$0xf0]  ;;  %v12042_v9 = vld [vmem:[#allocation7 + $0xc9c] sm:$0xf0]  ;;  %v14076_v35 = vld [vmem:[#allocation7 + $0xd6c] sm:$0xf] }
 0x2dd   :  { %v16203_v49 = vadd.f32 %v7057_v41, %v7029_v6  ;;  %v7002_v62 = vadd.f32 %v7001_v33, %v6973_v13  ;;  %7339 = vmatpush.bf16.msrb.mxu1 %v11697_v7  ;;  %7396 = vmatpush.bf16.msrb.mxu3 %v11901_v56  ;;  %v13959_v41 = vld [vmem:[#allocation7 + $0x9c4] sm:$0xf]  ;;  %v11778_v6 = vld [vmem:[#allocation7 + $0xa8c] sm:$0xf0]  ;;  %v17913_v7 = vld [vmem:[#allocation35_spill] sm:$0xff] }
 0x2de   :  { %7311 = vmatpush.bf16.msrb.mxu0 %v11589_v57  ;;  %v11685_v14 = vor.u32 %v13959_v41, %v11682_v0  ;;  %v11781_v15 = vor.u32 %v13983_v24, %v11778_v6  ;;  %v14052_v57 = vld [vmem:[#allocation7 + $0xcac] sm:$0xf]  ;;  %v17916_v41 = vld [vmem:[#allocation38_spill] sm:$0xff] }
 0x2df   :  { %v12057_v0 = vor.u32 %v14052_v57, %v12054_v18 }
 0x2e0   :  { %7369 = vmatpush.bf16.msrb.mxu2 %v11781_v15  ;;  %v14049_v15 = vld [vmem:[#allocation7 + $0xc94] sm:$0xf] }
 0x2e1   :  { %7340 = vmatpush.bf16.msrb.mxu1 %v11685_v14  ;;  %7397 = vmatpush.bf16.msrb.mxu3 %v11889_v58 }
 0x2e2   :  { %v7030_v59 = vpop.f32.mrf.mxu2  ;;  %v6975_v33 = vpop.f32.mrf.mxu0  ;;  %7420 = vmatpush.bf16.msra.mxu0 %v12057_v0 }
 0x2e3   :  { %v7031_v13 = vadd.f32 %v7030_v59, %v7002_v62  ;;  %v7059_v16 = vpop.f32.mrf.mxu3  ;;  %v6976_v21 = vadd.f32 %v6975_v33, %v16183_v22  ;;  %v7004_v50 = vpop.f32.mrf.mxu1  ;;  %v17915_v62 = vld [vmem:[#allocation37_spill] sm:$0xff] }
 0x2e5   :  { %v16206_v56 = vadd.f32 %v7059_v16, %v7031_v13  ;;  %v7005_v19 = vadd.f32 %v7004_v50, %v6976_v21  ;;  %7206 = vmatmul.bf16.gmra.mxu0 %v17913_v7  ;;  %7398 = vmatpush.bf16.msrb.mxu3 %v11877_v17  ;;  %v12045_v21 = vor.u32 %v14049_v15, %v12042_v9  ;;  %v12150_v50 = vld [vmem:[#allocation7 + $0xd74] sm:$0xf0]  ;;  %v14046_v15 = vld [vmem:[#allocation7 + $0xc7c] sm:$0xf]  ;;  %v12030_v9 = vld [vmem:[#allocation7 + $0xc84] sm:$0xf0] }
 0x2e6   :  { %7235 = vmatmul.bf16.gmra.mxu1 %v17914_v60  ;;  %v14100_v60 = vld [vmem:[#allocation7 + $0xe2c] sm:$0xf] }
 0x2e7   :  { %7264 = vmatmul.bf16.gmra.mxu2 %v17915_v62  ;;  %v12153_v62 = vor.u32 %v14076_v35, %v12150_v50  ;;  %7421 = vmatpush.bf16.msra.mxu0 %v12045_v21  ;;  %v14073_v35 = vld [vmem:[#allocation7 + $0xd54] sm:$0xf] }
 0x2e8   :  { %7293 = vmatmul.bf16.gmra.mxu3 %v17916_v41  ;;  %v17920_v21 = vld [vmem:[#allocation42_spill] sm:$0xff] }
 0x2e9   :  { %7449 = vmatpush.bf16.msra.mxu1 %v12153_v62  ;;  %v12033_v62 = vor.u32 %v14046_v15, %v12030_v9  ;;  %v12018_v41 = vld [vmem:[#allocation7 + $0xc6c] sm:$0xf0]  ;;  %v14070_v15 = vld [vmem:[#allocation7 + $0xd3c] sm:$0xf]  ;;  %v12126_v9 = vld [vmem:[#allocation7 + $0xd44] sm:$0xf0] }
 0x2ea   :  { %v7033_v24 = vpop.f32.mrf.mxu2  ;;  %v6977_v59 = vpop.f32.mrf.mxu0 }
 0x2eb   :  { %v7034_v16 = vadd.f32 %v7033_v24, %v7005_v19  ;;  %v7062_v58 = vpop.f32.mrf.mxu3  ;;  %v6978_v14 = vadd.f32 %v6977_v59, %v16183_v22  ;;  %v7006_v6 = vpop.f32.mrf.mxu1  ;;  %7422 = vmatpush.bf16.msra.mxu0 %v12033_v62 }
 0x2ed   :  { %v16213_v13 = vadd.f32 %v7062_v58, %v7034_v16  ;;  %v7007_v33 = vadd.f32 %v7006_v6, %v6978_v14  ;;  %v17917_v58 = vld [vmem:[#allocation39_spill] sm:$0xff]  ;;  %v17918_v14 = vld [vmem:[#allocation40_spill] sm:$0xff]  ;;  %v17919_v6 = vld [vmem:[#allocation41_spill] sm:$0xff] }
 0x2f2   :  { %v7035_v57 = vpop.f32.mrf.mxu2  ;;  %v6980_v18 = vpop.f32.mrf.mxu0 }
 0x2f3   :  { %v7036_v17 = vadd.f32 %v7035_v57, %v7007_v33  ;;  %v7064_v19 = vpop.f32.mrf.mxu3  ;;  %v6981_v0 = vadd.f32 %v6980_v18, %v16183_v22  ;;  %v7009_v24 = vpop.f32.mrf.mxu1  ;;  %v12138_v33 = vld [vmem:[#allocation7 + $0xd5c] sm:$0xf0] }
 0x2f4   :  { %v12141_v50 = vor.u32 %v14073_v35, %v12138_v33  ;;  %v12129_v33 = vor.u32 %v14070_v15, %v12126_v9  ;;  %v12234_v15 = vld [vmem:[#allocation7 + $0xe1c] sm:$0xf0]  ;;  %v14067_v9 = vld [vmem:[#allocation7 + $0xd24] sm:$0xf] }
 0x2f5   :  { %v16216_v59 = vadd.f32 %v7064_v19, %v7036_v17  ;;  %v7010_v16 = vadd.f32 %v7009_v24, %v6981_v0  ;;  %7211 = vmatmul.bf16.gmra.mxu0 %v17917_v58  ;;  %v14043_v58 = vld [vmem:[#allocation7 + $0xc64] sm:$0xf] }
 0x2f6   :  { %7240 = vmatmul.bf16.gmra.mxu1 %v17918_v14  ;;  %v12021_v7 = vor.u32 %v14043_v58, %v12018_v41  ;;  %v17922_v41 = vld [vmem:[#allocation44_spill] sm:$0xff]  ;;  %v17923_v58 = vld [vmem:[#allocation45_spill] sm:$0xff] }
 0x2f7   :  { %7269 = vmatmul.bf16.gmra.mxu2 %v17919_v6  ;;  %7450 = vmatpush.bf16.msra.mxu1 %v12141_v50 }
 0x2f8   :  { %7298 = vmatmul.bf16.gmra.mxu3 %v17920_v21  ;;  %v12246_v21 = vld [vmem:[#allocation7 + $0xe34] sm:$0xf0]  ;;  %7423 = vmatpush.bf16.msra.mxu0 %v12021_v7 }
 0x2f9   :  { %v12249_v35 = vor.u32 %v14100_v60, %v12246_v21  ;;  %v14040_v60 = vld [vmem:[#allocation7 + $0xc4c] sm:$0xf]  ;;  %v12006_v7 = vld [vmem:[#allocation7 + $0xc54] sm:$0xf0]  ;;  %v14097_v21 = vld [vmem:[#allocation7 + $0xe14] sm:$0xf] }
 0x2fa   :  { %v7038_v57 = vpop.f32.mrf.mxu2  ;;  %v6982_v17 = vpop.f32.mrf.mxu0 }
 0x2fb   :  { %v7039_v18 = vadd.f32 %v7038_v57, %v7010_v16  ;;  %v7067_v19 = vpop.f32.mrf.mxu3  ;;  %v6983_v0 = vadd.f32 %v6982_v17, %v16183_v22  ;;  %v7011_v24 = vpop.f32.mrf.mxu1  ;;  %7478 = vmatpush.bf16.msra.mxu2 %v12249_v35  ;;  %7451 = vmatpush.bf16.msra.mxu1 %v12129_v33  ;;  %v12114_v35 = vld [vmem:[#allocation7 + $0xd2c] sm:$0xf0] }
 0x2fc   :  { %v12117_v33 = vor.u32 %v14067_v9, %v12114_v35  ;;  %v14037_v35 = vld [vmem:[#allocation7 + $0xc34] sm:$0xf] }
 0x2fd   :  { %v16223_v14 = vadd.f32 %v7067_v19, %v7039_v18  ;;  %v7012_v6 = vadd.f32 %v7011_v24, %v6983_v0  ;;  %v17921_v0 = vld [vmem:[#allocation43_spill] sm:$0xff]  ;;  %v17924_v24 = vld [vmem:[#allocation46_spill] sm:$0xff] }
 0x2ff   :  { %7452 = vmatpush.bf16.msra.mxu1 %v12117_v33  ;;  %v12318_v33 = vld [vmem:[#allocation7 + $0xec4] sm:$0xf0] }
 0x302   :  { %v7040_v16 = vpop.f32.mrf.mxu2  ;;  %v7081_v22 = vpop.f32.mrf.mxu0 }
 0x303   :  { %v7041_v62 = vadd.f32 %v7040_v16, %v7012_v6  ;;  %v7069_v50 = vpop.f32.mrf.mxu3  ;;  %v7082_v57 = vadd.f32 %v7081_v22, %v16193_v42  ;;  %v7110_v18 = vpop.f32.mrf.mxu1  ;;  %v12009_v6 = vor.u32 %v14040_v60, %v12006_v7  ;;  %v12237_v42 = vor.u32 %v14097_v21, %v12234_v15  ;;  %v14124_v16 = vld [vmem:[#allocation7 + $0xeec] sm:$0xf]  ;;  %v14094_v21 = vld [vmem:[#allocation7 + $0xdfc] sm:$0xf]  ;;  %v12222_v15 = vld [vmem:[#allocation7 + $0xe04] sm:$0xf0] }
 0x305   :  { %v16226_v17 = vadd.f32 %v7069_v50, %v7041_v62  ;;  %v7111_v19 = vadd.f32 %v7110_v18, %v7082_v57  ;;  %7312 = vmatmul.bf16.vlgmr.msrb.gmra.mxu0 %v17921_v0  ;;  %v12342_v62 = vld [vmem:[#allocation7 + $0xef4] sm:$0xf0]  ;;  %7479 = vmatpush.bf16.msra.mxu2 %v12237_v42  ;;  %v12330_v0 = vld [vmem:[#allocation7 + $0xedc] sm:$0xf0]  ;;  %v14118_v42 = vld [vmem:[#allocation7 + $0xebc] sm:$0xf] }
 0x306   :  { %7341 = vmatmul.bf16.vlgmr.msrb.gmra.mxu1 %v17922_v41  ;;  %7424 = vmatpush.bf16.msra.mxu0 %v12009_v6  ;;  %v12345_v22 = vor.u32 %v14124_v16, %v12342_v62  ;;  %v11994_v6 = vld [vmem:[#allocation7 + $0xc3c] sm:$0xf0]  ;;  %v12225_v16 = vor.u32 %v14094_v21, %v12222_v15  ;;  %v12306_v21 = vld [vmem:[#allocation7 + $0xeac] sm:$0xf0] }
 0x307   :  { %7370 = vmatmul.bf16.vlgmr.msrb.gmra.mxu2 %v17923_v58  ;;  %v14121_v58 = vld [vmem:[#allocation7 + $0xed4] sm:$0xf]  ;;  %v11997_v62 = vor.u32 %v14037_v35, %v11994_v6 }
 0x308   :  { %7399 = vmatmul.bf16.vlgmr.msrb.gmra.mxu3 %v17924_v24  ;;  %v12333_v7 = vor.u32 %v14121_v58, %v12330_v0  ;;  %v12210_v0 = vld [vmem:[#allocation7 + $0xdec] sm:$0xf0] }
 0x309   :  { %7507 = vmatpush.bf16.msra.mxu3 %v12345_v22  ;;  %7480 = vmatpush.bf16.msra.mxu2 %v12225_v16  ;;  %v14091_v22 = vld [vmem:[#allocation7 + $0xde4] sm:$0xf]  ;;  %v14088_v16 = vld [vmem:[#allocation7 + $0xdcc] sm:$0xf] }
 0x30a   :  { %v7139_v50 = vpop.f32.mrf.mxu2  ;;  %v7083_v18 = vpop.f32.mrf.mxu0  ;;  %7425 = vmatpush.bf16.msra.mxu0 %v11997_v62  ;;  %v12213_v58 = vor.u32 %v14091_v22, %v12210_v0  ;;  %v11982_v22 = vld [vmem:[#allocation7 + $0xc24] sm:$0xf0]  ;;  %v14061_v0 = vld [vmem:[#allocation7 + $0xcf4] sm:$0xf] }
 0x30b   :  { %v7140_v57 = vadd.f32 %v7139_v50, %v7111_v19  ;;  %v7168_v41 = vpop.f32.mrf.mxu3  ;;  %v7084_v24 = vadd.f32 %v7083_v18, %v16196_v25  ;;  %v7112_v60 = vpop.f32.mrf.mxu1  ;;  %v14064_v19 = vld [vmem:[#allocation7 + $0xd0c] sm:$0xf]  ;;  %v12102_v50 = vld [vmem:[#allocation7 + $0xd14] sm:$0xf0]  ;;  %v12321_v25 = vor.u32 %v14118_v42, %v12318_v33  ;;  %v17926_v42 = vld [vmem:[#allocation48_spill] sm:$0xff] }
 0x30c   :  { %v12105_v8 = vor.u32 %v14064_v19, %v12102_v50  ;;  %v12198_v19 = vld [vmem:[#allocation7 + $0xdd4] sm:$0xf0]  ;;  %v14034_v33 = vld [vmem:[#allocation7 + $0xc1c] sm:$0xf] }
 0x30d   :  { %v16233_v53 = vadd.f32 %v7168_v41, %v7140_v57  ;;  %v7113_v9 = vadd.f32 %v7112_v60, %v7084_v24  ;;  %7508 = vmatpush.bf16.msra.mxu3 %v12333_v7  ;;  %v14115_v60 = vld [vmem:[#allocation7 + $0xea4] sm:$0xf]  ;;  %7481 = vmatpush.bf16.msra.mxu2 %v12213_v58  ;;  %v17925_v50 = vld [vmem:[#allocation47_spill] sm:$0xff]  ;;  %v14112_v58 = vld [vmem:[#allocation7 + $0xe8c] sm:$0xf] }
 0x30e   :  { %7453 = vmatpush.bf16.msra.mxu1 %v12105_v8  ;;  %v12309_v6 = vor.u32 %v14115_v60, %v12306_v21  ;;  %v12201_v8 = vor.u32 %v14088_v16, %v12198_v19  ;;  %v14085_v60 = vld [vmem:[#allocation7 + $0xdb4] sm:$0xf]  ;;  %v12186_v21 = vld [vmem:[#allocation7 + $0xdbc] sm:$0xf0] }
 0x311   :  { %7509 = vmatpush.bf16.msra.mxu3 %v12321_v25  ;;  %v11985_v25 = vor.u32 %v14034_v33, %v11982_v22  ;;  %7482 = vmatpush.bf16.msra.mxu2 %v12201_v8 }
 0x312   :  { %v7141_v41 = vpop.f32.mrf.mxu2  ;;  %v7086_v24 = vpop.f32.mrf.mxu0 }
 0x313   :  { %v7142_v57 = vadd.f32 %v7141_v41, %v7113_v9  ;;  %v7170_v18 = vpop.f32.mrf.mxu3  ;;  %v7087_v15 = vadd.f32 %v7086_v24, %v16203_v49  ;;  %v7115_v35 = vpop.f32.mrf.mxu1  ;;  %v17927_v9 = vld [vmem:[#allocation49_spill] sm:$0xff]  ;;  %v17928_v49 = vld [vmem:[#allocation50_spill] sm:$0xff]  ;;  %v12090_v41 = vld [vmem:[#allocation7 + $0xcfc] sm:$0xf0]  ;;  %7426 = vmatpush.bf16.msra.mxu0 %v11985_v25 }
 0x314   :  { %v12093_v24 = vor.u32 %v14061_v0, %v12090_v41  ;;  %v14058_v0 = vld [vmem:[#allocation7 + $0xcdc] sm:$0xf]  ;;  %v12078_v41 = vld [vmem:[#allocation7 + $0xce4] sm:$0xf0]  ;;  %v14031_v25 = vld [vmem:[#allocation7 + $0xc04] sm:$0xf] }
 0x315   :  { %v16236_v7 = vadd.f32 %v7170_v18, %v7142_v57  ;;  %v7116_v62 = vadd.f32 %v7115_v35, %v7087_v15  ;;  %7317 = vmatmul.bf16.gmra.mxu0 %v17925_v50  ;;  %v12294_v57 = vld [vmem:[#allocation7 + $0xe94] sm:$0xf0]  ;;  %7510 = vmatpush.bf16.msra.mxu3 %v12309_v6  ;;  %v12189_v35 = vor.u32 %v14085_v60, %v12186_v21  ;;  %v12282_v50 = vld [vmem:[#allocation7 + $0xe7c] sm:$0xf0]  ;;  %v11970_v60 = vld [vmem:[#allocation7 + $0xc0c] sm:$0xf0] }
 0x316   :  { %7346 = vmatmul.bf16.gmra.mxu1 %v17926_v42  ;;  %v12297_v18 = vor.u32 %v14112_v58, %v12294_v57  ;;  %v14109_v42 = vld [vmem:[#allocation7 + $0xe74] sm:$0xf]  ;;  %v14082_v58 = vld [vmem:[#allocation7 + $0xd9c] sm:$0xf]  ;;  %v12174_v21 = vld [vmem:[#allocation7 + $0xda4] sm:$0xf0] }
 0x317   :  { %7375 = vmatmul.bf16.gmra.mxu2 %v17927_v9  ;;  %7454 = vmatpush.bf16.msra.mxu1 %v12093_v24  ;;  %v12285_v6 = vor.u32 %v14109_v42, %v12282_v50  ;;  %v12177_v24 = vor.u32 %v14082_v58, %v12174_v21  ;;  %v17930_v21 = vld [vmem:[#allocation52_spill] sm:$0xff] }
 0x318   :  { %7404 = vmatmul.bf16.gmra.mxu3 %v17928_v49  ;;  %7483 = vmatpush.bf16.msra.mxu2 %v12189_v35  ;;  %v14106_v49 = vld [vmem:[#allocation7 + $0xe5c] sm:$0xf]  ;;  %v12066_v35 = vld [vmem:[#allocation7 + $0xccc] sm:$0xf0] }
 0x319   :  { %7511 = vmatpush.bf16.msra.mxu3 %v12297_v18  ;;  %v14079_v18 = vld [vmem:[#allocation7 + $0xd84] sm:$0xf] }
 0x31a   :  { %v7144_v15 = vpop.f32.mrf.mxu2  ;;  %v7088_v19 = vpop.f32.mrf.mxu0 }
 0x31b   :  { %v7145_v16 = vadd.f32 %v7144_v15, %v7116_v62  ;;  %v7173_v9 = vpop.f32.mrf.mxu3  ;;  %v7089_v33 = vadd.f32 %v7088_v19, %v16206_v56  ;;  %v7117_v22 = vpop.f32.mrf.mxu1  ;;  %v12081_v62 = vor.u32 %v14058_v0, %v12078_v41  ;;  %v11973_v15 = vor.u32 %v14031_v25, %v11970_v60  ;;  %v14103_v41 = vld [vmem:[#allocation7 + $0xe44] sm:$0xf]  ;;  %v12258_v25 = vld [vmem:[#allocation7 + $0xe4c] sm:$0xf0] }
 0x31c   :  { %v12273_v56 = vor.u32 %v14106_v49, %v12270_v48  ;;  %7484 = vmatpush.bf16.msra.mxu2 %v12177_v24  ;;  %v12261_v48 = vor.u32 %v14103_v41, %v12258_v25  ;;  %v12438_v24 = vld [vmem:[#allocation7 + $0xfb4] sm:$0xf0]  ;;  %v14172_v41 = vld [vmem:[#allocation7 + $0x106c] sm:$0xf] }
 0x31d   :  { %v16243_v8 = vadd.f32 %v7173_v9, %v7145_v16  ;;  %v7118_v57 = vadd.f32 %v7117_v22, %v7089_v33  ;;  %7455 = vmatpush.bf16.msra.mxu1 %v12081_v62  ;;  %7512 = vmatpush.bf16.msra.mxu3 %v12285_v6  ;;  %v14055_v9 = vld [vmem:[#allocation7 + $0xcc4] sm:$0xf]  ;;  %v12162_v16 = vld [vmem:[#allocation7 + $0xd8c] sm:$0xf0]  ;;  %v17929_v62 = vld [vmem:[#allocation51_spill] sm:$0xff] }
 0x31e   :  { %7427 = vmatpush.bf16.msra.mxu0 %v11973_v15  ;;  %v12069_v42 = vor.u32 %v14055_v9, %v12066_v35  ;;  %v12165_v0 = vor.u32 %v14079_v18, %v12162_v16  ;;  %v14148_v15 = vld [vmem:[#allocation7 + $0xfac] sm:$0xf]  ;;  %v17932_v9 = vld [vmem:[#allocation54_spill] sm:$0xff] }
 0x31f   :  { %v12441_v35 = vor.u32 %v14148_v15, %v12438_v24 }
 0x320   :  { %7485 = vmatpush.bf16.msra.mxu2 %v12165_v0  ;;  %v12426_v0 = vld [vmem:[#allocation7 + $0xf9c] sm:$0xf0] }
 0x321   :  { %7456 = vmatpush.bf16.msra.mxu1 %v12069_v42  ;;  %7513 = vmatpush.bf16.msra.mxu3 %v12273_v56 }
 0x322   :  { %v7146_v50 = vpop.f32.mrf.mxu2  ;;  %v7091_v33 = vpop.f32.mrf.mxu0  ;;  %7536 = vmatpush.bf16.msrb.mxu0 %v12441_v35 }
 0x323   :  { %v7147_v19 = vadd.f32 %v7146_v50, %v7118_v57  ;;  %v7175_v22 = vpop.f32.mrf.mxu3  ;;  %v7092_v58 = vadd.f32 %v7091_v33, %v16213_v13  ;;  %v7120_v60 = vpop.f32.mrf.mxu1  ;;  %v17931_v57 = vld [vmem:[#allocation53_spill] sm:$0xff] }
 0x325   :  { %v16246_v6 = vadd.f32 %v7175_v22, %v7147_v19  ;;  %v7121_v49 = vadd.f32 %v7120_v60, %v7092_v58  ;;  %7322 = vmatmul.bf16.gmra.mxu0 %v17929_v62  ;;  %7514 = vmatpush.bf16.msra.mxu3 %v12261_v48  ;;  %v14145_v22 = vld [vmem:[#allocation7 + $0xf94] sm:$0xf]  ;;  %v12534_v58 = vld [vmem:[#allocation7 + $0x1074] sm:$0xf0]  ;;  %v12654_v62 = vld [vmem:[#allocation7 + $0x1164] sm:$0xf0] }
 0x326   :  { %7351 = vmatmul.bf16.gmra.mxu1 %v17930_v21  ;;  %v12429_v25 = vor.u32 %v14145_v22, %v12426_v0  ;;  %v12537_v60 = vor.u32 %v14172_v41, %v12534_v58  ;;  %v12414_v22 = vld [vmem:[#allocation7 + $0xf84] sm:$0xf0]  ;;  %v14169_v0 = vld [vmem:[#allocation7 + $0x1054] sm:$0xf] }
 0x327   :  { %7380 = vmatmul.bf16.gmra.mxu2 %v17931_v57  ;;  %v17936_v41 = vld [vmem:[#allocation58_spill] sm:$0xff] }
 0x328   :  { %7409 = vmatmul.bf16.gmra.mxu3 %v17932_v9  ;;  %7537 = vmatpush.bf16.msrb.mxu0 %v12429_v25  ;;  %v12522_v25 = vld [vmem:[#allocation7 + $0x105c] sm:$0xf0] }
 0x329   :  { %7565 = vmatpush.bf16.msrb.mxu1 %v12537_v60  ;;  %v12525_v58 = vor.u32 %v14169_v0, %v12522_v25 }
 0x32a   :  { %v7149_v13 = vpop.f32.mrf.mxu2  ;;  %v7093_v50 = vpop.f32.mrf.mxu0 }
 0x32b   :  { %v7150_v18 = vadd.f32 %v7149_v13, %v7121_v49  ;;  %v7178_v56 = vpop.f32.mrf.mxu3  ;;  %v7094_v42 = vadd.f32 %v7093_v50, %v16216_v59  ;;  %v7122_v16 = vpop.f32.mrf.mxu1  ;;  %v17933_v50 = vld [vmem:[#allocation55_spill] sm:$0xff] }
 0x32d   :  { %v16253_v19 = vadd.f32 %v7178_v56, %v7150_v18  ;;  %v7123_v33 = vadd.f32 %v7122_v16, %v7094_v42  ;;  %v17934_v56 = vld [vmem:[#allocation56_spill] sm:$0xff]  ;;  %v17935_v42 = vld [vmem:[#allocation57_spill] sm:$0xff]  ;;  %v14142_v16 = vld [vmem:[#allocation7 + $0xf7c] sm:$0xf]  ;;  %7566 = vmatpush.bf16.msrb.mxu1 %v12525_v58 }
 0x332   :  { %v7151_v15 = vpop.f32.mrf.mxu2  ;;  %v7096_v24 = vpop.f32.mrf.mxu0 }
 0x333   :  { %v7152_v48 = vadd.f32 %v7151_v15, %v7123_v33  ;;  %v7180_v49 = vpop.f32.mrf.mxu3  ;;  %v7097_v35 = vadd.f32 %v7096_v24, %v16223_v14  ;;  %v7125_v13 = vpop.f32.mrf.mxu1  ;;  %v12417_v33 = vor.u32 %v14142_v16, %v12414_v22  ;;  %v14166_v16 = vld [vmem:[#allocation7 + $0x103c] sm:$0xf]  ;;  %v12510_v22 = vld [vmem:[#allocation7 + $0x1044] sm:$0xf0] }
 0x334   :  { %v12513_v25 = vor.u32 %v14166_v16, %v12510_v22  ;;  %v12618_v16 = vld [vmem:[#allocation7 + $0x111c] sm:$0xf0]  ;;  %v14163_v22 = vld [vmem:[#allocation7 + $0x1024] sm:$0xf] }
 0x335   :  { %v16256_v59 = vadd.f32 %v7180_v49, %v7152_v48  ;;  %v7126_v18 = vadd.f32 %v7125_v13, %v7097_v35  ;;  %7327 = vmatmul.bf16.gmra.mxu0 %v17933_v50  ;;  %v14196_v50 = vld [vmem:[#allocation7 + $0x112c] sm:$0xf] }
 0x336   :  { %7356 = vmatmul.bf16.gmra.mxu1 %v17934_v56  ;;  %7538 = vmatpush.bf16.msrb.mxu0 %v12417_v33  ;;  %v12402_v56 = vld [vmem:[#allocation7 + $0xf6c] sm:$0xf0] }
 0x337   :  { %7385 = vmatmul.bf16.gmra.mxu2 %v17935_v42  ;;  %v14139_v42 = vld [vmem:[#allocation7 + $0xf64] sm:$0xf]  ;;  %7567 = vmatpush.bf16.msrb.mxu1 %v12513_v25 }
 0x338   :  { %7414 = vmatmul.bf16.gmra.mxu3 %v17936_v41  ;;  %v12405_v9 = vor.u32 %v14139_v42, %v12402_v56  ;;  %v12630_v41 = vld [vmem:[#allocation7 + $0x1134] sm:$0xf0]  ;;  %v17938_v56 = vld [vmem:[#allocation60_spill] sm:$0xff]  ;;  %v17939_v42 = vld [vmem:[#allocation61_spill] sm:$0xff] }
 0x339   :  { %v12633_v0 = vor.u32 %v14196_v50, %v12630_v41  ;;  %v14136_v50 = vld [vmem:[#allocation7 + $0xf4c] sm:$0xf]  ;;  %v14193_v41 = vld [vmem:[#allocation7 + $0x1114] sm:$0xf] }
 0x33a   :  { %v7154_v60 = vpop.f32.mrf.mxu2  ;;  %v7098_v15 = vpop.f32.mrf.mxu0  ;;  %7539 = vmatpush.bf16.msrb.mxu0 %v12405_v9  ;;  %v12390_v9 = vld [vmem:[#allocation7 + $0xf54] sm:$0xf0] }
 0x33b   :  { %v7155_v14 = vadd.f32 %v7154_v60, %v7126_v18  ;;  %v7183_v48 = vpop.f32.mrf.mxu3  ;;  %v7099_v24 = vadd.f32 %v7098_v15, %v16226_v17  ;;  %v7127_v49 = vpop.f32.mrf.mxu1  ;;  %7594 = vmatpush.bf16.msrb.mxu2 %v12633_v0  ;;  %v12498_v0 = vld [vmem:[#allocation7 + $0x102c] sm:$0xf0] }
 0x33c   :  { %v12501_v25 = vor.u32 %v14163_v22, %v12498_v0  ;;  %v14133_v0 = vld [vmem:[#allocation7 + $0xf34] sm:$0xf] }
 0x33d   :  { %v16263_v35 = vadd.f32 %v7183_v48, %v7155_v14  ;;  %v7128_v13 = vadd.f32 %v7127_v49, %v7099_v24  ;;  %v17937_v24 = vld [vmem:[#allocation59_spill] sm:$0xff]  ;;  %v17940_v49 = vld [vmem:[#allocation62_spill] sm:$0xff] }
 0x33e   :  { %7568 = vmatpush.bf16.msrb.mxu1 %v12501_v25  ;;  %v12702_v25 = vld [vmem:[#allocation7 + $0x11c4] sm:$0xf0] }
 0x342   :  { %v7156_v18 = vpop.f32.mrf.mxu2  ;;  %v7197_v17 = vpop.f32.mrf.mxu0 }
 0x343   :  { %v7157_v33 = vadd.f32 %v7156_v18, %v7128_v13  ;;  %v7185_v58 = vpop.f32.mrf.mxu3  ;;  %v7198_v60 = vadd.f32 %v7197_v17, %v16233_v53  ;;  %v7226_v14 = vpop.f32.mrf.mxu1  ;;  %v12393_v13 = vor.u32 %v14136_v50, %v12390_v9  ;;  %v12621_v53 = vor.u32 %v14193_v41, %v12618_v16  ;;  %v14220_v18 = vld [vmem:[#allocation7 + $0x11ec] sm:$0xf]  ;;  %v14190_v41 = vld [vmem:[#allocation7 + $0x10fc] sm:$0xf]  ;;  %v12606_v16 = vld [vmem:[#allocation7 + $0x1104] sm:$0xf0] }
 0x345   :  { %v16266_v15 = vadd.f32 %v7185_v58, %v7157_v33  ;;  %v7227_v48 = vadd.f32 %v7226_v14, %v7198_v60  ;;  %7428 = vmatmul.bf16.vlgmr.msra.gmra.mxu0 %v17937_v24  ;;  %v12726_v33 = vld [vmem:[#allocation7 + $0x11f4] sm:$0xf0]  ;;  %7595 = vmatpush.bf16.msrb.mxu2 %v12621_v53  ;;  %v12714_v24 = vld [vmem:[#allocation7 + $0x11dc] sm:$0xf0]  ;;  %v14214_v53 = vld [vmem:[#allocation7 + $0x11bc] sm:$0xf] }
 0x346   :  { %7457 = vmatmul.bf16.vlgmr.msra.gmra.mxu1 %v17938_v56  ;;  %7540 = vmatpush.bf16.msrb.mxu0 %v12393_v13  ;;  %v12729_v17 = vor.u32 %v14220_v18, %v12726_v33  ;;  %v12378_v13 = vld [vmem:[#allocation7 + $0xf3c] sm:$0xf0]  ;;  %v12609_v18 = vor.u32 %v14190_v41, %v12606_v16  ;;  %v12690_v41 = vld [vmem:[#allocation7 + $0x11ac] sm:$0xf0] }
 0x347   :  { %7486 = vmatmul.bf16.vlgmr.msra.gmra.mxu2 %v17939_v42  ;;  %v14217_v42 = vld [vmem:[#allocation7 + $0x11d4] sm:$0xf]  ;;  %v12381_v33 = vor.u32 %v14133_v0, %v12378_v13 }
 0x348   :  { %7515 = vmatmul.bf16.vlgmr.msra.gmra.mxu3 %v17940_v49  ;;  %v12717_v9 = vor.u32 %v14217_v42, %v12714_v24  ;;  %v12594_v24 = vld [vmem:[#allocation7 + $0x10ec] sm:$0xf0] }
 0x349   :  { %7623 = vmatpush.bf16.msrb.mxu3 %v12729_v17  ;;  %7596 = vmatpush.bf16.msrb.mxu2 %v12609_v18  ;;  %v14187_v17 = vld [vmem:[#allocation7 + $0x10e4] sm:$0xf]  ;;  %v14184_v18 = vld [vmem:[#allocation7 + $0x10cc] sm:$0xf] }
 0x34a   :  { %v7255_v58 = vpop.f32.mrf.mxu2  ;;  %v7199_v14 = vpop.f32.mrf.mxu0  ;;  %7541 = vmatpush.bf16.msrb.mxu0 %v12381_v33  ;;  %v12597_v42 = vor.u32 %v14187_v17, %v12594_v24  ;;  %v12366_v17 = vld [vmem:[#allocation7 + $0xf24] sm:$0xf0]  ;;  %v14157_v24 = vld [vmem:[#allocation7 + $0xff4] sm:$0xf] }
 0x34b   :  { %v7256_v60 = vadd.f32 %v7255_v58, %v7227_v48  ;;  %v7284_v56 = vpop.f32.mrf.mxu3  ;;  %v7200_v49 = vadd.f32 %v7199_v14, %v16236_v7  ;;  %v7228_v50 = vpop.f32.mrf.mxu1  ;;  %v14160_v48 = vld [vmem:[#allocation7 + $0x100c] sm:$0xf]  ;;  %v12486_v58 = vld [vmem:[#allocation7 + $0x1014] sm:$0xf0]  ;;  %v12705_v7 = vor.u32 %v14214_v53, %v12702_v25  ;;  %v17942_v53 = vld [vmem:[#allocation64_spill] sm:$0xff] }
 0x34c   :  { %v12489_v21 = vor.u32 %v14160_v48, %v12486_v58  ;;  %v12582_v48 = vld [vmem:[#allocation7 + $0x10d4] sm:$0xf0]  ;;  %v14130_v25 = vld [vmem:[#allocation7 + $0xf1c] sm:$0xf] }
 0x34d   :  { %v16273_v57 = vadd.f32 %v7284_v56, %v7256_v60  ;;  %v7229_v22 = vadd.f32 %v7228_v50, %v7200_v49  ;;  %7624 = vmatpush.bf16.msrb.mxu3 %v12717_v9  ;;  %v14211_v50 = vld [vmem:[#allocation7 + $0x11a4] sm:$0xf]  ;;  %7597 = vmatpush.bf16.msrb.mxu2 %v12597_v42  ;;  %v17941_v58 = vld [vmem:[#allocation63_spill] sm:$0xff]  ;;  %v14208_v42 = vld [vmem:[#allocation7 + $0x118c] sm:$0xf] }
 0x34e   :  { %7569 = vmatpush.bf16.msrb.mxu1 %v12489_v21  ;;  %v12693_v13 = vor.u32 %v14211_v50, %v12690_v41  ;;  %v12585_v21 = vor.u32 %v14184_v18, %v12582_v48  ;;  %v14181_v50 = vld [vmem:[#allocation7 + $0x10b4] sm:$0xf]  ;;  %v12570_v41 = vld [vmem:[#allocation7 + $0x10bc] sm:$0xf0] }
 0x351   :  { %7625 = vmatpush.bf16.msrb.mxu3 %v12705_v7  ;;  %v12369_v7 = vor.u32 %v14130_v25, %v12366_v17  ;;  %7598 = vmatpush.bf16.msrb.mxu2 %v12585_v21 }
 0x352   :  { %v7257_v56 = vpop.f32.mrf.mxu2  ;;  %v7202_v49 = vpop.f32.mrf.mxu0 }
 0x353   :  { %v7258_v60 = vadd.f32 %v7257_v56, %v7229_v22  ;;  %v7286_v14 = vpop.f32.mrf.mxu3  ;;  %v7203_v16 = vadd.f32 %v7202_v49, %v16243_v8  ;;  %v7231_v0 = vpop.f32.mrf.mxu1  ;;  %v17943_v22 = vld [vmem:[#allocation65_spill] sm:$0xff]  ;;  %v17944_v8 = vld [vmem:[#allocation66_spill] sm:$0xff]  ;;  %v12474_v56 = vld [vmem:[#allocation7 + $0xffc] sm:$0xf0]  ;;  %7542 = vmatpush.bf16.msrb.mxu0 %v12369_v7 }
 0x354   :  { %v12477_v49 = vor.u32 %v14157_v24, %v12474_v56  ;;  %v14154_v24 = vld [vmem:[#allocation7 + $0xfdc] sm:$0xf]  ;;  %v12462_v56 = vld [vmem:[#allocation7 + $0xfe4] sm:$0xf0]  ;;  %v14127_v7 = vld [vmem:[#allocation7 + $0xf04] sm:$0xf] }
 0x355   :  { %v16276_v9 = vadd.f32 %v7286_v14, %v7258_v60  ;;  %v7232_v33 = vadd.f32 %v7231_v0, %v7203_v16  ;;  %7433 = vmatmul.bf16.gmra.mxu0 %v17941_v58  ;;  %v12678_v60 = vld [vmem:[#allocation7 + $0x1194] sm:$0xf0]  ;;  %7626 = vmatpush.bf16.msrb.mxu3 %v12693_v13  ;;  %v12573_v0 = vor.u32 %v14181_v50, %v12570_v41  ;;  %v12666_v58 = vld [vmem:[#allocation7 + $0x117c] sm:$0xf0]  ;;  %v12354_v50 = vld [vmem:[#allocation7 + $0xf0c] sm:$0xf0] }
 0x356   :  { %7462 = vmatmul.bf16.gmra.mxu1 %v17942_v53  ;;  %v12681_v14 = vor.u32 %v14208_v42, %v12678_v60  ;;  %v14205_v53 = vld [vmem:[#allocation7 + $0x1174] sm:$0xf]  ;;  %v14178_v42 = vld [vmem:[#allocation7 + $0x109c] sm:$0xf]  ;;  %v12558_v41 = vld [vmem:[#allocation7 + $0x10a4] sm:$0xf0] }
 0x357   :  { %7491 = vmatmul.bf16.gmra.mxu2 %v17943_v22  ;;  %7570 = vmatpush.bf16.msrb.mxu1 %v12477_v49  ;;  %v12669_v13 = vor.u32 %v14205_v53, %v12666_v58  ;;  %v12561_v49 = vor.u32 %v14178_v42, %v12558_v41  ;;  %v17946_v41 = vld [vmem:[#allocation68_spill] sm:$0xff] }
 0x358   :  { %7520 = vmatmul.bf16.gmra.mxu3 %v17944_v8  ;;  %7599 = vmatpush.bf16.msrb.mxu2 %v12573_v0  ;;  %v14202_v8 = vld [vmem:[#allocation7 + $0x115c] sm:$0xf]  ;;  %v12450_v0 = vld [vmem:[#allocation7 + $0xfcc] sm:$0xf0] }
 0x359   :  { %7627 = vmatpush.bf16.msrb.mxu3 %v12681_v14  ;;  %v14175_v14 = vld [vmem:[#allocation7 + $0x1084] sm:$0xf] }
 0x35a   :  { %v7260_v16 = vpop.f32.mrf.mxu2  ;;  %v7204_v48 = vpop.f32.mrf.mxu0 }
 0x35b   :  { %v7261_v18 = vadd.f32 %v7260_v16, %v7232_v33  ;;  %v7289_v22 = vpop.f32.mrf.mxu3  ;;  %v7205_v25 = vadd.f32 %v7204_v48, %v16246_v6  ;;  %v7233_v17 = vpop.f32.mrf.mxu1  ;;  %v12465_v33 = vor.u32 %v14154_v24, %v12462_v56  ;;  %v12357_v16 = vor.u32 %v14127_v7, %v12354_v50  ;;  %v14199_v56 = vld [vmem:[#allocation7 + $0x1144] sm:$0xf]  ;;  %v12642_v7 = vld [vmem:[#allocation7 + $0x114c] sm:$0xf0] }
 0x35c   :  { %v12657_v6 = vor.u32 %v14202_v8, %v12654_v62  ;;  %7600 = vmatpush.bf16.msrb.mxu2 %v12561_v49  ;;  %v12645_v62 = vor.u32 %v14199_v56, %v12642_v7  ;;  %v12822_v49 = vld [vmem:[#allocation7 + $0x12b4] sm:$0xf0]  ;;  %v14268_v56 = vld [vmem:[#allocation7 + $0x136c] sm:$0xf] }
 0x35d   :  { %v16283_v21 = vadd.f32 %v7289_v22, %v7261_v18  ;;  %v7234_v60 = vadd.f32 %v7233_v17, %v7205_v25  ;;  %7571 = vmatpush.bf16.msrb.mxu1 %v12465_v33  ;;  %7628 = vmatpush.bf16.msrb.mxu3 %v12669_v13  ;;  %v14151_v22 = vld [vmem:[#allocation7 + $0xfc4] sm:$0xf]  ;;  %v12546_v18 = vld [vmem:[#allocation7 + $0x108c] sm:$0xf0]  ;;  %v17945_v33 = vld [vmem:[#allocation67_spill] sm:$0xff] }
 0x35e   :  { %7543 = vmatpush.bf16.msrb.mxu0 %v12357_v16  ;;  %v12453_v53 = vor.u32 %v14151_v22, %v12450_v0  ;;  %v12549_v24 = vor.u32 %v14175_v14, %v12546_v18  ;;  %v14244_v16 = vld [vmem:[#allocation7 + $0x12ac] sm:$0xf]  ;;  %v17948_v22 = vld [vmem:[#allocation70_spill] sm:$0xff] }
 0x35f   :  { %v12825_v0 = vor.u32 %v14244_v16, %v12822_v49 }
 0x360   :  { %7601 = vmatpush.bf16.msrb.mxu2 %v12549_v24  ;;  %v12810_v24 = vld [vmem:[#allocation7 + $0x129c] sm:$0xf0] }
 0x361   :  { %7572 = vmatpush.bf16.msrb.mxu1 %v12453_v53  ;;  %7629 = vmatpush.bf16.msrb.mxu3 %v12657_v6 }
 0x362   :  { %v7262_v58 = vpop.f32.mrf.mxu2  ;;  %v7207_v25 = vpop.f32.mrf.mxu0  ;;  %7652 = vmatpush.bf16.msra.mxu0 %v12825_v0 }
 0x363   :  { %v7263_v48 = vadd.f32 %v7262_v58, %v7234_v60  ;;  %v7291_v17 = vpop.f32.mrf.mxu3  ;;  %v7208_v42 = vadd.f32 %v7207_v25, %v16253_v19  ;;  %v7236_v50 = vpop.f32.mrf.mxu1  ;;  %v17947_v60 = vld [vmem:[#allocation69_spill] sm:$0xff] }
 0x365   :  { %v16286_v13 = vadd.f32 %v7291_v17, %v7263_v48  ;;  %v7237_v8 = vadd.f32 %v7236_v50, %v7208_v42  ;;  %7438 = vmatmul.bf16.gmra.mxu0 %v17945_v33  ;;  %7630 = vmatpush.bf16.msrb.mxu3 %v12645_v62  ;;  %v14241_v17 = vld [vmem:[#allocation7 + $0x1294] sm:$0xf]  ;;  %v12918_v42 = vld [vmem:[#allocation7 + $0x1374] sm:$0xf0]  ;;  %v13038_v33 = vld [vmem:[#allocation7 + $0x1464] sm:$0xf0] }
 0x366   :  { %7467 = vmatmul.bf16.gmra.mxu1 %v17946_v41  ;;  %v12813_v7 = vor.u32 %v14241_v17, %v12810_v24  ;;  %v12921_v50 = vor.u32 %v14268_v56, %v12918_v42  ;;  %v12798_v17 = vld [vmem:[#allocation7 + $0x1284] sm:$0xf0]  ;;  %v14265_v24 = vld [vmem:[#allocation7 + $0x1354] sm:$0xf] }
 0x367   :  { %7496 = vmatmul.bf16.gmra.mxu2 %v17947_v60  ;;  %v17952_v56 = vld [vmem:[#allocation74_spill] sm:$0xff] }
 0x368   :  { %7525 = vmatmul.bf16.gmra.mxu3 %v17948_v22  ;;  %7653 = vmatpush.bf16.msra.mxu0 %v12813_v7  ;;  %v12906_v7 = vld [vmem:[#allocation7 + $0x135c] sm:$0xf0] }
 0x369   :  { %7681 = vmatpush.bf16.msra.mxu1 %v12921_v50  ;;  %v12909_v42 = vor.u32 %v14265_v24, %v12906_v7 }
 0x36a   :  { %v7265_v19 = vpop.f32.mrf.mxu2  ;;  %v7209_v58 = vpop.f32.mrf.mxu0 }
 0x36b   :  { %v7266_v14 = vadd.f32 %v7265_v19, %v7237_v8  ;;  %v7294_v6 = vpop.f32.mrf.mxu3  ;;  %v7210_v53 = vadd.f32 %v7209_v58, %v16256_v59  ;;  %v7238_v18 = vpop.f32.mrf.mxu1  ;;  %v17949_v58 = vld [vmem:[#allocation71_spill] sm:$0xff] }
 0x36d   :  { %v16293_v48 = vadd.f32 %v7294_v6, %v7266_v14  ;;  %v7239_v25 = vadd.f32 %v7238_v18, %v7210_v53  ;;  %v17950_v6 = vld [vmem:[#allocation72_spill] sm:$0xff]  ;;  %v17951_v53 = vld [vmem:[#allocation73_spill] sm:$0xff]  ;;  %v14238_v18 = vld [vmem:[#allocation7 + $0x127c] sm:$0xf]  ;;  %7682 = vmatpush.bf16.msra.mxu1 %v12909_v42 }
 0x372   :  { %v7267_v16 = vpop.f32.mrf.mxu2  ;;  %v7212_v49 = vpop.f32.mrf.mxu0 }
 0x373   :  { %v7268_v62 = vadd.f32 %v7267_v16, %v7239_v25  ;;  %v7296_v8 = vpop.f32.mrf.mxu3  ;;  %v7213_v0 = vadd.f32 %v7212_v49, %v16263_v35  ;;  %v7241_v19 = vpop.f32.mrf.mxu1  ;;  %v12801_v25 = vor.u32 %v14238_v18, %v12798_v17  ;;  %v14262_v18 = vld [vmem:[#allocation7 + $0x133c] sm:$0xf]  ;;  %v12894_v17 = vld [vmem:[#allocation7 + $0x1344] sm:$0xf0] }
 0x374   :  { %v12897_v7 = vor.u32 %v14262_v18, %v12894_v17  ;;  %v13002_v18 = vld [vmem:[#allocation7 + $0x141c] sm:$0xf0]  ;;  %v14259_v17 = vld [vmem:[#allocation7 + $0x1324] sm:$0xf] }
 0x375   :  { %v16296_v59 = vadd.f32 %v7296_v8, %v7268_v62  ;;  %v7242_v14 = vadd.f32 %v7241_v19, %v7213_v0  ;;  %7443 = vmatmul.bf16.gmra.mxu0 %v17949_v58  ;;  %v14292_v58 = vld [vmem:[#allocation7 + $0x142c] sm:$0xf] }
 0x376   :  { %7472 = vmatmul.bf16.gmra.mxu1 %v17950_v6  ;;  %7654 = vmatpush.bf16.msra.mxu0 %v12801_v25  ;;  %v12786_v6 = vld [vmem:[#allocation7 + $0x126c] sm:$0xf0] }
 0x377   :  { %7501 = vmatmul.bf16.gmra.mxu2 %v17951_v53  ;;  %v14235_v53 = vld [vmem:[#allocation7 + $0x1264] sm:$0xf]  ;;  %7683 = vmatpush.bf16.msra.mxu1 %v12897_v7 }
 0x378   :  { %7530 = vmatmul.bf16.gmra.mxu3 %v17952_v56  ;;  %v12789_v22 = vor.u32 %v14235_v53, %v12786_v6  ;;  %v13014_v56 = vld [vmem:[#allocation7 + $0x1434] sm:$0xf0]  ;;  %v17954_v6 = vld [vmem:[#allocation76_spill] sm:$0xff]  ;;  %v17955_v53 = vld [vmem:[#allocation77_spill] sm:$0xff] }
 0x379   :  { %v13017_v24 = vor.u32 %v14292_v58, %v13014_v56  ;;  %v14232_v58 = vld [vmem:[#allocation7 + $0x124c] sm:$0xf]  ;;  %v14289_v56 = vld [vmem:[#allocation7 + $0x1414] sm:$0xf] }
 0x37a   :  { %v7270_v50 = vpop.f32.mrf.mxu2  ;;  %v7214_v16 = vpop.f32.mrf.mxu0  ;;  %7655 = vmatpush.bf16.msra.mxu0 %v12789_v22  ;;  %v12774_v22 = vld [vmem:[#allocation7 + $0x1254] sm:$0xf0] }
 0x37b   :  { %v7271_v35 = vadd.f32 %v7270_v50, %v7242_v14  ;;  %v7299_v62 = vpop.f32.mrf.mxu3  ;;  %v7215_v49 = vadd.f32 %v7214_v16, %v16266_v15  ;;  %v7243_v8 = vpop.f32.mrf.mxu1  ;;  %7710 = vmatpush.bf16.msra.mxu2 %v13017_v24  ;;  %v12882_v24 = vld [vmem:[#allocation7 + $0x132c] sm:$0xf0] }
 0x37c   :  { %v12885_v7 = vor.u32 %v14259_v17, %v12882_v24  ;;  %v14229_v24 = vld [vmem:[#allocation7 + $0x1234] sm:$0xf] }
 0x37d   :  { %v16303_v0 = vadd.f32 %v7299_v62, %v7271_v35  ;;  %v7244_v19 = vadd.f32 %v7243_v8, %v7215_v49  ;;  %v17953_v49 = vld [vmem:[#allocation75_spill] sm:$0xff]  ;;  %v17956_v8 = vld [vmem:[#allocation78_spill] sm:$0xff] }
 0x37e   :  { %7684 = vmatpush.bf16.msra.mxu1 %v12885_v7  ;;  %v13086_v7 = vld [vmem:[#allocation7 + $0x14c4] sm:$0xf0] }
 0x382   :  { %v7272_v14 = vpop.f32.mrf.mxu2  ;;  %v7313_v15 = vpop.f32.mrf.mxu0 }
 0x383   :  { %v7273_v25 = vadd.f32 %v7272_v14, %v7244_v19  ;;  %v7301_v42 = vpop.f32.mrf.mxu3  ;;  %v7314_v50 = vadd.f32 %v7313_v15, %v16273_v57  ;;  %v7342_v35 = vpop.f32.mrf.mxu1  ;;  %v12777_v19 = vor.u32 %v14232_v58, %v12774_v22  ;;  %v13005_v57 = vor.u32 %v14289_v56, %v13002_v18  ;;  %v14316_v14 = vld [vmem:[#allocation7 + $0x14ec] sm:$0xf]  ;;  %v14286_v56 = vld [vmem:[#allocation7 + $0x13fc] sm:$0xf]  ;;  %v12990_v18 = vld [vmem:[#allocation7 + $0x1404] sm:$0xf0] }
 0x385   :  { %v16306_v16 = vadd.f32 %v7301_v42, %v7273_v25  ;;  %v7343_v62 = vadd.f32 %v7342_v35, %v7314_v50  ;;  %7544 = vmatmul.bf16.vlgmr.msrb.gmra.mxu0 %v17953_v49  ;;  %v13110_v25 = vld [vmem:[#allocation7 + $0x14f4] sm:$0xf0]  ;;  %7711 = vmatpush.bf16.msra.mxu2 %v13005_v57  ;;  %v13098_v49 = vld [vmem:[#allocation7 + $0x14dc] sm:$0xf0]  ;;  %v14310_v57 = vld [vmem:[#allocation7 + $0x14bc] sm:$0xf] }
 0x386   :  { %7573 = vmatmul.bf16.vlgmr.msrb.gmra.mxu1 %v17954_v6  ;;  %7656 = vmatpush.bf16.msra.mxu0 %v12777_v19  ;;  %v13113_v15 = vor.u32 %v14316_v14, %v13110_v25  ;;  %v12762_v19 = vld [vmem:[#allocation7 + $0x123c] sm:$0xf0]  ;;  %v12993_v14 = vor.u32 %v14286_v56, %v12990_v18  ;;  %v13074_v56 = vld [vmem:[#allocation7 + $0x14ac] sm:$0xf0] }
 0x387   :  { %7602 = vmatmul.bf16.vlgmr.msrb.gmra.mxu2 %v17955_v53  ;;  %v14313_v53 = vld [vmem:[#allocation7 + $0x14d4] sm:$0xf]  ;;  %v12765_v25 = vor.u32 %v14229_v24, %v12762_v19 }
 0x388   :  { %7631 = vmatmul.bf16.vlgmr.msrb.gmra.mxu3 %v17956_v8  ;;  %v13101_v22 = vor.u32 %v14313_v53, %v13098_v49  ;;  %v12978_v49 = vld [vmem:[#allocation7 + $0x13ec] sm:$0xf0] }
 0x389   :  { %7739 = vmatpush.bf16.msra.mxu3 %v13113_v15  ;;  %7712 = vmatpush.bf16.msra.mxu2 %v12993_v14  ;;  %v14283_v15 = vld [vmem:[#allocation7 + $0x13e4] sm:$0xf]  ;;  %v14280_v14 = vld [vmem:[#allocation7 + $0x13cc] sm:$0xf] }
 0x38a   :  { %v7371_v42 = vpop.f32.mrf.mxu2  ;;  %v7315_v35 = vpop.f32.mrf.mxu0  ;;  %7657 = vmatpush.bf16.msra.mxu0 %v12765_v25  ;;  %v12981_v53 = vor.u32 %v14283_v15, %v12978_v49  ;;  %v12750_v15 = vld [vmem:[#allocation7 + $0x1224] sm:$0xf0]  ;;  %v14253_v49 = vld [vmem:[#allocation7 + $0x12f4] sm:$0xf] }
 0x38b   :  { %v7372_v50 = vadd.f32 %v7371_v42, %v7343_v62  ;;  %v7400_v6 = vpop.f32.mrf.mxu3  ;;  %v7316_v8 = vadd.f32 %v7315_v35, %v16276_v9  ;;  %v7344_v58 = vpop.f32.mrf.mxu1  ;;  %v14256_v62 = vld [vmem:[#allocation7 + $0x130c] sm:$0xf]  ;;  %v12870_v42 = vld [vmem:[#allocation7 + $0x1314] sm:$0xf0]  ;;  %v13089_v9 = vor.u32 %v14310_v57, %v13086_v7  ;;  %v17958_v57 = vld [vmem:[#allocation80_spill] sm:$0xff] }
 0x38c   :  { %v12873_v41 = vor.u32 %v14256_v62, %v12870_v42  ;;  %v12966_v62 = vld [vmem:[#allocation7 + $0x13d4] sm:$0xf0]  ;;  %v14226_v7 = vld [vmem:[#allocation7 + $0x121c] sm:$0xf] }
 0x38d   :  { %v16313_v60 = vadd.f32 %v7400_v6, %v7372_v50  ;;  %v7345_v17 = vadd.f32 %v7344_v58, %v7316_v8  ;;  %7740 = vmatpush.bf16.msra.mxu3 %v13101_v22  ;;  %v14307_v58 = vld [vmem:[#allocation7 + $0x14a4] sm:$0xf]  ;;  %7713 = vmatpush.bf16.msra.mxu2 %v12981_v53  ;;  %v17957_v42 = vld [vmem:[#allocation79_spill] sm:$0xff]  ;;  %v14304_v53 = vld [vmem:[#allocation7 + $0x148c] sm:$0xf] }
 0x38e   :  { %7685 = vmatpush.bf16.msra.mxu1 %v12873_v41  ;;  %v13077_v19 = vor.u32 %v14307_v58, %v13074_v56  ;;  %v12969_v41 = vor.u32 %v14280_v14, %v12966_v62  ;;  %v14277_v58 = vld [vmem:[#allocation7 + $0x13b4] sm:$0xf]  ;;  %v12954_v56 = vld [vmem:[#allocation7 + $0x13bc] sm:$0xf0] }
 0x391   :  { %7741 = vmatpush.bf16.msra.mxu3 %v13089_v9  ;;  %v12753_v9 = vor.u32 %v14226_v7, %v12750_v15  ;;  %7714 = vmatpush.bf16.msra.mxu2 %v12969_v41 }
 0x392   :  { %v7373_v6 = vpop.f32.mrf.mxu2  ;;  %v7318_v8 = vpop.f32.mrf.mxu0 }
 0x393   :  { %v7374_v50 = vadd.f32 %v7373_v6, %v7345_v17  ;;  %v7402_v35 = vpop.f32.mrf.mxu3  ;;  %v7319_v18 = vadd.f32 %v7318_v8, %v16283_v21  ;;  %v7347_v24 = vpop.f32.mrf.mxu1  ;;  %v17959_v17 = vld [vmem:[#allocation81_spill] sm:$0xff]  ;;  %v17960_v21 = vld [vmem:[#allocation82_spill] sm:$0xff]  ;;  %v12858_v6 = vld [vmem:[#allocation7 + $0x12fc] sm:$0xf0]  ;;  %7658 = vmatpush.bf16.msra.mxu0 %v12753_v9 }
 0x394   :  { %v12861_v8 = vor.u32 %v14253_v49, %v12858_v6  ;;  %v14250_v49 = vld [vmem:[#allocation7 + $0x12dc] sm:$0xf]  ;;  %v12846_v6 = vld [vmem:[#allocation7 + $0x12e4] sm:$0xf0]  ;;  %v14223_v9 = vld [vmem:[#allocation7 + $0x1204] sm:$0xf] }
 0x395   :  { %v16316_v22 = vadd.f32 %v7402_v35, %v7374_v50  ;;  %v7348_v25 = vadd.f32 %v7347_v24, %v7319_v18  ;;  %7549 = vmatmul.bf16.gmra.mxu0 %v17957_v42  ;;  %v13062_v50 = vld [vmem:[#allocation7 + $0x1494] sm:$0xf0]  ;;  %7742 = vmatpush.bf16.msra.mxu3 %v13077_v19  ;;  %v12957_v24 = vor.u32 %v14277_v58, %v12954_v56  ;;  %v13050_v42 = vld [vmem:[#allocation7 + $0x147c] sm:$0xf0]  ;;  %v12738_v58 = vld [vmem:[#allocation7 + $0x120c] sm:$0xf0] }
 0x396   :  { %7578 = vmatmul.bf16.gmra.mxu1 %v17958_v57  ;;  %v13065_v35 = vor.u32 %v14304_v53, %v13062_v50  ;;  %v14301_v57 = vld [vmem:[#allocation7 + $0x1474] sm:$0xf]  ;;  %v14274_v53 = vld [vmem:[#allocation7 + $0x139c] sm:$0xf]  ;;  %v12942_v56 = vld [vmem:[#allocation7 + $0x13a4] sm:$0xf0] }
 0x397   :  { %7607 = vmatmul.bf16.gmra.mxu2 %v17959_v17  ;;  %7686 = vmatpush.bf16.msra.mxu1 %v12861_v8  ;;  %v13053_v19 = vor.u32 %v14301_v57, %v13050_v42  ;;  %v12945_v8 = vor.u32 %v14274_v53, %v12942_v56  ;;  %v17962_v56 = vld [vmem:[#allocation84_spill] sm:$0xff] }
 0x398   :  { %7636 = vmatmul.bf16.gmra.mxu3 %v17960_v21  ;;  %7715 = vmatpush.bf16.msra.mxu2 %v12957_v24  ;;  %v14298_v21 = vld [vmem:[#allocation7 + $0x145c] sm:$0xf]  ;;  %v12834_v24 = vld [vmem:[#allocation7 + $0x12cc] sm:$0xf0] }
 0x399   :  { %7743 = vmatpush.bf16.msra.mxu3 %v13065_v35  ;;  %v14271_v35 = vld [vmem:[#allocation7 + $0x1384] sm:$0xf] }
 0x39a   :  { %v7376_v18 = vpop.f32.mrf.mxu2  ;;  %v7320_v62 = vpop.f32.mrf.mxu0 }
 0x39b   :  { %v7377_v14 = vadd.f32 %v7376_v18, %v7348_v25  ;;  %v7405_v17 = vpop.f32.mrf.mxu3  ;;  %v7321_v7 = vadd.f32 %v7320_v62, %v16286_v13  ;;  %v7349_v15 = vpop.f32.mrf.mxu1  ;;  %v12849_v25 = vor.u32 %v14250_v49, %v12846_v6  ;;  %v12741_v18 = vor.u32 %v14223_v9, %v12738_v58  ;;  %v14295_v6 = vld [vmem:[#allocation7 + $0x1444] sm:$0xf]  ;;  %v13026_v9 = vld [vmem:[#allocation7 + $0x144c] sm:$0xf0] }
 0x39c   :  { %v13041_v13 = vor.u32 %v14298_v21, %v13038_v33  ;;  %7716 = vmatpush.bf16.msra.mxu2 %v12945_v8  ;;  %v13029_v33 = vor.u32 %v14295_v6, %v13026_v9  ;;  %v13206_v8 = vld [vmem:[#allocation7 + $0x15b4] sm:$0xf0]  ;;  %v14364_v6 = vld [vmem:[#allocation7 + $0x166c] sm:$0xf] }
 0x39d   :  { %v16323_v41 = vadd.f32 %v7405_v17, %v7377_v14  ;;  %v7350_v50 = vadd.f32 %v7349_v15, %v7321_v7  ;;  %7687 = vmatpush.bf16.msra.mxu1 %v12849_v25  ;;  %7744 = vmatpush.bf16.msra.mxu3 %v13053_v19  ;;  %v14247_v17 = vld [vmem:[#allocation7 + $0x12c4] sm:$0xf]  ;;  %v12930_v14 = vld [vmem:[#allocation7 + $0x138c] sm:$0xf0]  ;;  %v17961_v25 = vld [vmem:[#allocation83_spill] sm:$0xff] }
 0x39e   :  { %7659 = vmatpush.bf16.msra.mxu0 %v12741_v18  ;;  %v12837_v57 = vor.u32 %v14247_v17, %v12834_v24  ;;  %v12933_v49 = vor.u32 %v14271_v35, %v12930_v14  ;;  %v14340_v18 = vld [vmem:[#allocation7 + $0x15ac] sm:$0xf]  ;;  %v17964_v17 = vld [vmem:[#allocation86_spill] sm:$0xff] }
 0x39f   :  { %v13209_v24 = vor.u32 %v14340_v18, %v13206_v8 }
 0x3a0   :  { %7717 = vmatpush.bf16.msra.mxu2 %v12933_v49  ;;  %v13194_v49 = vld [vmem:[#allocation7 + $0x159c] sm:$0xf0] }
 0x3a1   :  { %7688 = vmatpush.bf16.msra.mxu1 %v12837_v57  ;;  %7745 = vmatpush.bf16.msra.mxu3 %v13041_v13 }
 0x3a2   :  { %v7378_v42 = vpop.f32.mrf.mxu2  ;;  %v7323_v7 = vpop.f32.mrf.mxu0  ;;  %7768 = vmatpush.bf16.msrb.mxu0 %v13209_v24 }
 0x3a3   :  { %v7379_v62 = vadd.f32 %v7378_v42, %v7350_v50  ;;  %v7407_v15 = vpop.f32.mrf.mxu3  ;;  %v7324_v53 = vadd.f32 %v7323_v7, %v16293_v48  ;;  %v7352_v58 = vpop.f32.mrf.mxu1  ;;  %v17963_v50 = vld [vmem:[#allocation85_spill] sm:$0xff] }
 0x3a5   :  { %v16326_v19 = vadd.f32 %v7407_v15, %v7379_v62  ;;  %v7353_v21 = vadd.f32 %v7352_v58, %v7324_v53  ;;  %7554 = vmatmul.bf16.gmra.mxu0 %v17961_v25  ;;  %7746 = vmatpush.bf16.msra.mxu3 %v13029_v33  ;;  %v14337_v15 = vld [vmem:[#allocation7 + $0x1594] sm:$0xf]  ;;  %v13302_v53 = vld [vmem:[#allocation7 + $0x1674] sm:$0xf0]  ;;  %v13422_v25 = vld [vmem:[#allocation7 + $0x1764] sm:$0xf0] }
 0x3a6   :  { %7583 = vmatmul.bf16.gmra.mxu1 %v17962_v56  ;;  %v13197_v9 = vor.u32 %v14337_v15, %v13194_v49  ;;  %v13305_v58 = vor.u32 %v14364_v6, %v13302_v53  ;;  %v13182_v15 = vld [vmem:[#allocation7 + $0x1584] sm:$0xf0]  ;;  %v14361_v49 = vld [vmem:[#allocation7 + $0x1654] sm:$0xf] }
 0x3a7   :  { %7612 = vmatmul.bf16.gmra.mxu2 %v17963_v50  ;;  %v17968_v6 = vld [vmem:[#allocation90_spill] sm:$0xff] }
 0x3a8   :  { %7641 = vmatmul.bf16.gmra.mxu3 %v17964_v17  ;;  %7769 = vmatpush.bf16.msrb.mxu0 %v13197_v9  ;;  %v13290_v9 = vld [vmem:[#allocation7 + $0x165c] sm:$0xf0] }
 0x3a9   :  { %7797 = vmatpush.bf16.msrb.mxu1 %v13305_v58  ;;  %v13293_v53 = vor.u32 %v14361_v49, %v13290_v9 }
 0x3aa   :  { %v7381_v48 = vpop.f32.mrf.mxu2  ;;  %v7325_v42 = vpop.f32.mrf.mxu0 }
 0x3ab   :  { %v7382_v35 = vadd.f32 %v7381_v48, %v7353_v21  ;;  %v7410_v13 = vpop.f32.mrf.mxu3  ;;  %v7326_v57 = vadd.f32 %v7325_v42, %v16296_v59  ;;  %v7354_v14 = vpop.f32.mrf.mxu1  ;;  %v17965_v42 = vld [vmem:[#allocation87_spill] sm:$0xff] }
 0x3ad   :  { %v16333_v62 = vadd.f32 %v7410_v13, %v7382_v35  ;;  %v7355_v7 = vadd.f32 %v7354_v14, %v7326_v57  ;;  %v17966_v13 = vld [vmem:[#allocation88_spill] sm:$0xff]  ;;  %v17967_v57 = vld [vmem:[#allocation89_spill] sm:$0xff]  ;;  %v14334_v14 = vld [vmem:[#allocation7 + $0x157c] sm:$0xf]  ;;  %7798 = vmatpush.bf16.msrb.mxu1 %v13293_v53 }
 0x3b2   :  { %v7383_v18 = vpop.f32.mrf.mxu2  ;;  %v7328_v8 = vpop.f32.mrf.mxu0 }
 0x3b3   :  { %v7384_v33 = vadd.f32 %v7383_v18, %v7355_v7  ;;  %v7412_v21 = vpop.f32.mrf.mxu3  ;;  %v7329_v24 = vadd.f32 %v7328_v8, %v16303_v0  ;;  %v7357_v48 = vpop.f32.mrf.mxu1  ;;  %v13185_v7 = vor.u32 %v14334_v14, %v13182_v15  ;;  %v14358_v14 = vld [vmem:[#allocation7 + $0x163c] sm:$0xf]  ;;  %v13278_v15 = vld [vmem:[#allocation7 + $0x1644] sm:$0xf0] }
 0x3b4   :  { %v13281_v9 = vor.u32 %v14358_v14, %v13278_v15  ;;  %v13386_v14 = vld [vmem:[#allocation7 + $0x171c] sm:$0xf0]  ;;  %v14355_v15 = vld [vmem:[#allocation7 + $0x1624] sm:$0xf] }
 0x3b5   :  { %v16336_v59 = vadd.f32 %v7412_v21, %v7384_v33  ;;  %v7358_v35 = vadd.f32 %v7357_v48, %v7329_v24  ;;  %7559 = vmatmul.bf16.gmra.mxu0 %v17965_v42  ;;  %v14388_v42 = vld [vmem:[#allocation7 + $0x172c] sm:$0xf] }
 0x3b6   :  { %7588 = vmatmul.bf16.gmra.mxu1 %v17966_v13  ;;  %7770 = vmatpush.bf16.msrb.mxu0 %v13185_v7  ;;  %v13170_v13 = vld [vmem:[#allocation7 + $0x156c] sm:$0xf0] }
 0x3b7   :  { %7617 = vmatmul.bf16.gmra.mxu2 %v17967_v57  ;;  %v14331_v57 = vld [vmem:[#allocation7 + $0x1564] sm:$0xf]  ;;  %7799 = vmatpush.bf16.msrb.mxu1 %v13281_v9 }
 0x3b8   :  { %7646 = vmatmul.bf16.gmra.mxu3 %v17968_v6  ;;  %v13173_v17 = vor.u32 %v14331_v57, %v13170_v13  ;;  %v13398_v6 = vld [vmem:[#allocation7 + $0x1734] sm:$0xf0]  ;;  %v17970_v13 = vld [vmem:[#allocation92_spill] sm:$0xff]  ;;  %v17971_v57 = vld [vmem:[#allocation93_spill] sm:$0xff] }
 0x3b9   :  { %v13401_v49 = vor.u32 %v14388_v42, %v13398_v6  ;;  %v14328_v42 = vld [vmem:[#allocation7 + $0x154c] sm:$0xf]  ;;  %v14385_v6 = vld [vmem:[#allocation7 + $0x1714] sm:$0xf] }
 0x3ba   :  { %v7386_v58 = vpop.f32.mrf.mxu2  ;;  %v7330_v18 = vpop.f32.mrf.mxu0  ;;  %7771 = vmatpush.bf16.msrb.mxu0 %v13173_v17  ;;  %v13158_v17 = vld [vmem:[#allocation7 + $0x1554] sm:$0xf0] }
 0x3bb   :  { %v7387_v0 = vadd.f32 %v7386_v58, %v7358_v35  ;;  %v7415_v33 = vpop.f32.mrf.mxu3  ;;  %v7331_v8 = vadd.f32 %v7330_v18, %v16306_v16  ;;  %v7359_v21 = vpop.f32.mrf.mxu1  ;;  %7826 = vmatpush.bf16.msrb.mxu2 %v13401_v49  ;;  %v13266_v49 = vld [vmem:[#allocation7 + $0x162c] sm:$0xf0] }
 0x3bc   :  { %v13269_v9 = vor.u32 %v14355_v15, %v13266_v49  ;;  %v14325_v49 = vld [vmem:[#allocation7 + $0x1534] sm:$0xf] }
 0x3bd   :  { %v16343_v24 = vadd.f32 %v7415_v33, %v7387_v0  ;;  %v7360_v48 = vadd.f32 %v7359_v21, %v7331_v8  ;;  %v17969_v8 = vld [vmem:[#allocation91_spill] sm:$0xff]  ;;  %v17972_v21 = vld [vmem:[#allocation94_spill] sm:$0xff] }
 0x3be   :  { %7800 = vmatpush.bf16.msrb.mxu1 %v13269_v9  ;;  %v13470_v9 = vld [vmem:[#allocation7 + $0x17c4] sm:$0xf0] }
 0x3c2   :  { %v7388_v35 = vpop.f32.mrf.mxu2  ;;  %v7429_v16 = vpop.f32.mrf.mxu0 }
 0x3c3   :  { %v7389_v7 = vadd.f32 %v7388_v35, %v7360_v48  ;;  %v7417_v53 = vpop.f32.mrf.mxu3  ;;  %v7430_v58 = vadd.f32 %v7429_v16, %v16313_v60  ;;  %v7458_v0 = vpop.f32.mrf.mxu1  ;;  %v13161_v48 = vor.u32 %v14328_v42, %v13158_v17  ;;  %v13389_v60 = vor.u32 %v14385_v6, %v13386_v14  ;;  %v14412_v35 = vld [vmem:[#allocation7 + $0x17ec] sm:$0xf]  ;;  %v14382_v6 = vld [vmem:[#allocation7 + $0x16fc] sm:$0xf]  ;;  %v13374_v14 = vld [vmem:[#allocation7 + $0x1704] sm:$0xf0] }
 0x3c5   :  { %v16346_v18 = vadd.f32 %v7417_v53, %v7389_v7  ;;  %v7459_v33 = vadd.f32 %v7458_v0, %v7430_v58  ;;  %7660 = vmatmul.bf16.vlgmr.msra.gmra.mxu0 %v17969_v8  ;;  %v13494_v7 = vld [vmem:[#allocation7 + $0x17f4] sm:$0xf0]  ;;  %7827 = vmatpush.bf16.msrb.mxu2 %v13389_v60  ;;  %v13482_v8 = vld [vmem:[#allocation7 + $0x17dc] sm:$0xf0]  ;;  %v14406_v60 = vld [vmem:[#allocation7 + $0x17bc] sm:$0xf] }
 0x3c6   :  { %7689 = vmatmul.bf16.vlgmr.msra.gmra.mxu1 %v17970_v13  ;;  %7772 = vmatpush.bf16.msrb.mxu0 %v13161_v48  ;;  %v13497_v16 = vor.u32 %v14412_v35, %v13494_v7  ;;  %v13146_v48 = vld [vmem:[#allocation7 + $0x153c] sm:$0xf0]  ;;  %v13377_v35 = vor.u32 %v14382_v6, %v13374_v14  ;;  %v13458_v6 = vld [vmem:[#allocation7 + $0x17ac] sm:$0xf0] }
 0x3c7   :  { %7718 = vmatmul.bf16.vlgmr.msra.gmra.mxu2 %v17971_v57  ;;  %v14409_v57 = vld [vmem:[#allocation7 + $0x17d4] sm:$0xf]  ;;  %v13149_v7 = vor.u32 %v14325_v49, %v13146_v48 }
 0x3c8   :  { %7747 = vmatmul.bf16.vlgmr.msra.gmra.mxu3 %v17972_v21  ;;  %v13485_v17 = vor.u32 %v14409_v57, %v13482_v8  ;;  %v13362_v8 = vld [vmem:[#allocation7 + $0x16ec] sm:$0xf0] }
 0x3c9   :  { %7855 = vmatpush.bf16.msrb.mxu3 %v13497_v16  ;;  %7828 = vmatpush.bf16.msrb.mxu2 %v13377_v35  ;;  %v14379_v16 = vld [vmem:[#allocation7 + $0x16e4] sm:$0xf]  ;;  %v14376_v35 = vld [vmem:[#allocation7 + $0x16cc] sm:$0xf] }
 0x3ca   :  { %v7487_v53 = vpop.f32.mrf.mxu2  ;;  %v7431_v0 = vpop.f32.mrf.mxu0  ;;  %7773 = vmatpush.bf16.msrb.mxu0 %v13149_v7  ;;  %v13365_v57 = vor.u32 %v14379_v16, %v13362_v8  ;;  %v13134_v16 = vld [vmem:[#allocation7 + $0x1524] sm:$0xf0]  ;;  %v14349_v8 = vld [vmem:[#allocation7 + $0x15f4] sm:$0xf] }
 0x3cb   :  { %v7488_v58 = vadd.f32 %v7487_v53, %v7459_v33  ;;  %v7516_v13 = vpop.f32.mrf.mxu3  ;;  %v7432_v21 = vadd.f32 %v7431_v0, %v16316_v22  ;;  %v7460_v42 = vpop.f32.mrf.mxu1  ;;  %v14352_v33 = vld [vmem:[#allocation7 + $0x160c] sm:$0xf]  ;;  %v13254_v53 = vld [vmem:[#allocation7 + $0x1614] sm:$0xf0]  ;;  %v13473_v22 = vor.u32 %v14406_v60, %v13470_v9  ;;  %v17974_v60 = vld [vmem:[#allocation96_spill] sm:$0xff] }
 0x3cc   :  { %v13257_v56 = vor.u32 %v14352_v33, %v13254_v53  ;;  %v13350_v33 = vld [vmem:[#allocation7 + $0x16d4] sm:$0xf0]  ;;  %v14322_v9 = vld [vmem:[#allocation7 + $0x151c] sm:$0xf] }
 0x3cd   :  { %v16353_v50 = vadd.f32 %v7516_v13, %v7488_v58  ;;  %v7461_v15 = vadd.f32 %v7460_v42, %v7432_v21  ;;  %7856 = vmatpush.bf16.msrb.mxu3 %v13485_v17  ;;  %v14403_v42 = vld [vmem:[#allocation7 + $0x17a4] sm:$0xf]  ;;  %7829 = vmatpush.bf16.msrb.mxu2 %v13365_v57  ;;  %v17973_v53 = vld [vmem:[#allocation95_spill] sm:$0xff]  ;;  %v14400_v57 = vld [vmem:[#allocation7 + $0x178c] sm:$0xf] }
 0x3ce   :  { %7801 = vmatpush.bf16.msrb.mxu1 %v13257_v56  ;;  %v13461_v48 = vor.u32 %v14403_v42, %v13458_v6  ;;  %v13353_v56 = vor.u32 %v14376_v35, %v13350_v33  ;;  %v14373_v42 = vld [vmem:[#allocation7 + $0x16b4] sm:$0xf]  ;;  %v13338_v6 = vld [vmem:[#allocation7 + $0x16bc] sm:$0xf0] }
 0x3d1   :  { %7857 = vmatpush.bf16.msrb.mxu3 %v13473_v22  ;;  %v13137_v22 = vor.u32 %v14322_v9, %v13134_v16  ;;  %7830 = vmatpush.bf16.msrb.mxu2 %v13353_v56 }
 0x3d2   :  { %v7489_v13 = vpop.f32.mrf.mxu2  ;;  %v7434_v21 = vpop.f32.mrf.mxu0 }
 0x3d3   :  { %v7490_v58 = vadd.f32 %v7489_v13, %v7461_v15  ;;  %v7518_v0 = vpop.f32.mrf.mxu3  ;;  %v7435_v14 = vadd.f32 %v7434_v21, %v16323_v41  ;;  %v7463_v49 = vpop.f32.mrf.mxu1  ;;  %v17975_v15 = vld [vmem:[#allocation97_spill] sm:$0xff]  ;;  %v17976_v41 = vld [vmem:[#allocation98_spill] sm:$0xff]  ;;  %v13242_v13 = vld [vmem:[#allocation7 + $0x15fc] sm:$0xf0]  ;;  %7774 = vmatpush.bf16.msrb.mxu0 %v13137_v22 }
 0x3d4   :  { %v13245_v21 = vor.u32 %v14349_v8, %v13242_v13  ;;  %v14346_v8 = vld [vmem:[#allocation7 + $0x15dc] sm:$0xf]  ;;  %v13230_v13 = vld [vmem:[#allocation7 + $0x15e4] sm:$0xf0]  ;;  %v14319_v22 = vld [vmem:[#allocation7 + $0x1504] sm:$0xf] }
 0x3d5   :  { %v16356_v17 = vadd.f32 %v7518_v0, %v7490_v58  ;;  %v7464_v7 = vadd.f32 %v7463_v49, %v7435_v14  ;;  %7665 = vmatmul.bf16.gmra.mxu0 %v17973_v53  ;;  %v13446_v58 = vld [vmem:[#allocation7 + $0x1794] sm:$0xf0]  ;;  %7858 = vmatpush.bf16.msrb.mxu3 %v13461_v48  ;;  %v13341_v49 = vor.u32 %v14373_v42, %v13338_v6  ;;  %v13434_v53 = vld [vmem:[#allocation7 + $0x177c] sm:$0xf0]  ;;  %v13122_v42 = vld [vmem:[#allocation7 + $0x150c] sm:$0xf0] }
 0x3d6   :  { %7694 = vmatmul.bf16.gmra.mxu1 %v17974_v60  ;;  %v13449_v0 = vor.u32 %v14400_v57, %v13446_v58  ;;  %v14397_v60 = vld [vmem:[#allocation7 + $0x1774] sm:$0xf]  ;;  %v14370_v57 = vld [vmem:[#allocation7 + $0x169c] sm:$0xf]  ;;  %v13326_v6 = vld [vmem:[#allocation7 + $0x16a4] sm:$0xf0] }
 0x3d7   :  { %7723 = vmatmul.bf16.gmra.mxu2 %v17975_v15  ;;  %7802 = vmatpush.bf16.msrb.mxu1 %v13245_v21  ;;  %v13437_v48 = vor.u32 %v14397_v60, %v13434_v53  ;;  %v13329_v21 = vor.u32 %v14370_v57, %v13326_v6  ;;  %v17978_v6 = vld [vmem:[#allocation100_spill] sm:$0xff] }
 0x3d8   :  { %7752 = vmatmul.bf16.gmra.mxu3 %v17976_v41  ;;  %7831 = vmatpush.bf16.msrb.mxu2 %v13341_v49  ;;  %v14394_v41 = vld [vmem:[#allocation7 + $0x175c] sm:$0xf]  ;;  %v13218_v49 = vld [vmem:[#allocation7 + $0x15cc] sm:$0xf0] }
 0x3d9   :  { %7859 = vmatpush.bf16.msrb.mxu3 %v13449_v0  ;;  %v14367_v0 = vld [vmem:[#allocation7 + $0x1684] sm:$0xf] }
 0x3da   :  { %v7492_v14 = vpop.f32.mrf.mxu2  ;;  %v7436_v33 = vpop.f32.mrf.mxu0 }
 0x3db   :  { %v7493_v35 = vadd.f32 %v7492_v14, %v7464_v7  ;;  %v7521_v15 = vpop.f32.mrf.mxu3  ;;  %v7437_v9 = vadd.f32 %v7436_v33, %v16326_v19  ;;  %v7465_v16 = vpop.f32.mrf.mxu1  ;;  %v13233_v7 = vor.u32 %v14346_v8, %v13230_v13  ;;  %v13125_v14 = vor.u32 %v14319_v22, %v13122_v42  ;;  %v14391_v13 = vld [vmem:[#allocation7 + $0x1744] sm:$0xf]  ;;  %v13410_v22 = vld [vmem:[#allocation7 + $0x174c] sm:$0xf0] }
 0x3dc   :  { %v13425_v19 = vor.u32 %v14394_v41, %v13422_v25  ;;  %7832 = vmatpush.bf16.msrb.mxu2 %v13329_v21  ;;  %v13413_v25 = vor.u32 %v14391_v13, %v13410_v22  ;;  %v13670_v21 = vld [vmem:[#allocation7 + $0xb8] sm:$0xf0]  ;;  %v10620_v13 = vld [vmem:[#allocation7 + $0x170] sm:$0xf] }
 0x3dd   :  { %v16363_v56 = vadd.f32 %v7521_v15, %v7493_v35  ;;  %v7466_v58 = vadd.f32 %v7465_v16, %v7437_v9  ;;  %7803 = vmatpush.bf16.msrb.mxu1 %v13233_v7  ;;  %7860 = vmatpush.bf16.msrb.mxu3 %v13437_v48  ;;  %v14343_v15 = vld [vmem:[#allocation7 + $0x15c4] sm:$0xf]  ;;  %v13314_v35 = vld [vmem:[#allocation7 + $0x168c] sm:$0xf0]  ;;  %v17977_v7 = vld [vmem:[#allocation99_spill] sm:$0xff] }
 0x3de   :  { %7775 = vmatpush.bf16.msrb.mxu0 %v13125_v14  ;;  %v13221_v60 = vor.u32 %v14343_v15, %v13218_v49  ;;  %v13317_v8 = vor.u32 %v14367_v0, %v13314_v35  ;;  %v10524_v14 = vld [vmem:[#allocation7 + $0xb0] sm:$0xf] }
 0x3df   :  { %v17980_v15 = vld [vmem:[#allocation102_spill] sm:$0xff]  ;;  %v10525_v49 = vor.u32 %v13670_v21, %v10524_v14 }
 0x3e0   :  { %7833 = vmatpush.bf16.msrb.mxu2 %v13317_v8  ;;  %v13667_v8 = vld [vmem:[#allocation7 + $0xa0] sm:$0xf0] }
 0x3e1   :  { %7804 = vmatpush.bf16.msrb.mxu1 %v13221_v60  ;;  %7861 = vmatpush.bf16.msrb.mxu3 %v13425_v19 }
 0x3e2   :  { %v7494_v53 = vpop.f32.mrf.mxu2  ;;  %v7439_v9 = vpop.f32.mrf.mxu0  ;;  %7884 = vmatpush.bf16.msra.mxu0 %v10525_v49 }
 0x3e3   :  { %v7495_v33 = vadd.f32 %v7494_v53, %v7466_v58  ;;  %v7523_v16 = vpop.f32.mrf.mxu3  ;;  %v7440_v57 = vadd.f32 %v7439_v9, %v16333_v62  ;;  %v7468_v42 = vpop.f32.mrf.mxu1  ;;  %v17979_v58 = vld [vmem:[#allocation101_spill] sm:$0xff] }
 0x3e5   :  { %v16366_v48 = vadd.f32 %v7523_v16, %v7495_v33  ;;  %v7469_v41 = vadd.f32 %v7468_v42, %v7440_v57  ;;  %7670 = vmatmul.bf16.gmra.mxu0 %v17977_v7  ;;  %7862 = vmatpush.bf16.msrb.mxu3 %v13413_v25  ;;  %v10512_v16 = vld [vmem:[#allocation7 + $0x98] sm:$0xf]  ;;  %v13694_v57 = vld [vmem:[#allocation7 + $0x178] sm:$0xf0]  ;;  %v13724_v7 = vld [vmem:[#allocation7 + $0x268] sm:$0xf0] }
 0x3e6   :  { %7699 = vmatmul.bf16.gmra.mxu1 %v17978_v6  ;;  %v10513_v22 = vor.u32 %v13667_v8, %v10512_v16  ;;  %v10621_v42 = vor.u32 %v13694_v57, %v10620_v13  ;;  %v13664_v16 = vld [vmem:[#allocation7 + $0x88] sm:$0xf0]  ;;  %v10608_v8 = vld [vmem:[#allocation7 + $0x158] sm:$0xf] }
 0x3e7   :  { %7728 = vmatmul.bf16.gmra.mxu2 %v17979_v58  ;;  %v17984_v13 = vld [vmem:[#allocation106_spill] sm:$0xff] }
 0x3e8   :  { %7757 = vmatmul.bf16.gmra.mxu3 %v17980_v15  ;;  %7885 = vmatpush.bf16.msra.mxu0 %v10513_v22  ;;  %v13691_v22 = vld [vmem:[#allocation7 + $0x160] sm:$0xf0] }
 0x3e9   :  { %7913 = vmatpush.bf16.msra.mxu1 %v10621_v42  ;;  %v10609_v57 = vor.u32 %v13691_v22, %v10608_v8 }
 0x3ea   :  { %v7497_v62 = vpop.f32.mrf.mxu2  ;;  %v7441_v53 = vpop.f32.mrf.mxu0 }
 0x3eb   :  { %v7498_v0 = vadd.f32 %v7497_v62, %v7469_v41  ;;  %v7526_v19 = vpop.f32.mrf.mxu3  ;;  %v7442_v60 = vadd.f32 %v7441_v53, %v16336_v59  ;;  %v7470_v35 = vpop.f32.mrf.mxu1  ;;  %v17981_v53 = vld [vmem:[#allocation103_spill] sm:$0xff] }
 0x3ed   :  { %v16373_v33 = vadd.f32 %v7526_v19, %v7498_v0  ;;  %v7471_v9 = vadd.f32 %v7470_v35, %v7442_v60  ;;  %v17982_v19 = vld [vmem:[#allocation104_spill] sm:$0xff]  ;;  %v17983_v60 = vld [vmem:[#allocation105_spill] sm:$0xff]  ;;  %7914 = vmatpush.bf16.msra.mxu1 %v10609_v57 }
 0x3ee   :  { %v10500_v35 = vld [vmem:[#allocation7 + $0x80] sm:$0xf] }
 0x3f2   :  { %v7499_v14 = vpop.f32.mrf.mxu2  ;;  %v7444_v21 = vpop.f32.mrf.mxu0 }
 0x3f3   :  { %v7500_v25 = vadd.f32 %v7499_v14, %v7471_v9  ;;  %v7528_v41 = vpop.f32.mrf.mxu3  ;;  %v7445_v49 = vadd.f32 %v7444_v21, %v16343_v24  ;;  %v7473_v62 = vpop.f32.mrf.mxu1  ;;  %v10501_v9 = vor.u32 %v13664_v16, %v10500_v35  ;;  %v10596_v35 = vld [vmem:[#allocation7 + $0x140] sm:$0xf]  ;;  %v13688_v16 = vld [vmem:[#allocation7 + $0x148] sm:$0xf0] }
 0x3f4   :  { %v10597_v22 = vor.u32 %v13688_v16, %v10596_v35  ;;  %v13715_v35 = vld [vmem:[#allocation7 + $0x220] sm:$0xf0]  ;;  %v10584_v16 = vld [vmem:[#allocation7 + $0x128] sm:$0xf] }
 0x3f5   :  { %v16376_v59 = vadd.f32 %v7528_v41, %v7500_v25  ;;  %v7474_v0 = vadd.f32 %v7473_v62, %v7445_v49  ;;  %7675 = vmatmul.bf16.gmra.mxu0 %v17981_v53  ;;  %v10716_v53 = vld [vmem:[#allocation7 + $0x230] sm:$0xf] }
 0x3f6   :  { %7704 = vmatmul.bf16.gmra.mxu1 %v17982_v19  ;;  %7886 = vmatpush.bf16.msra.mxu0 %v10501_v9  ;;  %v13661_v19 = vld [vmem:[#allocation7 + $0x70] sm:$0xf0] }
 0x3f7   :  { %7733 = vmatmul.bf16.gmra.mxu2 %v17983_v60  ;;  %v10488_v60 = vld [vmem:[#allocation7 + $0x68] sm:$0xf]  ;;  %7915 = vmatpush.bf16.msra.mxu1 %v10597_v22 }
 0x3f8   :  { %7762 = vmatmul.bf16.gmra.mxu3 %v17984_v13  ;;  %v10489_v15 = vor.u32 %v13661_v19, %v10488_v60  ;;  %v13718_v13 = vld [vmem:[#allocation7 + $0x238] sm:$0xf0]  ;;  %v17986_v19 = vld [vmem:[#allocation108_spill] sm:$0xff]  ;;  %v17987_v60 = vld [vmem:[#allocation109_spill] sm:$0xff] }
 0x3f9   :  { %v10717_v8 = vor.u32 %v13718_v13, %v10716_v53  ;;  %v10476_v53 = vld [vmem:[#allocation7 + $0x50] sm:$0xf]  ;;  %v10704_v13 = vld [vmem:[#allocation7 + $0x218] sm:$0xf] }
 0x3fa   :  { %v7502_v42 = vpop.f32.mrf.mxu2  ;;  %v7446_v14 = vpop.f32.mrf.mxu0  ;;  %7887 = vmatpush.bf16.msra.mxu0 %v10489_v15  ;;  %v13658_v15 = vld [vmem:[#allocation7 + $0x58] sm:$0xf0] }
 0x3fb   :  { %v7503_v24 = vadd.f32 %v7502_v42, %v7474_v0  ;;  %v7531_v25 = vpop.f32.mrf.mxu3  ;;  %v7447_v21 = vadd.f32 %v7446_v14, %v16346_v18  ;;  %v7475_v41 = vpop.f32.mrf.mxu1  ;;  %7942 = vmatpush.bf16.msra.mxu2 %v10717_v8  ;;  %v13685_v8 = vld [vmem:[#allocation7 + $0x130] sm:$0xf0] }
 0x3fc   :  { %v10585_v22 = vor.u32 %v13685_v8, %v10584_v16  ;;  %v10464_v8 = vld [vmem:[#allocation7 + $0x38] sm:$0xf] }
 0x3fd   :  { %v16383_v49 = vadd.f32 %v7531_v25, %v7503_v24  ;;  %v7476_v62 = vadd.f32 %v7475_v41, %v7447_v21  ;;  %v17985_v21 = vld [vmem:[#allocation107_spill] sm:$0xff]  ;;  %v17988_v41 = vld [vmem:[#allocation110_spill] sm:$0xff] }
 0x3fe   :  { %7916 = vmatpush.bf16.msra.mxu1 %v10585_v22  ;;  %v13736_v22 = vld [vmem:[#allocation7 + $0x2c8] sm:$0xf0] }
 0x402   :  { %v7504_v0 = vpop.f32.mrf.mxu2  ;;  %v7545_v18 = vpop.f32.mrf.mxu0 }
 0x403   :  { %v7505_v9 = vadd.f32 %v7504_v0, %v7476_v62  ;;  %v7533_v57 = vpop.f32.mrf.mxu3  ;;  %v7546_v42 = vadd.f32 %v7545_v18, %v16353_v50  ;;  %v7574_v24 = vpop.f32.mrf.mxu1  ;;  %v10477_v62 = vor.u32 %v13658_v15, %v10476_v53  ;;  %v10705_v50 = vor.u32 %v13715_v35, %v10704_v13  ;;  %v10812_v0 = vld [vmem:[#allocation7 + $0x2f0] sm:$0xf]  ;;  %v10692_v13 = vld [vmem:[#allocation7 + $0x200] sm:$0xf]  ;;  %v13712_v35 = vld [vmem:[#allocation7 + $0x208] sm:$0xf0] }
 0x405   :  { %v16386_v14 = vadd.f32 %v7533_v57, %v7505_v9  ;;  %v7575_v25 = vadd.f32 %v7574_v24, %v7546_v42  ;;  %7776 = vmatmul.bf16.vlgmr.msrb.gmra.mxu0 %v17985_v21  ;;  %v13742_v9 = vld [vmem:[#allocation7 + $0x2f8] sm:$0xf0]  ;;  %7943 = vmatpush.bf16.msra.mxu2 %v10705_v50  ;;  %v13739_v21 = vld [vmem:[#allocation7 + $0x2e0] sm:$0xf0]  ;;  %v10788_v50 = vld [vmem:[#allocation7 + $0x2c0] sm:$0xf] }
 0x406   :  { %7805 = vmatmul.bf16.vlgmr.msrb.gmra.mxu1 %v17986_v19  ;;  %7888 = vmatpush.bf16.msra.mxu0 %v10477_v62  ;;  %v10813_v18 = vor.u32 %v13742_v9, %v10812_v0  ;;  %v13655_v62 = vld [vmem:[#allocation7 + $0x40] sm:$0xf0]  ;;  %v10693_v0 = vor.u32 %v13712_v35, %v10692_v13  ;;  %v13733_v13 = vld [vmem:[#allocation7 + $0x2b0] sm:$0xf0] }
 0x407   :  { %7834 = vmatmul.bf16.vlgmr.msrb.gmra.mxu2 %v17987_v60  ;;  %v10800_v60 = vld [vmem:[#allocation7 + $0x2d8] sm:$0xf]  ;;  %v10465_v9 = vor.u32 %v13655_v62, %v10464_v8 }
 0x408   :  { %7863 = vmatmul.bf16.vlgmr.msrb.gmra.mxu3 %v17988_v41  ;;  %v10801_v15 = vor.u32 %v13739_v21, %v10800_v60  ;;  %v13709_v21 = vld [vmem:[#allocation7 + $0x1f0] sm:$0xf0] }
 0x409   :  { %7971 = vmatpush.bf16.msra.mxu3 %v10813_v18  ;;  %7944 = vmatpush.bf16.msra.mxu2 %v10693_v0  ;;  %v10680_v18 = vld [vmem:[#allocation7 + $0x1e8] sm:$0xf]  ;;  %v10668_v0 = vld [vmem:[#allocation7 + $0x1d0] sm:$0xf] }
 0x40a   :  { %v7603_v57 = vpop.f32.mrf.mxu2  ;;  %v7547_v24 = vpop.f32.mrf.mxu0  ;;  %7889 = vmatpush.bf16.msra.mxu0 %v10465_v9  ;;  %v10681_v60 = vor.u32 %v13709_v21, %v10680_v18  ;;  %v13652_v18 = vld [vmem:[#allocation7 + $0x28] sm:$0xf0]  ;;  %v10560_v21 = vld [vmem:[#allocation7 + $0xf8] sm:$0xf] }
 0x40b   :  { %v7604_v42 = vadd.f32 %v7603_v57, %v7575_v25  ;;  %v7632_v19 = vpop.f32.mrf.mxu3  ;;  %v7548_v41 = vadd.f32 %v7547_v24, %v16356_v17  ;;  %v7576_v53 = vpop.f32.mrf.mxu1  ;;  %v10572_v25 = vld [vmem:[#allocation7 + $0x110] sm:$0xf]  ;;  %v13682_v57 = vld [vmem:[#allocation7 + $0x118] sm:$0xf0]  ;;  %v10789_v17 = vor.u32 %v13736_v22, %v10788_v50  ;;  %v17990_v50 = vld [vmem:[#allocation112_spill] sm:$0xff] }
 0x40c   :  { %v10573_v6 = vor.u32 %v13682_v57, %v10572_v25  ;;  %v13706_v25 = vld [vmem:[#allocation7 + $0x1d8] sm:$0xf0]  ;;  %v10452_v22 = vld [vmem:[#allocation7 + $0x20] sm:$0xf] }
 0x40d   :  { %v16393_v58 = vadd.f32 %v7632_v19, %v7604_v42  ;;  %v7577_v16 = vadd.f32 %v7576_v53, %v7548_v41  ;;  %7972 = vmatpush.bf16.msra.mxu3 %v10801_v15  ;;  %v10776_v53 = vld [vmem:[#allocation7 + $0x2a8] sm:$0xf]  ;;  %7945 = vmatpush.bf16.msra.mxu2 %v10681_v60  ;;  %v17989_v57 = vld [vmem:[#allocation111_spill] sm:$0xff]  ;;  %v10764_v60 = vld [vmem:[#allocation7 + $0x290] sm:$0xf] }
 0x40e   :  { %7917 = vmatpush.bf16.msra.mxu1 %v10573_v6  ;;  %v10777_v62 = vor.u32 %v13733_v13, %v10776_v53  ;;  %v10669_v6 = vor.u32 %v13706_v25, %v10668_v0  ;;  %v10656_v53 = vld [vmem:[#allocation7 + $0x1b8] sm:$0xf]  ;;  %v13703_v13 = vld [vmem:[#allocation7 + $0x1c0] sm:$0xf0] }
 0x411   :  { %7973 = vmatpush.bf16.msra.mxu3 %v10789_v17  ;;  %v10453_v17 = vor.u32 %v13652_v18, %v10452_v22  ;;  %7946 = vmatpush.bf16.msra.mxu2 %v10669_v6 }
 0x412   :  { %v7605_v19 = vpop.f32.mrf.mxu2  ;;  %v7550_v41 = vpop.f32.mrf.mxu0 }
 0x413   :  { %v7606_v42 = vadd.f32 %v7605_v19, %v7577_v16  ;;  %v7634_v24 = vpop.f32.mrf.mxu3  ;;  %v7551_v35 = vadd.f32 %v7550_v41, %v16363_v56  ;;  %v7579_v8 = vpop.f32.mrf.mxu1  ;;  %v17991_v16 = vld [vmem:[#allocation113_spill] sm:$0xff]  ;;  %v17992_v56 = vld [vmem:[#allocation114_spill] sm:$0xff]  ;;  %v13679_v19 = vld [vmem:[#allocation7 + $0x100] sm:$0xf0]  ;;  %7890 = vmatpush.bf16.msra.mxu0 %v10453_v17 }
 0x414   :  { %v10561_v41 = vor.u32 %v13679_v19, %v10560_v21  ;;  %v10548_v21 = vld [vmem:[#allocation7 + $0xe0] sm:$0xf]  ;;  %v13676_v19 = vld [vmem:[#allocation7 + $0xe8] sm:$0xf0]  ;;  %v10440_v17 = vld [vmem:[#allocation7 + $0x8] sm:$0xf] }
 0x415   :  { %v16396_v15 = vadd.f32 %v7634_v24, %v7606_v42  ;;  %v7580_v9 = vadd.f32 %v7579_v8, %v7551_v35  ;;  %7781 = vmatmul.bf16.gmra.mxu0 %v17989_v57  ;;  %v13730_v42 = vld [vmem:[#allocation7 + $0x298] sm:$0xf0]  ;;  %7974 = vmatpush.bf16.msra.mxu3 %v10777_v62  ;;  %v10657_v8 = vor.u32 %v13703_v13, %v10656_v53  ;;  %v13727_v57 = vld [vmem:[#allocation7 + $0x280] sm:$0xf0]  ;;  %v13649_v53 = vld [vmem:[#allocation7 + $0x10] sm:$0xf0] }
 0x416   :  { %7810 = vmatmul.bf16.gmra.mxu1 %v17990_v50  ;;  %v10765_v24 = vor.u32 %v13730_v42, %v10764_v60  ;;  %v10752_v50 = vld [vmem:[#allocation7 + $0x278] sm:$0xf]  ;;  %v10644_v60 = vld [vmem:[#allocation7 + $0x1a0] sm:$0xf]  ;;  %v13700_v13 = vld [vmem:[#allocation7 + $0x1a8] sm:$0xf0] }
 0x417   :  { %7839 = vmatmul.bf16.gmra.mxu2 %v17991_v16  ;;  %7918 = vmatpush.bf16.msra.mxu1 %v10561_v41  ;;  %v10753_v62 = vor.u32 %v13727_v57, %v10752_v50  ;;  %v10645_v41 = vor.u32 %v13700_v13, %v10644_v60 }
 0x418   :  { %7868 = vmatmul.bf16.gmra.mxu3 %v17992_v56  ;;  %7947 = vmatpush.bf16.msra.mxu2 %v10657_v8  ;;  %v10740_v56 = vld [vmem:[#allocation7 + $0x260] sm:$0xf]  ;;  %v13673_v8 = vld [vmem:[#allocation7 + $0xd0] sm:$0xf0] }
 0x419   :  { %7975 = vmatpush.bf16.msra.mxu3 %v10765_v24  ;;  %v10632_v24 = vld [vmem:[#allocation7 + $0x188] sm:$0xf] }
 0x41a   :  { %v7608_v35 = vpop.f32.mrf.mxu2  ;;  %v7552_v25 = vpop.f32.mrf.mxu0 }
 0x41b   :  { %v7609_v0 = vadd.f32 %v7608_v35, %v7580_v9  ;;  %v7637_v16 = vpop.f32.mrf.mxu3  ;;  %v7553_v22 = vadd.f32 %v7552_v25, %v16366_v48  ;;  %v7581_v18 = vpop.f32.mrf.mxu1  ;;  %v10549_v9 = vor.u32 %v13676_v19, %v10548_v21  ;;  %v10441_v35 = vor.u32 %v13649_v53, %v10440_v17  ;;  %v10728_v19 = vld [vmem:[#allocation7 + $0x248] sm:$0xf]  ;;  %v13721_v17 = vld [vmem:[#allocation7 + $0x250] sm:$0xf0] }
 0x41c   :  { %v10741_v48 = vor.u32 %v13724_v7, %v10740_v56  ;;  %7948 = vmatpush.bf16.msra.mxu2 %v10645_v41  ;;  %v10729_v7 = vor.u32 %v13721_v17, %v10728_v19 }
 0x41d   :  { %v16403_v6 = vadd.f32 %v7637_v16, %v7609_v0  ;;  %v7582_v42 = vadd.f32 %v7581_v18, %v7553_v22  ;;  %7919 = vmatpush.bf16.msra.mxu1 %v10549_v9  ;;  %7976 = vmatpush.bf16.msra.mxu3 %v10753_v62  ;;  %v10536_v16 = vld [vmem:[#allocation7 + $0xc8] sm:$0xf]  ;;  %v13697_v0 = vld [vmem:[#allocation7 + $0x190] sm:$0xf0]  ;;  %v13766_v9 = vld [vmem:[#allocation7 + $0x3b8] sm:$0xf0] }
 0x41e   :  { %7891 = vmatpush.bf16.msra.mxu0 %v10441_v35  ;;  %v10537_v50 = vor.u32 %v13673_v8, %v10536_v16  ;;  %v10633_v21 = vor.u32 %v13697_v0, %v10632_v24  ;;  %v13763_v0 = vld [vmem:[#allocation7 + $0x3a0] sm:$0xf0] }
 0x420   :  { %7949 = vmatpush.bf16.msra.mxu2 %v10633_v21 }
 0x421   :  { %7920 = vmatpush.bf16.msra.mxu1 %v10537_v50  ;;  %7977 = vmatpush.bf16.msra.mxu3 %v10741_v48  ;;  %v10896_v50 = vld [vmem:[#allocation7 + $0x398] sm:$0xf] }
 0x422   :  { %v7610_v57 = vpop.f32.mrf.mxu2  ;;  %v7555_v22 = vpop.f32.mrf.mxu0 }
 0x423   :  { %v7611_v25 = vadd.f32 %v7610_v57, %v7582_v42  ;;  %v7639_v18 = vpop.f32.mrf.mxu3  ;;  %v7556_v60 = vadd.f32 %v7555_v22, %v16373_v33  ;;  %v7584_v53 = vpop.f32.mrf.mxu1  ;;  %v10908_v42 = vld [vmem:[#allocation7 + $0x3b0] sm:$0xf]  ;;  %v10897_v22 = vor.u32 %v13763_v0, %v10896_v50 }
 0x424   :  { %v10909_v13 = vor.u32 %v13766_v9, %v10908_v42  ;;  %v10884_v9 = vld [vmem:[#allocation7 + $0x380] sm:$0xf] }
 0x425   :  { %v16406_v62 = vadd.f32 %v7639_v18, %v7611_v25  ;;  %v7585_v56 = vadd.f32 %v7584_v53, %v7556_v60  ;;  %7786 = vmatmul.bf16.gmra.mxu0 %v16043_v55  ;;  %7978 = vmatpush.bf16.msra.mxu3 %v10729_v7  ;;  %v11004_v25 = vld [vmem:[#allocation7 + $0x470] sm:$0xf]  ;;  %v13790_v18 = vld [vmem:[#allocation7 + $0x478] sm:$0xf0] }
 0x426   :  { %7815 = vmatmul.bf16.gmra.mxu1 %v16045_v1  ;;  %8000 = vmatpush.bf16.msrb.mxu0 %v10909_v13  ;;  %v11005_v21 = vor.u32 %v13790_v18, %v11004_v25  ;;  %v13760_v13 = vld [vmem:[#allocation7 + $0x388] sm:$0xf0]  ;;  %v10872_v18 = vld [vmem:[#allocation7 + $0x368] sm:$0xf] }
 0x427   :  { %7844 = vmatmul.bf16.gmra.mxu2 %v16047_v12 }
 0x428   :  { %7873 = vmatmul.bf16.gmra.mxu3 %v16050_v63  ;;  %8029 = vmatpush.bf16.msrb.mxu1 %v11005_v21  ;;  %v13757_v21 = vld [vmem:[#allocation7 + $0x370] sm:$0xf0] }
 0x42a   :  { %v7613_v33 = vpop.f32.mrf.mxu2  ;;  %v7557_v41 = vpop.f32.mrf.mxu0  ;;  %8001 = vmatpush.bf16.msrb.mxu0 %v10897_v22 }
 0x42b   :  { %v7614_v35 = vadd.f32 %v7613_v33, %v7585_v56  ;;  %v7642_v48 = vpop.f32.mrf.mxu3  ;;  %v7558_v16 = vadd.f32 %v7557_v41, %v16376_v59  ;;  %v7586_v8 = vpop.f32.mrf.mxu1  ;;  %v10992_v33 = vld [vmem:[#allocation7 + $0x458] sm:$0xf]  ;;  %v13787_v41 = vld [vmem:[#allocation7 + $0x460] sm:$0xf0] }
 0x42d   :  { %v16413_v24 = vadd.f32 %v7642_v48, %v7614_v35  ;;  %v7587_v57 = vadd.f32 %v7586_v8, %v7558_v16  ;;  %v10885_v35 = vor.u32 %v13760_v13, %v10884_v9  ;;  %v10993_v48 = vor.u32 %v13787_v41, %v10992_v33 }
 0x42f   :  { %8002 = vmatpush.bf16.msrb.mxu0 %v10885_v35  ;;  %8030 = vmatpush.bf16.msrb.mxu1 %v10993_v48 }
 0x432   :  { %v7615_v19 = vpop.f32.mrf.mxu2  ;;  %v7560_v60 = vpop.f32.mrf.mxu0 }
 0x433   :  { %v7616_v17 = vadd.f32 %v7615_v19, %v7587_v57  ;;  %v7644_v53 = vpop.f32.mrf.mxu3  ;;  %v7561_v7 = vadd.f32 %v7560_v60, %v16383_v49  ;;  %v7589_v56 = vpop.f32.mrf.mxu1  ;;  %v11100_v19 = vld [vmem:[#allocation7 + $0x530] sm:$0xf]  ;;  %v13814_v60 = vld [vmem:[#allocation7 + $0x538] sm:$0xf0] }
 0x435   :  { %v16416_v59 = vadd.f32 %v7644_v53, %v7616_v17  ;;  %v7590_v42 = vadd.f32 %v7589_v56, %v7561_v7  ;;  %7791 = vmatmul.bf16.gmra.mxu0 %v16085_v11  ;;  %v10873_v17 = vor.u32 %v13757_v21, %v10872_v18  ;;  %v10980_v53 = vld [vmem:[#allocation7 + $0x440] sm:$0xf]  ;;  %v13784_v7 = vld [vmem:[#allocation7 + $0x448] sm:$0xf0]  ;;  %v11101_v56 = vor.u32 %v13814_v60, %v11100_v19  ;;  %v10968_v18 = vld [vmem:[#allocation7 + $0x428] sm:$0xf] }
 0x436   :  { %7820 = vmatmul.bf16.gmra.mxu1 %v16087_v10  ;;  %v10981_v9 = vor.u32 %v13784_v7, %v10980_v53  ;;  %v13781_v21 = vld [vmem:[#allocation7 + $0x430] sm:$0xf0]  ;;  %v13838_v60 = vld [vmem:[#allocation7 + $0x5f8] sm:$0xf0] }
 0x437   :  { %7849 = vmatmul.bf16.gmra.mxu2 %v16089_v61  ;;  %8003 = vmatpush.bf16.msrb.mxu0 %v10873_v17  ;;  %v10969_v19 = vor.u32 %v13781_v21, %v10968_v18  ;;  %v11196_v17 = vld [vmem:[#allocation7 + $0x5f0] sm:$0xf]  ;;  %v11172_v18 = vld [vmem:[#allocation7 + $0x5c0] sm:$0xf]  ;;  %v13832_v21 = vld [vmem:[#allocation7 + $0x5c8] sm:$0xf0] }
 0x438   :  { %7878 = vmatmul.bf16.gmra.mxu3 %v16092_v20  ;;  %8058 = vmatpush.bf16.msrb.mxu2 %v11101_v56 }
 0x439   :  { %8031 = vmatpush.bf16.msrb.mxu1 %v10981_v9  ;;  %v13835_v9 = vld [vmem:[#allocation7 + $0x5e0] sm:$0xf0] }
 0x43a   :  { %v7618_v16 = vpop.f32.mrf.mxu2  ;;  %v7562_v8 = vpop.f32.mrf.mxu0 }
 0x43b   :  { %v7619_v49 = vadd.f32 %v7618_v16, %v7590_v42  ;;  %v7647_v57 = vpop.f32.mrf.mxu3  ;;  %v7563_v50 = vadd.f32 %v7562_v8, %v16386_v14  ;;  %v7591_v0 = vpop.f32.mrf.mxu1  ;;  %v13754_v8 = vld [vmem:[#allocation7 + $0x358] sm:$0xf0] }
 0x43d   :  { %v16423_v25 = vadd.f32 %v7647_v57, %v7619_v49  ;;  %v7592_v22 = vadd.f32 %v7591_v0, %v7563_v50  ;;  %v10860_v49 = vld [vmem:[#allocation7 + $0x350] sm:$0xf]  ;;  %v11088_v57 = vld [vmem:[#allocation7 + $0x518] sm:$0xf]  ;;  %8032 = vmatpush.bf16.msrb.mxu1 %v10969_v19  ;;  %v11064_v19 = vld [vmem:[#allocation7 + $0x4e8] sm:$0xf] }
 0x43e   :  { %v17993_v50 = vld [vmem:[#allocation21_spill] sm:$0xff]  ;;  %v10861_v0 = vor.u32 %v13754_v8, %v10860_v49  ;;  %v10848_v8 = vld [vmem:[#allocation7 + $0x338] sm:$0xf] }
 0x440   :  { %8004 = vmatpush.bf16.msrb.mxu0 %v10861_v0 }
 0x442   :  { %v7620_v42 = vpop.f32.mrf.mxu2  ;;  %v7661_v14 = vpop.f32.mrf.mxu0 }
 0x443   :  { %v7621_v13 = vadd.f32 %v7620_v42, %v7592_v22  ;;  %v7649_v33 = vpop.f32.mrf.mxu3  ;;  %v7662_v35 = vadd.f32 %v7661_v14, %v16393_v58  ;;  %v7690_v41 = vpop.f32.mrf.mxu1  ;;  %v13811_v22 = vld [vmem:[#allocation7 + $0x520] sm:$0xf0] }
 0x444   :  { %v11089_v58 = vor.u32 %v13811_v22, %v11088_v57  ;;  %v13751_v57 = vld [vmem:[#allocation7 + $0x340] sm:$0xf0]  ;;  %v13778_v22 = vld [vmem:[#allocation7 + $0x418] sm:$0xf0] }
 0x445   :  { %v16426_v48 = vadd.f32 %v7649_v33, %v7621_v13  ;;  %v7691_v16 = vadd.f32 %v7690_v41, %v7662_v35  ;;  %7892 = vmatmul.bf16.vlgmr.msra.gmra.mxu0 %v14831_v46  ;;  %v11197_v46 = vor.u32 %v13838_v60, %v11196_v17  ;;  %v11076_v35 = vld [vmem:[#allocation7 + $0x500] sm:$0xf]  ;;  %v13808_v41 = vld [vmem:[#allocation7 + $0x508] sm:$0xf0]  ;;  %v10849_v0 = vor.u32 %v13751_v57, %v10848_v8  ;;  %v13805_v17 = vld [vmem:[#allocation7 + $0x4f0] sm:$0xf0] }
 0x446   :  { %7921 = vmatmul.bf16.vlgmr.msra.gmra.mxu1 %v14833_v51  ;;  %8059 = vmatpush.bf16.msrb.mxu2 %v11089_v58 }
 0x447   :  { %7950 = vmatmul.bf16.vlgmr.msra.gmra.mxu2 %v14835_v52  ;;  %v11184_v52 = vld [vmem:[#allocation7 + $0x5d8] sm:$0xf]  ;;  %8087 = vmatpush.bf16.msrb.mxu3 %v11197_v46 }
 0x448   :  { %7979 = vmatmul.bf16.vlgmr.msra.gmra.mxu3 %v17993_v50  ;;  %v11185_v33 = vor.u32 %v13835_v9, %v11184_v52  ;;  %v11077_v50 = vor.u32 %v13808_v41, %v11076_v35  ;;  %8005 = vmatpush.bf16.msrb.mxu0 %v10849_v0  ;;  %v13829_v52 = vld [vmem:[#allocation7 + $0x5b0] sm:$0xf0]  ;;  %v11052_v35 = vld [vmem:[#allocation7 + $0x4d0] sm:$0xf]  ;;  %v13802_v41 = vld [vmem:[#allocation7 + $0x4d8] sm:$0xf0] }
 0x449   :  { %v11053_v57 = vor.u32 %v13802_v41, %v11052_v35  ;;  %v11028_v35 = vld [vmem:[#allocation7 + $0x4a0] sm:$0xf] }
 0x44a   :  { %v7719_v53 = vpop.f32.mrf.mxu2  ;;  %v7663_v51 = vpop.f32.mrf.mxu0  ;;  %8060 = vmatpush.bf16.msrb.mxu2 %v11077_v50  ;;  %v13748_v50 = vld [vmem:[#allocation7 + $0x328] sm:$0xf0] }
 0x44b   :  { %v7720_v7 = vadd.f32 %v7719_v53, %v7691_v16  ;;  %v7748_v56 = vpop.f32.mrf.mxu3  ;;  %v7664_v42 = vadd.f32 %v7663_v51, %v16396_v15  ;;  %v7692_v13 = vpop.f32.mrf.mxu1  ;;  %v10956_v16 = vld [vmem:[#allocation7 + $0x410] sm:$0xf]  ;;  %8088 = vmatpush.bf16.msrb.mxu3 %v11185_v33  ;;  %v11173_v15 = vor.u32 %v13832_v21, %v11172_v18  ;;  %v11065_v53 = vor.u32 %v13805_v17, %v11064_v19  ;;  %v13826_v21 = vld [vmem:[#allocation7 + $0x598] sm:$0xf0]  ;;  %v11040_v19 = vld [vmem:[#allocation7 + $0x4b8] sm:$0xf] }
 0x44c   :  { %v10957_v58 = vor.u32 %v13778_v22, %v10956_v16  ;;  %v10944_v16 = vld [vmem:[#allocation7 + $0x3f8] sm:$0xf]  ;;  %v13775_v22 = vld [vmem:[#allocation7 + $0x400] sm:$0xf0]  ;;  %v11148_v18 = vld [vmem:[#allocation7 + $0x590] sm:$0xf] }
 0x44d   :  { %v16433_v14 = vadd.f32 %v7748_v56, %v7720_v7  ;;  %v7693_v49 = vadd.f32 %v7692_v13, %v7664_v42  ;;  %v11160_v56 = vld [vmem:[#allocation7 + $0x5a8] sm:$0xf] }
 0x44e   :  { %8033 = vmatpush.bf16.msrb.mxu1 %v10957_v58  ;;  %8061 = vmatpush.bf16.msrb.mxu2 %v11065_v53  ;;  %v11161_v33 = vor.u32 %v13829_v52, %v11160_v56  ;;  %v10945_v58 = vor.u32 %v13775_v22, %v10944_v16  ;;  %v13820_v22 = vld [vmem:[#allocation7 + $0x568] sm:$0xf0] }
 0x44f   :  { %8089 = vmatpush.bf16.msrb.mxu3 %v11173_v15  ;;  %v11149_v15 = vor.u32 %v13826_v21, %v11148_v18  ;;  %v10920_v18 = vld [vmem:[#allocation7 + $0x3c8] sm:$0xf]  ;;  %v13769_v21 = vld [vmem:[#allocation7 + $0x3d0] sm:$0xf0] }
 0x452   :  { %v7721_v60 = vpop.f32.mrf.mxu2  ;;  %v7666_v7 = vpop.f32.mrf.mxu0  ;;  %8062 = vmatpush.bf16.msrb.mxu2 %v11053_v57  ;;  %8034 = vmatpush.bf16.msrb.mxu1 %v10945_v58  ;;  %v10824_v57 = vld [vmem:[#allocation7 + $0x308] sm:$0xf] }
 0x453   :  { %v7722_v46 = vadd.f32 %v7721_v60, %v7693_v49  ;;  %v7750_v51 = vpop.f32.mrf.mxu3  ;;  %v7667_v9 = vadd.f32 %v7666_v7, %v16403_v6  ;;  %v7695_v42 = vpop.f32.mrf.mxu1  ;;  %v10836_v49 = vld [vmem:[#allocation7 + $0x320] sm:$0xf]  ;;  %v17994_v6 = vld [vmem:[#allocation22_spill] sm:$0xff]  ;;  %8090 = vmatpush.bf16.msrb.mxu3 %v11161_v33  ;;  %v13823_v7 = vld [vmem:[#allocation7 + $0x580] sm:$0xf0] }
 0x454   :  { %v10837_v0 = vor.u32 %v13748_v50, %v10836_v49  ;;  %v13772_v33 = vld [vmem:[#allocation7 + $0x3e8] sm:$0xf0]  ;;  %v13745_v49 = vld [vmem:[#allocation7 + $0x310] sm:$0xf0]  ;;  %v11016_v58 = vld [vmem:[#allocation7 + $0x488] sm:$0xf] }
 0x455   :  { %v16436_v13 = vadd.f32 %v7750_v51, %v7722_v46  ;;  %v7696_v8 = vadd.f32 %v7695_v42, %v7667_v9  ;;  %7897 = vmatmul.bf16.gmra.mxu0 %v14867_v40  ;;  %v13799_v40 = vld [vmem:[#allocation7 + $0x4c0] sm:$0xf0]  ;;  %v11136_v46 = vld [vmem:[#allocation7 + $0x578] sm:$0xf]  ;;  %v10932_v42 = vld [vmem:[#allocation7 + $0x3e0] sm:$0xf]  ;;  %v10825_v16 = vor.u32 %v13745_v49, %v10824_v57 }
 0x456   :  { %7926 = vmatmul.bf16.gmra.mxu1 %v14869_v45  ;;  %8006 = vmatpush.bf16.msrb.mxu0 %v10837_v0  ;;  %v11041_v45 = vor.u32 %v13799_v40, %v11040_v19  ;;  %v11137_v9 = vor.u32 %v13823_v7, %v11136_v46  ;;  %v13796_v50 = vld [vmem:[#allocation7 + $0x4a8] sm:$0xf0]  ;;  %v11124_v0 = vld [vmem:[#allocation7 + $0x560] sm:$0xf]  ;;  %v10921_v19 = vor.u32 %v13769_v21, %v10920_v18  ;;  %v13793_v40 = vld [vmem:[#allocation7 + $0x490] sm:$0xf0] }
 0x457   :  { %7955 = vmatmul.bf16.gmra.mxu2 %v14871_v47  ;;  %8091 = vmatpush.bf16.msrb.mxu3 %v11149_v15  ;;  %v13817_v46 = vld [vmem:[#allocation7 + $0x550] sm:$0xf0] }
 0x458   :  { %7984 = vmatmul.bf16.gmra.mxu3 %v17994_v6  ;;  %8063 = vmatpush.bf16.msrb.mxu2 %v11041_v45  ;;  %v11029_v6 = vor.u32 %v13796_v50, %v11028_v35  ;;  %v13862_v35 = vld [vmem:[#allocation7 + $0x6b8] sm:$0xf0] }
 0x45a   :  { %v7724_v17 = vpop.f32.mrf.mxu2  ;;  %v7668_v47 = vpop.f32.mrf.mxu0  ;;  %8007 = vmatpush.bf16.msrb.mxu0 %v10825_v16 }
 0x45b   :  { %v7725_v60 = vadd.f32 %v7724_v17, %v7696_v8  ;;  %v7753_v53 = vpop.f32.mrf.mxu3  ;;  %v7669_v51 = vadd.f32 %v7668_v47, %v16406_v62  ;;  %v7697_v56 = vpop.f32.mrf.mxu1  ;;  %v10933_v8 = vor.u32 %v13772_v33, %v10932_v42  ;;  %8092 = vmatpush.bf16.msrb.mxu3 %v11137_v9  ;;  %v11125_v62 = vor.u32 %v13820_v22, %v11124_v0  ;;  %v11292_v33 = vld [vmem:[#allocation7 + $0x6b0] sm:$0xf]  ;;  %v13859_v0 = vld [vmem:[#allocation7 + $0x6a0] sm:$0xf0] }
 0x45c   :  { %8064 = vmatpush.bf16.msrb.mxu2 %v11029_v6  ;;  %v11017_v47 = vor.u32 %v13793_v40, %v11016_v58 }
 0x45d   :  { %v16443_v52 = vadd.f32 %v7753_v53, %v7725_v60  ;;  %v7698_v41 = vadd.f32 %v7697_v56, %v7669_v51  ;;  %8035 = vmatpush.bf16.msrb.mxu1 %v10933_v8  ;;  %v11112_v53 = vld [vmem:[#allocation7 + $0x548] sm:$0xf] }
 0x45e   :  { %v11113_v9 = vor.u32 %v13817_v46, %v11112_v53  ;;  %v13883_v46 = vld [vmem:[#allocation7 + $0x760] sm:$0xf0] }
 0x45f   :  { %8093 = vmatpush.bf16.msrb.mxu3 %v11125_v62  ;;  %v13886_v62 = vld [vmem:[#allocation7 + $0x778] sm:$0xf0] }
 0x460   :  { %8065 = vmatpush.bf16.msrb.mxu2 %v11017_v47  ;;  %v11376_v47 = vld [vmem:[#allocation7 + $0x758] sm:$0xf] }
 0x461   :  { %8036 = vmatpush.bf16.msrb.mxu1 %v10921_v19 }
 0x462   :  { %v7726_v15 = vpop.f32.mrf.mxu2  ;;  %v7671_v45 = vpop.f32.mrf.mxu0 }
 0x463   :  { %v7727_v17 = vadd.f32 %v7726_v15, %v7698_v41  ;;  %v7755_v60 = vpop.f32.mrf.mxu3  ;;  %v7672_v7 = vadd.f32 %v7671_v45, %v16413_v24  ;;  %v7700_v51 = vpop.f32.mrf.mxu1  ;;  %v11293_v41 = vor.u32 %v13862_v35, %v11292_v33  ;;  %8094 = vmatpush.bf16.msrb.mxu3 %v11113_v9  ;;  %v11268_v45 = vld [vmem:[#allocation7 + $0x680] sm:$0xf]  ;;  %v11256_v35 = vld [vmem:[#allocation7 + $0x668] sm:$0xf] }
 0x465   :  { %v16446_v56 = vadd.f32 %v7755_v60, %v7727_v17  ;;  %v7701_v42 = vadd.f32 %v7700_v51, %v7672_v7  ;;  %7902 = vmatmul.bf16.gmra.mxu0 %v14903_v34  ;;  %v13856_v60 = vld [vmem:[#allocation7 + $0x688] sm:$0xf0]  ;;  %v11377_v7 = vor.u32 %v13883_v46, %v11376_v47  ;;  %v13934_v47 = vld [vmem:[#allocation7 + $0x8f8] sm:$0xf0] }
 0x466   :  { %7931 = vmatmul.bf16.gmra.mxu1 %v14905_v37  ;;  %8116 = vmatpush.bf16.msra.mxu0 %v11293_v41  ;;  %v11280_v37 = vld [vmem:[#allocation7 + $0x698] sm:$0xf]  ;;  %v11269_v53 = vor.u32 %v13856_v60, %v11268_v45  ;;  %v13853_v41 = vld [vmem:[#allocation7 + $0x670] sm:$0xf0]  ;;  %v11580_v60 = vld [vmem:[#allocation7 + $0x8f0] sm:$0xf] }
 0x467   :  { %7960 = vmatmul.bf16.gmra.mxu2 %v14907_v38  ;;  %v11388_v38 = vld [vmem:[#allocation7 + $0x770] sm:$0xf]  ;;  %v11281_v22 = vor.u32 %v13859_v0, %v11280_v37 }
 0x468   :  { %7989 = vmatmul.bf16.gmra.mxu3 %v14909_v39  ;;  %v11389_v18 = vor.u32 %v13886_v62, %v11388_v38 }
 0x46a   :  { %v7729_v24 = vpop.f32.mrf.mxu2  ;;  %v7673_v49 = vpop.f32.mrf.mxu0  ;;  %8117 = vmatpush.bf16.msra.mxu0 %v11281_v22  ;;  %8145 = vmatpush.bf16.msra.mxu1 %v11389_v18 }
 0x46b   :  { %v7730_v57 = vadd.f32 %v7729_v24, %v7701_v42  ;;  %v7758_v8 = vpop.f32.mrf.mxu3  ;;  %v7674_v50 = vadd.f32 %v7673_v49, %v16416_v59  ;;  %v7702_v16 = vpop.f32.mrf.mxu1  ;;  %v11484_v24 = vld [vmem:[#allocation7 + $0x830] sm:$0xf]  ;;  %v11364_v49 = vld [vmem:[#allocation7 + $0x740] sm:$0xf] }
 0x46d   :  { %v16453_v34 = vadd.f32 %v7758_v8, %v7730_v57  ;;  %v7703_v6 = vadd.f32 %v7702_v16, %v7674_v50  ;;  %v11257_v57 = vor.u32 %v13853_v41, %v11256_v35  ;;  %v13880_v8 = vld [vmem:[#allocation7 + $0x748] sm:$0xf0]  ;;  %v11232_v35 = vld [vmem:[#allocation7 + $0x638] sm:$0xf]  ;;  %v13847_v41 = vld [vmem:[#allocation7 + $0x640] sm:$0xf0] }
 0x46e   :  { %8118 = vmatpush.bf16.msra.mxu0 %v11269_v53  ;;  %8146 = vmatpush.bf16.msra.mxu1 %v11377_v7  ;;  %v11365_v16 = vor.u32 %v13880_v8, %v11364_v49  ;;  %v13874_v49 = vld [vmem:[#allocation7 + $0x718] sm:$0xf0]  ;;  %v11556_v8 = vld [vmem:[#allocation7 + $0x8c0] sm:$0xf] }
 0x472   :  { %v7731_v39 = vpop.f32.mrf.mxu2  ;;  %v7676_v58 = vpop.f32.mrf.mxu0  ;;  %8119 = vmatpush.bf16.msra.mxu0 %v11257_v57  ;;  %8147 = vmatpush.bf16.msra.mxu1 %v11365_v16  ;;  %v11340_v57 = vld [vmem:[#allocation7 + $0x710] sm:$0xf] }
 0x473   :  { %v7732_v21 = vadd.f32 %v7731_v39, %v7703_v6  ;;  %v7760_v15 = vpop.f32.mrf.mxu3  ;;  %v7677_v19 = vadd.f32 %v7676_v58, %v16423_v25  ;;  %v7705_v40 = vpop.f32.mrf.mxu1  ;;  %v11244_v39 = vld [vmem:[#allocation7 + $0x650] sm:$0xf]  ;;  %v11472_v58 = vld [vmem:[#allocation7 + $0x818] sm:$0xf]  ;;  %v11341_v16 = vor.u32 %v13874_v49, %v11340_v57  ;;  %v11316_v57 = vld [vmem:[#allocation7 + $0x6e0] sm:$0xf] }
 0x474   :  { %v11412_v49 = vld [vmem:[#allocation7 + $0x7a0] sm:$0xf] }
 0x475   :  { %v16456_v59 = vadd.f32 %v7760_v15, %v7732_v21  ;;  %v7706_v17 = vadd.f32 %v7705_v40, %v7677_v19  ;;  %7907 = vmatmul.bf16.gmra.mxu0 %v14939_v2  ;;  %v13850_v21 = vld [vmem:[#allocation7 + $0x658] sm:$0xf0]  ;;  %v13907_v19 = vld [vmem:[#allocation7 + $0x820] sm:$0xf0]  ;;  %v11352_v40 = vld [vmem:[#allocation7 + $0x728] sm:$0xf] }
 0x476   :  { %7936 = vmatmul.bf16.gmra.mxu1 %v14941_v3  ;;  %v11245_v15 = vor.u32 %v13850_v21, %v11244_v39  ;;  %v11544_v39 = vld [vmem:[#allocation7 + $0x8a8] sm:$0xf]  ;;  %v13925_v21 = vld [vmem:[#allocation7 + $0x8b0] sm:$0xf0] }
 0x477   :  { %7965 = vmatmul.bf16.gmra.mxu2 %v14943_v4 }
 0x478   :  { %7994 = vmatmul.bf16.gmra.mxu3 %v14945_v5  ;;  %v13910_v5 = vld [vmem:[#allocation7 + $0x838] sm:$0xf0]  ;;  %8120 = vmatpush.bf16.msra.mxu0 %v11245_v15 }
 0x479   :  { %v11485_v50 = vor.u32 %v13910_v5, %v11484_v24  ;;  %v11233_v5 = vor.u32 %v13847_v41, %v11232_v35 }
 0x47a   :  { %v7734_v51 = vpop.f32.mrf.mxu2  ;;  %v7678_v9 = vpop.f32.mrf.mxu0 }
 0x47b   :  { %v7735_v25 = vadd.f32 %v7734_v51, %v7706_v17  ;;  %v7763_v42 = vpop.f32.mrf.mxu3  ;;  %v7679_v2 = vadd.f32 %v7678_v9, %v16426_v48  ;;  %v7707_v33 = vpop.f32.mrf.mxu1  ;;  %8174 = vmatpush.bf16.msra.mxu2 %v11485_v50  ;;  %v13877_v17 = vld [vmem:[#allocation7 + $0x730] sm:$0xf0]  ;;  %v13931_v51 = vld [vmem:[#allocation7 + $0x8e0] sm:$0xf0]  ;;  %v13928_v50 = vld [vmem:[#allocation7 + $0x8c8] sm:$0xf0] }
 0x47c   :  { %v11353_v45 = vor.u32 %v13877_v17, %v11352_v40  ;;  %8121 = vmatpush.bf16.msra.mxu0 %v11233_v5  ;;  %v11545_v40 = vor.u32 %v13925_v21, %v11544_v39  ;;  %v11436_v17 = vld [vmem:[#allocation7 + $0x7d0] sm:$0xf]  ;;  %v13868_v5 = vld [vmem:[#allocation7 + $0x6e8] sm:$0xf0]  ;;  %v11400_v39 = vld [vmem:[#allocation7 + $0x788] sm:$0xf] }
 0x47d   :  { %v16463_v3 = vadd.f32 %v7763_v42, %v7735_v25  ;;  %v7708_v4 = vadd.f32 %v7707_v33, %v7679_v2  ;;  %v11460_v2 = vld [vmem:[#allocation7 + $0x800] sm:$0xf]  ;;  %v13904_v33 = vld [vmem:[#allocation7 + $0x808] sm:$0xf0] }
 0x47e   :  { %8148 = vmatpush.bf16.msra.mxu1 %v11353_v45  ;;  %v11461_v24 = vor.u32 %v13904_v33, %v11460_v2  ;;  %v11520_v33 = vld [vmem:[#allocation7 + $0x878] sm:$0xf] }
 0x482   :  { %v7736_v6 = vpop.f32.mrf.mxu2  ;;  %v7777_v48 = vpop.f32.mrf.mxu0  ;;  %8149 = vmatpush.bf16.msra.mxu1 %v11341_v16  ;;  %v13841_v16 = vld [vmem:[#allocation7 + $0x610] sm:$0xf0] }
 0x483   :  { %v7737_v37 = vadd.f32 %v7736_v6, %v7708_v4  ;;  %v7765_v0 = vpop.f32.mrf.mxu3  ;;  %v7778_v38 = vadd.f32 %v7777_v48, %v16433_v14  ;;  %v7806_v22 = vpop.f32.mrf.mxu1  ;;  %v11473_v14 = vor.u32 %v13907_v19, %v11472_v58  ;;  %v11448_v6 = vld [vmem:[#allocation7 + $0x7e8] sm:$0xf] }
 0x485   :  { %v16466_v62 = vadd.f32 %v7765_v0, %v7737_v37  ;;  %v7807_v18 = vadd.f32 %v7806_v22, %v7778_v38  ;;  %8008 = vmatmul.bf16.vlgmr.msrb.gmra.mxu0 %v14975_v29  ;;  %v11581_v29 = vor.u32 %v13934_v47, %v11580_v60  ;;  %8175 = vmatpush.bf16.msra.mxu2 %v11473_v14  ;;  %v13901_v37 = vld [vmem:[#allocation7 + $0x7f0] sm:$0xf0]  ;;  %v13898_v14 = vld [vmem:[#allocation7 + $0x7d8] sm:$0xf0]  ;;  %v11220_v47 = vld [vmem:[#allocation7 + $0x620] sm:$0xf] }
 0x486   :  { %8037 = vmatmul.bf16.vlgmr.msrb.gmra.mxu1 %v14977_v30  ;;  %v11449_v48 = vor.u32 %v13901_v37, %v11448_v6  ;;  %v11437_v60 = vor.u32 %v13898_v14, %v11436_v17  ;;  %v13892_v6 = vld [vmem:[#allocation7 + $0x7a8] sm:$0xf0] }
 0x487   :  { %8066 = vmatmul.bf16.vlgmr.msrb.gmra.mxu2 %v14979_v31  ;;  %v11568_v31 = vld [vmem:[#allocation7 + $0x8d8] sm:$0xf]  ;;  %8203 = vmatpush.bf16.msra.mxu3 %v11581_v29 }
 0x488   :  { %8095 = vmatmul.bf16.vlgmr.msrb.gmra.mxu3 %v14981_v32  ;;  %v11569_v9 = vor.u32 %v13931_v51, %v11568_v31  ;;  %v11328_v29 = vld [vmem:[#allocation7 + $0x6f8] sm:$0xf] }
 0x489   :  { %8176 = vmatpush.bf16.msra.mxu2 %v11461_v24 }
 0x48a   :  { %v7835_v53 = vpop.f32.mrf.mxu2  ;;  %v7779_v30 = vpop.f32.mrf.mxu0 }
 0x48b   :  { %v7836_v46 = vadd.f32 %v7835_v53, %v7807_v18  ;;  %v7864_v7 = vpop.f32.mrf.mxu3  ;;  %v7780_v32 = vadd.f32 %v7779_v30, %v16436_v13  ;;  %v7808_v25 = vpop.f32.mrf.mxu1  ;;  %8204 = vmatpush.bf16.msra.mxu3 %v11569_v9  ;;  %v11557_v13 = vor.u32 %v13928_v50, %v11556_v8  ;;  %v13844_v53 = vld [vmem:[#allocation7 + $0x628] sm:$0xf0]  ;;  %v11532_v30 = vld [vmem:[#allocation7 + $0x890] sm:$0xf]  ;;  %v11208_v50 = vld [vmem:[#allocation7 + $0x608] sm:$0xf] }
 0x48c   :  { %v11209_v37 = vor.u32 %v13841_v16, %v11208_v50  ;;  %v18001_v50 = vld [vmem:[#allocation23_spill] sm:$0xff]  ;;  %v18002_v16 = vld [vmem:[#allocation24_spill] sm:$0xff] }
 0x48d   :  { %v16473_v42 = vadd.f32 %v7864_v7, %v7836_v46  ;;  %v7809_v4 = vadd.f32 %v7808_v25, %v7780_v32  ;;  %8177 = vmatpush.bf16.msra.mxu2 %v11449_v48  ;;  %v13871_v46 = vld [vmem:[#allocation7 + $0x700] sm:$0xf0]  ;;  %v13922_v7 = vld [vmem:[#allocation7 + $0x898] sm:$0xf0]  ;;  %v11424_v32 = vld [vmem:[#allocation7 + $0x7b8] sm:$0xf] }
 0x48e   :  { %v11329_v31 = vor.u32 %v13871_v46, %v11328_v29  ;;  %v11533_v51 = vor.u32 %v13922_v7, %v11532_v30  ;;  %v11508_v48 = vld [vmem:[#allocation7 + $0x860] sm:$0xf]  ;;  %v11676_v7 = vld [vmem:[#allocation7 + $0x9b0] sm:$0xf] }
 0x48f   :  { %17995 = vst [vmem:[#allocation21_spill] sm:$0xff] %v16473_v42  ;;  %8205 = vmatpush.bf16.msra.mxu3 %v11557_v13  ;;  %v11317_v13 = vor.u32 %v13868_v5, %v11316_v57  ;;  %v16862_v42 = vld [vmem:[#allocation11 + $0x50] sm:$0xff] }
 0x490   :  { %8150 = vmatpush.bf16.msra.mxu1 %v11329_v31  ;;  %v13958_v31 = vld [vmem:[#allocation7 + $0x9b8] sm:$0xf0] }
 0x491   :  { %8178 = vmatpush.bf16.msra.mxu2 %v11437_v60  ;;  %v11496_v60 = vld [vmem:[#allocation7 + $0x848] sm:$0xf] }
 0x492   :  { %v7837_v0 = vpop.f32.mrf.mxu2  ;;  %v7782_v22 = vpop.f32.mrf.mxu0 }
 0x493   :  { %v7838_v38 = vadd.f32 %v7837_v0, %v7809_v4  ;;  %v7866_v18 = vpop.f32.mrf.mxu3  ;;  %v7783_v58 = vadd.f32 %v7782_v22, %v16443_v52  ;;  %v7811_v15 = vpop.f32.mrf.mxu1  ;;  %v11221_v52 = vor.u32 %v13844_v53, %v11220_v47  ;;  %8206 = vmatpush.bf16.msra.mxu3 %v11545_v40  ;;  %v13919_v4 = vld [vmem:[#allocation7 + $0x880] sm:$0xf0]  ;;  %v11413_v0 = vor.u32 %v13892_v6, %v11412_v49  ;;  %v11304_v22 = vld [vmem:[#allocation7 + $0x6c8] sm:$0xf]  ;;  %v13913_v47 = vld [vmem:[#allocation7 + $0x850] sm:$0xf0] }
 0x494   :  { %v11521_v24 = vor.u32 %v13919_v4, %v11520_v33  ;;  %8151 = vmatpush.bf16.msra.mxu1 %v11317_v13  ;;  %v11497_v46 = vor.u32 %v13913_v47, %v11496_v60  ;;  %v13982_v4 = vld [vmem:[#allocation7 + $0xa78] sm:$0xf0]  ;;  %v18003_v13 = vld [vmem:[#allocation25_spill] sm:$0xff]  ;;  %v11652_v6 = vld [vmem:[#allocation7 + $0x980] sm:$0xf] }
 0x495   :  { %v16476_v19 = vadd.f32 %v7866_v18, %v7838_v38  ;;  %v7812_v45 = vadd.f32 %v7811_v15, %v7783_v58  ;;  %8013 = vmatmul.bf16.gmra.mxu0 %v15011_v23  ;;  %v13895_v23 = vld [vmem:[#allocation7 + $0x7c0] sm:$0xf0]  ;;  %v13916_v38 = vld [vmem:[#allocation7 + $0x868] sm:$0xf0]  ;;  %v13865_v18 = vld [vmem:[#allocation7 + $0x6d0] sm:$0xf0] }
 0x496   :  { %8042 = vmatmul.bf16.gmra.mxu1 %v15013_v26  ;;  %8122 = vmatpush.bf16.msra.mxu0 %v11221_v52  ;;  %v11425_v26 = vor.u32 %v13895_v23, %v11424_v32  ;;  %v11305_v58 = vor.u32 %v13865_v18, %v11304_v22  ;;  %v13889_v15 = vld [vmem:[#allocation7 + $0x790] sm:$0xf0]  ;;  %v11868_v60 = vld [vmem:[#allocation7 + $0xb30] sm:$0xf] }
 0x497   :  { %17996 = vst [vmem:[#allocation22_spill] sm:$0xff] %v16476_v19  ;;  %8071 = vmatmul.bf16.gmra.mxu2 %v15015_v27  ;;  %8207 = vmatpush.bf16.msra.mxu3 %v11533_v51  ;;  %v11677_v51 = vor.u32 %v13958_v31, %v11676_v7  ;;  %v16860_v19 = vld [vmem:[#allocation11 + $0xb8] sm:$0xff] }
 0x498   :  { %8100 = vmatmul.bf16.gmra.mxu3 %v15017_v28  ;;  %8179 = vmatpush.bf16.msra.mxu2 %v11425_v26 }
 0x499   :  { %8152 = vmatpush.bf16.msra.mxu1 %v11305_v58 }
 0x49a   :  { %v7840_v25 = vpop.f32.mrf.mxu2  ;;  %v7784_v27 = vpop.f32.mrf.mxu0  ;;  %8123 = vmatpush.bf16.msra.mxu0 %v11209_v37  ;;  %v13952_v37 = vld [vmem:[#allocation7 + $0x988] sm:$0xf0] }
 0x49b   :  { %v7841_v9 = vadd.f32 %v7840_v25, %v7812_v45  ;;  %v7869_v2 = vpop.f32.mrf.mxu3  ;;  %v7785_v28 = vadd.f32 %v7784_v27, %v16446_v56  ;;  %v7813_v35 = vpop.f32.mrf.mxu1  ;;  %8208 = vmatpush.bf16.msra.mxu3 %v11521_v24  ;;  %v11509_v56 = vor.u32 %v13916_v38, %v11508_v48  ;;  %v11401_v45 = vor.u32 %v13889_v15, %v11400_v39  ;;  %v18004_v48 = vld [vmem:[#allocation26_spill] sm:$0xff] }
 0x49c   :  { %8180 = vmatpush.bf16.msra.mxu2 %v11413_v0  ;;  %v11760_v0 = vld [vmem:[#allocation7 + $0xa58] sm:$0xf]  ;;  %v11653_v38 = vor.u32 %v13952_v37, %v11652_v6 }
 0x49d   :  { %v16483_v41 = vadd.f32 %v7869_v2, %v7841_v9  ;;  %v7814_v8 = vadd.f32 %v7813_v35, %v7785_v28  ;;  %v13955_v2 = vld [vmem:[#allocation7 + $0x9a0] sm:$0xf0] }
 0x49e   :  { %8232 = vmatpush.bf16.msrb.mxu0 %v11677_v51 }
 0x49f   :  { %17997 = vst [vmem:[#allocation123_spill] sm:$0xff] %v16483_v41  ;;  %8209 = vmatpush.bf16.msra.mxu3 %v11509_v56  ;;  %v13979_v56 = vld [vmem:[#allocation7 + $0xa60] sm:$0xf0]  ;;  %v16858_v41 = vld [vmem:[#allocation11 + $0x18] sm:$0xff] }
 0x4a0   :  { %8181 = vmatpush.bf16.msra.mxu2 %v11401_v45  ;;  %v11761_v22 = vor.u32 %v13979_v56, %v11760_v0  ;;  %v13949_v45 = vld [vmem:[#allocation7 + $0x970] sm:$0xf0]  ;;  %v14027_v56 = vld [vmem:[#allocation7 + $0xbe0] sm:$0xf0] }
 0x4a2   :  { %v7842_v21 = vpop.f32.mrf.mxu2  ;;  %v7787_v17 = vpop.f32.mrf.mxu0 }
 0x4a3   :  { %v7843_v40 = vadd.f32 %v7842_v21, %v7814_v8  ;;  %v7871_v14 = vpop.f32.mrf.mxu3  ;;  %v7788_v53 = vadd.f32 %v7787_v17, %v16453_v34  ;;  %v7816_v29 = vpop.f32.mrf.mxu1  ;;  %8210 = vmatpush.bf16.msra.mxu3 %v11497_v46  ;;  %v13976_v46 = vld [vmem:[#allocation7 + $0xa48] sm:$0xf0] }
 0x4a5   :  { %v16486_v52 = vadd.f32 %v7871_v14, %v7843_v40  ;;  %v7817_v30 = vadd.f32 %v7816_v29, %v7788_v53  ;;  %8018 = vmatmul.bf16.gmra.mxu0 %v15047_v36  ;;  %v11640_v14 = vld [vmem:[#allocation7 + $0x968] sm:$0xf]  ;;  %v14006_v53 = vld [vmem:[#allocation7 + $0xb38] sm:$0xf0]  ;;  %v11748_v29 = vld [vmem:[#allocation7 + $0xa40] sm:$0xf] }
 0x4a6   :  { %8047 = vmatmul.bf16.gmra.mxu1 %v15049_v43  ;;  %v11664_v43 = vld [vmem:[#allocation7 + $0x998] sm:$0xf]  ;;  %v11641_v47 = vor.u32 %v13949_v45, %v11640_v14  ;;  %v11869_v31 = vor.u32 %v14006_v53, %v11868_v60  ;;  %v11749_v51 = vor.u32 %v13976_v46, %v11748_v29  ;;  %v13943_v14 = vld [vmem:[#allocation7 + $0x940] sm:$0xf0]  ;;  %v11724_v60 = vld [vmem:[#allocation7 + $0xa10] sm:$0xf] }
 0x4a7   :  { %17998 = vst [vmem:[#allocation124_spill] sm:$0xff] %v16486_v52  ;;  %8076 = vmatmul.bf16.gmra.mxu2 %v15051_v44  ;;  %v11772_v44 = vld [vmem:[#allocation7 + $0xa70] sm:$0xf]  ;;  %v11665_v33 = vor.u32 %v13955_v2, %v11664_v43  ;;  %v18007_v43 = vld [vmem:[#allocation27_spill] sm:$0xff]  ;;  %v18008_v2 = vld [vmem:[#allocation28_spill] sm:$0xff] }
 0x4a8   :  { %8105 = vmatmul.bf16.gmra.mxu3 %v15053_v54  ;;  %v11773_v28 = vor.u32 %v13982_v4, %v11772_v44  ;;  %8290 = vmatpush.bf16.msrb.mxu2 %v11869_v31  ;;  %v18009_v44 = vld [vmem:[#allocation29_spill] sm:$0xff]  ;;  %v13946_v4 = vld [vmem:[#allocation7 + $0x958] sm:$0xf0]  ;;  %v11940_v29 = vld [vmem:[#allocation7 + $0xbc0] sm:$0xf] }
 0x4a9   :  { %8233 = vmatpush.bf16.msrb.mxu0 %v11665_v33  ;;  %v11628_v33 = vld [vmem:[#allocation7 + $0x950] sm:$0xf]  ;;  %v13970_v53 = vld [vmem:[#allocation7 + $0xa18] sm:$0xf0]  ;;  %v14024_v46 = vld [vmem:[#allocation7 + $0xbc8] sm:$0xf0] }
 0x4aa   :  { %v7845_v34 = vpop.f32.mrf.mxu2  ;;  %v7789_v23 = vpop.f32.mrf.mxu0  ;;  %8261 = vmatpush.bf16.msrb.mxu1 %v11773_v28  ;;  %v11856_v28 = vld [vmem:[#allocation7 + $0xb18] sm:$0xf]  ;;  %v11941_v31 = vor.u32 %v14024_v46, %v11940_v29  ;;  %v11700_v46 = vld [vmem:[#allocation7 + $0x9e0] sm:$0xf]  ;;  %v16854_v52 = vld [vmem:[#allocation11 + $0x68] sm:$0xff] }
 0x4ab   :  { %v7846_v32 = vadd.f32 %v7845_v34, %v7817_v30  ;;  %v7874_v25 = vpop.f32.mrf.mxu3  ;;  %v7790_v26 = vadd.f32 %v7789_v23, %v16456_v59  ;;  %v7818_v9 = vpop.f32.mrf.mxu1  ;;  %v14513_v30 = vld [vmem:[#allocation9] sm:$0x7] }
 0x4ac   :  { %v16505_v7 = vperm.slane %v14513_v30, 2  ;;  %v11725_v30 = vor.u32 %v13970_v53, %v11724_v60 }
 0x4ad   :  { %v16493_v36 = vadd.f32 %v7874_v25, %v7846_v32  ;;  %v7819_v27 = vadd.f32 %v7818_v9, %v7790_v26  ;;  %8234 = vmatpush.bf16.msrb.mxu0 %v11653_v38  ;;  %v11952_v38 = vld [vmem:[#allocation7 + $0xbd8] sm:$0xf] }
 0x4ae   :  { %8262 = vmatpush.bf16.msrb.mxu1 %v11761_v22 }
 0x4af   :  { %17999 = vst [vmem:[#allocation125_spill] sm:$0xff] %v16493_v36  ;;  %v16848_v36 = vld [vmem:[#allocation11 + $0xd0] sm:$0xff] }
 0x4b1   :  { %8235 = vmatpush.bf16.msrb.mxu0 %v11641_v47 }
 0x4b2   :  { %v7847_v54 = vpop.f32.mrf.mxu2  ;;  %v7792_v24 = vpop.f32.mrf.mxu0  ;;  %8263 = vmatpush.bf16.msrb.mxu1 %v11749_v51  ;;  %v11832_v51 = vld [vmem:[#allocation7 + $0xae8] sm:$0xf] }
 0x4b3   :  { %v7848_v35 = vadd.f32 %v7847_v54, %v7819_v27  ;;  %v7876_v57 = vpop.f32.mrf.mxu3  ;;  %v7793_v5 = vadd.f32 %v7792_v24, %v16463_v3  ;;  %v7821_v49 = vpop.f32.mrf.mxu1  ;;  %v18010_v54 = vld [vmem:[#allocation30_spill] sm:$0xff]  ;;  %v14003_v24 = vld [vmem:[#allocation7 + $0xb20] sm:$0xf0] }
 0x4b5   :  { %v16496_v59 = vadd.f32 %v7876_v57, %v7848_v35  ;;  %v7822_v8 = vadd.f32 %v7821_v49, %v7793_v5  ;;  %8023 = vmatmul.bf16.gmra.mxu0 %v18001_v50  ;;  %v11629_v35 = vor.u32 %v13946_v4, %v11628_v33  ;;  %v11736_v57 = vld [vmem:[#allocation7 + $0xa28] sm:$0xf]  ;;  %v13973_v5 = vld [vmem:[#allocation7 + $0xa30] sm:$0xf0]  ;;  %v11857_v49 = vor.u32 %v14003_v24, %v11856_v28  ;;  %v11964_v50 = vld [vmem:[#allocation7 + $0xbf0] sm:$0xf] }
 0x4b6   :  { %8052 = vmatmul.bf16.gmra.mxu1 %v18002_v16  ;;  %v14030_v16 = vld [vmem:[#allocation7 + $0xbf8] sm:$0xf0]  ;;  %v11820_v28 = vld [vmem:[#allocation7 + $0xad0] sm:$0xf] }
 0x4b7   :  { %18000 = vst [vmem:[#allocation126_spill] sm:$0xff] %v16496_v59  ;;  %8081 = vmatmul.bf16.gmra.mxu2 %v18003_v13  ;;  %8236 = vmatpush.bf16.msrb.mxu0 %v11629_v35  ;;  %v11965_v6 = vor.u32 %v14030_v16, %v11964_v50  ;;  %v18011_v24 = vld [vmem:[#allocation31_spill] sm:$0xff]  ;;  %v13940_v50 = vld [vmem:[#allocation7 + $0x928] sm:$0xf0] }
 0x4b8   :  { %8110 = vmatmul.bf16.gmra.mxu3 %v18004_v48  ;;  %8291 = vmatpush.bf16.msrb.mxu2 %v11857_v49  ;;  %v18013_v49 = vld [vmem:[#allocation33_spill] sm:$0xff]  ;;  %v11712_v16 = vld [vmem:[#allocation7 + $0x9f8] sm:$0xf] }
 0x4b9   :  { %8319 = vmatpush.bf16.msrb.mxu3 %v11965_v6  ;;  %v16846_v59 = vld [vmem:[#allocation11 + $0x30] sm:$0xff] }
 0x4ba   :  { %v7850_v18 = vpop.f32.mrf.mxu2  ;;  %v7794_v39 = vpop.f32.mrf.mxu0 }
 0x4bb   :  { %v7851_v3 = vadd.f32 %v7850_v18, %v7822_v8  ;;  %v7879_v21 = vpop.f32.mrf.mxu3  ;;  %v7795_v58 = vadd.f32 %v7794_v39, %v16466_v62  ;;  %v7823_v15 = vpop.f32.mrf.mxu1  ;;  %v11737_v8 = vor.u32 %v13973_v5, %v11736_v57  ;;  %v18012_v5 = vld [vmem:[#allocation32_spill] sm:$0xff] }
 0x4bd   :  { %v16503_v40 = vadd.f32 %v7879_v21, %v7851_v3  ;;  %v7824_v17 = vadd.f32 %v7823_v15, %v7795_v58  ;;  %8264 = vmatpush.bf16.msrb.mxu1 %v11737_v8  ;;  %v11953_v3 = vor.u32 %v14027_v56, %v11952_v38  ;;  %v11844_v21 = vld [vmem:[#allocation7 + $0xb00] sm:$0xf]  ;;  %v14000_v58 = vld [vmem:[#allocation7 + $0xb08] sm:$0xf0] }
 0x4be   :  { %v11845_v45 = vor.u32 %v14000_v58, %v11844_v21  ;;  %v11604_v8 = vld [vmem:[#allocation7 + $0x920] sm:$0xf] }
 0x4bf   :  { %18005 = vst [vmem:[#allocation23_spill] sm:$0xff] %v16503_v40  ;;  %8320 = vmatpush.bf16.msrb.mxu3 %v11953_v3  ;;  %v11605_v6 = vor.u32 %v13940_v50, %v11604_v8  ;;  %v11880_v50 = vld [vmem:[#allocation7 + $0xb48] sm:$0xf]  ;;  %v18102_v40 = vld [vmem:[#allocation114_spill] sm:$0xff] }
 0x4c0   :  { %8292 = vmatpush.bf16.msrb.mxu2 %v11845_v45  ;;  %v14015_v45 = vld [vmem:[#allocation7 + $0xb80] sm:$0xf0] }
 0x4c1   :  { %8265 = vmatpush.bf16.msrb.mxu1 %v11725_v30  ;;  %v13964_v30 = vld [vmem:[#allocation7 + $0x9e8] sm:$0xf0] }
 0x4c2   :  { %v7852_v34 = vpop.f32.mrf.mxu2  ;;  %v7893_v23 = vpop.f32.mrf.mxu0 }
 0x4c3   :  { %v7853_v62 = vadd.f32 %v7852_v34, %v7824_v17  ;;  %v7881_v32 = vpop.f32.mrf.mxu3  ;;  %v7894_v25 = vadd.f32 %v7893_v23, %v16505_v7  ;;  %v7922_v26 = vpop.f32.mrf.mxu1  ;;  %v11616_v17 = vld [vmem:[#allocation7 + $0x938] sm:$0xf]  ;;  %v13997_v34 = vld [vmem:[#allocation7 + $0xaf0] sm:$0xf0]  ;;  %8321 = vmatpush.bf16.msrb.mxu3 %v11941_v31  ;;  %v11796_v31 = vld [vmem:[#allocation7 + $0xaa0] sm:$0xf] }
 0x4c4   :  { %v11617_v47 = vor.u32 %v13943_v14, %v11616_v17  ;;  %v11904_v14 = vld [vmem:[#allocation7 + $0xb78] sm:$0xf] }
 0x4c5   :  { %v16508_v9 = vadd.f32 %v7881_v32, %v7853_v62  ;;  %v7923_v27 = vadd.f32 %v7922_v26, %v7894_v25  ;;  %8124 = vmatmul.bf16.vlgmr.msra.gmra.mxu0 %v18007_v43  ;;  %v11833_v32 = vor.u32 %v13997_v34, %v11832_v51  ;;  %v14021_v43 = vld [vmem:[#allocation7 + $0xbb0] sm:$0xf0]  ;;  %v11905_v29 = vor.u32 %v14015_v45, %v11904_v14  ;;  %v11592_v34 = vld [vmem:[#allocation7 + $0x908] sm:$0xf] }
 0x4c6   :  { %8153 = vmatmul.bf16.vlgmr.msra.gmra.mxu1 %v18008_v2  ;;  %8237 = vmatpush.bf16.msrb.mxu0 %v11617_v47 }
 0x4c7   :  { %18006 = vst [vmem:[#allocation24_spill] sm:$0xff] %v16508_v9  ;;  %8182 = vmatmul.bf16.vlgmr.msra.gmra.mxu2 %v18009_v44  ;;  %v16832_v9 = vld [vmem:[#allocation11 + $0x80] sm:$0xff] }
 0x4c8   :  { %8211 = vmatmul.bf16.vlgmr.msra.gmra.mxu3 %v18010_v54  ;;  %8293 = vmatpush.bf16.msrb.mxu2 %v11833_v32  ;;  %v13994_v54 = vld [vmem:[#allocation7 + $0xad8] sm:$0xf0]  ;;  %v11701_v32 = vor.u32 %v13964_v30, %v11700_v46  ;;  %v12048_v30 = vld [vmem:[#allocation7 + $0xc98] sm:$0xf] }
 0x4c9   :  { %v11821_v57 = vor.u32 %v13994_v54, %v11820_v28  ;;  %v11784_v28 = vld [vmem:[#allocation7 + $0xa88] sm:$0xf] }
 0x4ca   :  { %v7951_v13 = vpop.f32.mrf.mxu2  ;;  %v7895_v0 = vpop.f32.mrf.mxu0  ;;  %8238 = vmatpush.bf16.msrb.mxu0 %v11605_v6 }
 0x4cb   :  { %v7952_v37 = vadd.f32 %v7951_v13, %v7923_v27  ;;  %v7980_v48 = vpop.f32.mrf.mxu3  ;;  %v7896_v22 = vadd.f32 %v7895_v0, %v16505_v7  ;;  %v7924_v18 = vpop.f32.mrf.mxu1  ;;  %v11928_v27 = vld [vmem:[#allocation7 + $0xba8] sm:$0xf]  ;;  %v18014_v13 = vld [vmem:[#allocation34_spill] sm:$0xff] }
 0x4cc   :  { %v11929_v4 = vor.u32 %v14021_v43, %v11928_v27  ;;  %8294 = vmatpush.bf16.msrb.mxu2 %v11821_v57  ;;  %v11916_v0 = vld [vmem:[#allocation7 + $0xb90] sm:$0xf]  ;;  %v11892_v27 = vld [vmem:[#allocation7 + $0xb60] sm:$0xf]  ;;  %v14012_v43 = vld [vmem:[#allocation7 + $0xb68] sm:$0xf0] }
 0x4cd   :  { %v16515_v39 = vadd.f32 %v7980_v48, %v7952_v37  ;;  %v7925_v15 = vadd.f32 %v7924_v18, %v7896_v22  ;;  %v13967_v37 = vld [vmem:[#allocation7 + $0xa00] sm:$0xf0]  ;;  %v14018_v48 = vld [vmem:[#allocation7 + $0xb98] sm:$0xf0]  ;;  %v11808_v22 = vld [vmem:[#allocation7 + $0xab8] sm:$0xf] }
 0x4ce   :  { %8322 = vmatpush.bf16.msrb.mxu3 %v11929_v4  ;;  %v11713_v38 = vor.u32 %v13967_v37, %v11712_v16  ;;  %v11917_v56 = vor.u32 %v14018_v48, %v11916_v0  ;;  %v13991_v18 = vld [vmem:[#allocation7 + $0xac0] sm:$0xf0]  ;;  %v13961_v4 = vld [vmem:[#allocation7 + $0x9d0] sm:$0xf0]  ;;  %18104 = vst [vmem:[#allocation34_spill] sm:$0xff] %v16846_v59 }
 0x4cf   :  { %v11809_v21 = vor.u32 %v13991_v18, %v11808_v22  ;;  %v14009_v16 = vld [vmem:[#allocation7 + $0xb50] sm:$0xf0]  ;;  %v18017_v22 = vld [vmem:[#allocation37_spill] sm:$0xff] }
 0x4d0   :  { %8266 = vmatpush.bf16.msrb.mxu1 %v11713_v38  ;;  %v11881_v0 = vor.u32 %v14009_v16, %v11880_v50  ;;  %v18015_v38 = vld [vmem:[#allocation35_spill] sm:$0xff]  ;;  %v12060_v18 = vld [vmem:[#allocation7 + $0xcb0] sm:$0xf]  ;;  %v14075_v50 = vld [vmem:[#allocation7 + $0xd60] sm:$0xf0] }
 0x4d1   :  { %8295 = vmatpush.bf16.msrb.mxu2 %v11809_v21  ;;  %v18018_v21 = vld [vmem:[#allocation38_spill] sm:$0xff] }
 0x4d2   :  { %v7953_v62 = vpop.f32.mrf.mxu2  ;;  %v7898_v25 = vpop.f32.mrf.mxu0  ;;  %8323 = vmatpush.bf16.msrb.mxu3 %v11917_v56  ;;  %v18016_v56 = vld [vmem:[#allocation36_spill] sm:$0xff] }
 0x4d3   :  { %v7954_v23 = vadd.f32 %v7953_v62, %v7925_v15  ;;  %v7982_v26 = vpop.f32.mrf.mxu3  ;;  %v7899_v2 = vadd.f32 %v7898_v25, %v16505_v7  ;;  %v7927_v44 = vpop.f32.mrf.mxu1  ;;  %v13937_v62 = vld [vmem:[#allocation7 + $0x910] sm:$0xf0]  ;;  %18106 = vst [vmem:[#allocation36_spill] sm:$0xff] %v16858_v41 }
 0x4d4   :  { %v11593_v25 = vor.u32 %v13937_v62, %v11592_v34  ;;  %8267 = vmatpush.bf16.msrb.mxu1 %v11701_v32  ;;  %v14078_v62 = vld [vmem:[#allocation7 + $0xd78] sm:$0xf0] }
 0x4d5   :  { %v16518_v33 = vadd.f32 %v7982_v26, %v7954_v23  ;;  %v7928_v35 = vadd.f32 %v7927_v44, %v7899_v2  ;;  %8129 = vmatmul.bf16.gmra.mxu0 %v18011_v24  ;;  %v13988_v23 = vld [vmem:[#allocation7 + $0xaa8] sm:$0xf0]  ;;  %v11893_v2 = vor.u32 %v14012_v43, %v11892_v27  ;;  %v11688_v44 = vld [vmem:[#allocation7 + $0x9c8] sm:$0xf]  ;;  %v13985_v24 = vld [vmem:[#allocation7 + $0xa90] sm:$0xf0] }
 0x4d6   :  { %8158 = vmatmul.bf16.gmra.mxu1 %v18012_v5  ;;  %v11797_v26 = vor.u32 %v13988_v23, %v11796_v31  ;;  %8324 = vmatpush.bf16.msrb.mxu3 %v11905_v29  ;;  %v11785_v8 = vor.u32 %v13985_v24, %v11784_v28  ;;  %v14051_v31 = vld [vmem:[#allocation7 + $0xca0] sm:$0xf0]  ;;  %v18019_v28 = vld [vmem:[#allocation39_spill] sm:$0xff] }
 0x4d7   :  { %8187 = vmatmul.bf16.gmra.mxu2 %v18013_v49  ;;  %8239 = vmatpush.bf16.msrb.mxu0 %v11593_v25  ;;  %v12049_v34 = vor.u32 %v14051_v31, %v12048_v30  ;;  %v12036_v24 = vld [vmem:[#allocation7 + $0xc80] sm:$0xf] }
 0x4d8   :  { %8216 = vmatmul.bf16.gmra.mxu3 %v18014_v13  ;;  %8296 = vmatpush.bf16.msrb.mxu2 %v11797_v26 }
 0x4da   :  { %v7956_v3 = vpop.f32.mrf.mxu2  ;;  %v7900_v15 = vpop.f32.mrf.mxu0  ;;  %8325 = vmatpush.bf16.msrb.mxu3 %v11893_v2 }
 0x4db   :  { %v7957_v58 = vadd.f32 %v7956_v3, %v7928_v35  ;;  %v7985_v17 = vpop.f32.mrf.mxu3  ;;  %v7901_v60 = vadd.f32 %v7900_v15, %v16505_v7  ;;  %v7929_v47 = vpop.f32.mrf.mxu1  ;;  %v11689_v35 = vor.u32 %v13961_v4, %v11688_v44  ;;  %v14054_v3 = vld [vmem:[#allocation7 + $0xcb8] sm:$0xf0] }
 0x4dc   :  { %8297 = vmatpush.bf16.msrb.mxu2 %v11785_v8 }
 0x4dd   :  { %v16525_v53 = vadd.f32 %v7985_v17, %v7957_v58  ;;  %v7930_v51 = vadd.f32 %v7929_v47, %v7901_v60  ;;  %8268 = vmatpush.bf16.msrb.mxu1 %v11689_v35  ;;  %v12061_v58 = vor.u32 %v14054_v3, %v12060_v18  ;;  %v18021_v35 = vld [vmem:[#allocation41_spill] sm:$0xff] }
 0x4de   :  { %8326 = vmatpush.bf16.msrb.mxu3 %v11881_v0  ;;  %v12024_v3 = vld [vmem:[#allocation7 + $0xc68] sm:$0xf] }
 0x4df   :  { %8348 = vmatpush.bf16.msra.mxu0 %v12061_v58  ;;  %v12252_v58 = vld [vmem:[#allocation7 + $0xe30] sm:$0xf] }
 0x4e2   :  { %v7958_v54 = vpop.f32.mrf.mxu2  ;;  %v7903_v5 = vpop.f32.mrf.mxu0 }
 0x4e3   :  { %v7959_v57 = vadd.f32 %v7958_v54, %v7930_v51  ;;  %v7987_v49 = vpop.f32.mrf.mxu3  ;;  %v7904_v13 = vadd.f32 %v7903_v5, %v16505_v7  ;;  %v7932_v6 = vpop.f32.mrf.mxu1  ;;  %v12156_v51 = vld [vmem:[#allocation7 + $0xd70] sm:$0xf]  ;;  %8349 = vmatpush.bf16.msra.mxu0 %v12049_v34  ;;  %v18020_v54 = vld [vmem:[#allocation40_spill] sm:$0xff]  ;;  %v12144_v5 = vld [vmem:[#allocation7 + $0xd58] sm:$0xf] }
 0x4e4   :  { %v12157_v32 = vor.u32 %v14078_v62, %v12156_v51  ;;  %v12145_v16 = vor.u32 %v14075_v50, %v12144_v5  ;;  %v12348_v5 = vld [vmem:[#allocation7 + $0xef0] sm:$0xf] }
 0x4e5   :  { %v16528_v37 = vadd.f32 %v7987_v49, %v7959_v57  ;;  %v7933_v48 = vadd.f32 %v7932_v6, %v7904_v13  ;;  %8134 = vmatmul.bf16.gmra.mxu0 %v18015_v38  ;;  %v14048_v57 = vld [vmem:[#allocation7 + $0xc88] sm:$0xf0]  ;;  %v18022_v49 = vld [vmem:[#allocation42_spill] sm:$0xff] }
 0x4e6   :  { %8163 = vmatmul.bf16.gmra.mxu1 %v18016_v56  ;;  %v12037_v8 = vor.u32 %v14048_v57, %v12036_v24  ;;  %v14069_v24 = vld [vmem:[#allocation7 + $0xd30] sm:$0xf0] }
 0x4e7   :  { %8192 = vmatmul.bf16.gmra.mxu2 %v18017_v22  ;;  %8377 = vmatpush.bf16.msra.mxu1 %v12157_v32 }
 0x4e8   :  { %8221 = vmatmul.bf16.gmra.mxu3 %v18018_v21  ;;  %8350 = vmatpush.bf16.msra.mxu0 %v12037_v8  ;;  %v14045_v21 = vld [vmem:[#allocation7 + $0xc70] sm:$0xf0] }
 0x4ea   :  { %v7961_v15 = vpop.f32.mrf.mxu2  ;;  %v7905_v14 = vpop.f32.mrf.mxu0 }
 0x4eb   :  { %v7962_v17 = vadd.f32 %v7961_v15, %v7933_v48  ;;  %v7990_v45 = vpop.f32.mrf.mxu3  ;;  %v7906_v60 = vadd.f32 %v7905_v14, %v16505_v7  ;;  %v7934_v47 = vpop.f32.mrf.mxu1  ;;  %8378 = vmatpush.bf16.msra.mxu1 %v12145_v16  ;;  %v12025_v15 = vor.u32 %v14045_v21, %v12024_v3  ;;  %v12132_v14 = vld [vmem:[#allocation7 + $0xd40] sm:$0xf] }
 0x4ec   :  { %v12228_v21 = vld [vmem:[#allocation7 + $0xe00] sm:$0xf] }
 0x4ed   :  { %v16535_v29 = vadd.f32 %v7990_v45, %v7962_v17  ;;  %v7935_v46 = vadd.f32 %v7934_v47, %v7906_v60  ;;  %v14102_v17 = vld [vmem:[#allocation7 + $0xe38] sm:$0xf0]  ;;  %v14072_v45 = vld [vmem:[#allocation7 + $0xd48] sm:$0xf0]  ;;  %8351 = vmatpush.bf16.msra.mxu0 %v12025_v15 }
 0x4ee   :  { %v12253_v60 = vor.u32 %v14102_v17, %v12252_v58  ;;  %v12133_v47 = vor.u32 %v14072_v45, %v12132_v14  ;;  %v14096_v58 = vld [vmem:[#allocation7 + $0xe08] sm:$0xf0]  ;;  %v12000_v17 = vld [vmem:[#allocation7 + $0xc38] sm:$0xf]  ;;  %v14039_v14 = vld [vmem:[#allocation7 + $0xc40] sm:$0xf0] }
 0x4ef   :  { %v12229_v45 = vor.u32 %v14096_v58, %v12228_v21  ;;  %v12192_v58 = vld [vmem:[#allocation7 + $0xdb8] sm:$0xf] }
 0x4f0   :  { %8406 = vmatpush.bf16.msra.mxu2 %v12253_v60  ;;  %8379 = vmatpush.bf16.msra.mxu1 %v12133_v47  ;;  %v12108_v60 = vld [vmem:[#allocation7 + $0xd10] sm:$0xf]  ;;  %v12001_v47 = vor.u32 %v14039_v14, %v12000_v17 }
 0x4f2   :  { %v7963_v23 = vpop.f32.mrf.mxu2  ;;  %v7908_v26 = vpop.f32.mrf.mxu0 }
 0x4f3   :  { %v7964_v25 = vadd.f32 %v7963_v23, %v7935_v46  ;;  %v7992_v27 = vpop.f32.mrf.mxu3  ;;  %v7909_v43 = vadd.f32 %v7908_v26, %v16505_v7  ;;  %v7937_v2 = vpop.f32.mrf.mxu1  ;;  %v18023_v23 = vld [vmem:[#allocation43_spill] sm:$0xff]  ;;  %v18025_v26 = vld [vmem:[#allocation45_spill] sm:$0xff] }
 0x4f5   :  { %v16538_v44 = vadd.f32 %v7992_v27, %v7964_v25  ;;  %v7938_v4 = vadd.f32 %v7937_v2, %v7909_v43  ;;  %8139 = vmatmul.bf16.gmra.mxu0 %v18019_v28  ;;  %v18024_v25 = vld [vmem:[#allocation44_spill] sm:$0xff]  ;;  %v12012_v27 = vld [vmem:[#allocation7 + $0xc50] sm:$0xf]  ;;  %v14042_v43 = vld [vmem:[#allocation7 + $0xc58] sm:$0xf0] }
 0x4f6   :  { %8168 = vmatmul.bf16.gmra.mxu1 %v18020_v54  ;;  %v12240_v2 = vld [vmem:[#allocation7 + $0xe18] sm:$0xf]  ;;  %v12013_v28 = vor.u32 %v14042_v43, %v12012_v27  ;;  %v14099_v54 = vld [vmem:[#allocation7 + $0xe20] sm:$0xf0]  ;;  %v12312_v43 = vld [vmem:[#allocation7 + $0xea8] sm:$0xf] }
 0x4f7   :  { %8197 = vmatmul.bf16.gmra.mxu2 %v18021_v35  ;;  %v12120_v35 = vld [vmem:[#allocation7 + $0xd28] sm:$0xf] }
 0x4f8   :  { %8226 = vmatmul.bf16.gmra.mxu3 %v18022_v49  ;;  %v12121_v57 = vor.u32 %v14069_v24, %v12120_v35  ;;  %v14126_v49 = vld [vmem:[#allocation7 + $0xef8] sm:$0xf0]  ;;  %8352 = vmatpush.bf16.msra.mxu0 %v12013_v28  ;;  %v12204_v24 = vld [vmem:[#allocation7 + $0xdd0] sm:$0xf] }
 0x4f9   :  { %v12349_v50 = vor.u32 %v14126_v49, %v12348_v5  ;;  %v18027_v5 = vld [vmem:[#allocation47_spill] sm:$0xff] }
 0x4fa   :  { %v7966_v13 = vpop.f32.mrf.mxu2  ;;  %v7910_v0 = vpop.f32.mrf.mxu0  ;;  %8380 = vmatpush.bf16.msra.mxu1 %v12121_v57 }
 0x4fb   :  { %v7967_v6 = vadd.f32 %v7966_v13, %v7938_v4  ;;  %v7995_v48 = vpop.f32.mrf.mxu3  ;;  %v7911_v38 = vadd.f32 %v7910_v0, %v16505_v7  ;;  %v7939_v56 = vpop.f32.mrf.mxu1  ;;  %v18026_v4 = vld [vmem:[#allocation46_spill] sm:$0xff]  ;;  %8435 = vmatpush.bf16.msra.mxu3 %v12349_v50  ;;  %v18029_v50 = vld [vmem:[#allocation49_spill] sm:$0xff] }
 0x4fc   :  { %v12336_v0 = vld [vmem:[#allocation7 + $0xed8] sm:$0xf]  ;;  %8353 = vmatpush.bf16.msra.mxu0 %v12001_v47 }
 0x4fd   :  { %v16545_v22 = vadd.f32 %v7995_v48, %v7967_v6  ;;  %v7940_v18 = vadd.f32 %v7939_v56, %v7911_v38  ;;  %v14123_v48 = vld [vmem:[#allocation7 + $0xee0] sm:$0xf0] }
 0x502   :  { %v7968_v46 = vpop.f32.mrf.mxu2  ;;  %v8009_v7 = vpop.f32.mrf.mxu0 }
 0x503   :  { %v7969_v30 = vadd.f32 %v7968_v46, %v7940_v18  ;;  %v7997_v31 = vpop.f32.mrf.mxu3  ;;  %v8010_v51 = vadd.f32 %v8009_v7, %v16515_v39  ;;  %v8038_v34 = vpop.f32.mrf.mxu1  ;;  %v12241_v39 = vor.u32 %v14099_v54, %v12240_v2  ;;  %v12337_v18 = vor.u32 %v14123_v48, %v12336_v0  ;;  %v14066_v46 = vld [vmem:[#allocation7 + $0xd18] sm:$0xf0]  ;;  %v14117_v2 = vld [vmem:[#allocation7 + $0xeb0] sm:$0xf0]  ;;  %v14063_v48 = vld [vmem:[#allocation7 + $0xd00] sm:$0xf0] }
 0x504   :  { %v12109_v7 = vor.u32 %v14066_v46, %v12108_v60  ;;  %v12313_v35 = vor.u32 %v14117_v2, %v12312_v43  ;;  %v12288_v46 = vld [vmem:[#allocation7 + $0xe78] sm:$0xf]  ;;  %v14084_v2 = vld [vmem:[#allocation7 + $0xda8] sm:$0xf0] }
 0x505   :  { %v16548_v62 = vadd.f32 %v7997_v31, %v7969_v30  ;;  %v8039_v32 = vadd.f32 %v8038_v34, %v8010_v51  ;;  %8240 = vmatmul.bf16.vlgmr.msrb.gmra.mxu0 %v18023_v23  ;;  %8407 = vmatpush.bf16.msra.mxu2 %v12241_v39  ;;  %v12324_v30 = vld [vmem:[#allocation7 + $0xec0] sm:$0xf]  ;;  %v14120_v31 = vld [vmem:[#allocation7 + $0xec8] sm:$0xf0]  ;;  %v12216_v51 = vld [vmem:[#allocation7 + $0xde8] sm:$0xf] }
 0x506   :  { %8269 = vmatmul.bf16.vlgmr.msrb.gmra.mxu1 %v18024_v25  ;;  %8436 = vmatpush.bf16.msra.mxu3 %v12337_v18  ;;  %v14093_v34 = vld [vmem:[#allocation7 + $0xdf0] sm:$0xf0]  ;;  %v14090_v39 = vld [vmem:[#allocation7 + $0xdd8] sm:$0xf0] }
 0x507   :  { %8298 = vmatmul.bf16.vlgmr.msrb.gmra.mxu2 %v18025_v26  ;;  %8381 = vmatpush.bf16.msra.mxu1 %v12109_v7  ;;  %v12217_v23 = vor.u32 %v14093_v34, %v12216_v51  ;;  %v12205_v49 = vor.u32 %v14090_v39, %v12204_v24  ;;  %v12084_v34 = vld [vmem:[#allocation7 + $0xce0] sm:$0xf]  ;;  %v14108_v24 = vld [vmem:[#allocation7 + $0xe68] sm:$0xf0]  ;;  %v12072_v39 = vld [vmem:[#allocation7 + $0xcc8] sm:$0xf] }
 0x508   :  { %8327 = vmatmul.bf16.vlgmr.msrb.gmra.mxu3 %v18026_v4 }
 0x509   :  { %8408 = vmatpush.bf16.msra.mxu2 %v12229_v45 }
 0x50a   :  { %v8067_v8 = vpop.f32.mrf.mxu2  ;;  %v8011_v13 = vpop.f32.mrf.mxu0 }
 0x50b   :  { %v8068_v16 = vadd.f32 %v8067_v8, %v8039_v32  ;;  %v8096_v6 = vpop.f32.mrf.mxu3  ;;  %v8012_v38 = vadd.f32 %v8011_v13, %v16518_v33  ;;  %v8040_v56 = vpop.f32.mrf.mxu1  ;;  %v12325_v33 = vor.u32 %v14120_v31, %v12324_v30  ;;  %v18028_v8 = vld [vmem:[#allocation48_spill] sm:$0xff]  ;;  %v14036_v13 = vld [vmem:[#allocation7 + $0xc28] sm:$0xf0] }
 0x50c   :  { %v14111_v30 = vld [vmem:[#allocation7 + $0xe80] sm:$0xf0] }
 0x50d   :  { %v16555_v3 = vadd.f32 %v8096_v6, %v8068_v16  ;;  %v8041_v15 = vadd.f32 %v8040_v56, %v8012_v38  ;;  %8437 = vmatpush.bf16.msra.mxu3 %v12325_v33  ;;  %8409 = vmatpush.bf16.msra.mxu2 %v12217_v23  ;;  %v11988_v16 = vld [vmem:[#allocation7 + $0xc20] sm:$0xf]  ;;  %v12096_v6 = vld [vmem:[#allocation7 + $0xcf8] sm:$0xf]  ;;  %v12300_v38 = vld [vmem:[#allocation7 + $0xe90] sm:$0xf]  ;;  %v12289_v51 = vor.u32 %v14111_v30, %v12288_v46 }
 0x50e   :  { %v11989_v0 = vor.u32 %v14036_v13, %v11988_v16  ;;  %v14114_v56 = vld [vmem:[#allocation7 + $0xe98] sm:$0xf0]  ;;  %v12097_v18 = vor.u32 %v14063_v48, %v12096_v6  ;;  %v12180_v23 = vld [vmem:[#allocation7 + $0xda0] sm:$0xf]  ;;  %v14105_v48 = vld [vmem:[#allocation7 + $0xe50] sm:$0xf0] }
 0x50f   :  { %v12301_v21 = vor.u32 %v14114_v56, %v12300_v38 }
 0x510   :  { %8354 = vmatpush.bf16.msra.mxu0 %v11989_v0  ;;  %8382 = vmatpush.bf16.msra.mxu1 %v12097_v18  ;;  %v12264_v0 = vld [vmem:[#allocation7 + $0xe48] sm:$0xf] }
 0x511   :  { %8410 = vmatpush.bf16.msra.mxu2 %v12205_v49  ;;  %8438 = vmatpush.bf16.msra.mxu3 %v12313_v35  ;;  %v12276_v35 = vld [vmem:[#allocation7 + $0xe60] sm:$0xf] }
 0x512   :  { %v8069_v32 = vpop.f32.mrf.mxu2  ;;  %v8014_v26 = vpop.f32.mrf.mxu0 }
 0x513   :  { %v8070_v25 = vadd.f32 %v8069_v32, %v8041_v15  ;;  %v8098_v27 = vpop.f32.mrf.mxu3  ;;  %v8015_v4 = vadd.f32 %v8014_v26, %v16525_v53  ;;  %v8043_v28 = vpop.f32.mrf.mxu1  ;;  %v18030_v53 = vld [vmem:[#allocation50_spill] sm:$0xff]  ;;  %v14087_v15 = vld [vmem:[#allocation7 + $0xdc0] sm:$0xf0]  ;;  %v14060_v32 = vld [vmem:[#allocation7 + $0xce8] sm:$0xf0] }
 0x514   :  { %v12193_v14 = vor.u32 %v14087_v15, %v12192_v58  ;;  %v11976_v26 = vld [vmem:[#allocation7 + $0xc08] sm:$0xf]  ;;  %v12085_v43 = vor.u32 %v14060_v32, %v12084_v34  ;;  %v18031_v15 = vld [vmem:[#allocation51_spill] sm:$0xff] }
 0x515   :  { %v16558_v54 = vadd.f32 %v8098_v27, %v8070_v25  ;;  %v8044_v57 = vadd.f32 %v8043_v28, %v8015_v4  ;;  %8245 = vmatmul.bf16.gmra.mxu0 %v18027_v5  ;;  %8439 = vmatpush.bf16.msra.mxu3 %v12301_v21  ;;  %v14033_v27 = vld [vmem:[#allocation7 + $0xc10] sm:$0xf0]  ;;  %v12181_v28 = vor.u32 %v14084_v2, %v12180_v23  ;;  %v12168_v5 = vld [vmem:[#allocation7 + $0xd88] sm:$0xf]  ;;  %v14174_v2 = vld [vmem:[#allocation7 + $0x1078] sm:$0xf0] }
 0x516   :  { %8274 = vmatmul.bf16.gmra.mxu1 %v18028_v8  ;;  %8411 = vmatpush.bf16.msra.mxu2 %v12193_v14  ;;  %v11977_v4 = vor.u32 %v14033_v27, %v11976_v26  ;;  %v12265_v21 = vor.u32 %v14105_v48, %v12264_v0  ;;  %v18033_v14 = vld [vmem:[#allocation53_spill] sm:$0xff]  ;;  %v14147_v26 = vld [vmem:[#allocation7 + $0xfa0] sm:$0xf0] }
 0x517   :  { %8303 = vmatmul.bf16.gmra.mxu2 %v18029_v50  ;;  %8383 = vmatpush.bf16.msra.mxu1 %v12085_v43  ;;  %v14081_v50 = vld [vmem:[#allocation7 + $0xd90] sm:$0xf0]  ;;  %v12540_v27 = vld [vmem:[#allocation7 + $0x1070] sm:$0xf]  ;;  %v14171_v48 = vld [vmem:[#allocation7 + $0x1060] sm:$0xf0] }
 0x518   :  { %8332 = vmatmul.bf16.gmra.mxu3 %v18030_v53  ;;  %8355 = vmatpush.bf16.msra.mxu0 %v11977_v4  ;;  %v12169_v53 = vor.u32 %v14081_v50, %v12168_v5  ;;  %v12541_v4 = vor.u32 %v14174_v2, %v12540_v27  ;;  %v18037_v50 = vld [vmem:[#allocation57_spill] sm:$0xff] }
 0x519   :  { %8440 = vmatpush.bf16.msra.mxu3 %v12289_v51 }
 0x51a   :  { %v8072_v17 = vpop.f32.mrf.mxu2  ;;  %v8016_v60 = vpop.f32.mrf.mxu0  ;;  %8412 = vmatpush.bf16.msra.mxu2 %v12181_v28 }
 0x51b   :  { %v8073_v45 = vadd.f32 %v8072_v17, %v8044_v57  ;;  %v8101_v47 = vpop.f32.mrf.mxu3  ;;  %v8017_v31 = vadd.f32 %v8016_v60, %v16528_v37  ;;  %v8045_v7 = vpop.f32.mrf.mxu1  ;;  %v12277_v37 = vor.u32 %v14108_v24, %v12276_v35  ;;  %v14057_v57 = vld [vmem:[#allocation7 + $0xcd0] sm:$0xf0]  ;;  %v18032_v17 = vld [vmem:[#allocation52_spill] sm:$0xff]  ;;  %v14150_v60 = vld [vmem:[#allocation7 + $0xfb8] sm:$0xf0] }
 0x51c   :  { %v12073_v8 = vor.u32 %v14057_v57, %v12072_v39 }
 0x51d   :  { %v16565_v33 = vadd.f32 %v8101_v47, %v8073_v45  ;;  %v8046_v25 = vadd.f32 %v8045_v7, %v8017_v31  ;;  %8441 = vmatpush.bf16.msra.mxu3 %v12277_v37  ;;  %v12444_v45 = vld [vmem:[#allocation7 + $0xfb0] sm:$0xf] }
 0x51e   :  { %8384 = vmatpush.bf16.msra.mxu1 %v12073_v8  ;;  %8413 = vmatpush.bf16.msra.mxu2 %v12169_v53  ;;  %v18034_v47 = vld [vmem:[#allocation54_spill] sm:$0xff]  ;;  %v12445_v46 = vor.u32 %v14150_v60, %v12444_v45  ;;  %v18036_v8 = vld [vmem:[#allocation56_spill] sm:$0xff] }
 0x51f   :  { %v18038_v53 = vld [vmem:[#allocation58_spill] sm:$0xff]  ;;  %v12408_v60 = vld [vmem:[#allocation7 + $0xf68] sm:$0xf] }
 0x520   :  { %8464 = vmatpush.bf16.msrb.mxu0 %v12445_v46  ;;  %v12636_v46 = vld [vmem:[#allocation7 + $0x1130] sm:$0xf] }
 0x521   :  { %8442 = vmatpush.bf16.msra.mxu3 %v12265_v21 }
 0x522   :  { %v8074_v49 = vpop.f32.mrf.mxu2  ;;  %v8019_v13 = vpop.f32.mrf.mxu0  ;;  %8493 = vmatpush.bf16.msrb.mxu1 %v12541_v4 }
 0x523   :  { %v8075_v16 = vadd.f32 %v8074_v49, %v8046_v25  ;;  %v8103_v6 = vpop.f32.mrf.mxu3  ;;  %v8020_v38 = vadd.f32 %v8019_v13, %v16535_v29  ;;  %v8048_v56 = vpop.f32.mrf.mxu1  ;;  %v12432_v25 = vld [vmem:[#allocation7 + $0xf98] sm:$0xf]  ;;  %v14144_v13 = vld [vmem:[#allocation7 + $0xf88] sm:$0xf0] }
 0x524   :  { %v12433_v43 = vor.u32 %v14147_v26, %v12432_v25  ;;  %v18035_v49 = vld [vmem:[#allocation55_spill] sm:$0xff] }
 0x525   :  { %v16568_v18 = vadd.f32 %v8103_v6, %v8075_v16  ;;  %v8049_v58 = vadd.f32 %v8048_v56, %v8020_v38  ;;  %8250 = vmatmul.bf16.gmra.mxu0 %v18031_v15  ;;  %v12420_v16 = vld [vmem:[#allocation7 + $0xf80] sm:$0xf]  ;;  %v12528_v6 = vld [vmem:[#allocation7 + $0x1058] sm:$0xf] }
 0x526   :  { %8279 = vmatmul.bf16.gmra.mxu1 %v18032_v17  ;;  %8465 = vmatpush.bf16.msrb.mxu0 %v12433_v43  ;;  %v12421_v0 = vor.u32 %v14144_v13, %v12420_v16  ;;  %v12529_v38 = vor.u32 %v14171_v48, %v12528_v6  ;;  %v14165_v16 = vld [vmem:[#allocation7 + $0x1030] sm:$0xf0]  ;;  %v12732_v6 = vld [vmem:[#allocation7 + $0x11f0] sm:$0xf] }
 0x527   :  { %8308 = vmatmul.bf16.gmra.mxu2 %v18033_v14 }
 0x528   :  { %8337 = vmatmul.bf16.gmra.mxu3 %v18034_v47  ;;  %8494 = vmatpush.bf16.msrb.mxu1 %v12529_v38  ;;  %v14141_v47 = vld [vmem:[#allocation7 + $0xf70] sm:$0xf0] }
 0x52a   :  { %v8077_v29 = vpop.f32.mrf.mxu2  ;;  %v8021_v31 = vpop.f32.mrf.mxu0  ;;  %8466 = vmatpush.bf16.msrb.mxu0 %v12421_v0 }
 0x52b   :  { %v8078_v30 = vadd.f32 %v8077_v29, %v8049_v58  ;;  %v8106_v7 = vpop.f32.mrf.mxu3  ;;  %v8022_v51 = vadd.f32 %v8021_v31, %v16538_v44  ;;  %v8050_v34 = vpop.f32.mrf.mxu1  ;;  %v12409_v29 = vor.u32 %v14141_v47, %v12408_v60  ;;  %v12516_v31 = vld [vmem:[#allocation7 + $0x1040] sm:$0xf] }
 0x52c   :  { %v12612_v47 = vld [vmem:[#allocation7 + $0x1100] sm:$0xf] }
 0x52d   :  { %v16575_v32 = vadd.f32 %v8106_v7, %v8078_v30  ;;  %v8051_v23 = vadd.f32 %v8050_v34, %v8022_v51  ;;  %v14198_v30 = vld [vmem:[#allocation7 + $0x1138] sm:$0xf0]  ;;  %v14168_v7 = vld [vmem:[#allocation7 + $0x1048] sm:$0xf0] }
 0x52e   :  { %v12637_v51 = vor.u32 %v14198_v30, %v12636_v46  ;;  %v12517_v34 = vor.u32 %v14168_v7, %v12516_v31  ;;  %8467 = vmatpush.bf16.msrb.mxu0 %v12409_v29  ;;  %v14192_v46 = vld [vmem:[#allocation7 + $0x1108] sm:$0xf0]  ;;  %v12384_v30 = vld [vmem:[#allocation7 + $0xf38] sm:$0xf]  ;;  %v14135_v31 = vld [vmem:[#allocation7 + $0xf40] sm:$0xf0] }
 0x52f   :  { %v12613_v7 = vor.u32 %v14192_v46, %v12612_v47  ;;  %v12576_v46 = vld [vmem:[#allocation7 + $0x10b8] sm:$0xf] }
 0x530   :  { %8522 = vmatpush.bf16.msrb.mxu2 %v12637_v51  ;;  %8495 = vmatpush.bf16.msrb.mxu1 %v12517_v34  ;;  %v12492_v51 = vld [vmem:[#allocation7 + $0x1010] sm:$0xf]  ;;  %v12385_v34 = vor.u32 %v14135_v31, %v12384_v30 }
 0x532   :  { %v8079_v28 = vpop.f32.mrf.mxu2  ;;  %v8024_v24 = vpop.f32.mrf.mxu0 }
 0x533   :  { %v8080_v35 = vadd.f32 %v8079_v28, %v8051_v23  ;;  %v8108_v37 = vpop.f32.mrf.mxu3  ;;  %v8025_v39 = vadd.f32 %v8024_v24, %v16545_v22  ;;  %v8053_v57 = vpop.f32.mrf.mxu1  ;;  %v18039_v28 = vld [vmem:[#allocation59_spill] sm:$0xff]  ;;  %v18041_v24 = vld [vmem:[#allocation61_spill] sm:$0xff] }
 0x535   :  { %v16578_v44 = vadd.f32 %v8108_v37, %v8080_v35  ;;  %v8054_v5 = vadd.f32 %v8053_v57, %v8025_v39  ;;  %8255 = vmatmul.bf16.gmra.mxu0 %v18035_v49  ;;  %v18040_v35 = vld [vmem:[#allocation60_spill] sm:$0xff]  ;;  %v12396_v37 = vld [vmem:[#allocation7 + $0xf50] sm:$0xf]  ;;  %v14138_v39 = vld [vmem:[#allocation7 + $0xf58] sm:$0xf0] }
 0x536   :  { %8284 = vmatmul.bf16.gmra.mxu1 %v18036_v8  ;;  %v12624_v57 = vld [vmem:[#allocation7 + $0x1118] sm:$0xf]  ;;  %v12397_v49 = vor.u32 %v14138_v39, %v12396_v37  ;;  %v14195_v8 = vld [vmem:[#allocation7 + $0x1120] sm:$0xf0]  ;;  %v12696_v39 = vld [vmem:[#allocation7 + $0x11a8] sm:$0xf] }
 0x537   :  { %8313 = vmatmul.bf16.gmra.mxu2 %v18037_v50  ;;  %v12504_v50 = vld [vmem:[#allocation7 + $0x1028] sm:$0xf] }
 0x538   :  { %8342 = vmatmul.bf16.gmra.mxu3 %v18038_v53  ;;  %v12505_v13 = vor.u32 %v14165_v16, %v12504_v50  ;;  %v14222_v53 = vld [vmem:[#allocation7 + $0x11f8] sm:$0xf0]  ;;  %8468 = vmatpush.bf16.msrb.mxu0 %v12397_v49  ;;  %v12588_v16 = vld [vmem:[#allocation7 + $0x10d0] sm:$0xf] }
 0x539   :  { %v12733_v48 = vor.u32 %v14222_v53, %v12732_v6  ;;  %v18043_v6 = vld [vmem:[#allocation63_spill] sm:$0xff] }
 0x53a   :  { %v8082_v56 = vpop.f32.mrf.mxu2  ;;  %v8026_v21 = vpop.f32.mrf.mxu0  ;;  %8496 = vmatpush.bf16.msrb.mxu1 %v12505_v13 }
 0x53b   :  { %v8083_v22 = vadd.f32 %v8082_v56, %v8054_v5  ;;  %v8111_v58 = vpop.f32.mrf.mxu3  ;;  %v8027_v15 = vadd.f32 %v8026_v21, %v16548_v62  ;;  %v8055_v17 = vpop.f32.mrf.mxu1  ;;  %v18042_v5 = vld [vmem:[#allocation62_spill] sm:$0xff]  ;;  %8551 = vmatpush.bf16.msrb.mxu3 %v12733_v48  ;;  %v18045_v48 = vld [vmem:[#allocation65_spill] sm:$0xff] }
 0x53c   :  { %v12720_v21 = vld [vmem:[#allocation7 + $0x11d8] sm:$0xf]  ;;  %8469 = vmatpush.bf16.msrb.mxu0 %v12385_v34 }
 0x53d   :  { %v16585_v14 = vadd.f32 %v8111_v58, %v8083_v22  ;;  %v8056_v45 = vadd.f32 %v8055_v17, %v8027_v15  ;;  %v14219_v58 = vld [vmem:[#allocation7 + $0x11e0] sm:$0xf0] }
 0x542   :  { %v8084_v23 = vpop.f32.mrf.mxu2  ;;  %v8125_v62 = vpop.f32.mrf.mxu0 }
 0x543   :  { %v8085_v25 = vadd.f32 %v8084_v23, %v8056_v45  ;;  %v8113_v26 = vpop.f32.mrf.mxu3  ;;  %v8126_v27 = vadd.f32 %v8125_v62, %v16555_v3  ;;  %v8154_v43 = vpop.f32.mrf.mxu1  ;;  %v12625_v3 = vor.u32 %v14195_v8, %v12624_v57  ;;  %v12721_v45 = vor.u32 %v14219_v58, %v12720_v21  ;;  %v14162_v23 = vld [vmem:[#allocation7 + $0x1018] sm:$0xf0]  ;;  %v14213_v57 = vld [vmem:[#allocation7 + $0x11b0] sm:$0xf0]  ;;  %v14159_v58 = vld [vmem:[#allocation7 + $0x1000] sm:$0xf0] }
 0x544   :  { %v12493_v62 = vor.u32 %v14162_v23, %v12492_v51  ;;  %v12697_v50 = vor.u32 %v14213_v57, %v12696_v39  ;;  %v12672_v23 = vld [vmem:[#allocation7 + $0x1178] sm:$0xf]  ;;  %v14180_v57 = vld [vmem:[#allocation7 + $0x10a8] sm:$0xf0] }
 0x545   :  { %v16588_v2 = vadd.f32 %v8113_v26, %v8085_v25  ;;  %v8155_v4 = vadd.f32 %v8154_v43, %v8126_v27  ;;  %8356 = vmatmul.bf16.vlgmr.msra.gmra.mxu0 %v18039_v28  ;;  %8523 = vmatpush.bf16.msrb.mxu2 %v12625_v3  ;;  %v12708_v25 = vld [vmem:[#allocation7 + $0x11c0] sm:$0xf]  ;;  %v14216_v26 = vld [vmem:[#allocation7 + $0x11c8] sm:$0xf0]  ;;  %v12600_v27 = vld [vmem:[#allocation7 + $0x10e8] sm:$0xf] }
 0x546   :  { %8385 = vmatmul.bf16.vlgmr.msra.gmra.mxu1 %v18040_v35  ;;  %8552 = vmatpush.bf16.msrb.mxu3 %v12721_v45  ;;  %v14189_v43 = vld [vmem:[#allocation7 + $0x10f0] sm:$0xf0]  ;;  %v14186_v3 = vld [vmem:[#allocation7 + $0x10d8] sm:$0xf0] }
 0x547   :  { %8414 = vmatmul.bf16.vlgmr.msra.gmra.mxu2 %v18041_v24  ;;  %8497 = vmatpush.bf16.msrb.mxu1 %v12493_v62  ;;  %v12601_v28 = vor.u32 %v14189_v43, %v12600_v27  ;;  %v12589_v53 = vor.u32 %v14186_v3, %v12588_v16  ;;  %v12468_v43 = vld [vmem:[#allocation7 + $0xfe0] sm:$0xf]  ;;  %v14204_v16 = vld [vmem:[#allocation7 + $0x1168] sm:$0xf0]  ;;  %v12456_v3 = vld [vmem:[#allocation7 + $0xfc8] sm:$0xf] }
 0x548   :  { %8443 = vmatmul.bf16.vlgmr.msra.gmra.mxu3 %v18042_v5 }
 0x549   :  { %8524 = vmatpush.bf16.msrb.mxu2 %v12613_v7 }
 0x54a   :  { %v8183_v0 = vpop.f32.mrf.mxu2  ;;  %v8127_v56 = vpop.f32.mrf.mxu0 }
 0x54b   :  { %v8184_v38 = vadd.f32 %v8183_v0, %v8155_v4  ;;  %v8212_v22 = vpop.f32.mrf.mxu3  ;;  %v8128_v15 = vadd.f32 %v8127_v56, %v16558_v54  ;;  %v8156_v17 = vpop.f32.mrf.mxu1  ;;  %v12709_v54 = vor.u32 %v14216_v26, %v12708_v25  ;;  %v18044_v0 = vld [vmem:[#allocation64_spill] sm:$0xff]  ;;  %v14132_v56 = vld [vmem:[#allocation7 + $0xf28] sm:$0xf0] }
 0x54c   :  { %v14207_v25 = vld [vmem:[#allocation7 + $0x1180] sm:$0xf0] }
 0x54d   :  { %v16595_v60 = vadd.f32 %v8212_v22, %v8184_v38  ;;  %v8157_v29 = vadd.f32 %v8156_v17, %v8128_v15  ;;  %8553 = vmatpush.bf16.msrb.mxu3 %v12709_v54  ;;  %8525 = vmatpush.bf16.msrb.mxu2 %v12601_v28  ;;  %v12372_v38 = vld [vmem:[#allocation7 + $0xf20] sm:$0xf]  ;;  %v12480_v22 = vld [vmem:[#allocation7 + $0xff8] sm:$0xf]  ;;  %v12684_v15 = vld [vmem:[#allocation7 + $0x1190] sm:$0xf]  ;;  %v12673_v27 = vor.u32 %v14207_v25, %v12672_v23 }
 0x54e   :  { %v12373_v21 = vor.u32 %v14132_v56, %v12372_v38  ;;  %v14210_v17 = vld [vmem:[#allocation7 + $0x1198] sm:$0xf0]  ;;  %v12481_v45 = vor.u32 %v14159_v58, %v12480_v22  ;;  %v12564_v28 = vld [vmem:[#allocation7 + $0x10a0] sm:$0xf]  ;;  %v14201_v58 = vld [vmem:[#allocation7 + $0x1150] sm:$0xf0] }
 0x54f   :  { %v12685_v47 = vor.u32 %v14210_v17, %v12684_v15 }
 0x550   :  { %8470 = vmatpush.bf16.msrb.mxu0 %v12373_v21  ;;  %8498 = vmatpush.bf16.msrb.mxu1 %v12481_v45  ;;  %v12648_v21 = vld [vmem:[#allocation7 + $0x1148] sm:$0xf] }
 0x551   :  { %8526 = vmatpush.bf16.msrb.mxu2 %v12589_v53  ;;  %8554 = vmatpush.bf16.msrb.mxu3 %v12697_v50  ;;  %v12660_v50 = vld [vmem:[#allocation7 + $0x1160] sm:$0xf] }
 0x552   :  { %v8185_v4 = vpop.f32.mrf.mxu2  ;;  %v8130_v24 = vpop.f32.mrf.mxu0 }
 0x553   :  { %v8186_v35 = vadd.f32 %v8185_v4, %v8157_v29  ;;  %v8214_v37 = vpop.f32.mrf.mxu3  ;;  %v8131_v5 = vadd.f32 %v8130_v24, %v16565_v33  ;;  %v8159_v49 = vpop.f32.mrf.mxu1  ;;  %v18046_v33 = vld [vmem:[#allocation66_spill] sm:$0xff]  ;;  %v14183_v29 = vld [vmem:[#allocation7 + $0x10c0] sm:$0xf0]  ;;  %v14156_v4 = vld [vmem:[#allocation7 + $0xfe8] sm:$0xf0] }
 0x554   :  { %v12577_v31 = vor.u32 %v14183_v29, %v12576_v46  ;;  %v12360_v24 = vld [vmem:[#allocation7 + $0xf08] sm:$0xf]  ;;  %v12469_v39 = vor.u32 %v14156_v4, %v12468_v43  ;;  %v18047_v29 = vld [vmem:[#allocation67_spill] sm:$0xff] }
 0x555   :  { %v16598_v8 = vadd.f32 %v8214_v37, %v8186_v35  ;;  %v8160_v13 = vadd.f32 %v8159_v49, %v8131_v5  ;;  %8361 = vmatmul.bf16.gmra.mxu0 %v18043_v6  ;;  %8555 = vmatpush.bf16.msrb.mxu3 %v12685_v47  ;;  %v14129_v37 = vld [vmem:[#allocation7 + $0xf10] sm:$0xf0]  ;;  %v12565_v49 = vor.u32 %v14180_v57, %v12564_v28  ;;  %v12552_v6 = vld [vmem:[#allocation7 + $0x1088] sm:$0xf]  ;;  %v14270_v57 = vld [vmem:[#allocation7 + $0x1378] sm:$0xf0] }
 0x556   :  { %8390 = vmatmul.bf16.gmra.mxu1 %v18044_v0  ;;  %8527 = vmatpush.bf16.msrb.mxu2 %v12577_v31  ;;  %v12361_v5 = vor.u32 %v14129_v37, %v12360_v24  ;;  %v12649_v47 = vor.u32 %v14201_v58, %v12648_v21  ;;  %v18049_v31 = vld [vmem:[#allocation69_spill] sm:$0xff]  ;;  %v14243_v24 = vld [vmem:[#allocation7 + $0x12a0] sm:$0xf0] }
 0x557   :  { %8419 = vmatmul.bf16.gmra.mxu2 %v18045_v48  ;;  %8499 = vmatpush.bf16.msrb.mxu1 %v12469_v39  ;;  %v14177_v48 = vld [vmem:[#allocation7 + $0x1090] sm:$0xf0]  ;;  %v12924_v37 = vld [vmem:[#allocation7 + $0x1370] sm:$0xf]  ;;  %v14267_v58 = vld [vmem:[#allocation7 + $0x1360] sm:$0xf0] }
 0x558   :  { %8448 = vmatmul.bf16.gmra.mxu3 %v18046_v33  ;;  %8471 = vmatpush.bf16.msrb.mxu0 %v12361_v5  ;;  %v12553_v33 = vor.u32 %v14177_v48, %v12552_v6  ;;  %v12925_v5 = vor.u32 %v14270_v57, %v12924_v37  ;;  %v18053_v48 = vld [vmem:[#allocation73_spill] sm:$0xff] }
 0x559   :  { %8556 = vmatpush.bf16.msrb.mxu3 %v12673_v27 }
 0x55a   :  { %v8188_v30 = vpop.f32.mrf.mxu2  ;;  %v8132_v51 = vpop.f32.mrf.mxu0  ;;  %8528 = vmatpush.bf16.msrb.mxu2 %v12565_v49 }
 0x55b   :  { %v8189_v7 = vadd.f32 %v8188_v30, %v8160_v13  ;;  %v8217_v34 = vpop.f32.mrf.mxu3  ;;  %v8133_v26 = vadd.f32 %v8132_v51, %v16568_v18  ;;  %v8161_v62 = vpop.f32.mrf.mxu1  ;;  %v12661_v18 = vor.u32 %v14204_v16, %v12660_v50  ;;  %v14153_v13 = vld [vmem:[#allocation7 + $0xfd0] sm:$0xf0]  ;;  %v18048_v30 = vld [vmem:[#allocation68_spill] sm:$0xff]  ;;  %v14246_v51 = vld [vmem:[#allocation7 + $0x12b8] sm:$0xf0] }
 0x55c   :  { %v12457_v0 = vor.u32 %v14153_v13, %v12456_v3 }
 0x55d   :  { %v16605_v54 = vadd.f32 %v8217_v34, %v8189_v7  ;;  %v8162_v35 = vadd.f32 %v8161_v62, %v8133_v26  ;;  %8557 = vmatpush.bf16.msrb.mxu3 %v12661_v18  ;;  %v12828_v7 = vld [vmem:[#allocation7 + $0x12b0] sm:$0xf] }
 0x55e   :  { %8500 = vmatpush.bf16.msrb.mxu1 %v12457_v0  ;;  %8529 = vmatpush.bf16.msrb.mxu2 %v12553_v33  ;;  %v18050_v34 = vld [vmem:[#allocation70_spill] sm:$0xff]  ;;  %v12829_v23 = vor.u32 %v14246_v51, %v12828_v7  ;;  %v18052_v0 = vld [vmem:[#allocation72_spill] sm:$0xff] }
 0x55f   :  { %v18054_v33 = vld [vmem:[#allocation74_spill] sm:$0xff]  ;;  %v12792_v51 = vld [vmem:[#allocation7 + $0x1268] sm:$0xf] }
 0x560   :  { %8580 = vmatpush.bf16.msra.mxu0 %v12829_v23  ;;  %v13020_v23 = vld [vmem:[#allocation7 + $0x1430] sm:$0xf] }
 0x561   :  { %8558 = vmatpush.bf16.msrb.mxu3 %v12649_v47 }
 0x562   :  { %v8190_v53 = vpop.f32.mrf.mxu2  ;;  %v8135_v56 = vpop.f32.mrf.mxu0  ;;  %8609 = vmatpush.bf16.msra.mxu1 %v12925_v5 }
 0x563   :  { %v8191_v38 = vadd.f32 %v8190_v53, %v8162_v35  ;;  %v8219_v22 = vpop.f32.mrf.mxu3  ;;  %v8136_v15 = vadd.f32 %v8135_v56, %v16575_v32  ;;  %v8164_v17 = vpop.f32.mrf.mxu1  ;;  %v12816_v35 = vld [vmem:[#allocation7 + $0x1298] sm:$0xf]  ;;  %v14240_v56 = vld [vmem:[#allocation7 + $0x1288] sm:$0xf0] }
 0x564   :  { %v12817_v39 = vor.u32 %v14243_v24, %v12816_v35  ;;  %v18051_v53 = vld [vmem:[#allocation71_spill] sm:$0xff] }
 0x565   :  { %v16608_v45 = vadd.f32 %v8219_v22, %v8191_v38  ;;  %v8165_v46 = vadd.f32 %v8164_v17, %v8136_v15  ;;  %8366 = vmatmul.bf16.gmra.mxu0 %v18047_v29  ;;  %v12804_v38 = vld [vmem:[#allocation7 + $0x1280] sm:$0xf]  ;;  %v12912_v22 = vld [vmem:[#allocation7 + $0x1358] sm:$0xf] }
 0x566   :  { %8395 = vmatmul.bf16.gmra.mxu1 %v18048_v30  ;;  %8581 = vmatpush.bf16.msra.mxu0 %v12817_v39  ;;  %v12805_v21 = vor.u32 %v14240_v56, %v12804_v38  ;;  %v12913_v15 = vor.u32 %v14267_v58, %v12912_v22  ;;  %v14261_v38 = vld [vmem:[#allocation7 + $0x1330] sm:$0xf0]  ;;  %v13116_v22 = vld [vmem:[#allocation7 + $0x14f0] sm:$0xf] }
 0x567   :  { %8424 = vmatmul.bf16.gmra.mxu2 %v18049_v31 }
 0x568   :  { %8453 = vmatmul.bf16.gmra.mxu3 %v18050_v34  ;;  %8610 = vmatpush.bf16.msra.mxu1 %v12913_v15  ;;  %v14237_v34 = vld [vmem:[#allocation7 + $0x1270] sm:$0xf0] }
 0x56a   :  { %v8193_v32 = vpop.f32.mrf.mxu2  ;;  %v8137_v26 = vpop.f32.mrf.mxu0  ;;  %8582 = vmatpush.bf16.msra.mxu0 %v12805_v21 }
 0x56b   :  { %v8194_v25 = vadd.f32 %v8193_v32, %v8165_v46  ;;  %v8222_v62 = vpop.f32.mrf.mxu3  ;;  %v8138_v27 = vadd.f32 %v8137_v26, %v16578_v44  ;;  %v8166_v43 = vpop.f32.mrf.mxu1  ;;  %v12793_v32 = vor.u32 %v14237_v34, %v12792_v51  ;;  %v12900_v26 = vld [vmem:[#allocation7 + $0x1340] sm:$0xf] }
 0x56c   :  { %v12996_v34 = vld [vmem:[#allocation7 + $0x1400] sm:$0xf] }
 0x56d   :  { %v16615_v4 = vadd.f32 %v8222_v62, %v8194_v25  ;;  %v8167_v28 = vadd.f32 %v8166_v43, %v8138_v27  ;;  %v14294_v25 = vld [vmem:[#allocation7 + $0x1438] sm:$0xf0]  ;;  %v14264_v62 = vld [vmem:[#allocation7 + $0x1348] sm:$0xf0] }
 0x56e   :  { %v13021_v27 = vor.u32 %v14294_v25, %v13020_v23  ;;  %v12901_v43 = vor.u32 %v14264_v62, %v12900_v26  ;;  %8583 = vmatpush.bf16.msra.mxu0 %v12793_v32  ;;  %v14288_v23 = vld [vmem:[#allocation7 + $0x1408] sm:$0xf0]  ;;  %v12768_v25 = vld [vmem:[#allocation7 + $0x1238] sm:$0xf]  ;;  %v14231_v26 = vld [vmem:[#allocation7 + $0x1240] sm:$0xf0] }
 0x56f   :  { %v12997_v62 = vor.u32 %v14288_v23, %v12996_v34  ;;  %v12960_v23 = vld [vmem:[#allocation7 + $0x13b8] sm:$0xf] }
 0x570   :  { %8638 = vmatpush.bf16.msra.mxu2 %v13021_v27  ;;  %8611 = vmatpush.bf16.msra.mxu1 %v12901_v43  ;;  %v12876_v27 = vld [vmem:[#allocation7 + $0x1310] sm:$0xf]  ;;  %v12769_v43 = vor.u32 %v14231_v26, %v12768_v25 }
 0x572   :  { %v8195_v49 = vpop.f32.mrf.mxu2  ;;  %v8140_v16 = vpop.f32.mrf.mxu0 }
 0x573   :  { %v8196_v50 = vadd.f32 %v8195_v49, %v8167_v28  ;;  %v8224_v18 = vpop.f32.mrf.mxu3  ;;  %v8141_v3 = vadd.f32 %v8140_v16, %v16585_v14  ;;  %v8169_v13 = vpop.f32.mrf.mxu1  ;;  %v18055_v49 = vld [vmem:[#allocation75_spill] sm:$0xff]  ;;  %v18057_v16 = vld [vmem:[#allocation77_spill] sm:$0xff] }
 0x575   :  { %v16618_v44 = vadd.f32 %v8224_v18, %v8196_v50  ;;  %v8170_v6 = vadd.f32 %v8169_v13, %v8141_v3  ;;  %8371 = vmatmul.bf16.gmra.mxu0 %v18051_v53  ;;  %v18056_v50 = vld [vmem:[#allocation76_spill] sm:$0xff]  ;;  %v12780_v18 = vld [vmem:[#allocation7 + $0x1250] sm:$0xf]  ;;  %v14234_v3 = vld [vmem:[#allocation7 + $0x1258] sm:$0xf0] }
 0x576   :  { %8400 = vmatmul.bf16.gmra.mxu1 %v18052_v0  ;;  %v13008_v13 = vld [vmem:[#allocation7 + $0x1418] sm:$0xf]  ;;  %v12781_v53 = vor.u32 %v14234_v3, %v12780_v18  ;;  %v14291_v0 = vld [vmem:[#allocation7 + $0x1420] sm:$0xf0]  ;;  %v13080_v3 = vld [vmem:[#allocation7 + $0x14a8] sm:$0xf] }
 0x577   :  { %8429 = vmatmul.bf16.gmra.mxu2 %v18053_v48  ;;  %v12888_v48 = vld [vmem:[#allocation7 + $0x1328] sm:$0xf] }
 0x578   :  { %8458 = vmatmul.bf16.gmra.mxu3 %v18054_v33  ;;  %v12889_v56 = vor.u32 %v14261_v38, %v12888_v48  ;;  %v14318_v33 = vld [vmem:[#allocation7 + $0x14f8] sm:$0xf0]  ;;  %8584 = vmatpush.bf16.msra.mxu0 %v12781_v53  ;;  %v12972_v38 = vld [vmem:[#allocation7 + $0x13d0] sm:$0xf] }
 0x579   :  { %v13117_v58 = vor.u32 %v14318_v33, %v13116_v22  ;;  %v18059_v22 = vld [vmem:[#allocation79_spill] sm:$0xff] }
 0x57a   :  { %v8198_v17 = vpop.f32.mrf.mxu2  ;;  %v8142_v47 = vpop.f32.mrf.mxu0  ;;  %8612 = vmatpush.bf16.msra.mxu1 %v12889_v56 }
 0x57b   :  { %v8199_v14 = vadd.f32 %v8198_v17, %v8170_v6  ;;  %v8227_v46 = vpop.f32.mrf.mxu3  ;;  %v8143_v29 = vadd.f32 %v8142_v47, %v16588_v2  ;;  %v8171_v30 = vpop.f32.mrf.mxu1  ;;  %v18058_v6 = vld [vmem:[#allocation78_spill] sm:$0xff]  ;;  %8667 = vmatpush.bf16.msra.mxu3 %v13117_v58  ;;  %v18061_v58 = vld [vmem:[#allocation81_spill] sm:$0xff] }
 0x57c   :  { %v13104_v47 = vld [vmem:[#allocation7 + $0x14d8] sm:$0xf]  ;;  %8585 = vmatpush.bf16.msra.mxu0 %v12769_v43 }
 0x57d   :  { %v16625_v31 = vadd.f32 %v8227_v46, %v8199_v14  ;;  %v8172_v7 = vadd.f32 %v8171_v30, %v8143_v29  ;;  %v14315_v46 = vld [vmem:[#allocation7 + $0x14e0] sm:$0xf0] }
 0x582   :  { %v8200_v28 = vpop.f32.mrf.mxu2  ;;  %v8241_v2 = vpop.f32.mrf.mxu0 }
 0x583   :  { %v8201_v35 = vadd.f32 %v8200_v28, %v8172_v7  ;;  %v8229_v24 = vpop.f32.mrf.mxu3  ;;  %v8242_v37 = vadd.f32 %v8241_v2, %v16595_v60  ;;  %v8270_v39 = vpop.f32.mrf.mxu1  ;;  %v13009_v60 = vor.u32 %v14291_v0, %v13008_v13  ;;  %v13105_v7 = vor.u32 %v14315_v46, %v13104_v47  ;;  %v14258_v28 = vld [vmem:[#allocation7 + $0x1318] sm:$0xf0]  ;;  %v14309_v13 = vld [vmem:[#allocation7 + $0x14b0] sm:$0xf0]  ;;  %v14255_v46 = vld [vmem:[#allocation7 + $0x1300] sm:$0xf0] }
 0x584   :  { %v12877_v2 = vor.u32 %v14258_v28, %v12876_v27  ;;  %v13081_v48 = vor.u32 %v14309_v13, %v13080_v3  ;;  %v13056_v28 = vld [vmem:[#allocation7 + $0x1478] sm:$0xf]  ;;  %v14276_v13 = vld [vmem:[#allocation7 + $0x13a8] sm:$0xf0] }
 0x585   :  { %v16628_v57 = vadd.f32 %v8229_v24, %v8201_v35  ;;  %v8271_v5 = vadd.f32 %v8270_v39, %v8242_v37  ;;  %8472 = vmatmul.bf16.vlgmr.msrb.gmra.mxu0 %v18055_v49  ;;  %8639 = vmatpush.bf16.msra.mxu2 %v13009_v60  ;;  %v13092_v35 = vld [vmem:[#allocation7 + $0x14c0] sm:$0xf]  ;;  %v14312_v24 = vld [vmem:[#allocation7 + $0x14c8] sm:$0xf0]  ;;  %v12984_v37 = vld [vmem:[#allocation7 + $0x13e8] sm:$0xf] }
 0x586   :  { %8501 = vmatmul.bf16.vlgmr.msrb.gmra.mxu1 %v18056_v50  ;;  %8668 = vmatpush.bf16.msra.mxu3 %v13105_v7  ;;  %v14285_v39 = vld [vmem:[#allocation7 + $0x13f0] sm:$0xf0]  ;;  %v14282_v60 = vld [vmem:[#allocation7 + $0x13d8] sm:$0xf0] }
 0x587   :  { %8530 = vmatmul.bf16.vlgmr.msrb.gmra.mxu2 %v18057_v16  ;;  %8613 = vmatpush.bf16.msra.mxu1 %v12877_v2  ;;  %v12985_v49 = vor.u32 %v14285_v39, %v12984_v37  ;;  %v12973_v33 = vor.u32 %v14282_v60, %v12972_v38  ;;  %v12852_v39 = vld [vmem:[#allocation7 + $0x12e0] sm:$0xf]  ;;  %v14300_v38 = vld [vmem:[#allocation7 + $0x1468] sm:$0xf0]  ;;  %v12840_v60 = vld [vmem:[#allocation7 + $0x12c8] sm:$0xf] }
 0x588   :  { %8559 = vmatmul.bf16.vlgmr.msrb.gmra.mxu3 %v18058_v6 }
 0x589   :  { %8640 = vmatpush.bf16.msra.mxu2 %v12997_v62 }
 0x58a   :  { %v8299_v21 = vpop.f32.mrf.mxu2  ;;  %v8243_v17 = vpop.f32.mrf.mxu0 }
 0x58b   :  { %v8300_v15 = vadd.f32 %v8299_v21, %v8271_v5  ;;  %v8328_v14 = vpop.f32.mrf.mxu3  ;;  %v8244_v29 = vadd.f32 %v8243_v17, %v16598_v8  ;;  %v8272_v30 = vpop.f32.mrf.mxu1  ;;  %v13093_v8 = vor.u32 %v14312_v24, %v13092_v35  ;;  %v18060_v21 = vld [vmem:[#allocation80_spill] sm:$0xff]  ;;  %v14228_v17 = vld [vmem:[#allocation7 + $0x1228] sm:$0xf0] }
 0x58c   :  { %v14303_v35 = vld [vmem:[#allocation7 + $0x1480] sm:$0xf0] }
 0x58d   :  { %v16635_v51 = vadd.f32 %v8328_v14, %v8300_v15  ;;  %v8273_v32 = vadd.f32 %v8272_v30, %v8244_v29  ;;  %8669 = vmatpush.bf16.msra.mxu3 %v13093_v8  ;;  %8641 = vmatpush.bf16.msra.mxu2 %v12985_v49  ;;  %v12756_v15 = vld [vmem:[#allocation7 + $0x1220] sm:$0xf]  ;;  %v12864_v14 = vld [vmem:[#allocation7 + $0x12f8] sm:$0xf]  ;;  %v13068_v29 = vld [vmem:[#allocation7 + $0x1490] sm:$0xf]  ;;  %v13057_v37 = vor.u32 %v14303_v35, %v13056_v28 }
 0x58e   :  { %v12757_v47 = vor.u32 %v14228_v17, %v12756_v15  ;;  %v14306_v30 = vld [vmem:[#allocation7 + $0x1498] sm:$0xf0]  ;;  %v12865_v7 = vor.u32 %v14255_v46, %v12864_v14  ;;  %v12948_v49 = vld [vmem:[#allocation7 + $0x13a0] sm:$0xf]  ;;  %v14297_v46 = vld [vmem:[#allocation7 + $0x1450] sm:$0xf0] }
 0x58f   :  { %v13069_v34 = vor.u32 %v14306_v30, %v13068_v29 }
 0x590   :  { %8586 = vmatpush.bf16.msra.mxu0 %v12757_v47  ;;  %8614 = vmatpush.bf16.msra.mxu1 %v12865_v7  ;;  %v13032_v47 = vld [vmem:[#allocation7 + $0x1448] sm:$0xf] }
 0x591   :  { %8642 = vmatpush.bf16.msra.mxu2 %v12973_v33  ;;  %8670 = vmatpush.bf16.msra.mxu3 %v13081_v48  ;;  %v13044_v48 = vld [vmem:[#allocation7 + $0x1460] sm:$0xf] }
 0x592   :  { %v8301_v5 = vpop.f32.mrf.mxu2  ;;  %v8246_v16 = vpop.f32.mrf.mxu0 }
 0x593   :  { %v8302_v50 = vadd.f32 %v8301_v5, %v8273_v32  ;;  %v8330_v18 = vpop.f32.mrf.mxu3  ;;  %v8247_v6 = vadd.f32 %v8246_v16, %v16605_v54  ;;  %v8275_v53 = vpop.f32.mrf.mxu1  ;;  %v18062_v54 = vld [vmem:[#allocation82_spill] sm:$0xff]  ;;  %v14279_v32 = vld [vmem:[#allocation7 + $0x13c0] sm:$0xf0]  ;;  %v14252_v5 = vld [vmem:[#allocation7 + $0x12e8] sm:$0xf0] }
 0x594   :  { %v12961_v26 = vor.u32 %v14279_v32, %v12960_v23  ;;  %v12744_v16 = vld [vmem:[#allocation7 + $0x1208] sm:$0xf]  ;;  %v12853_v3 = vor.u32 %v14252_v5, %v12852_v39  ;;  %v18063_v32 = vld [vmem:[#allocation83_spill] sm:$0xff] }
 0x595   :  { %v16638_v0 = vadd.f32 %v8330_v18, %v8302_v50  ;;  %v8276_v56 = vadd.f32 %v8275_v53, %v8247_v6  ;;  %8477 = vmatmul.bf16.gmra.mxu0 %v18059_v22  ;;  %8671 = vmatpush.bf16.msra.mxu3 %v13069_v34  ;;  %v14225_v18 = vld [vmem:[#allocation7 + $0x1210] sm:$0xf0]  ;;  %v12949_v53 = vor.u32 %v14276_v13, %v12948_v49  ;;  %v12936_v22 = vld [vmem:[#allocation7 + $0x1388] sm:$0xf]  ;;  %v14366_v13 = vld [vmem:[#allocation7 + $0x1678] sm:$0xf0] }
 0x596   :  { %8506 = vmatmul.bf16.gmra.mxu1 %v18060_v21  ;;  %8643 = vmatpush.bf16.msra.mxu2 %v12961_v26  ;;  %v12745_v6 = vor.u32 %v14225_v18, %v12744_v16  ;;  %v13033_v34 = vor.u32 %v14297_v46, %v13032_v47  ;;  %v18065_v26 = vld [vmem:[#allocation85_spill] sm:$0xff]  ;;  %v14339_v16 = vld [vmem:[#allocation7 + $0x15a0] sm:$0xf0] }
 0x597   :  { %8535 = vmatmul.bf16.gmra.mxu2 %v18061_v58  ;;  %8615 = vmatpush.bf16.msra.mxu1 %v12853_v3  ;;  %v14273_v58 = vld [vmem:[#allocation7 + $0x1390] sm:$0xf0]  ;;  %v13308_v18 = vld [vmem:[#allocation7 + $0x1670] sm:$0xf]  ;;  %v14363_v46 = vld [vmem:[#allocation7 + $0x1660] sm:$0xf0] }
 0x598   :  { %8564 = vmatmul.bf16.gmra.mxu3 %v18062_v54  ;;  %8587 = vmatpush.bf16.msra.mxu0 %v12745_v6  ;;  %v12937_v54 = vor.u32 %v14273_v58, %v12936_v22  ;;  %v13309_v6 = vor.u32 %v14366_v13, %v13308_v18  ;;  %v18069_v58 = vld [vmem:[#allocation89_spill] sm:$0xff] }
 0x599   :  { %8672 = vmatpush.bf16.msra.mxu3 %v13057_v37 }
 0x59a   :  { %v8304_v25 = vpop.f32.mrf.mxu2  ;;  %v8248_v27 = vpop.f32.mrf.mxu0  ;;  %8644 = vmatpush.bf16.msra.mxu2 %v12949_v53 }
 0x59b   :  { %v8305_v62 = vadd.f32 %v8304_v25, %v8276_v56  ;;  %v8333_v43 = vpop.f32.mrf.mxu3  ;;  %v8249_v24 = vadd.f32 %v8248_v27, %v16608_v45  ;;  %v8277_v2 = vpop.f32.mrf.mxu1  ;;  %v13045_v45 = vor.u32 %v14300_v38, %v13044_v48  ;;  %v14249_v56 = vld [vmem:[#allocation7 + $0x12d0] sm:$0xf0]  ;;  %v18064_v25 = vld [vmem:[#allocation84_spill] sm:$0xff]  ;;  %v14342_v27 = vld [vmem:[#allocation7 + $0x15b8] sm:$0xf0] }
 0x59c   :  { %v12841_v21 = vor.u32 %v14249_v56, %v12840_v60 }
 0x59d   :  { %v16645_v8 = vadd.f32 %v8333_v43, %v8305_v62  ;;  %v8278_v50 = vadd.f32 %v8277_v2, %v8249_v24  ;;  %8673 = vmatpush.bf16.msra.mxu3 %v13045_v45  ;;  %v13212_v62 = vld [vmem:[#allocation7 + $0x15b0] sm:$0xf] }
 0x59e   :  { %8616 = vmatpush.bf16.msra.mxu1 %v12841_v21  ;;  %8645 = vmatpush.bf16.msra.mxu2 %v12937_v54  ;;  %v18066_v43 = vld [vmem:[#allocation86_spill] sm:$0xff]  ;;  %v13213_v28 = vor.u32 %v14342_v27, %v13212_v62  ;;  %v18068_v21 = vld [vmem:[#allocation88_spill] sm:$0xff] }
 0x59f   :  { %v18070_v54 = vld [vmem:[#allocation90_spill] sm:$0xff]  ;;  %v13176_v27 = vld [vmem:[#allocation7 + $0x1568] sm:$0xf] }
 0x5a0   :  { %8696 = vmatpush.bf16.msrb.mxu0 %v13213_v28  ;;  %v13404_v28 = vld [vmem:[#allocation7 + $0x1730] sm:$0xf] }
 0x5a1   :  { %8674 = vmatpush.bf16.msra.mxu3 %v13033_v34 }
 0x5a2   :  { %v8306_v33 = vpop.f32.mrf.mxu2  ;;  %v8251_v17 = vpop.f32.mrf.mxu0  ;;  %8725 = vmatpush.bf16.msrb.mxu1 %v13309_v6 }
 0x5a3   :  { %v8307_v15 = vadd.f32 %v8306_v33, %v8278_v50  ;;  %v8335_v14 = vpop.f32.mrf.mxu3  ;;  %v8252_v29 = vadd.f32 %v8251_v17, %v16615_v4  ;;  %v8280_v30 = vpop.f32.mrf.mxu1  ;;  %v13200_v50 = vld [vmem:[#allocation7 + $0x1598] sm:$0xf]  ;;  %v14336_v17 = vld [vmem:[#allocation7 + $0x1588] sm:$0xf0] }
 0x5a4   :  { %v13201_v3 = vor.u32 %v14339_v16, %v13200_v50  ;;  %v18067_v33 = vld [vmem:[#allocation87_spill] sm:$0xff] }
 0x5a5   :  { %v16648_v7 = vadd.f32 %v8335_v14, %v8307_v15  ;;  %v8281_v23 = vadd.f32 %v8280_v30, %v8252_v29  ;;  %8482 = vmatmul.bf16.gmra.mxu0 %v18063_v32  ;;  %v13188_v15 = vld [vmem:[#allocation7 + $0x1580] sm:$0xf]  ;;  %v13296_v14 = vld [vmem:[#allocation7 + $0x1658] sm:$0xf] }
 0x5a6   :  { %8511 = vmatmul.bf16.gmra.mxu1 %v18064_v25  ;;  %8697 = vmatpush.bf16.msrb.mxu0 %v13201_v3  ;;  %v13189_v47 = vor.u32 %v14336_v17, %v13188_v15  ;;  %v13297_v29 = vor.u32 %v14363_v46, %v13296_v14  ;;  %v14357_v15 = vld [vmem:[#allocation7 + $0x1630] sm:$0xf0]  ;;  %v13500_v14 = vld [vmem:[#allocation7 + $0x17f0] sm:$0xf] }
 0x5a7   :  { %8540 = vmatmul.bf16.gmra.mxu2 %v18065_v26 }
 0x5a8   :  { %8569 = vmatmul.bf16.gmra.mxu3 %v18066_v43  ;;  %8726 = vmatpush.bf16.msrb.mxu1 %v13297_v29  ;;  %v14333_v43 = vld [vmem:[#allocation7 + $0x1570] sm:$0xf0] }
 0x5aa   :  { %v8309_v4 = vpop.f32.mrf.mxu2  ;;  %v8253_v24 = vpop.f32.mrf.mxu0  ;;  %8698 = vmatpush.bf16.msrb.mxu0 %v13189_v47 }
 0x5ab   :  { %v8310_v35 = vadd.f32 %v8309_v4, %v8281_v23  ;;  %v8338_v2 = vpop.f32.mrf.mxu3  ;;  %v8254_v37 = vadd.f32 %v8253_v24, %v16618_v44  ;;  %v8282_v39 = vpop.f32.mrf.mxu1  ;;  %v13177_v4 = vor.u32 %v14333_v43, %v13176_v27  ;;  %v13284_v24 = vld [vmem:[#allocation7 + $0x1640] sm:$0xf] }
 0x5ac   :  { %v13380_v43 = vld [vmem:[#allocation7 + $0x1700] sm:$0xf] }
 0x5ad   :  { %v16655_v5 = vadd.f32 %v8338_v2, %v8310_v35  ;;  %v8283_v49 = vadd.f32 %v8282_v39, %v8254_v37  ;;  %v14390_v35 = vld [vmem:[#allocation7 + $0x1738] sm:$0xf0]  ;;  %v14360_v2 = vld [vmem:[#allocation7 + $0x1648] sm:$0xf0] }
 0x5ae   :  { %v13405_v37 = vor.u32 %v14390_v35, %v13404_v28  ;;  %v13285_v39 = vor.u32 %v14360_v2, %v13284_v24  ;;  %8699 = vmatpush.bf16.msrb.mxu0 %v13177_v4  ;;  %v14384_v28 = vld [vmem:[#allocation7 + $0x1708] sm:$0xf0]  ;;  %v13152_v35 = vld [vmem:[#allocation7 + $0x1538] sm:$0xf]  ;;  %v14327_v24 = vld [vmem:[#allocation7 + $0x1540] sm:$0xf0] }
 0x5af   :  { %v13381_v2 = vor.u32 %v14384_v28, %v13380_v43  ;;  %v13344_v28 = vld [vmem:[#allocation7 + $0x16b8] sm:$0xf] }
 0x5b0   :  { %8754 = vmatpush.bf16.msrb.mxu2 %v13405_v37  ;;  %8727 = vmatpush.bf16.msrb.mxu1 %v13285_v39  ;;  %v13260_v37 = vld [vmem:[#allocation7 + $0x1610] sm:$0xf]  ;;  %v13153_v39 = vor.u32 %v14327_v24, %v13152_v35 }
 0x5b2   :  { %v8311_v53 = vpop.f32.mrf.mxu2  ;;  %v8256_v38 = vpop.f32.mrf.mxu0 }
 0x5b3   :  { %v8312_v48 = vadd.f32 %v8311_v53, %v8283_v49  ;;  %v8340_v45 = vpop.f32.mrf.mxu3  ;;  %v8257_v60 = vadd.f32 %v8256_v38, %v16625_v31  ;;  %v8285_v56 = vpop.f32.mrf.mxu1  ;;  %v18071_v53 = vld [vmem:[#allocation91_spill] sm:$0xff]  ;;  %v18073_v38 = vld [vmem:[#allocation93_spill] sm:$0xff] }
 0x5b5   :  { %v16658_v44 = vadd.f32 %v8340_v45, %v8312_v48  ;;  %v8286_v22 = vadd.f32 %v8285_v56, %v8257_v60  ;;  %8487 = vmatmul.bf16.gmra.mxu0 %v18067_v33  ;;  %v18072_v48 = vld [vmem:[#allocation92_spill] sm:$0xff]  ;;  %v13164_v45 = vld [vmem:[#allocation7 + $0x1550] sm:$0xf]  ;;  %v14330_v60 = vld [vmem:[#allocation7 + $0x1558] sm:$0xf0] }
 0x5b6   :  { %8516 = vmatmul.bf16.gmra.mxu1 %v18068_v21  ;;  %v13392_v56 = vld [vmem:[#allocation7 + $0x1718] sm:$0xf]  ;;  %v13165_v33 = vor.u32 %v14330_v60, %v13164_v45  ;;  %v14387_v21 = vld [vmem:[#allocation7 + $0x1720] sm:$0xf0]  ;;  %v13464_v60 = vld [vmem:[#allocation7 + $0x17a8] sm:$0xf] }
 0x5b7   :  { %8545 = vmatmul.bf16.gmra.mxu2 %v18069_v58  ;;  %v13272_v58 = vld [vmem:[#allocation7 + $0x1628] sm:$0xf] }
 0x5b8   :  { %8574 = vmatmul.bf16.gmra.mxu3 %v18070_v54  ;;  %v13273_v17 = vor.u32 %v14357_v15, %v13272_v58  ;;  %v14414_v54 = vld [vmem:[#allocation7 + $0x17f8] sm:$0xf0]  ;;  %8700 = vmatpush.bf16.msrb.mxu0 %v13165_v33  ;;  %v13356_v15 = vld [vmem:[#allocation7 + $0x16d0] sm:$0xf] }
 0x5b9   :  { %v13501_v46 = vor.u32 %v14414_v54, %v13500_v14  ;;  %v18075_v14 = vld [vmem:[#allocation95_spill] sm:$0xff] }
 0x5ba   :  { %v8314_v30 = vpop.f32.mrf.mxu2  ;;  %v8258_v34 = vpop.f32.mrf.mxu0  ;;  %8728 = vmatpush.bf16.msrb.mxu1 %v13273_v17 }
 0x5bb   :  { %v8315_v31 = vadd.f32 %v8314_v30, %v8286_v22  ;;  %v8343_v23 = vpop.f32.mrf.mxu3  ;;  %v8259_v32 = vadd.f32 %v8258_v34, %v16628_v57  ;;  %v8287_v25 = vpop.f32.mrf.mxu1  ;;  %v18074_v22 = vld [vmem:[#allocation94_spill] sm:$0xff]  ;;  %8783 = vmatpush.bf16.msrb.mxu3 %v13501_v46  ;;  %v18077_v46 = vld [vmem:[#allocation97_spill] sm:$0xff] }
 0x5bc   :  { %v13488_v34 = vld [vmem:[#allocation7 + $0x17d8] sm:$0xf]  ;;  %8701 = vmatpush.bf16.msrb.mxu0 %v13153_v39 }
 0x5bd   :  { %v16665_v26 = vadd.f32 %v8343_v23, %v8315_v31  ;;  %v8288_v62 = vadd.f32 %v8287_v25, %v8259_v32  ;;  %v14411_v23 = vld [vmem:[#allocation7 + $0x17e0] sm:$0xf0] }
 0x5c2   :  { %v8316_v49 = vpop.f32.mrf.mxu2  ;;  %v8357_v57 = vpop.f32.mrf.mxu0 }
 0x5c3   :  { %v8317_v50 = vadd.f32 %v8316_v49, %v8288_v62  ;;  %v8345_v16 = vpop.f32.mrf.mxu3  ;;  %v8358_v18 = vadd.f32 %v8357_v57, %v16635_v51  ;;  %v8386_v3 = vpop.f32.mrf.mxu1  ;;  %v13393_v51 = vor.u32 %v14387_v21, %v13392_v56  ;;  %v13489_v62 = vor.u32 %v14411_v23, %v13488_v34  ;;  %v14354_v49 = vld [vmem:[#allocation7 + $0x1618] sm:$0xf0]  ;;  %v14405_v56 = vld [vmem:[#allocation7 + $0x17b0] sm:$0xf0]  ;;  %v14351_v23 = vld [vmem:[#allocation7 + $0x1600] sm:$0xf0] }
 0x5c4   :  { %v13261_v57 = vor.u32 %v14354_v49, %v13260_v37  ;;  %v13465_v58 = vor.u32 %v14405_v56, %v13464_v60  ;;  %v13440_v49 = vld [vmem:[#allocation7 + $0x1778] sm:$0xf]  ;;  %v14372_v56 = vld [vmem:[#allocation7 + $0x16a8] sm:$0xf0] }
 0x5c5   :  { %v16668_v13 = vadd.f32 %v8345_v16, %v8317_v50  ;;  %v8387_v6 = vadd.f32 %v8386_v3, %v8358_v18  ;;  %8588 = vmatmul.bf16.vlgmr.msra.gmra.mxu0 %v18071_v53  ;;  %8755 = vmatpush.bf16.msrb.mxu2 %v13393_v51  ;;  %v13476_v50 = vld [vmem:[#allocation7 + $0x17c0] sm:$0xf]  ;;  %v14408_v16 = vld [vmem:[#allocation7 + $0x17c8] sm:$0xf0]  ;;  %v13368_v18 = vld [vmem:[#allocation7 + $0x16e8] sm:$0xf] }
 0x5c6   :  { %8617 = vmatmul.bf16.vlgmr.msra.gmra.mxu1 %v18072_v48  ;;  %8784 = vmatpush.bf16.msrb.mxu3 %v13489_v62  ;;  %v14381_v3 = vld [vmem:[#allocation7 + $0x16f0] sm:$0xf0]  ;;  %v14378_v51 = vld [vmem:[#allocation7 + $0x16d8] sm:$0xf0] }
 0x5c7   :  { %8646 = vmatmul.bf16.vlgmr.msra.gmra.mxu2 %v18073_v38  ;;  %8729 = vmatpush.bf16.msrb.mxu1 %v13261_v57  ;;  %v13369_v53 = vor.u32 %v14381_v3, %v13368_v18  ;;  %v13357_v54 = vor.u32 %v14378_v51, %v13356_v15  ;;  %v13236_v3 = vld [vmem:[#allocation7 + $0x15e0] sm:$0xf]  ;;  %v14396_v15 = vld [vmem:[#allocation7 + $0x1768] sm:$0xf0]  ;;  %v13224_v51 = vld [vmem:[#allocation7 + $0x15c8] sm:$0xf] }
 0x5c8   :  { %8675 = vmatmul.bf16.vlgmr.msra.gmra.mxu3 %v18074_v22 }
 0x5c9   :  { %8756 = vmatpush.bf16.msrb.mxu2 %v13381_v2 }
 0x5ca   :  { %v8415_v47 = vpop.f32.mrf.mxu2  ;;  %v8359_v30 = vpop.f32.mrf.mxu0 }
 0x5cb   :  { %v8416_v29 = vadd.f32 %v8415_v47, %v8387_v6  ;;  %v8444_v31 = vpop.f32.mrf.mxu3  ;;  %v8360_v32 = vadd.f32 %v8359_v30, %v16638_v0  ;;  %v8388_v25 = vpop.f32.mrf.mxu1  ;;  %v13477_v0 = vor.u32 %v14408_v16, %v13476_v50  ;;  %v18076_v47 = vld [vmem:[#allocation96_spill] sm:$0xff]  ;;  %v14324_v30 = vld [vmem:[#allocation7 + $0x1528] sm:$0xf0] }
 0x5cc   :  { %v14399_v50 = vld [vmem:[#allocation7 + $0x1780] sm:$0xf0] }
 0x5cd   :  { %v16675_v27 = vadd.f32 %v8444_v31, %v8416_v29  ;;  %v8389_v4 = vadd.f32 %v8388_v25, %v8360_v32  ;;  %8785 = vmatpush.bf16.msrb.mxu3 %v13477_v0  ;;  %8757 = vmatpush.bf16.msrb.mxu2 %v13369_v53  ;;  %v13140_v29 = vld [vmem:[#allocation7 + $0x1520] sm:$0xf]  ;;  %v13248_v31 = vld [vmem:[#allocation7 + $0x15f8] sm:$0xf]  ;;  %v13452_v32 = vld [vmem:[#allocation7 + $0x1790] sm:$0xf]  ;;  %v13441_v18 = vor.u32 %v14399_v50, %v13440_v49 }
 0x5ce   :  { %v13141_v34 = vor.u32 %v14324_v30, %v13140_v29  ;;  %v14402_v25 = vld [vmem:[#allocation7 + $0x1798] sm:$0xf0]  ;;  %v13249_v62 = vor.u32 %v14351_v23, %v13248_v31  ;;  %v13332_v53 = vld [vmem:[#allocation7 + $0x16a0] sm:$0xf]  ;;  %v14393_v23 = vld [vmem:[#allocation7 + $0x1750] sm:$0xf0] }
 0x5cf   :  { %v13453_v43 = vor.u32 %v14402_v25, %v13452_v32 }
 0x5d0   :  { %8702 = vmatpush.bf16.msrb.mxu0 %v13141_v34  ;;  %8730 = vmatpush.bf16.msrb.mxu1 %v13249_v62  ;;  %v13416_v34 = vld [vmem:[#allocation7 + $0x1748] sm:$0xf] }
 0x5d1   :  { %8758 = vmatpush.bf16.msrb.mxu2 %v13357_v54  ;;  %8786 = vmatpush.bf16.msrb.mxu3 %v13465_v58  ;;  %v13428_v58 = vld [vmem:[#allocation7 + $0x1760] sm:$0xf] }
 0x5d2   :  { %v8417_v6 = vpop.f32.mrf.mxu2  ;;  %v8362_v38 = vpop.f32.mrf.mxu0 }
 0x5d3   :  { %v8418_v48 = vadd.f32 %v8417_v6, %v8389_v4  ;;  %v8446_v45 = vpop.f32.mrf.mxu3  ;;  %v8363_v22 = vadd.f32 %v8362_v38, %v16645_v8  ;;  %v8391_v33 = vpop.f32.mrf.mxu1  ;;  %v18078_v8 = vld [vmem:[#allocation98_spill] sm:$0xff]  ;;  %v14375_v4 = vld [vmem:[#allocation7 + $0x16c0] sm:$0xf0]  ;;  %v14348_v6 = vld [vmem:[#allocation7 + $0x15e8] sm:$0xf0] }
 0x5d4   :  { %v13345_v24 = vor.u32 %v14375_v4, %v13344_v28  ;;  %v13128_v38 = vld [vmem:[#allocation7 + $0x1508] sm:$0xf]  ;;  %v13237_v60 = vor.u32 %v14348_v6, %v13236_v3  ;;  %v18079_v4 = vld [vmem:[#allocation99_spill] sm:$0xff] }
 0x5d5   :  { %v16678_v21 = vadd.f32 %v8446_v45, %v8418_v48  ;;  %v8392_v17 = vadd.f32 %v8391_v33, %v8363_v22  ;;  %8593 = vmatmul.bf16.gmra.mxu0 %v18075_v14  ;;  %8787 = vmatpush.bf16.msrb.mxu3 %v13453_v43  ;;  %v14321_v45 = vld [vmem:[#allocation7 + $0x1510] sm:$0xf0]  ;;  %v13333_v33 = vor.u32 %v14372_v56, %v13332_v53  ;;  %v13320_v14 = vld [vmem:[#allocation7 + $0x1688] sm:$0xf]  ;;  %v16705_v53 = vld [vmem:[#allocation11 + $0x138] sm:$0xff] }
 0x5d6   :  { %8622 = vmatmul.bf16.gmra.mxu1 %v18076_v47  ;;  %8759 = vmatpush.bf16.msrb.mxu2 %v13345_v24  ;;  %v13129_v22 = vor.u32 %v14321_v45, %v13128_v38  ;;  %v13417_v43 = vor.u32 %v14393_v23, %v13416_v34  ;;  %v18081_v24 = vld [vmem:[#allocation101_spill] sm:$0xff] }
 0x5d7   :  { %8651 = vmatmul.bf16.gmra.mxu2 %v18077_v46  ;;  %8731 = vmatpush.bf16.msrb.mxu1 %v13237_v60  ;;  %v14369_v46 = vld [vmem:[#allocation7 + $0x1690] sm:$0xf0]  ;;  %v16712_v56 = vld [vmem:[#allocation11 + $0x120] sm:$0xff] }
 0x5d8   :  { %8680 = vmatmul.bf16.gmra.mxu3 %v18078_v8  ;;  %8703 = vmatpush.bf16.msrb.mxu0 %v13129_v22  ;;  %v13321_v8 = vor.u32 %v14369_v46, %v13320_v14  ;;  %v18089_v14 = vld [vmem:[#allocation105_spill] sm:$0xff] }
 0x5d9   :  { %8788 = vmatpush.bf16.msrb.mxu3 %v13441_v18 }
 0x5da   :  { %v8420_v35 = vpop.f32.mrf.mxu2  ;;  %v8364_v37 = vpop.f32.mrf.mxu0  ;;  %8760 = vmatpush.bf16.msrb.mxu2 %v13333_v33 }
 0x5db   :  { %v8421_v2 = vadd.f32 %v8420_v35, %v8392_v17  ;;  %v8449_v39 = vpop.f32.mrf.mxu3  ;;  %v8365_v16 = vadd.f32 %v8364_v37, %v16648_v7  ;;  %v8393_v57 = vpop.f32.mrf.mxu1  ;;  %v13429_v7 = vor.u32 %v14396_v15, %v13428_v58  ;;  %v14345_v17 = vld [vmem:[#allocation7 + $0x15d0] sm:$0xf0]  ;;  %v18080_v35 = vld [vmem:[#allocation100_spill] sm:$0xff] }
 0x5dc   :  { %v13225_v47 = vor.u32 %v14345_v17, %v13224_v51  ;;  %v18082_v37 = vld [vmem:[#allocation102_spill] sm:$0xff]  ;;  %v16720_v51 = vld [vmem:[#allocation11 + $0x158] sm:$0xff] }
 0x5dd   :  { %v16685_v0 = vadd.f32 %v8449_v39, %v8421_v2  ;;  %v8394_v48 = vadd.f32 %v8393_v57, %v8365_v16  ;;  %8789 = vmatpush.bf16.msrb.mxu3 %v13429_v7  ;;  %v16693_v2 = vld [vmem:[#allocation11 + $0x168] sm:$0xff]  ;;  %v16698_v16 = vld [vmem:[#allocation11 + $0x150] sm:$0xff]  ;;  %18087 = vst [vmem:[#allocation28_spill] sm:$0xff] %v16720_v51  ;;  %v18088_v17 = vld [vmem:[#allocation104_spill] sm:$0xff] }
 0x5de   :  { %8732 = vmatpush.bf16.msrb.mxu1 %v13225_v47  ;;  %8761 = vmatpush.bf16.msrb.mxu2 %v13321_v8  ;;  %v18086_v7 = vld [vmem:[#allocation103_spill] sm:$0xff]  ;;  %v16726_v47 = vld [vmem:[#allocation11 + $0x140] sm:$0xff] }
 0x5df   :  { %8899 = vmatpush.msra.mxu0 %v16693_v2  ;;  %v16733_v8 = vld [vmem:[#allocation11 + $0xf0] sm:$0xff] }
 0x5e1   :  { %8790 = vmatpush.bf16.msrb.mxu3 %v13417_v43  ;;  %8900 = vmatpush.msra.mxu0 %v16698_v16  ;;  %v16740_v43 = vld [vmem:[#allocation11 + $0x128] sm:$0xff] }
 0x5e2   :  { %v8422_v54 = vpop.f32.mrf.mxu2  ;;  %v8367_v30 = vpop.f32.mrf.mxu0  ;;  %18091 = vst [vmem:[#allocation29_spill] sm:$0xff] %v16740_v43 }
 0x5e3   :  { %v8423_v29 = vadd.f32 %v8422_v54, %v8394_v48  ;;  %v8451_v31 = vpop.f32.mrf.mxu3  ;;  %v8368_v32 = vadd.f32 %v8367_v30, %v16655_v5  ;;  %v8396_v25 = vpop.f32.mrf.mxu1  ;;  %v16707_v48 = vld [vmem:[#allocation11 + $0x170] sm:$0xff]  ;;  %8901 = vmatpush.msra.mxu0 %v16705_v53  ;;  %v16724_v54 = vld [vmem:[#allocation11 + $0x108] sm:$0xff] }
 0x5e4   :  { %18084 = vst [vmem:[#allocation26_spill] sm:$0xff] %v16707_v48  ;;  %8919 = vmatpush.msra.mxu1 %v16707_v48 }
 0x5e5   :  { %v16688_v62 = vadd.f32 %v8451_v31, %v8423_v29  ;;  %v8397_v28 = vadd.f32 %v8396_v25, %v8368_v32  ;;  %8598 = vmatmul.bf16.gmra.mxu0 %v18079_v4  ;;  %9018 = vmatpush.msra.mxu3 %v16693_v2  ;;  %v16744_v4 = vld [vmem:[#allocation11 + $0x178] sm:$0xff] }
 0x5e6   :  { %8627 = vmatmul.bf16.gmra.mxu1 %v18080_v35  ;;  %8902 = vmatpush.msra.mxu0 %v16712_v56  ;;  %v16748_v35 = vld [vmem:[#allocation11 + $0x110] sm:$0xff] }
 0x5e7   :  { %8656 = vmatmul.bf16.gmra.mxu2 %v18081_v24  ;;  %9019 = vmatpush.msra.mxu3 %v16698_v16 }
 0x5e8   :  { %8685 = vmatmul.bf16.gmra.mxu3 %v18082_v37  ;;  %8920 = vmatpush.msra.mxu1 %v16720_v51 }
 0x5e9   :  { %9020 = vmatpush.msra.mxu3 %v16705_v53  ;;  %8903 = vmatpush.msra.mxu0 %v16724_v54 }
 0x5ea   :  { %v8425_v5 = vpop.f32.mrf.mxu2  ;;  %v8369_v49 = vpop.f32.mrf.mxu0  ;;  %8921 = vmatpush.msra.mxu1 %v16726_v47  ;;  %8939 = vmatpush.msra.mxu2 %v16744_v4 }
 0x5eb   :  { %v8426_v39 = vadd.f32 %v8425_v5, %v8397_v28  ;;  %v8454_v50 = vpop.f32.mrf.mxu3  ;;  %v8370_v57 = vadd.f32 %v8369_v49, %v16658_v44  ;;  %v8398_v18 = vpop.f32.mrf.mxu1  ;;  %9021 = vmatpush.msra.mxu3 %v16712_v56  ;;  %8904 = vmatpush.msra.mxu0 %v16733_v8  ;;  %v16742_v28 = vld [vmem:[#allocation11 + $0xd8] sm:$0xff]  ;;  %v16755_v49 = vld [vmem:[#allocation11 + $0x160] sm:$0xff] }
 0x5ec   :  { %8922 = vmatpush.msra.mxu1 %v16740_v43  ;;  %8940 = vmatpush.msra.mxu2 %v16755_v49 }
 0x5ed   :  { %v16703_v3 = vadd.f32 %v8454_v50, %v8426_v39  ;;  %v8399_v6 = vadd.f32 %v8398_v18, %v8370_v57  ;;  %9022 = vmatpush.msra.mxu3 %v16724_v54  ;;  %8905 = vmatpush.msra.mxu0 %v16742_v28  ;;  %v16753_v39 = vld [vmem:[#allocation11 + $0xc0] sm:$0xff] }
 0x5ee   :  { %8923 = vmatpush.msra.mxu1 %v16748_v35 }
 0x5ef   :  { %18083 = vst [vmem:[#allocation25_spill] sm:$0xff] %v16703_v3  ;;  %9023 = vmatpush.msra.mxu3 %v16733_v8  ;;  %8906 = vmatpush.msra.mxu0 %v16753_v39 }
 0x5f1   :  { %9024 = vmatpush.msra.mxu3 %v16742_v28 }
 0x5f2   :  { %v8427_v38 = vpop.f32.mrf.mxu2  ;;  %v8372_v45 = vpop.f32.mrf.mxu0 }
 0x5f3   :  { %v8428_v44 = vadd.f32 %v8427_v38, %v8399_v6  ;;  %v8456_v60 = vpop.f32.mrf.mxu3  ;;  %v8373_v22 = vadd.f32 %v8372_v45, %v16665_v26  ;;  %v8401_v33 = vpop.f32.mrf.mxu1  ;;  %v18090_v26 = vld [vmem:[#allocation106_spill] sm:$0xff]  ;;  %9025 = vmatpush.msra.mxu3 %v16753_v39  ;;  %v18092_v6 = vld [vmem:[#allocation107_spill] sm:$0xff]  ;;  %v18094_v45 = vld [vmem:[#allocation109_spill] sm:$0xff] }
 0x5f4   :  { %v16764_v38 = vld [vmem:[#allocation11 + $0xf8] sm:$0xff] }
 0x5f5   :  { %v16717_v58 = vadd.f32 %v8456_v60, %v8428_v44  ;;  %v8402_v15 = vadd.f32 %v8401_v33, %v8373_v22  ;;  %8603 = vmatmul.bf16.gmra.mxu0 %v18086_v7  ;;  %v18093_v44 = vld [vmem:[#allocation108_spill] sm:$0xff]  ;;  %v16768_v60 = vld [vmem:[#allocation11 + $0xa8] sm:$0xff]  ;;  %8924 = vmatpush.msra.mxu1 %v16764_v38 }
 0x5f6   :  { %8632 = vmatmul.bf16.gmra.mxu1 %v18088_v17  ;;  %v16770_v22 = vld [vmem:[#allocation11 + $0x148] sm:$0xff]  ;;  %v16772_v33 = vld [vmem:[#allocation11 + $0xe0] sm:$0xff]  ;;  %8907 = vmatpush.msra.mxu0 %v16768_v60 }
 0x5f7   :  { %18085 = vst [vmem:[#allocation27_spill] sm:$0xff] %v16717_v58  ;;  %8661 = vmatmul.bf16.gmra.mxu2 %v18089_v14  ;;  %8925 = vmatpush.msra.mxu1 %v16772_v33  ;;  %v16868_v58 = vld [vmem:[#allocation11 + $0x38] sm:$0xff] }
 0x5f8   :  { %8690 = vmatmul.bf16.gmra.mxu3 %v18090_v26  ;;  %8941 = vmatpush.msra.mxu2 %v16770_v22 }
 0x5f9   :  { %9026 = vmatpush.msra.mxu3 %v16768_v60 }
 0x5fa   :  { %v8430_v46 = vpop.f32.mrf.mxu2  ;;  %v8374_v30 = vpop.f32.mrf.mxu0 }
 0x5fb   :  { %v8431_v29 = vadd.f32 %v8430_v46, %v8402_v15  ;;  %v8459_v31 = vpop.f32.mrf.mxu3  ;;  %v8375_v34 = vadd.f32 %v8374_v30, %v16668_v13  ;;  %v8403_v23 = vpop.f32.mrf.mxu1  ;;  %v18095_v15 = vld [vmem:[#allocation110_spill] sm:$0xff] }
 0x5fc   :  { %v16786_v46 = vld [vmem:[#allocation11 + $0x90] sm:$0xff] }
 0x5fd   :  { %v16738_v32 = vadd.f32 %v8459_v31, %v8431_v29  ;;  %v8404_v25 = vadd.f32 %v8403_v23, %v8375_v34  ;;  %v16788_v29 = vld [vmem:[#allocation11 + $0x130] sm:$0xff]  ;;  %8908 = vmatpush.msra.mxu0 %v16786_v46  ;;  %9027 = vmatpush.msra.mxu3 %v16786_v46  ;;  %v16795_v31 = vld [vmem:[#allocation11 + $0xc8] sm:$0xff]  ;;  %v16797_v34 = vld [vmem:[#allocation11 + $0x78] sm:$0xff] }
 0x5fe   :  { %8942 = vmatpush.msra.mxu2 %v16788_v29  ;;  %18096 = vst [vmem:[#allocation30_spill] sm:$0xff] %v16797_v34  ;;  %v16799_v23 = vld [vmem:[#allocation11 + $0x118] sm:$0xff]  ;;  %8926 = vmatpush.msra.mxu1 %v16795_v31 }
 0x5ff   :  { %8909 = vmatpush.msra.mxu0 %v16797_v34  ;;  %9028 = vmatpush.msra.mxu3 %v16797_v34  ;;  %v16881_v34 = vld [vmem:[#allocation11 + $0x20] sm:$0xff] }
 0x600   :  { %8943 = vmatpush.msra.mxu2 %v16799_v23  ;;  %18109 = vst [vmem:[#allocation39_spill] sm:$0xff] %v16881_v34 }
 0x602   :  { %v8432_v13 = vpop.f32.mrf.mxu2  ;;  %v8473_v5 = vpop.f32.mrf.mxu0 }
 0x603   :  { %v8433_v24 = vadd.f32 %v8432_v13, %v8404_v25  ;;  %v8461_v37 = vpop.f32.mrf.mxu3  ;;  %v8502_v50 = vpop.f32.mrf.mxu1  ;;  %v8474_v18 = vadd.f32 %v8473_v5, %v16675_v27  ;;  %v16803_v25 = vld [vmem:[#allocation11 + $0xb0] sm:$0xff]  ;;  %v16814_v5 = vld [vmem:[#allocation11 + $0x60] sm:$0xff] }
 0x604   :  { %8927 = vmatpush.msra.mxu1 %v16803_v25  ;;  %18097 = vst [vmem:[#allocation31_spill] sm:$0xff] %v16814_v5  ;;  %8910 = vmatpush.msra.mxu0 %v16814_v5 }
 0x605   :  { %v16759_v57 = vadd.f32 %v8461_v37, %v8433_v24  ;;  %8704 = vmatmul.bf16.vlgmr.msrb.gmra.mxu0 %v18092_v6  ;;  %v8503_v27 = vadd.f32 %v8502_v50, %v8474_v18  ;;  %v16816_v50 = vld [vmem:[#allocation11 + $0x100] sm:$0xff]  ;;  %9029 = vmatpush.msra.mxu3 %v16814_v5  ;;  %v18098_v6 = vld [vmem:[#allocation111_spill] sm:$0xff] }
 0x606   :  { %8733 = vmatmul.bf16.vlgmr.msrb.gmra.mxu1 %v18093_v44  ;;  %8944 = vmatpush.msra.mxu2 %v16816_v50  ;;  %v16824_v44 = vld [vmem:[#allocation11 + $0x98] sm:$0xff]  ;;  %v16877_v5 = vld [vmem:[#allocation11] sm:$0xff] }
 0x607   :  { %8762 = vmatmul.bf16.vlgmr.msrb.gmra.mxu2 %v18094_v45  ;;  %v18099_v45 = vld [vmem:[#allocation112_spill] sm:$0xff]  ;;  %8928 = vmatpush.msra.mxu1 %v16824_v44  ;;  %18108 = vst [vmem:[#allocation38_spill] sm:$0xff] %v16877_v5 }
 0x608   :  { %8791 = vmatmul.bf16.vlgmr.msrb.gmra.mxu3 %v18095_v15  ;;  %v18100_v15 = vld [vmem:[#allocation113_spill] sm:$0xff] }
 0x609   :  { %8929 = vmatpush.msra.mxu1 %v16832_v9 }
 0x60a   :  { %v8531_v7 = vpop.f32.mrf.mxu2  ;;  %v16782_v14 = vpop.f32.mrf.mxu0 }
 0x60b   :  { %v16780_v17 = vadd.f32 %v8531_v7, %v8503_v27  ;;  %v16784_v26 = vpop.f32.mrf.mxu3  ;;  %v16790_v30 = vpop.f32.mrf.mxu1  ;;  %v16828_v27 = vld [vmem:[#allocation11 + $0x48] sm:$0xff]  ;;  %8930 = vmatpush.msra.mxu1 %v16854_v52 }
 0x60c   :  { %18101 = vst [vmem:[#allocation32_spill] sm:$0xff] %v16828_v27  ;;  %v16830_v7 = vld [vmem:[#allocation11 + $0xe8] sm:$0xff]  ;;  %8911 = vmatpush.msra.mxu0 %v16828_v27  ;;  %9030 = vmatpush.msra.mxu3 %v16828_v27 }
 0x60d   :  { %8945 = vmatpush.msra.mxu2 %v16830_v7  ;;  %8931 = vmatpush.msra.mxu1 %v16862_v42 }
 0x60e   :  { %8912 = vmatpush.msra.mxu0 %v16846_v59  ;;  %9031 = vmatpush.msra.mxu3 %v16846_v59 }
 0x60f   :  { %8946 = vmatpush.msra.mxu2 %v16848_v36  ;;  %8932 = vmatpush.msra.mxu1 %v16868_v58 }
 0x610   :  { %8913 = vmatpush.msra.mxu0 %v16858_v41  ;;  %9032 = vmatpush.msra.mxu3 %v16858_v41  ;;  %v16888_v41 = vld [vmem:[#allocation11 + $0x8] sm:$0xff] }
 0x611   :  { %8947 = vmatpush.msra.mxu2 %v16860_v19  ;;  %8933 = vmatpush.msra.mxu1 %v16881_v34  ;;  %18111 = vst [vmem:[#allocation41_spill] sm:$0xff] %v16888_v41 }
 0x612   :  { %v16808_v13 = vpop.f32.mrf.mxu2  ;;  %v16810_v24 = vpop.f32.mrf.mxu0  ;;  %8914 = vmatpush.msra.mxu0 %v16877_v5  ;;  %9033 = vmatpush.msra.mxu3 %v16877_v5 }
 0x613   :  { %v16812_v37 = vpop.f32.mrf.mxu3  ;;  %v16818_v18 = vpop.f32.mrf.mxu1  ;;  %8934 = vmatpush.msra.mxu1 %v16888_v41 }
 0x614   :  { %9038 = vmatpush.msrb.mxu0 %v16707_v48  ;;  %9157 = vmatpush.msrb.mxu3 %v16707_v48 }
 0x615   :  { %8709 = vmatmul.bf16.gmra.mxu0 %v18098_v6  ;;  %9058 = vmatpush.msrb.mxu1 %v16744_v4 }
 0x616   :  { %8738 = vmatmul.bf16.gmra.mxu1 %v18099_v45  ;;  %9039 = vmatpush.msrb.mxu0 %v16720_v51 }
 0x617   :  { %8767 = vmatmul.bf16.gmra.mxu2 %v18100_v15  ;;  %9059 = vmatpush.msrb.mxu1 %v16755_v49 }
 0x618   :  { %8796 = vmatmul.bf16.gmra.mxu3 %v18102_v40  ;;  %9040 = vmatpush.msrb.mxu0 %v16726_v47 }
 0x619   :  { %9060 = vmatpush.msrb.mxu1 %v16770_v22  ;;  %9158 = vmatpush.msrb.mxu3 %v16720_v51 }
 0x61a   :  { %v16838_v6 = vpop.f32.mrf.mxu2  ;;  %v16842_v45 = vpop.f32.mrf.mxu0  ;;  %9041 = vmatpush.msrb.mxu0 %v16740_v43 }
 0x61b   :  { %v16844_v15 = vpop.f32.mrf.mxu3  ;;  %v16850_v40 = vpop.f32.mrf.mxu1  ;;  %9061 = vmatpush.msrb.mxu1 %v16788_v29  ;;  %9159 = vmatpush.msrb.mxu3 %v16726_v47 }
 0x61c   :  { %18103 = vst [vmem:[#allocation33_spill] sm:$0xff] %v16844_v15  ;;  %9042 = vmatpush.msrb.mxu0 %v16748_v35 }
 0x61d   :  { %18105 = vst [vmem:[#allocation35_spill] sm:$0xff] %v16850_v40  ;;  %v16879_v40 = vld [vmem:[#allocation11 + $0xa0] sm:$0xff]  ;;  %9062 = vmatpush.msrb.mxu1 %v16799_v23  ;;  %9160 = vmatpush.msrb.mxu3 %v16740_v43  ;;  %v16941_v43 = vld [vmem:[#allocation11 + $0x28] sm:$0xff] }
 0x61e   :  { %8948 = vmatpush.msra.mxu2 %v16879_v40  ;;  %9043 = vmatpush.msrb.mxu0 %v16764_v38 }
 0x61f   :  { %9063 = vmatpush.msrb.mxu1 %v16816_v50  ;;  %9161 = vmatpush.msrb.mxu3 %v16748_v35 }
 0x620   :  { %9044 = vmatpush.msrb.mxu0 %v16772_v33 }
 0x621   :  { %9064 = vmatpush.msrb.mxu1 %v16830_v7  ;;  %9162 = vmatpush.msrb.mxu3 %v16764_v38 }
 0x622   :  { %v16870_v3 = vpop.f32.mrf.mxu2  ;;  %v16873_v59 = vpop.f32.mrf.mxu0  ;;  %9045 = vmatpush.msrb.mxu0 %v16795_v31 }
 0x623   :  { %v16875_v27 = vpop.f32.mrf.mxu3  ;;  %v16883_v15 = vpop.f32.mrf.mxu1  ;;  %9065 = vmatpush.msrb.mxu1 %v16848_v36  ;;  %9163 = vmatpush.msrb.mxu3 %v16772_v33 }
 0x624   :  { %18107 = vst [vmem:[#allocation37_spill] sm:$0xff] %v16875_v27  ;;  %v16895_v27 = vld [vmem:[#allocation11 + $0x88] sm:$0xff]  ;;  %9046 = vmatpush.msrb.mxu0 %v16803_v25 }
 0x625   :  { %18110 = vst [vmem:[#allocation40_spill] sm:$0xff] %v16883_v15  ;;  %8714 = vmatmul.bf16.gmra.mxu0 %v16043_v55  ;;  %8949 = vmatpush.msra.mxu2 %v16895_v27 }
 0x626   :  { %8743 = vmatmul.bf16.gmra.mxu1 %v16045_v1  ;;  %9047 = vmatpush.msrb.mxu0 %v16824_v44 }
 0x627   :  { %8772 = vmatmul.bf16.gmra.mxu2 %v16047_v12  ;;  %v16909_v12 = vld [vmem:[#allocation11 + $0x70] sm:$0xff]  ;;  %9066 = vmatpush.msrb.mxu1 %v16860_v19 }
 0x628   :  { %8801 = vmatmul.bf16.gmra.mxu3 %v16050_v63  ;;  %8950 = vmatpush.msra.mxu2 %v16909_v12 }
 0x629   :  { %9067 = vmatpush.msrb.mxu1 %v16879_v40  ;;  %9164 = vmatpush.msrb.mxu3 %v16795_v31 }
 0x62a   :  { %v16901_v15 = vpop.f32.mrf.mxu2  ;;  %v16905_v55 = vpop.f32.mrf.mxu0  ;;  %9048 = vmatpush.msrb.mxu0 %v16832_v9 }
 0x62b   :  { %18112 = vst [vmem:[#allocation42_spill] sm:$0xff] %v16901_v15  ;;  %v16907_v1 = vpop.f32.mrf.mxu3  ;;  %v16912_v63 = vpop.f32.mrf.mxu1  ;;  %v16918_v15 = vld [vmem:[#allocation11 + $0x58] sm:$0xff]  ;;  %9068 = vmatpush.msrb.mxu1 %v16895_v27  ;;  %9165 = vmatpush.msrb.mxu3 %v16803_v25 }
 0x62c   :  { %18113 = vst [vmem:[#allocation43_spill] sm:$0xff] %v16905_v55  ;;  %8951 = vmatpush.msra.mxu2 %v16918_v15  ;;  %v16932_v55 = vld [vmem:[#allocation11 + $0x40] sm:$0xff]  ;;  %9049 = vmatpush.msrb.mxu0 %v16854_v52 }
 0x62d   :  { %18114 = vst [vmem:[#allocation44_spill] sm:$0xff] %v16907_v1  ;;  %9069 = vmatpush.msrb.mxu1 %v16909_v12  ;;  %9166 = vmatpush.msrb.mxu3 %v16824_v44 }
 0x62e   :  { %18115 = vst [vmem:[#allocation45_spill] sm:$0xff] %v16912_v63  ;;  %8952 = vmatpush.msra.mxu2 %v16932_v55  ;;  %9050 = vmatpush.msrb.mxu0 %v16862_v42 }
 0x62f   :  { %9070 = vmatpush.msrb.mxu1 %v16918_v15  ;;  %9167 = vmatpush.msrb.mxu3 %v16832_v9 }
 0x630   :  { %8953 = vmatpush.msra.mxu2 %v16941_v43  ;;  %9051 = vmatpush.msrb.mxu0 %v16868_v58 }
 0x631   :  { %9071 = vmatpush.msrb.mxu1 %v16932_v55  ;;  %9168 = vmatpush.msrb.mxu3 %v16854_v52 }
 0x632   :  { %v16926_v63 = vpop.f32.mrf.mxu2  ;;  %v8488_v1 = vpop.f32.mrf.mxu0  ;;  %9052 = vmatpush.msrb.mxu0 %v16881_v34 }
 0x633   :  { %18116 = vst [vmem:[#allocation46_spill] sm:$0xff] %v16926_v63  ;;  %v16930_v51 = vpop.f32.mrf.mxu3  ;;  %v8489_v48 = vadd.f32 %v8488_v1, %v16738_v32  ;;  %v8517_v5 = vpop.f32.mrf.mxu1  ;;  %v16950_v1 = vld [vmem:[#allocation11 + $0x10] sm:$0xff]  ;;  %9072 = vmatpush.msrb.mxu1 %v16941_v43  ;;  %9169 = vmatpush.msrb.mxu3 %v16862_v42 }
 0x634   :  { %18117 = vst [vmem:[#allocation47_spill] sm:$0xff] %v16950_v1  ;;  %8954 = vmatpush.msra.mxu2 %v16950_v1  ;;  %9053 = vmatpush.msrb.mxu0 %v16888_v41 }
 0x635   :  { %v8518_v63 = vadd.f32 %v8517_v5, %v8489_v48  ;;  %8719 = vmatmul.bf16.gmra.mxu0 %v16085_v11  ;;  %9073 = vmatpush.msrb.mxu1 %v16950_v1 }
 0x636   :  { %8748 = vmatmul.bf16.gmra.mxu1 %v16087_v10  ;;  %9137 = vmatpush.msrb.mxu2 %v16693_v2 }
 0x637   :  { %8777 = vmatmul.bf16.gmra.mxu2 %v16089_v61  ;;  %9170 = vmatpush.msrb.mxu3 %v16868_v58 }
 0x638   :  { %8806 = vmatmul.bf16.gmra.mxu3 %v16092_v20  ;;  %9138 = vmatpush.msrb.mxu2 %v16698_v16 }
 0x639   :  { %9171 = vmatpush.msrb.mxu3 %v16881_v34 }
 0x63a   :  { %v8546_v32 = vpop.f32.mrf.mxu2  ;;  %v8490_v5 = vpop.f32.mrf.mxu0  ;;  %9139 = vmatpush.msrb.mxu2 %v16705_v53 }
 0x63b   :  { %v8547_v48 = vadd.f32 %v8546_v32, %v8518_v63  ;;  %v8575_v11 = vpop.f32.mrf.mxu3  ;;  %v8491_v10 = vadd.f32 %v8490_v5, %v16759_v57  ;;  %v8519_v61 = vpop.f32.mrf.mxu1  ;;  %v8476_v57 = vadd.f32 %v16782_v14, %v16678_v21  ;;  %v8561_v32 = vadd.f32 %v16784_v26, %v16780_v17  ;;  %v16975_v21 = vld [vmem:[#allocation2] sm:$0xff]  ;;  %9172 = vmatpush.msrb.mxu3 %v16888_v41 }
 0x63c   :  { %9140 = vmatpush.msrb.mxu2 %v16712_v56 }
 0x63d   :  { %v16957_v20 = vadd.f32 %v8575_v11, %v8547_v48  ;;  %v8520_v63 = vadd.f32 %v8519_v61, %v8491_v10  ;;  %v8505_v14 = vadd.f32 %v16790_v30, %v8476_v57  ;;  %v8479_v30 = vadd.f32 %v16810_v24, %v16685_v0 }
 0x63e   :  { %9141 = vmatpush.msrb.mxu2 %v16724_v54 }
 0x63f   :  { %18118 = vst [vmem:[#allocation48_spill] sm:$0xff] %v16957_v20  ;;  %v8534_v26 = vadd.f32 %v16808_v13, %v8505_v14  ;;  %v8508_v0 = vadd.f32 %v16818_v18, %v8479_v30  ;;  %v8481_v18 = vadd.f32 %v16842_v45, %v16688_v62  ;;  %v18120_v62 = vld [vmem:[#allocation30_spill] sm:$0xff]  ;;  %v18121_v45 = vld [vmem:[#allocation35_spill] sm:$0xff] }
 0x640   :  { %9142 = vmatpush.msrb.mxu2 %v16733_v8 }
 0x641   :  { %v8563_v13 = vadd.f32 %v16812_v37, %v8534_v26  ;;  %v8537_v37 = vadd.f32 %v16838_v6, %v8508_v0  ;;  %v18124_v0 = vld [vmem:[#allocation25_spill] sm:$0xff] }
 0x642   :  { %v8548_v48 = vpop.f32.mrf.mxu2  ;;  %v8589_v10 = vpop.f32.mrf.mxu0  ;;  %9143 = vmatpush.msrb.mxu2 %v16742_v28 }
 0x643   :  { %v8549_v5 = vadd.f32 %v8548_v48, %v8520_v63  ;;  %v8577_v11 = vpop.f32.mrf.mxu3  ;;  %v8590_v61 = vadd.f32 %v8589_v10, %v8561_v32  ;;  %v8618_v20 = vpop.f32.mrf.mxu1 }
 0x644   :  { %9144 = vmatpush.msrb.mxu2 %v16753_v39 }
 0x645   :  { %v16982_v17 = vadd.f32 %v8577_v11, %v8549_v5  ;;  %v8619_v63 = vadd.f32 %v8618_v20, %v8590_v61  ;;  %8915 = vmatmul.f32.vlgmr.msra.gmra.mxu0 %v16975_v21 }
 0x646   :  { %8935 = vmatmul.f32.vlgmr.msra.gmra.mxu1 %v16975_v21  ;;  %9177 = vmatpush.msra.mxu0 %v16744_v4 }
 0x647   :  { %8955 = vmatmul.f32.vlgmr.msra.gmra.mxu2 %v16975_v21  ;;  %9256 = vmatpush.msra.mxu1 %v16693_v2  ;;  %v18119_v2 = vld [vmem:[#allocation33_spill] sm:$0xff] }
 0x648   :  { %9178 = vmatpush.msra.mxu0 %v16755_v49  ;;  %9145 = vmatpush.msrb.mxu2 %v16768_v60  ;;  %v8566_v6 = vadd.f32 %v18119_v2, %v8537_v37 }
 0x649   :  { %9257 = vmatpush.msra.mxu1 %v16698_v16 }
 0x64a   :  { %v8647_v20 = vpop.f32.mrf.mxu2  ;;  %v8591_v32 = vpop.f32.mrf.mxu0  ;;  %9179 = vmatpush.msra.mxu0 %v16770_v22  ;;  %9146 = vmatpush.msrb.mxu2 %v16786_v46 }
 0x64b   :  { %v17000_v57 = vadd.f32 %v8647_v20, %v8619_v63  ;;  %v17002_v48 = vpop.f32.mrf.mxu3  ;;  %v8592_v24 = vadd.f32 %v8591_v32, %v8563_v13  ;;  %v8620_v5 = vpop.f32.mrf.mxu1  ;;  %9258 = vmatpush.msra.mxu1 %v16705_v53  ;;  %v8510_v53 = vadd.f32 %v18121_v45, %v8481_v18  ;;  %v18122_v13 = vld [vmem:[#allocation31_spill] sm:$0xff]  ;;  %v18123_v32 = vld [vmem:[#allocation32_spill] sm:$0xff] }
 0x64c   :  { %9180 = vmatpush.msra.mxu0 %v16788_v29  ;;  %9147 = vmatpush.msrb.mxu2 %v18120_v62 }
 0x64d   :  { %v8621_v11 = vadd.f32 %v8620_v5, %v8592_v24  ;;  %9259 = vmatpush.msra.mxu1 %v16712_v56  ;;  %v8539_v56 = vadd.f32 %v16870_v3, %v8510_v53  ;;  %v8484_v24 = vadd.f32 %v16873_v59, %v18124_v0  ;;  %v18126_v5 = vld [vmem:[#allocation37_spill] sm:$0xff]  ;;  %v18127_v59 = vld [vmem:[#allocation36_spill] sm:$0xff]  ;;  %v18132_v0 = vld [vmem:[#allocation26_spill] sm:$0xff] }
 0x64e   :  { %9181 = vmatpush.msra.mxu0 %v16799_v23  ;;  %9148 = vmatpush.msrb.mxu2 %v18122_v13 }
 0x64f   :  { %9260 = vmatpush.msra.mxu1 %v16724_v54  ;;  %v18125_v54 = vld [vmem:[#allocation34_spill] sm:$0xff]  ;;  %v8568_v37 = vadd.f32 %v18126_v5, %v8539_v56 }
 0x650   :  { %9182 = vmatpush.msra.mxu0 %v16816_v50  ;;  %9149 = vmatpush.msrb.mxu2 %v18123_v32 }
 0x651   :  { %9261 = vmatpush.msra.mxu1 %v16733_v8 }
 0x652   :  { %v8649_v10 = vpop.f32.mrf.mxu2  ;;  %v8594_v14 = vpop.f32.mrf.mxu0  ;;  %9183 = vmatpush.msra.mxu0 %v16830_v7  ;;  %9150 = vmatpush.msrb.mxu2 %v18125_v54 }
 0x653   :  { %v8650_v16 = vadd.f32 %v8649_v10, %v8621_v11  ;;  %v8678_v61 = vpop.f32.mrf.mxu3  ;;  %v8595_v26 = vadd.f32 %v8594_v14, %v8566_v6  ;;  %v8623_v63 = vpop.f32.mrf.mxu1  ;;  %9262 = vmatpush.msra.mxu1 %v16742_v28  ;;  %v8885_v6 = vld [vmem:[%s17563_s6] sm:$0xff]  ;;  %v18128_v10 = vld [vmem:[#allocation40_spill] sm:$0xff] }
 0x654   :  { %9184 = vmatpush.msra.mxu0 %v16848_v36  ;;  %9151 = vmatpush.msrb.mxu2 %v18127_v59  ;;  %v17050_v45 = vadd.s32 4294967295, %v8885_v6 }
 0x655   :  { %v17029_v30 = vadd.f32 %v8678_v61, %v8650_v16  ;;  %v8624_v20 = vadd.f32 %v8623_v63, %v8595_v26  ;;  %9263 = vmatpush.msra.mxu1 %v16753_v39  ;;  %v8513_v16 = vadd.f32 %v18128_v10, %v8484_v24  ;;  %v18130_v26 = vld [vmem:[#allocation38_spill] sm:$0xff]  ;;  %v17769_v24 = vmov 0  }
 0x656   :  { %9185 = vmatpush.msra.mxu0 %v16860_v19  ;;  %18129 = vst [vmem:[#allocation49_spill] sm:$0xff] %v17050_v45  ;;  %9152 = vmatpush.msrb.mxu2 %v18130_v26  ;;  %v18131_v63 = vld [vmem:[#allocation42_spill] sm:$0xff]  ;;  %vm9007_vm0 = vcmp.eq.s32.totalorder %v17050_v45, 0  ;;  %vm9126_vm1 = vcmp.eq.s32.totalorder %v17050_v45, 1  ;;  %vm9245_vm10 = vcmp.eq.s32.totalorder %v17050_v45, 2 }
 0x657   :  { %9264 = vmatpush.msra.mxu1 %v16768_v60  ;;  %v8542_v56 = vadd.f32 %v18131_v63, %v8513_v16  ;;  %14429 = vset.pattern.permute.xlu0 %v17769_v24  ;;  %v9008_v5 = vsel %vm9007_vm0, 1, %v17769_v24  ;;  %v18137_v63 = vld [vmem:[#allocation45_spill] sm:$0xff] }
 0x658   :  { %9186 = vmatpush.msra.mxu0 %v16879_v40  ;;  %9276 = vmatpush.msra.mxu2 %v18132_v0 }
 0x659   :  { %9265 = vmatpush.msra.mxu1 %v16786_v46  ;;  %9010 = vperm.xlu0 %14429, %v9008_v5  }
 0x65a   :  { %v8652_v11 = vpop.f32.mrf.mxu2  ;;  %v8596_v18 = vpop.f32.mrf.mxu0  ;;  %9187 = vmatpush.msra.mxu0 %v16895_v27  ;;  %14430 = vset.pattern.permute.xlu1 %v17769_v24 }
 0x65b   :  { %v8653_v3 = vadd.f32 %v8652_v11, %v8624_v20  ;;  %v8681_v2 = vpop.f32.mrf.mxu3  ;;  %v8597_v14 = vadd.f32 %v8596_v18, %v8568_v37  ;;  %v8625_v61 = vpop.f32.mrf.mxu1  ;;  %v18133_v37 = vld [vmem:[#allocation27_spill] sm:$0xff]  ;;  %v18135_v18 = vld [vmem:[#allocation28_spill] sm:$0xff]  ;;  %9266 = vmatpush.msra.mxu1 %v18120_v62  ;;  %14431 = vset.pattern.permute.xlu2 %v17769_v24 }
 0x65c   :  { %v18134_v11 = vld [vmem:[#allocation43_spill] sm:$0xff]  ;;  %9188 = vmatpush.msra.mxu0 %v16909_v12  ;;  %9277 = vmatpush.msra.mxu2 %v18135_v18  ;;  %v18139_v18 = vld [vmem:[#allocation46_spill] sm:$0xff] }
 0x65d   :  { %v17053_v53 = vadd.f32 %v8681_v2, %v8653_v3  ;;  %v8626_v20 = vadd.f32 %v8625_v61, %v8597_v14  ;;  %v8486_v3 = vadd.f32 %v18134_v11, %v18133_v37  ;;  %v18136_v2 = vld [vmem:[#allocation44_spill] sm:$0xff]  ;;  %9267 = vmatpush.msra.mxu1 %v18122_v13 }
 0x65e   :  { %v8571_v6 = vadd.f32 %v18136_v2, %v8542_v56  ;;  %9189 = vmatpush.msra.mxu0 %v16918_v15  ;;  %9278 = vmatpush.msra.mxu2 %v16726_v47  ;;  %v18138_v56 = vld [vmem:[#allocation29_spill] sm:$0xff] }
 0x65f   :  { %v8515_v0 = vadd.f32 %v18137_v63, %v8486_v3  ;;  %9268 = vmatpush.msra.mxu1 %v18123_v32 }
 0x660   :  { %9190 = vmatpush.msra.mxu0 %v16932_v55  ;;  %9279 = vmatpush.msra.mxu2 %v18138_v56 }
 0x661   :  { %9269 = vmatpush.msra.mxu1 %v18125_v54 }
 0x662   :  { %v8654_v10 = vpop.f32.mrf.mxu2  ;;  %v8599_v14 = vpop.f32.mrf.mxu0  ;;  %9191 = vmatpush.msra.mxu0 %v16941_v43  ;;  %9280 = vmatpush.msra.mxu2 %v16748_v35 }
 0x663   :  { %v8655_v16 = vadd.f32 %v8654_v10, %v8626_v20  ;;  %v8683_v61 = vpop.f32.mrf.mxu3  ;;  %v8600_v5 = vadd.f32 %v8599_v14, %v8571_v6  ;;  %v8628_v37 = vpop.f32.mrf.mxu1  ;;  %v8544_v20 = vadd.f32 %v18139_v18, %v8515_v0  ;;  %9270 = vmatpush.msra.mxu1 %v18127_v59 }
 0x664   :  { %9192 = vmatpush.msra.mxu0 %v16950_v1  ;;  %9281 = vmatpush.msra.mxu2 %v16764_v38 }
 0x665   :  { %v17076_v11 = vadd.f32 %v8683_v61, %v8655_v16  ;;  %v8629_v2 = vadd.f32 %v8628_v37, %v8600_v5  ;;  %v8573_v47 = vadd.f32 %v16930_v51, %v8544_v20  ;;  %9271 = vmatpush.msra.mxu1 %v18130_v26  ;;  %v18140_v20 = vld [vmem:[#allocation48_spill] sm:$0xff] }
 0x666   :  { %9282 = vmatpush.msra.mxu2 %v16772_v33 }
 0x668   :  { %9283 = vmatpush.msra.mxu2 %v16795_v31 }
 0x66a   :  { %v8657_v3 = vpop.f32.mrf.mxu2  ;;  %v8601_v10 = vpop.f32.mrf.mxu0  ;;  %9284 = vmatpush.msra.mxu2 %v16803_v25 }
 0x66b   :  { %v8658_v6 = vadd.f32 %v8657_v3, %v8629_v2  ;;  %v8686_v16 = vpop.f32.mrf.mxu3  ;;  %v8602_v14 = vadd.f32 %v8601_v10, %v8573_v47  ;;  %v8630_v61 = vpop.f32.mrf.mxu1 }
 0x66c   :  { %9285 = vmatpush.msra.mxu2 %v16824_v44 }
 0x66d   :  { %v17091_v63 = vadd.f32 %v8686_v16, %v8658_v6  ;;  %v8631_v0 = vadd.f32 %v8630_v61, %v8602_v14 }
 0x66e   :  { %9286 = vmatpush.msra.mxu2 %v16832_v9 }
 0x670   :  { %9287 = vmatpush.msra.mxu2 %v16854_v52 }
 0x672   :  { %v8659_v51 = vpop.f32.mrf.mxu2  ;;  %v8604_v37 = vpop.f32.mrf.mxu0  ;;  %9288 = vmatpush.msra.mxu2 %v16862_v42 }
 0x673   :  { %v8660_v5 = vadd.f32 %v8659_v51, %v8631_v0  ;;  %v8688_v18 = vpop.f32.mrf.mxu3  ;;  %v8605_v2 = vadd.f32 %v8604_v37, %v18140_v20  ;;  %v8633_v47 = vpop.f32.mrf.mxu1  ;;  %v8677_v37 = vadd.f32 %v17002_v48, %v17000_v57 }
 0x674   :  { %9289 = vmatpush.msra.mxu2 %v16868_v58 }
 0x675   :  { %v8689_v3 = vadd.f32 %v8688_v18, %v8660_v5  ;;  %v8634_v6 = vadd.f32 %v8633_v47, %v8605_v2 }
 0x676   :  { %9290 = vmatpush.msra.mxu2 %v16881_v34 }
 0x678   :  { %9291 = vmatpush.msra.mxu2 %v16888_v41 }
 0x67a   :  { %v8662_v10 = vpop.f32.mrf.mxu2  ;;  %v8606_v14 = vpop.f32.mrf.mxu0 }
 0x67b   :  { %v8663_v16 = vadd.f32 %v8662_v10, %v8634_v6  ;;  %v8691_v61 = vpop.f32.mrf.mxu3  ;;  %v8607_v0 = vadd.f32 %v8606_v14, %v16982_v17  ;;  %v8635_v51 = vpop.f32.mrf.mxu1 }
 0x67d   :  { %v8692_v24 = vadd.f32 %v8691_v61, %v8663_v16  ;;  %v8636_v5 = vadd.f32 %v8635_v51, %v8607_v0 }
 0x682   :  { %v8664_v18 = vpop.f32.mrf.mxu2  ;;  %v8705_v47 = vpop.f32.mrf.mxu0 }
 0x683   :  { %v8665_v20 = vadd.f32 %v8664_v18, %v8636_v5  ;;  %v8693_v2 = vpop.f32.mrf.mxu3  ;;  %v8706_v26 = vadd.f32 %v8705_v47, %v8677_v37  ;;  %v8734_v6 = vpop.f32.mrf.mxu1 }
 0x685   :  { %v8694_v10 = vadd.f32 %v8693_v2, %v8665_v20  ;;  %v8735_v1 = vadd.f32 %v8734_v6, %v8706_v26 }
 0x68a   :  { %v8763_v59 = vpop.f32.mrf.mxu2  ;;  %v8707_v17 = vpop.f32.mrf.mxu0 }
 0x68b   :  { %v17106_v34 = vadd.f32 %v8763_v59, %v8735_v1  ;;  %v17108_v14 = vpop.f32.mrf.mxu3  ;;  %v8708_v16 = vadd.f32 %v8707_v17, %v17029_v30  ;;  %v8736_v61 = vpop.f32.mrf.mxu1 }
 0x68d   :  { %v8737_v0 = vadd.f32 %v8736_v61, %v8708_v16 }
 0x692   :  { %v8765_v51 = vpop.f32.mrf.mxu2  ;;  %v8710_v48 = vpop.f32.mrf.mxu0 }
 0x693   :  { %v8766_v57 = vadd.f32 %v8765_v51, %v8737_v0  ;;  %v8794_v5 = vpop.f32.mrf.mxu3  ;;  %v8711_v18 = vadd.f32 %v8710_v48, %v17053_v53  ;;  %v8739_v37 = vpop.f32.mrf.mxu1 }
 0x695   :  { %v17112_v47 = vadd.f32 %v8794_v5, %v8766_v57  ;;  %v8740_v26 = vadd.f32 %v8739_v37, %v8711_v18 }
 0x697   :  { %18141 = vst [vmem:[#allocation50_spill] sm:$0xff] %v17112_v47 }
 0x69a   :  { %v8768_v20 = vpop.f32.mrf.mxu2  ;;  %v8712_v59 = vpop.f32.mrf.mxu0 }
 0x69b   :  { %v8769_v1 = vadd.f32 %v8768_v20, %v8740_v26  ;;  %v8797_v2 = vpop.f32.mrf.mxu3  ;;  %v8713_v6 = vadd.f32 %v8712_v59, %v17076_v11  ;;  %v8741_v41 = vpop.f32.mrf.mxu1 }
 0x69d   :  { %v17115_v30 = vadd.f32 %v8797_v2, %v8769_v1  ;;  %v8742_v17 = vadd.f32 %v8741_v41, %v8713_v6 }
 0x69f   :  { %18142 = vst [vmem:[#allocation51_spill] sm:$0xff] %v17115_v30 }
 0x6a2   :  { %v8770_v16 = vpop.f32.mrf.mxu2  ;;  %v8715_v0 = vpop.f32.mrf.mxu0 }
 0x6a3   :  { %v8771_v61 = vadd.f32 %v8770_v16, %v8742_v17  ;;  %v8799_v51 = vpop.f32.mrf.mxu3  ;;  %v8716_v53 = vadd.f32 %v8715_v0, %v17091_v63  ;;  %v8744_v48 = vpop.f32.mrf.mxu1 }
 0x6a5   :  { %v17118_v57 = vadd.f32 %v8799_v51, %v8771_v61  ;;  %v8745_v5 = vadd.f32 %v8744_v48, %v8716_v53 }
 0x6a7   :  { %18143 = vst [vmem:[#allocation52_spill] sm:$0xff] %v17118_v57 }
 0x6aa   :  { %v8773_v18 = vpop.f32.mrf.mxu2  ;;  %v8717_v26 = vpop.f32.mrf.mxu0 }
 0x6ab   :  { %v8774_v37 = vadd.f32 %v8773_v18, %v8745_v5  ;;  %v8802_v20 = vpop.f32.mrf.mxu3  ;;  %v8718_v47 = vadd.f32 %v8717_v26, %v8689_v3  ;;  %v8746_v11 = vpop.f32.mrf.mxu1 }
 0x6ad   :  { %v17120_v59 = vadd.f32 %v8802_v20, %v8774_v37  ;;  %v8747_v1 = vadd.f32 %v8746_v11, %v8718_v47  ;;  %v8884_v37 = vld [vmem:[#allocation12] sm:$0x7] }
 0x6ae   :  { %v17126_v47 = vperm.slane %v8884_v37, 0  ;;  %v17128_v20 = vperm.slane %v8884_v37, 1 }
 0x6af   :  { %18144 = vst [vmem:[#allocation53_spill] sm:$0xff] %v17120_v59 }
 0x6b0   :  { %18147 = vst [vmem:[#allocation56_spill] sm:$0xff] %v17126_v47 }
 0x6b1   :  { %18148 = vst [vmem:[#allocation57_spill] sm:$0xff] %v17128_v20 }
 0x6b2   :  { %v8775_v41 = vpop.f32.mrf.mxu2  ;;  %v8720_v6 = vpop.f32.mrf.mxu0 }
 0x6b3   :  { %v8776_v2 = vadd.f32 %v8775_v41, %v8747_v1  ;;  %v8804_v17 = vpop.f32.mrf.mxu3  ;;  %v8721_v16 = vadd.f32 %v8720_v6, %v8692_v24  ;;  %v8749_v30 = vpop.f32.mrf.mxu1  ;;  %v18150_v6 = vld [vmem:[#allocation115_spill] sm:$0xff] }
 0x6b5   :  { %v17122_v63 = vadd.f32 %v8804_v17, %v8776_v2  ;;  %v8750_v61 = vadd.f32 %v8749_v30, %v8721_v16  ;;  %v18151_v17 = vld [vmem:[#allocation21_spill] sm:$0xff] }
 0x6b7   :  { %18145 = vst [vmem:[#allocation54_spill] sm:$0xff] %v17122_v63 }
 0x6ba   :  { %v8778_v0 = vpop.f32.mrf.mxu2  ;;  %v8722_v53 = vpop.f32.mrf.mxu0 }
 0x6bb   :  { %v8779_v51 = vadd.f32 %v8778_v0, %v8750_v61  ;;  %v8807_v48 = vpop.f32.mrf.mxu3  ;;  %v8723_v5 = vadd.f32 %v8722_v53, %v8694_v10  ;;  %v8751_v18 = vpop.f32.mrf.mxu1 }
 0x6bd   :  { %v17124_v3 = vadd.f32 %v8807_v48, %v8779_v51  ;;  %v8752_v26 = vadd.f32 %v8751_v18, %v8723_v5  ;;  %v18152_v18 = vmov 0  }
 0x6bf   :  { %18146 = vst [vmem:[#allocation55_spill] sm:$0xff] %v17124_v3 }
 0x6c2   :  { %v8780_v11 = vpop.f32.mrf.mxu2  ;;  %v8916_v1 = vpop.f32.mrf.mxu0 }
 0x6c3   :  { %v17130_v24 = vadd.f32 %v8780_v11, %v8752_v26  ;;  %v8917_v30 = vadd.f32 %v8916_v1, %v17126_v47  ;;  %v8936_v41 = vpop.f32.mrf.mxu1  ;;  %v9127_v26 = vsel %vm9126_vm1, 1, %v18152_v18 }
 0x6c4   :  { %v8937_v2 = vadd.f32 %v8936_v41, %v17128_v20  ;;  %9129 = vperm.xlu0 %14429, %v9127_v26  }
 0x6c5   :  { %18149 = vst [vmem:[#allocation58_spill] sm:$0xff] %v17130_v24  ;;  %v8959_v10 = vadd.f32 %v8917_v30, %v18150_v6 }
 0x6c6   :  { %v8979_v16 = vadd.f32 %v8937_v2, %v18151_v17  ;;  %v17138_v2 = vperm.slane %v8884_v37, 2 }
 0x6c7   :  { %v13503_v61 = vmul.f32 -1.442695, %v8959_v10 }
 0x6c8   :  { %v13504_v0 = vmul.f32 -1.442695, %v8979_v16 }
 0x6c9   :  { %14432 = vpow2.f32 %v13503_v61 }
 0x6ca   :  { %14434 = vpow2.f32 %v13504_v0  ;;  %v8956_v17 = vpop.f32.mrf.mxu2 }
 0x6cf   :  { %v14433_v51 = vpop.eup %14432 }
 0x6d0   :  { %v14435_v53 = vpop.eup %14434  ;;  %v8963_v48 = vadd.f32 1.0, %v14433_v51 }
 0x6d1   :  { %v8983_v5 = vadd.f32 1.0, %v14435_v53  ;;  %v8957_v53 = vadd.f32 %v8956_v17, %v17138_v2 }
 0x6d2   :  { %14436 = vrcp.f32 %v8963_v48  ;;  %v8975_v16 = vand.u32 2147483648, %v8963_v48  ;;  %v8973_v0 = vand.u32 2147483647, %v8963_v48  ;;  %vm8969_vm3 = vweird.f32 %v8963_v48 }
 0x6d3   :  { %14438 = vrcp.f32 %v8983_v5  ;;  %vm8989_vm7 = vweird.f32 %v8983_v5 }
 0x6d4   :  { %v8976_v26 = vor.u32 1.1754944e-38, %v8975_v16  ;;  %vm8974_vm5 = vcmp.eq.f32.partialorder %v8973_v0, 8.507059e+37 }
 0x6d8   :  { %v14437_v11 = vpop.eup %14436 }
 0x6d9   :  { %v14439_v1 = vpop.eup %14438  ;;  %v8965_v30 = vmul.f32 %v14437_v11, %v8963_v48  ;;  %vm8970_vm2 = vweird.f32 %v14437_v11 }
 0x6da   :  { %v8985_v41 = vmul.f32 %v14439_v1, %v8983_v5  ;;  %vm8971_vm4 = vmor %vm8969_vm3, %vm8970_vm2  ;;  %vm8990_vm6 = vweird.f32 %v14439_v1  ;;  %vm9364_vm3 = vcmp.eq.s32.totalorder %v17050_v45, 3 }
 0x6db   :  { %v8966_v6 = vsub.f32 1.0, %v8965_v30  ;;  %v8793_v30 = vadd.f32 %v17108_v14, %v17106_v34  ;;  %vm8991_vm8 = vmor %vm8989_vm7, %vm8990_vm6  ;;  %v17150_v34 = vld [vmem:[#allocation11 + $0x168] sm:$0xff]  ;;  %v17153_v14 = vld [vmem:[#allocation11 + $0x170] sm:$0xff] }
 0x6dc   :  { %v8986_v10 = vsub.f32 1.0, %v8985_v41  ;;  %v8995_v41 = vand.u32 2147483648, %v8983_v5 }
 0x6dd   :  { %v8967_v61 = vmul.f32 %v14437_v11, %v8966_v6  ;;  %v8993_v6 = vand.u32 2147483647, %v8983_v5 }
 0x6de   :  { %v8987_v51 = vmul.f32 %v14439_v1, %v8986_v10  ;;  %v8996_v17 = vor.u32 1.1754944e-38, %v8995_v41 }
 0x6df   :  { %v8968_v24 = vadd.f32 %v14437_v11, %v8967_v61  ;;  %vm8994_vm9 = vcmp.eq.f32.partialorder %v8993_v6, 8.507059e+37 }
 0x6e0   :  { %v8988_v37 = vadd.f32 %v14439_v1, %v8987_v51 }
 0x6e1   :  { %v8972_v3 = vsel %vm8971_vm4, %v14437_v11, %v8968_v24 }
 0x6e2   :  { %v8977_v63 = vsel %vm8974_vm5, %v8976_v26, %v8972_v3  ;;  %v8992_v57 = vsel %vm8991_vm8, %v14439_v1, %v8988_v37 }
 0x6e3   :  { %v8999_v59 = vmul.f32 %v8977_v63, %v8957_v53  ;;  %v8997_v48 = vsel %vm8994_vm9, %v8996_v17, %v8992_v57  ;;  %v17160_v57 = vld [vmem:[#allocation11 + $0x158] sm:$0xff]  ;;  %v17176_v63 = vld [vmem:[#allocation11 + $0x108] sm:$0xff] }
 0x6e4   :  { %v9002_v16 = vsub.f32 1.0, %v8997_v48  ;;  %v9004_v3 = vmul.f32 %v8997_v48, %v16975_v21  ;;  %v17157_v21 = vld [vmem:[#allocation11 + $0x150] sm:$0xff] }
 0x6e5   :  { %v9000_v10 = vadd.f32 %v8999_v59, %v8793_v30  ;;  %v17167_v59 = vld [vmem:[#allocation11 + $0x140] sm:$0xff]  ;;  %v18162_v48 = vld [vmem:[#allocation50_spill] sm:$0xff] }
 0x6e7   :  { %14440 = vtanh.f32 %v9000_v10 }
 0x6ed   :  { %v14441_v24 = vpop.eup %14440 }
 0x6ee   :  { %v9003_v11 = vmul.f32 %v14441_v24, %v9002_v16 }
 0x6f0   :  { %v17144_v61 = vadd.f32 %v9004_v3, %v9003_v11 }
 0x6f2   :  { %18153 = vst [vmem:[#allocation59_spill] sm:$0xff] %v17144_v61  ;;  %9034 = vmatmul.f32.vlgmr.msra.gmra.mxu3 %v17144_v61  ;;  %9054 = vmatmul.f32.vlgmr.msrb.gmra.mxu0 %v17144_v61 }
 0x6f3   :  { %9074 = vmatmul.f32.vlgmr.msrb.gmra.mxu1 %v17144_v61  ;;  %9296 = vmatpush.msra.mxu3 %v16744_v4  ;;  %v17164_v4 = vld [vmem:[#allocation11 + $0x138] sm:$0xff] }
 0x6f4   :  { %9375 = vmatpush.msrb.mxu0 %v17150_v34  ;;  %9395 = vmatpush.msrb.mxu1 %v17153_v14 }
 0x6f5   :  { %9297 = vmatpush.msra.mxu3 %v16755_v49  ;;  %v17171_v49 = vld [vmem:[#allocation11 + $0x120] sm:$0xff] }
 0x6f6   :  { %9376 = vmatpush.msrb.mxu0 %v17157_v21  ;;  %9396 = vmatpush.msrb.mxu1 %v17160_v57 }
 0x6f7   :  { %9298 = vmatpush.msra.mxu3 %v16770_v22 }
 0x6f8   :  { %9377 = vmatpush.msrb.mxu0 %v17164_v4  ;;  %9397 = vmatpush.msrb.mxu1 %v17167_v59 }
 0x6f9   :  { %9299 = vmatpush.msra.mxu3 %v16788_v29 }
 0x6fa   :  { %9378 = vmatpush.msrb.mxu0 %v17171_v49  ;;  %9398 = vmatpush.msrb.mxu1 %v18138_v56 }
 0x6fb   :  { %9300 = vmatpush.msra.mxu3 %v16799_v23 }
 0x6fc   :  { %9379 = vmatpush.msrb.mxu0 %v17176_v63  ;;  %9399 = vmatpush.msrb.mxu1 %v16748_v35 }
 0x6fd   :  { %9301 = vmatpush.msra.mxu3 %v16816_v50 }
 0x6fe   :  { %9380 = vmatpush.msrb.mxu0 %v16733_v8  ;;  %9400 = vmatpush.msrb.mxu1 %v16764_v38  ;;  %v18158_v8 = vld [vmem:[#allocation41_spill] sm:$0xff] }
 0x6ff   :  { %9302 = vmatpush.msra.mxu3 %v16830_v7 }
 0x700   :  { %9381 = vmatpush.msrb.mxu0 %v16742_v28  ;;  %9401 = vmatpush.msrb.mxu1 %v16772_v33  ;;  %v17213_v28 = vpop.f32.mrf.mxu3  ;;  %v18161_v33 = vld [vmem:[#allocation116_spill] sm:$0xff] }
 0x701   :  { %9303 = vmatpush.msra.mxu3 %v16848_v36  ;;  %v18155_v36 = vld [vmem:[#allocation39_spill] sm:$0xff]  ;;  %18159 = vst [vmem:[#allocation60_spill] sm:$0xff] %v17213_v28 }
 0x702   :  { %9382 = vmatpush.msrb.mxu0 %v16753_v39  ;;  %9402 = vmatpush.msrb.mxu1 %v16795_v31  ;;  %v18160_v39 = vld [vmem:[#allocation22_spill] sm:$0xff] }
 0x703   :  { %9304 = vmatpush.msra.mxu3 %v16860_v19  ;;  %v18154_v19 = vld [vmem:[#allocation36_spill] sm:$0xff] }
 0x704   :  { %9383 = vmatpush.msrb.mxu0 %v16768_v60  ;;  %9403 = vmatpush.msrb.mxu1 %v16803_v25 }
 0x705   :  { %9305 = vmatpush.msra.mxu3 %v16879_v40 }
 0x706   :  { %9384 = vmatpush.msrb.mxu0 %v16786_v46  ;;  %9404 = vmatpush.msrb.mxu1 %v16824_v44 }
 0x707   :  { %9306 = vmatpush.msra.mxu3 %v16895_v27  ;;  %v9246_v27 = vsel %vm9245_vm10, 1, %v18152_v18 }
 0x708   :  { %9385 = vmatpush.msrb.mxu0 %v18120_v62  ;;  %9405 = vmatpush.msrb.mxu1 %v16832_v9  ;;  %v18156_v9 = vld [vmem:[#allocation47_spill] sm:$0xff] }
 0x709   :  { %9307 = vmatpush.msra.mxu3 %v16909_v12  ;;  %9248 = vperm.xlu1 %14430, %v9246_v27   ;;  %v17279_v27 = vld [vmem:[#allocation11 + $0xc0] sm:$0xff] }
 0x70a   :  { %9386 = vmatpush.msrb.mxu0 %v18122_v13  ;;  %9406 = vmatpush.msrb.mxu1 %v16854_v52  ;;  %v18157_v52 = vld [vmem:[#allocation38_spill] sm:$0xff] }
 0x70b   :  { %9308 = vmatpush.msra.mxu3 %v16918_v15 }
 0x70c   :  { %9387 = vmatpush.msrb.mxu0 %v18123_v32  ;;  %9407 = vmatpush.msrb.mxu1 %v16862_v42 }
 0x70d   :  { %9309 = vmatpush.msra.mxu3 %v16932_v55 }
 0x70e   :  { %9388 = vmatpush.msrb.mxu0 %v18125_v54  ;;  %9408 = vmatpush.msrb.mxu1 %v16868_v58 }
 0x70f   :  { %9310 = vmatpush.msra.mxu3 %v16941_v43 }
 0x710   :  { %9389 = vmatpush.msrb.mxu0 %v18154_v19  ;;  %9409 = vmatpush.msrb.mxu1 %v18155_v36 }
 0x711   :  { %9311 = vmatpush.msra.mxu3 %v18156_v9 }
 0x712   :  { %9390 = vmatpush.msrb.mxu0 %v18157_v52  ;;  %9410 = vmatpush.msrb.mxu1 %v18158_v8 }
 0x76f   :  { %v9055_v42 = vpop.f32.mrf.mxu0 }
 0x770   :  { %v9056_v35 = vadd.f32 %v9055_v42, %v17128_v20  ;;  %v9075_v0 = vpop.f32.mrf.mxu1 }
 0x771   :  { %v9076_v26 = vadd.f32 %v9075_v0, %v17138_v2  ;;  %v17309_v0 = vld [vmem:[#allocation11 + $0x80] sm:$0xff] }
 0x772   :  { %v9098_v38 = vadd.f32 %v9056_v35, %v18160_v39  ;;  %v17229_v35 = vld [vmem:[#allocation11 + $0x178] sm:$0xff]  ;;  %v17234_v39 = vld [vmem:[#allocation11 + $0x160] sm:$0xff] }
 0x774   :  { %v13506_v58 = vmul.f32 -1.442695, %v9098_v38  ;;  %v17239_v38 = vld [vmem:[#allocation11 + $0x148] sm:$0xff] }
 0x775   :  { %v9035_v60 = vpop.f32.mrf.mxu3 }
 0x776   :  { %14442 = vpow2.f32 %v13506_v58  ;;  %v9036_v22 = vadd.f32 %v9035_v60, %v17126_v47  ;;  %v17244_v58 = vld [vmem:[#allocation11 + $0x130] sm:$0xff]  ;;  %v17248_v60 = vld [vmem:[#allocation11 + $0x128] sm:$0xff] }
 0x778   :  { %v9078_v46 = vadd.f32 %v9036_v22, %v18161_v33  ;;  %v17251_v22 = vld [vmem:[#allocation11 + $0x118] sm:$0xff]  ;;  %v17255_v33 = vld [vmem:[#allocation11 + $0x110] sm:$0xff] }
 0x77a   :  { %v13505_v29 = vmul.f32 -1.442695, %v9078_v46  ;;  %v17258_v46 = vld [vmem:[#allocation11 + $0x100] sm:$0xff] }
 0x77c   :  { %v14443_v31 = vpop.eup %14442  ;;  %14444 = vpow2.f32 %v13505_v29  ;;  %v17261_v29 = vld [vmem:[#allocation11 + $0xf0] sm:$0xff] }
 0x77d   :  { %v9102_v23 = vadd.f32 1.0, %v14443_v31  ;;  %v17264_v31 = vld [vmem:[#allocation11 + $0xf8] sm:$0xff] }
 0x77f   :  { %14446 = vrcp.f32 %v9102_v23  ;;  %v9114_v6 = vand.u32 2147483648, %v9102_v23  ;;  %vm9108_vm0 = vweird.f32 %v9102_v23  ;;  %v9112_v17 = vand.u32 2147483647, %v9102_v23 }
 0x781   :  { %v9115_v11 = vor.u32 1.1754944e-38, %v9114_v6  ;;  %vm9113_vm2 = vcmp.eq.f32.partialorder %v9112_v17, 8.507059e+37  ;;  %v17344_v6 = vld [vmem:[#allocation11 + $0x8] sm:$0xff] }
 0x782   :  { %v14445_v25 = vpop.eup %14444  ;;  %18169 = vst [vmem:[#allocation67_spill] sm:$0xff] %v17344_v6 }
 0x783   :  { %v9082_v50 = vadd.f32 1.0, %v14445_v25  ;;  %v17270_v25 = vld [vmem:[#allocation11 + $0xd8] sm:$0xff] }
 0x785   :  { %14448 = vrcp.f32 %v9082_v50  ;;  %v14447_v44 = vpop.eup %14446  ;;  %v9094_v54 = vand.u32 2147483648, %v9082_v50  ;;  %v9092_v5 = vand.u32 2147483647, %v9082_v50  ;;  %vm9088_vm12 = vweird.f32 %v9082_v50 }
 0x786   :  { %v9104_v7 = vmul.f32 %v14447_v44, %v9102_v23  ;;  %vm9109_vm15 = vweird.f32 %v14447_v44  ;;  %v17267_v23 = vld [vmem:[#allocation11 + $0xe8] sm:$0xff] }
 0x787   :  { %v9095_v53 = vor.u32 1.1754944e-38, %v9094_v54  ;;  %vm9093_vm14 = vcmp.eq.f32.partialorder %v9092_v5, 8.507059e+37  ;;  %vm9110_vm1 = vmor %vm9108_vm0, %vm9109_vm15  ;;  %v17297_v54 = vld [vmem:[#allocation11 + $0x90] sm:$0xff]  ;;  %v17303_v5 = vld [vmem:[#allocation11 + $0x88] sm:$0xff] }
 0x788   :  { %v9105_v13 = vsub.f32 1.0, %v9104_v7  ;;  %v17282_v7 = vld [vmem:[#allocation11 + $0xc8] sm:$0xff] }
 0x78a   :  { %v9106_v1 = vmul.f32 %v14447_v44, %v9105_v13  ;;  %v17291_v13 = vld [vmem:[#allocation11 + $0xb0] sm:$0xff] }
 0x78b   :  { %v14449_v40 = vpop.eup %14448 }
 0x78c   :  { %v9084_v62 = vmul.f32 %v14449_v40, %v9082_v50  ;;  %vm9089_vm11 = vweird.f32 %v14449_v40  ;;  %v9107_v30 = vadd.f32 %v14447_v44, %v9106_v1  ;;  %v17273_v50 = vld [vmem:[#allocation11 + $0xe0] sm:$0xff]  ;;  %v17306_v1 = vld [vmem:[#allocation11 + $0x78] sm:$0xff] }
 0x78d   :  { %vm9090_vm13 = vmor %vm9088_vm12, %vm9089_vm11 }
 0x78e   :  { %v9085_v32 = vsub.f32 1.0, %v9084_v62  ;;  %v9111_v24 = vsel %vm9110_vm1, %v14447_v44, %v9107_v30  ;;  %v17276_v44 = vld [vmem:[#allocation11 + $0xd0] sm:$0xff]  ;;  %v17288_v62 = vld [vmem:[#allocation11 + $0xa8] sm:$0xff]  ;;  %v17330_v30 = vld [vmem:[#allocation11 + $0x38] sm:$0xff] }
 0x78f   :  { %v9116_v3 = vsel %vm9113_vm2, %v9115_v11, %v9111_v24  ;;  %18165 = vst [vmem:[#allocation63_spill] sm:$0xff] %v17330_v30  ;;  %v18171_v11 = vld [vmem:[#allocation123_spill] sm:$0xff] }
 0x790   :  { %v9086_v56 = vmul.f32 %v14449_v40, %v9085_v32  ;;  %v9121_v19 = vsub.f32 1.0, %v9116_v3  ;;  %v9123_v8 = vmul.f32 %v9116_v3, %v17144_v61  ;;  %v17294_v32 = vld [vmem:[#allocation11 + $0xa0] sm:$0xff] }
 0x792   :  { %v9087_v51 = vadd.f32 %v14449_v40, %v9086_v56  ;;  %v17300_v56 = vld [vmem:[#allocation11 + $0x98] sm:$0xff] }
 0x794   :  { %v9091_v37 = vsel %vm9090_vm13, %v14449_v40, %v9087_v51  ;;  %v17285_v40 = vld [vmem:[#allocation11 + $0xb8] sm:$0xff]  ;;  %v17313_v51 = vld [vmem:[#allocation11 + $0x60] sm:$0xff] }
 0x795   :  { %v9096_v41 = vsel %vm9093_vm14, %v9095_v53, %v9091_v37  ;;  %v17316_v53 = vld [vmem:[#allocation11 + $0x68] sm:$0xff]  ;;  %v17323_v37 = vld [vmem:[#allocation11 + $0x50] sm:$0xff] }
 0x796   :  { %v9118_v10 = vmul.f32 %v9096_v41, %v9076_v26  ;;  %v17320_v26 = vld [vmem:[#allocation11 + $0x48] sm:$0xff]  ;;  %v17337_v41 = vld [vmem:[#allocation11 + $0x20] sm:$0xff] }
 0x797   :  { %18167 = vst [vmem:[#allocation65_spill] sm:$0xff] %v17337_v41 }
 0x798   :  { %v9119_v16 = vadd.f32 %v9118_v10, %v18162_v48 }
 0x79a   :  { %14450 = vtanh.f32 %v9119_v16  ;;  %v18170_v16 = vld [vmem:[#allocation117_spill] sm:$0xff] }
 0x7a0   :  { %v14451_v36 = vpop.eup %14450 }
 0x7a1   :  { %v9122_v52 = vmul.f32 %v14451_v36, %v9121_v19 }
 0x7a3   :  { %v17224_v42 = vadd.f32 %v9123_v8, %v9122_v52 }
 0x7a5   :  { %18163 = vst [vmem:[#allocation61_spill] sm:$0xff] %v17224_v42  ;;  %9153 = vmatmul.f32.vlgmr.msrb.gmra.mxu2 %v17224_v42  ;;  %9173 = vmatmul.f32.vlgmr.msrb.gmra.mxu3 %v17224_v42 }
 0x7a6   :  { %9193 = vmatmul.f32.vlgmr.msra.gmra.mxu0 %v17224_v42  ;;  %9415 = vmatpush.msrb.mxu2 %v17229_v35 }
 0x7a7   :  { %9494 = vmatpush.msrb.mxu3 %v17150_v34  ;;  %9514 = vmatpush.msra.mxu0 %v17153_v14 }
 0x7a8   :  { %9416 = vmatpush.msrb.mxu2 %v17234_v39 }
 0x7a9   :  { %9495 = vmatpush.msrb.mxu3 %v17157_v21  ;;  %9515 = vmatpush.msra.mxu0 %v17160_v57 }
 0x7aa   :  { %9417 = vmatpush.msrb.mxu2 %v17239_v38 }
 0x7ab   :  { %9496 = vmatpush.msrb.mxu3 %v17164_v4  ;;  %9516 = vmatpush.msra.mxu0 %v17167_v59 }
 0x7ac   :  { %9418 = vmatpush.msrb.mxu2 %v17244_v58 }
 0x7ad   :  { %9497 = vmatpush.msrb.mxu3 %v17171_v49  ;;  %9517 = vmatpush.msra.mxu0 %v17248_v60 }
 0x7ae   :  { %9419 = vmatpush.msrb.mxu2 %v17251_v22 }
 0x7af   :  { %9498 = vmatpush.msrb.mxu3 %v17176_v63  ;;  %9518 = vmatpush.msra.mxu0 %v17255_v33 }
 0x7b0   :  { %9420 = vmatpush.msrb.mxu2 %v17258_v46 }
 0x7b1   :  { %9499 = vmatpush.msrb.mxu3 %v17261_v29  ;;  %9519 = vmatpush.msra.mxu0 %v17264_v31 }
 0x7b2   :  { %9421 = vmatpush.msrb.mxu2 %v17267_v23 }
 0x7b3   :  { %9500 = vmatpush.msrb.mxu3 %v17270_v25  ;;  %9520 = vmatpush.msra.mxu0 %v17273_v50 }
 0x7b4   :  { %9422 = vmatpush.msrb.mxu2 %v17276_v44 }
 0x7b5   :  { %9501 = vmatpush.msrb.mxu3 %v17279_v27  ;;  %9521 = vmatpush.msra.mxu0 %v17282_v7 }
 0x7b6   :  { %9423 = vmatpush.msrb.mxu2 %v17285_v40 }
 0x7b7   :  { %9502 = vmatpush.msrb.mxu3 %v17288_v62  ;;  %9522 = vmatpush.msra.mxu0 %v17291_v13 }
 0x7b8   :  { %9424 = vmatpush.msrb.mxu2 %v17294_v32 }
 0x7b9   :  { %9503 = vmatpush.msrb.mxu3 %v17297_v54  ;;  %9523 = vmatpush.msra.mxu0 %v17300_v56 }
 0x7ba   :  { %9425 = vmatpush.msrb.mxu2 %v17303_v5 }
 0x7bb   :  { %9504 = vmatpush.msrb.mxu3 %v17306_v1  ;;  %9524 = vmatpush.msra.mxu0 %v17309_v0 }
 0x7bc   :  { %9426 = vmatpush.msrb.mxu2 %v16909_v12  ;;  %v17327_v12 = vld [vmem:[#allocation11 + $0x30] sm:$0xff] }
 0x7bd   :  { %9505 = vmatpush.msrb.mxu3 %v17313_v51  ;;  %9525 = vmatpush.msra.mxu0 %v17316_v53  ;;  %18164 = vst [vmem:[#allocation62_spill] sm:$0xff] %v17327_v12 }
 0x7be   :  { %9427 = vmatpush.msrb.mxu2 %v16918_v15  ;;  %v17334_v15 = vld [vmem:[#allocation11 + $0x18] sm:$0xff] }
 0x7bf   :  { %9506 = vmatpush.msrb.mxu3 %v17320_v26  ;;  %9526 = vmatpush.msra.mxu0 %v17323_v37  ;;  %18166 = vst [vmem:[#allocation64_spill] sm:$0xff] %v17334_v15 }
 0x7c0   :  { %9428 = vmatpush.msrb.mxu2 %v16932_v55  ;;  %v17341_v55 = vld [vmem:[#allocation11] sm:$0xff] }
 0x7c1   :  { %9507 = vmatpush.msrb.mxu3 %v17327_v12  ;;  %9527 = vmatpush.msra.mxu0 %v17330_v30  ;;  %18168 = vst [vmem:[#allocation66_spill] sm:$0xff] %v17341_v55 }
 0x7c2   :  { %9429 = vmatpush.msrb.mxu2 %v16941_v43 }
 0x7c3   :  { %9508 = vmatpush.msrb.mxu3 %v17334_v15  ;;  %9528 = vmatpush.msra.mxu0 %v17337_v41 }
 0x7c4   :  { %9430 = vmatpush.msrb.mxu2 %v18156_v9 }
 0x7c5   :  { %9509 = vmatpush.msrb.mxu3 %v17341_v55  ;;  %9529 = vmatpush.msra.mxu0 %v17344_v6 }
 0x828   :  { %v9154_v10 = vpop.f32.mrf.mxu2  ;;  %v9174_v43 = vpop.f32.mrf.mxu3 }
 0x829   :  { %v9155_v17 = vadd.f32 %v9154_v10, %v17126_v47  ;;  %v9175_v48 = vadd.f32 %v9174_v43, %v17128_v20  ;;  %v9365_v10 = vsel %vm9364_vm3, 1, %v18152_v18 }
 0x82a   :  { %9367 = vperm.xlu1 %14430, %v9365_v10  }
 0x82b   :  { %v9197_v24 = vadd.f32 %v9155_v17, %v18170_v16  ;;  %v9217_v3 = vadd.f32 %v9175_v48, %v18171_v11 }
 0x82d   :  { %v13507_v19 = vmul.f32 -1.442695, %v9197_v24  ;;  %v13508_v9 = vmul.f32 -1.442695, %v9217_v3 }
 0x82f   :  { %14452 = vpow2.f32 %v13507_v19 }
 0x830   :  { %14454 = vpow2.f32 %v13508_v9  ;;  %v9194_v9 = vpop.f32.mrf.mxu0 }
 0x831   :  { %v9195_v45 = vadd.f32 %v9194_v9, %v17138_v2 }
 0x835   :  { %v14453_v36 = vpop.eup %14452 }
 0x836   :  { %v14455_v52 = vpop.eup %14454  ;;  %v9201_v8 = vadd.f32 1.0, %v14453_v36 }
 0x837   :  { %v9221_v61 = vadd.f32 1.0, %v14455_v52 }
 0x838   :  { %14456 = vrcp.f32 %v9201_v8  ;;  %v9213_v24 = vand.u32 2147483648, %v9201_v8  ;;  %v9211_v19 = vand.u32 2147483647, %v9201_v8  ;;  %vm9207_vm5 = vweird.f32 %v9201_v8 }
 0x839   :  { %14458 = vrcp.f32 %v9221_v61  ;;  %vm9227_vm9 = vweird.f32 %v9221_v61 }
 0x83a   :  { %v9214_v20 = vor.u32 1.1754944e-38, %v9213_v24  ;;  %vm9212_vm7 = vcmp.eq.f32.partialorder %v9211_v19, 8.507059e+37 }
 0x83e   :  { %v14457_v43 = vpop.eup %14456 }
 0x83f   :  { %v14459_v28 = vpop.eup %14458  ;;  %v9203_v17 = vmul.f32 %v14457_v43, %v9201_v8  ;;  %vm9208_vm4 = vweird.f32 %v14457_v43 }
 0x840   :  { %v9223_v16 = vmul.f32 %v14459_v28, %v9221_v61  ;;  %vm9209_vm6 = vmor %vm9207_vm5, %vm9208_vm4  ;;  %vm9228_vm8 = vweird.f32 %v14459_v28 }
 0x841   :  { %v9204_v48 = vsub.f32 1.0, %v9203_v17  ;;  %v9233_v17 = vand.u32 2147483648, %v9221_v61  ;;  %vm9229_vm10 = vmor %vm9227_vm9, %vm9228_vm8 }
 0x842   :  { %v9224_v11 = vsub.f32 1.0, %v9223_v16  ;;  %v9231_v16 = vand.u32 2147483647, %v9221_v61  ;;  %v17409_v61 = vld [vmem:[#allocation11 + $0x28] sm:$0xff] }
 0x843   :  { %v9205_v3 = vmul.f32 %v14457_v43, %v9204_v48  ;;  %v18172_v48 = vld [vmem:[#allocation51_spill] sm:$0xff]  ;;  %18173 = vst [vmem:[#allocation68_spill] sm:$0xff] %v17409_v61 }
 0x844   :  { %v9225_v36 = vmul.f32 %v14459_v28, %v9224_v11  ;;  %v9234_v11 = vor.u32 1.1754944e-38, %v9233_v17  ;;  %vm9232_vm11 = vcmp.eq.f32.partialorder %v9231_v16, 8.507059e+37 }
 0x845   :  { %v9206_v52 = vadd.f32 %v14457_v43, %v9205_v3 }
 0x846   :  { %v9226_v47 = vadd.f32 %v14459_v28, %v9225_v36  ;;  %v18178_v36 = vld [vmem:[#allocation56_spill] sm:$0xff] }
 0x847   :  { %v9210_v18 = vsel %vm9209_vm6, %v14457_v43, %v9206_v52 }
 0x848   :  { %v9215_v10 = vsel %vm9212_vm7, %v9214_v20, %v9210_v18  ;;  %v9230_v41 = vsel %vm9229_vm10, %v14459_v28, %v9226_v47  ;;  %v17399_v47 = vld [vmem:[#allocation11 + $0x58] sm:$0xff]  ;;  %v17404_v18 = vld [vmem:[#allocation11 + $0x40] sm:$0xff] }
 0x849   :  { %v9237_v6 = vmul.f32 %v9215_v10, %v9195_v45  ;;  %v9235_v8 = vsel %vm9232_vm11, %v9234_v11, %v9230_v41  ;;  %v17394_v45 = vld [vmem:[#allocation11 + $0x70] sm:$0xff]  ;;  %v18174_v28 = vld [vmem:[#allocation65_spill] sm:$0xff] }
 0x84a   :  { %v9240_v24 = vsub.f32 1.0, %v9235_v8  ;;  %v9242_v43 = vmul.f32 %v9235_v8, %v17224_v42  ;;  %v17414_v41 = vld [vmem:[#allocation11 + $0x10] sm:$0xff]  ;;  %v18180_v11 = vld [vmem:[#allocation57_spill] sm:$0xff] }
 0x84b   :  { %v9238_v55 = vadd.f32 %v9237_v6, %v18172_v48  ;;  %18175 = vst [vmem:[#allocation69_spill] sm:$0xff] %v17414_v41  ;;  %v18177_v6 = vld [vmem:[#allocation67_spill] sm:$0xff]  ;;  %v18179_v10 = vld [vmem:[#allocation118_spill] sm:$0xff] }
 0x84d   :  { %14460 = vtanh.f32 %v9238_v55  ;;  %v18176_v55 = vld [vmem:[#allocation66_spill] sm:$0xff] }
 0x853   :  { %v14461_v3 = vpop.eup %14460 }
 0x854   :  { %v9241_v9 = vmul.f32 %v14461_v3, %v9240_v24  ;;  %v18181_v24 = vld [vmem:[#allocation124_spill] sm:$0xff] }
 0x856   :  { %v17356_v20 = vadd.f32 %v9242_v43, %v9241_v9 }
 0x858   :  { %9272 = vmatmul.f32.vlgmr.msra.gmra.mxu1 %v17356_v20  ;;  %9292 = vmatmul.f32.vlgmr.msra.gmra.mxu2 %v17356_v20 }
 0x859   :  { %9312 = vmatmul.f32.vlgmr.msra.gmra.mxu3 %v17356_v20  ;;  %9534 = vmatpush.msra.mxu1 %v17229_v35 }
 0x85a   :  { %9613 = vmatpush.msra.mxu2 %v17150_v34  ;;  %9633 = vmatpush.msra.mxu3 %v17153_v14 }
 0x85b   :  { %9535 = vmatpush.msra.mxu1 %v17234_v39 }
 0x85c   :  { %9614 = vmatpush.msra.mxu2 %v17157_v21  ;;  %9634 = vmatpush.msra.mxu3 %v17160_v57 }
 0x85d   :  { %9536 = vmatpush.msra.mxu1 %v17239_v38 }
 0x85e   :  { %9615 = vmatpush.msra.mxu2 %v17164_v4  ;;  %9635 = vmatpush.msra.mxu3 %v17167_v59 }
 0x85f   :  { %9537 = vmatpush.msra.mxu1 %v17244_v58 }
 0x860   :  { %9616 = vmatpush.msra.mxu2 %v17171_v49  ;;  %9636 = vmatpush.msra.mxu3 %v17248_v60 }
 0x861   :  { %9538 = vmatpush.msra.mxu1 %v17251_v22 }
 0x862   :  { %9617 = vmatpush.msra.mxu2 %v17176_v63  ;;  %9637 = vmatpush.msra.mxu3 %v17255_v33 }
 0x863   :  { %9539 = vmatpush.msra.mxu1 %v17258_v46 }
 0x864   :  { %9618 = vmatpush.msra.mxu2 %v17261_v29  ;;  %9638 = vmatpush.msra.mxu3 %v17264_v31 }
 0x865   :  { %9540 = vmatpush.msra.mxu1 %v17267_v23 }
 0x866   :  { %9619 = vmatpush.msra.mxu2 %v17270_v25  ;;  %9639 = vmatpush.msra.mxu3 %v17273_v50 }
 0x867   :  { %9541 = vmatpush.msra.mxu1 %v17276_v44 }
 0x868   :  { %9620 = vmatpush.msra.mxu2 %v17279_v27  ;;  %9640 = vmatpush.msra.mxu3 %v17282_v7 }
 0x869   :  { %9542 = vmatpush.msra.mxu1 %v17285_v40 }
 0x86a   :  { %9621 = vmatpush.msra.mxu2 %v17288_v62  ;;  %9641 = vmatpush.msra.mxu3 %v17291_v13 }
 0x86b   :  { %9543 = vmatpush.msra.mxu1 %v17294_v32 }
 0x86c   :  { %9622 = vmatpush.msra.mxu2 %v17297_v54  ;;  %9642 = vmatpush.msra.mxu3 %v17300_v56 }
 0x86d   :  { %9544 = vmatpush.msra.mxu1 %v17303_v5 }
 0x86e   :  { %9623 = vmatpush.msra.mxu2 %v17306_v1  ;;  %9643 = vmatpush.msra.mxu3 %v17309_v0 }
 0x86f   :  { %9545 = vmatpush.msra.mxu1 %v17394_v45 }
 0x870   :  { %9624 = vmatpush.msra.mxu2 %v17313_v51  ;;  %9644 = vmatpush.msra.mxu3 %v17316_v53 }
 0x871   :  { %9546 = vmatpush.msra.mxu1 %v17399_v47 }
 0x872   :  { %9625 = vmatpush.msra.mxu2 %v17320_v26  ;;  %9645 = vmatpush.msra.mxu3 %v17323_v37 }
 0x873   :  { %9547 = vmatpush.msra.mxu1 %v17404_v18 }
 0x874   :  { %9626 = vmatpush.msra.mxu2 %v17327_v12  ;;  %9646 = vmatpush.msra.mxu3 %v17330_v30  ;;  %v18184_v30 = vld [vmem:[#allocation52_spill] sm:$0xff] }
 0x875   :  { %9548 = vmatpush.msra.mxu1 %v17409_v61 }
 0x876   :  { %9627 = vmatpush.msra.mxu2 %v17334_v15  ;;  %9647 = vmatpush.msra.mxu3 %v18174_v28 }
 0x877   :  { %9549 = vmatpush.msra.mxu1 %v17414_v41 }
 0x878   :  { %9628 = vmatpush.msra.mxu2 %v18176_v55  ;;  %9648 = vmatpush.msra.mxu3 %v18177_v6  ;;  %v18182_v55 = vld [vmem:[#allocation49_spill] sm:$0xff]  ;;  %v18183_v6 = vmov 0  }
 0x879   :  { %vm9483_vm12 = vcmp.eq.s32.totalorder %v18182_v55, 4 }
 0x87a   :  { %v9484_v41 = vsel %vm9483_vm12, 1, %v18183_v6 }
 0x87b   :  { %9486 = vperm.xlu2 %14431, %v9484_v41  }
 0x8d5   :  { %v9273_v19 = vpop.f32.mrf.mxu1 }
 0x8d6   :  { %v9274_v52 = vadd.f32 %v9273_v19, %v18178_v36 }
 0x8d8   :  { %v9316_v17 = vadd.f32 %v9274_v52, %v18179_v10 }
 0x8da   :  { %v13509_v16 = vmul.f32 -1.442695, %v9316_v17 }
 0x8db   :  { %v9293_v48 = vpop.f32.mrf.mxu2 }
 0x8dc   :  { %14462 = vpow2.f32 %v13509_v16  ;;  %v9294_v8 = vadd.f32 %v9293_v48, %v18180_v11 }
 0x8de   :  { %v9336_v3 = vadd.f32 %v9294_v8, %v18181_v24 }
 0x8e0   :  { %v13510_v9 = vmul.f32 -1.442695, %v9336_v3  ;;  %v9313_v3 = vpop.f32.mrf.mxu3 }
 0x8e1   :  { %v9314_v6 = vadd.f32 %v9313_v3, %v17138_v2 }
 0x8e2   :  { %v14463_v43 = vpop.eup %14462  ;;  %14464 = vpow2.f32 %v13510_v9 }
 0x8e3   :  { %v9320_v42 = vadd.f32 1.0, %v14463_v43 }
 0x8e5   :  { %14466 = vrcp.f32 %v9320_v42  ;;  %v9332_v16 = vand.u32 2147483648, %v9320_v42  ;;  %v9330_v8 = vand.u32 2147483647, %v9320_v42  ;;  %vm9326_vm14 = vweird.f32 %v9320_v42 }
 0x8e7   :  { %v9333_v55 = vor.u32 1.1754944e-38, %v9332_v16  ;;  %vm9331_vm0 = vcmp.eq.f32.partialorder %v9330_v8, 8.507059e+37 }
 0x8e8   :  { %v14465_v28 = vpop.eup %14464 }
 0x8e9   :  { %v9340_v19 = vadd.f32 1.0, %v14465_v28 }
 0x8eb   :  { %v14467_v52 = vpop.eup %14466  ;;  %14468 = vrcp.f32 %v9340_v19  ;;  %vm9346_vm2 = vweird.f32 %v9340_v19 }
 0x8ec   :  { %v9322_v10 = vmul.f32 %v14467_v52, %v9320_v42  ;;  %vm9327_vm13 = vweird.f32 %v14467_v52 }
 0x8ed   :  { %vm9328_vm15 = vmor %vm9326_vm14, %vm9327_vm13 }
 0x8ee   :  { %v9323_v17 = vsub.f32 1.0, %v9322_v10  ;;  %v9352_v10 = vand.u32 2147483648, %v9340_v19 }
 0x8f0   :  { %v9324_v48 = vmul.f32 %v14467_v52, %v9323_v17  ;;  %v9350_v17 = vand.u32 2147483647, %v9340_v19 }
 0x8f1   :  { %v14469_v24 = vpop.eup %14468 }
 0x8f2   :  { %v9342_v9 = vmul.f32 %v14469_v24, %v9340_v19  ;;  %v9325_v43 = vadd.f32 %v14467_v52, %v9324_v48  ;;  %vm9347_vm1 = vweird.f32 %v14469_v24  ;;  %v9353_v48 = vor.u32 1.1754944e-38, %v9352_v10 }
 0x8f3   :  { %vm9348_vm3 = vmor %vm9346_vm2, %vm9347_vm1  ;;  %vm9351_vm4 = vcmp.eq.f32.partialorder %v9350_v17, 8.507059e+37 }
 0x8f4   :  { %v9343_v11 = vsub.f32 1.0, %v9342_v9  ;;  %v9329_v41 = vsel %vm9328_vm15, %v14467_v52, %v9325_v43 }
 0x8f5   :  { %v9334_v28 = vsel %vm9331_vm0, %v9333_v55, %v9329_v41 }
 0x8f6   :  { %v9344_v36 = vmul.f32 %v14469_v24, %v9343_v11  ;;  %v9356_v15 = vmul.f32 %v9334_v28, %v9314_v6 }
 0x8f8   :  { %v9345_v61 = vadd.f32 %v14469_v24, %v9344_v36  ;;  %v9357_v12 = vadd.f32 %v9356_v15, %v18184_v30 }
 0x8fa   :  { %v9349_v42 = vsel %vm9348_vm3, %v14469_v24, %v9345_v61  ;;  %14470 = vtanh.f32 %v9357_v12 }
 0x8fb   :  { %v9354_v16 = vsel %vm9351_vm4, %v9353_v48, %v9349_v42 }
 0x8fc   :  { %v9359_v9 = vsub.f32 1.0, %v9354_v16  ;;  %v9361_v55 = vmul.f32 %v9354_v16, %v17356_v20 }
 0x900   :  { %v14471_v3 = vpop.eup %14470 }
 0x901   :  { %v9360_v52 = vmul.f32 %v14471_v3, %v9359_v9 }
 0x903   :  { %v17428_v11 = vadd.f32 %v9361_v55, %v9360_v52 }
 0x905   :  { %9391 = vmatmul.f32.vlgmr.msrb.gmra.mxu0 %v17428_v11  ;;  %9411 = vmatmul.f32.vlgmr.msrb.gmra.mxu1 %v17428_v11 }
 0x906   :  { %9431 = vmatmul.f32.vlgmr.msrb.gmra.mxu2 %v17428_v11  ;;  %9653 = vmatpush.msrb.mxu0 %v17229_v35 }
 0x907   :  { %9732 = vmatpush.msrb.mxu1 %v17150_v34  ;;  %9752 = vmatpush.msrb.mxu2 %v17153_v14  ;;  %v18185_v34 = vld [vmem:[#allocation62_spill] sm:$0xff]  ;;  %v18186_v14 = vld [vmem:[#allocation63_spill] sm:$0xff] }
 0x908   :  { %9654 = vmatpush.msrb.mxu0 %v17234_v39 }
 0x909   :  { %9733 = vmatpush.msrb.mxu1 %v17157_v21  ;;  %9753 = vmatpush.msrb.mxu2 %v17160_v57  ;;  %v18187_v21 = vld [vmem:[#allocation68_spill] sm:$0xff] }
 0x90a   :  { %9655 = vmatpush.msrb.mxu0 %v17239_v38  ;;  %v18188_v57 = vld [vmem:[#allocation64_spill] sm:$0xff] }
 0x90b   :  { %9734 = vmatpush.msrb.mxu1 %v17164_v4  ;;  %9754 = vmatpush.msrb.mxu2 %v17167_v59  ;;  %v18189_v4 = vld [vmem:[#allocation65_spill] sm:$0xff] }
 0x90c   :  { %9656 = vmatpush.msrb.mxu0 %v17244_v58  ;;  %v18190_v59 = vld [vmem:[#allocation69_spill] sm:$0xff] }
 0x90d   :  { %9735 = vmatpush.msrb.mxu1 %v17171_v49  ;;  %9755 = vmatpush.msrb.mxu2 %v17248_v60  ;;  %v18191_v49 = vld [vmem:[#allocation66_spill] sm:$0xff] }
 0x90e   :  { %9657 = vmatpush.msrb.mxu0 %v17251_v22 }
 0x90f   :  { %9736 = vmatpush.msrb.mxu1 %v17176_v63  ;;  %9756 = vmatpush.msrb.mxu2 %v17255_v33  ;;  %v18192_v63 = vld [vmem:[#allocation67_spill] sm:$0xff] }
 0x910   :  { %9658 = vmatpush.msrb.mxu0 %v17258_v46 }
 0x911   :  { %9737 = vmatpush.msrb.mxu1 %v17261_v29  ;;  %9757 = vmatpush.msrb.mxu2 %v17264_v31  ;;  %v18193_v29 = vld [vmem:[#allocation56_spill] sm:$0xff] }
 0x912   :  { %9659 = vmatpush.msrb.mxu0 %v17267_v23 }
 0x913   :  { %9738 = vmatpush.msrb.mxu1 %v17270_v25  ;;  %9758 = vmatpush.msrb.mxu2 %v17273_v50  ;;  %v18194_v25 = vld [vmem:[#allocation57_spill] sm:$0xff] }
 0x914   :  { %9660 = vmatpush.msrb.mxu0 %v17276_v44 }
 0x915   :  { %9739 = vmatpush.msrb.mxu1 %v17279_v27  ;;  %9759 = vmatpush.msrb.mxu2 %v17282_v7  ;;  %v18195_v27 = vld [vmem:[#allocation119_spill] sm:$0xff] }
 0x916   :  { %9661 = vmatpush.msrb.mxu0 %v17285_v40 }
 0x917   :  { %9740 = vmatpush.msrb.mxu1 %v17288_v62  ;;  %9760 = vmatpush.msrb.mxu2 %v17291_v13  ;;  %v18196_v62 = vld [vmem:[#allocation125_spill] sm:$0xff] }
 0x918   :  { %9662 = vmatpush.msrb.mxu0 %v17294_v32 }
 0x919   :  { %9741 = vmatpush.msrb.mxu1 %v17297_v54  ;;  %9761 = vmatpush.msrb.mxu2 %v17300_v56 }
 0x91a   :  { %9663 = vmatpush.msrb.mxu0 %v17303_v5 }
 0x91b   :  { %9742 = vmatpush.msrb.mxu1 %v17306_v1  ;;  %9762 = vmatpush.msrb.mxu2 %v17309_v0 }
 0x91c   :  { %9664 = vmatpush.msrb.mxu0 %v17394_v45 }
 0x91d   :  { %9743 = vmatpush.msrb.mxu1 %v17313_v51  ;;  %9763 = vmatpush.msrb.mxu2 %v17316_v53 }
 0x91e   :  { %9665 = vmatpush.msrb.mxu0 %v17399_v47 }
 0x91f   :  { %9744 = vmatpush.msrb.mxu1 %v17320_v26  ;;  %9764 = vmatpush.msrb.mxu2 %v17323_v37  ;;  %v18197_v26 = vld [vmem:[#allocation49_spill] sm:$0xff]  ;;  %v18198_v37 = vmov 0  }
 0x920   :  { %9666 = vmatpush.msrb.mxu0 %v17404_v18  ;;  %vm9602_vm5 = vcmp.eq.s32.totalorder %v18197_v26, 5  ;;  %vm9721_vm14 = vcmp.eq.s32.totalorder %v18197_v26, 6 }
 0x921   :  { %9745 = vmatpush.msrb.mxu1 %v18185_v34  ;;  %9765 = vmatpush.msrb.mxu2 %v18186_v14  ;;  %v9603_v12 = vsel %vm9602_vm5, 1, %v18198_v37  ;;  %v18199_v34 = vld [vmem:[#allocation53_spill] sm:$0xff] }
 0x922   :  { %9667 = vmatpush.msrb.mxu0 %v18187_v21  ;;  %9605 = vperm.xlu2 %14431, %v9603_v12  }
 0x923   :  { %9746 = vmatpush.msrb.mxu1 %v18188_v57  ;;  %9766 = vmatpush.msrb.mxu2 %v18189_v4 }
 0x924   :  { %9668 = vmatpush.msrb.mxu0 %v18190_v59 }
 0x925   :  { %9747 = vmatpush.msrb.mxu1 %v18191_v49  ;;  %9767 = vmatpush.msrb.mxu2 %v18192_v63 }
 0x982   :  { %v9392_v60 = vpop.f32.mrf.mxu0  ;;  %v9412_v33 = vpop.f32.mrf.mxu1 }
 0x983   :  { %v9393_v31 = vadd.f32 %v9392_v60, %v18193_v29  ;;  %v9413_v50 = vadd.f32 %v9412_v33, %v18194_v25 }
 0x985   :  { %v9435_v7 = vadd.f32 %v9393_v31, %v18195_v27  ;;  %v9455_v13 = vadd.f32 %v9413_v50, %v18196_v62 }
 0x987   :  { %v13511_v54 = vmul.f32 -1.442695, %v9435_v7  ;;  %v13512_v56 = vmul.f32 -1.442695, %v9455_v13 }
 0x989   :  { %14472 = vpow2.f32 %v13511_v54  ;;  %v9432_v28 = vpop.f32.mrf.mxu2 }
 0x98a   :  { %14474 = vpow2.f32 %v13512_v56  ;;  %v9433_v48 = vadd.f32 %v9432_v28, %v17138_v2 }
 0x98f   :  { %v14473_v1 = vpop.eup %14472 }
 0x990   :  { %v14475_v0 = vpop.eup %14474  ;;  %v9439_v51 = vadd.f32 1.0, %v14473_v1 }
 0x991   :  { %v9459_v53 = vadd.f32 1.0, %v14475_v0 }
 0x992   :  { %14476 = vrcp.f32 %v9439_v51  ;;  %v9451_v8 = vand.u32 2147483648, %v9439_v51  ;;  %v9449_v43 = vand.u32 2147483647, %v9439_v51  ;;  %vm9445_vm7 = vweird.f32 %v9439_v51 }
 0x993   :  { %14478 = vrcp.f32 %v9459_v53  ;;  %v9471_v3 = vand.u32 2147483648, %v9459_v53  ;;  %vm9465_vm11 = vweird.f32 %v9459_v53  ;;  %v9469_v55 = vand.u32 2147483647, %v9459_v53 }
 0x994   :  { %v9452_v17 = vor.u32 1.1754944e-38, %v9451_v8  ;;  %vm9450_vm9 = vcmp.eq.f32.partialorder %v9449_v43, 8.507059e+37  ;;  %v18202_v43 = vld [vmem:[#allocation54_spill] sm:$0xff] }
 0x995   :  { %v9472_v4 = vor.u32 1.1754944e-38, %v9471_v3  ;;  %vm9470_vm13 = vcmp.eq.f32.partialorder %v9469_v55, 8.507059e+37 }
 0x998   :  { %v14477_v30 = vpop.eup %14476 }
 0x999   :  { %v14479_v15 = vpop.eup %14478  ;;  %v9441_v61 = vmul.f32 %v14477_v30, %v9439_v51  ;;  %vm9446_vm6 = vweird.f32 %v14477_v30 }
 0x99a   :  { %v9461_v6 = vmul.f32 %v14479_v15, %v9459_v53  ;;  %vm9447_vm8 = vmor %vm9445_vm7, %vm9446_vm6  ;;  %vm9466_vm10 = vweird.f32 %v14479_v15  ;;  %vm9840_vm7 = vcmp.eq.s32.totalorder %v18197_v26, 7 }
 0x99b   :  { %v9442_v36 = vsub.f32 1.0, %v9441_v61  ;;  %vm9467_vm12 = vmor %vm9465_vm11, %vm9466_vm10 }
 0x99c   :  { %v9462_v19 = vsub.f32 1.0, %v9461_v6 }
 0x99d   :  { %v9443_v24 = vmul.f32 %v14477_v30, %v9442_v36 }
 0x99e   :  { %v9463_v41 = vmul.f32 %v14479_v15, %v9462_v19 }
 0x99f   :  { %v9444_v10 = vadd.f32 %v14477_v30, %v9443_v24 }
 0x9a0   :  { %v9464_v9 = vadd.f32 %v14479_v15, %v9463_v41 }
 0x9a1   :  { %v9448_v42 = vsel %vm9447_vm8, %v14477_v30, %v9444_v10 }
 0x9a2   :  { %v9453_v16 = vsel %vm9450_vm9, %v9452_v17, %v9448_v42  ;;  %v9468_v57 = vsel %vm9467_vm12, %v14479_v15, %v9464_v9 }
 0x9a3   :  { %v9475_v52 = vmul.f32 %v9453_v16, %v9433_v48  ;;  %v9473_v49 = vsel %vm9470_vm13, %v9472_v4, %v9468_v57  ;;  %v18203_v57 = vld [vmem:[#allocation121_spill] sm:$0xff] }
 0x9a4   :  { %v9478_v63 = vsub.f32 1.0, %v9473_v49  ;;  %v9480_v31 = vmul.f32 %v9473_v49, %v17428_v11  ;;  %v18204_v49 = vld [vmem:[#allocation23_spill] sm:$0xff] }
 0x9a5   :  { %v9476_v14 = vadd.f32 %v9475_v52, %v18199_v34 }
 0x9a7   :  { %14480 = vtanh.f32 %v9476_v14 }
 0x9ad   :  { %v14481_v60 = vpop.eup %14480 }
 0x9ae   :  { %v9479_v33 = vmul.f32 %v14481_v60, %v9478_v63 }
 0x9b0   :  { %v17490_v50 = vadd.f32 %v9480_v31, %v9479_v33 }
 0x9b2   :  { %9510 = vmatmul.f32.vlgmr.msrb.gmra.mxu3 %v17490_v50  ;;  %9530 = vmatmul.f32.vlgmr.msra.gmra.mxu0 %v17490_v50 }
 0x9b3   :  { %9550 = vmatmul.f32.vlgmr.msra.gmra.mxu1 %v17490_v50  ;;  %9772 = vmatpush.msrb.mxu3 %v17229_v35 }
 0x9b5   :  { %9773 = vmatpush.msrb.mxu3 %v17234_v39 }
 0x9b7   :  { %9774 = vmatpush.msrb.mxu3 %v17239_v38  ;;  %v18200_v38 = vld [vmem:[#allocation126_spill] sm:$0xff] }
 0x9b9   :  { %9775 = vmatpush.msrb.mxu3 %v17244_v58 }
 0x9bb   :  { %9776 = vmatpush.msrb.mxu3 %v17251_v22 }
 0x9bd   :  { %9777 = vmatpush.msrb.mxu3 %v17258_v46 }
 0x9bf   :  { %9778 = vmatpush.msrb.mxu3 %v17267_v23 }
 0x9c1   :  { %9779 = vmatpush.msrb.mxu3 %v17276_v44  ;;  %v18201_v44 = vld [vmem:[#allocation120_spill] sm:$0xff] }
 0x9c3   :  { %9780 = vmatpush.msrb.mxu3 %v17285_v40 }
 0x9c5   :  { %9781 = vmatpush.msrb.mxu3 %v17294_v32 }
 0x9c7   :  { %9782 = vmatpush.msrb.mxu3 %v17303_v5 }
 0x9c9   :  { %9783 = vmatpush.msrb.mxu3 %v17394_v45 }
 0x9cb   :  { %9784 = vmatpush.msrb.mxu3 %v17399_v47 }
 0x9cd   :  { %9785 = vmatpush.msrb.mxu3 %v17404_v18 }
 0x9cf   :  { %9786 = vmatpush.msrb.mxu3 %v18187_v21 }
 0x9d1   :  { %9787 = vmatpush.msrb.mxu3 %v18190_v59  ;;  %v9722_v59 = vsel %vm9721_vm14, 1, %v18198_v37 }
 0x9d2   :  { %9724 = vperm.xlu0 %14429, %v9722_v59  }
 0xa2f   :  { %v9531_v35 = vpop.f32.mrf.mxu0 }
 0xa30   :  { %v9532_v39 = vadd.f32 %v9531_v35, %v18194_v25  ;;  %v9551_v53 = vpop.f32.mrf.mxu1 }
 0xa31   :  { %v9552_v15 = vadd.f32 %v9551_v53, %v17138_v2 }
 0xa32   :  { %v9574_v58 = vadd.f32 %v9532_v39, %v18200_v38 }
 0xa34   :  { %v13514_v22 = vmul.f32 -1.442695, %v9574_v58  ;;  %v9841_v58 = vsel %vm9840_vm7, 1, %v18198_v37 }
 0xa35   :  { %v9511_v46 = vpop.f32.mrf.mxu3  ;;  %9843 = vperm.xlu1 %14430, %v9841_v58  }
 0xa36   :  { %14482 = vpow2.f32 %v13514_v22  ;;  %v9512_v23 = vadd.f32 %v9511_v46, %v18193_v29 }
 0xa38   :  { %v9554_v40 = vadd.f32 %v9512_v23, %v18201_v44 }
 0xa3a   :  { %v13513_v32 = vmul.f32 -1.442695, %v9554_v40 }
 0xa3c   :  { %v14483_v5 = vpop.eup %14482  ;;  %14484 = vpow2.f32 %v13513_v32 }
 0xa3d   :  { %v9578_v45 = vadd.f32 1.0, %v14483_v5 }
 0xa3f   :  { %14486 = vrcp.f32 %v9578_v45  ;;  %v9590_v19 = vand.u32 2147483648, %v9578_v45  ;;  %vm9584_vm4 = vweird.f32 %v9578_v45  ;;  %v9588_v24 = vand.u32 2147483647, %v9578_v45 }
 0xa41   :  { %v9591_v10 = vor.u32 1.1754944e-38, %v9590_v19  ;;  %vm9589_vm6 = vcmp.eq.f32.partialorder %v9588_v24, 8.507059e+37  ;;  %v18206_v24 = vld [vmem:[#allocation122_spill] sm:$0xff] }
 0xa42   :  { %v14485_v47 = vpop.eup %14484 }
 0xa43   :  { %v9558_v18 = vadd.f32 1.0, %v14485_v47 }
 0xa45   :  { %14488 = vrcp.f32 %v9558_v18  ;;  %v14487_v21 = vpop.eup %14486  ;;  %v9570_v56 = vand.u32 2147483648, %v9558_v18  ;;  %v9568_v0 = vand.u32 2147483647, %v9558_v18  ;;  %vm9564_vm0 = vweird.f32 %v9558_v18 }
 0xa46   :  { %v9580_v27 = vmul.f32 %v14487_v21, %v9578_v45  ;;  %vm9585_vm3 = vweird.f32 %v14487_v21 }
 0xa47   :  { %v9571_v30 = vor.u32 1.1754944e-38, %v9570_v56  ;;  %vm9569_vm2 = vcmp.eq.f32.partialorder %v9568_v0, 8.507059e+37  ;;  %vm9586_vm5 = vmor %vm9584_vm4, %vm9585_vm3 }
 0xa48   :  { %v9581_v13 = vsub.f32 1.0, %v9580_v27 }
 0xa4a   :  { %v9582_v51 = vmul.f32 %v14487_v21, %v9581_v13 }
 0xa4b   :  { %v14489_v7 = vpop.eup %14488 }
 0xa4c   :  { %v9560_v62 = vmul.f32 %v14489_v7, %v9558_v18  ;;  %vm9565_vm15 = vweird.f32 %v14489_v7  ;;  %v9583_v6 = vadd.f32 %v14487_v21, %v9582_v51 }
 0xa4d   :  { %vm9566_vm1 = vmor %vm9564_vm0, %vm9565_vm15 }
 0xa4e   :  { %v9561_v54 = vsub.f32 1.0, %v9560_v62  ;;  %v9587_v28 = vsel %vm9586_vm5, %v14487_v21, %v9583_v6 }
 0xa4f   :  { %v9592_v17 = vsel %vm9589_vm6, %v9591_v10, %v9587_v28 }
 0xa50   :  { %v9562_v1 = vmul.f32 %v14489_v7, %v9561_v54  ;;  %v9597_v48 = vsub.f32 1.0, %v9592_v17  ;;  %v9599_v9 = vmul.f32 %v9592_v17, %v17490_v50  ;;  %v18207_v17 = vld [vmem:[#allocation24_spill] sm:$0xff] }
 0xa52   :  { %v9563_v12 = vadd.f32 %v14489_v7, %v9562_v1  ;;  %v18205_v1 = vld [vmem:[#allocation55_spill] sm:$0xff] }
 0xa54   :  { %v9567_v61 = vsel %vm9566_vm1, %v14489_v7, %v9563_v12 }
 0xa55   :  { %v9572_v36 = vsel %vm9569_vm2, %v9571_v30, %v9567_v61 }
 0xa56   :  { %v9594_v8 = vmul.f32 %v9572_v36, %v9552_v15 }
 0xa58   :  { %v9595_v41 = vadd.f32 %v9594_v8, %v18202_v43 }
 0xa5a   :  { %14490 = vtanh.f32 %v9595_v41 }
 0xa60   :  { %v14491_v42 = vpop.eup %14490 }
 0xa61   :  { %v9598_v16 = vmul.f32 %v14491_v42, %v9597_v48 }
 0xa63   :  { %v17520_v3 = vadd.f32 %v9599_v9, %v9598_v16 }
 0xa65   :  { %9629 = vmatmul.f32.vlgmr.msra.gmra.mxu2 %v17520_v3  ;;  %9649 = vmatmul.f32.vlgmr.msra.gmra.mxu3 %v17520_v3 }
 0xa66   :  { %9669 = vmatmul.f32.vlgmr.msrb.gmra.mxu0 %v17520_v3 }
 0xae3   :  { %v9670_v18 = vpop.f32.mrf.mxu0 }
 0xae4   :  { %v9671_v26 = vadd.f32 %v9670_v18, %v17138_v2 }
 0xae8   :  { %v9630_v52 = vpop.f32.mrf.mxu2  ;;  %v9650_v55 = vpop.f32.mrf.mxu3 }
 0xae9   :  { %v9631_v34 = vadd.f32 %v9630_v52, %v18193_v29  ;;  %v9651_v14 = vadd.f32 %v9650_v55, %v18194_v25 }
 0xaeb   :  { %v9673_v4 = vadd.f32 %v9631_v34, %v18203_v57  ;;  %v9693_v63 = vadd.f32 %v9651_v14, %v18204_v49 }
 0xaed   :  { %v13515_v60 = vmul.f32 -1.442695, %v9673_v4  ;;  %v13516_v33 = vmul.f32 -1.442695, %v9693_v63 }
 0xaef   :  { %14492 = vpow2.f32 %v13515_v60 }
 0xaf0   :  { %14494 = vpow2.f32 %v13516_v33 }
 0xaf5   :  { %v14493_v31 = vpop.eup %14492 }
 0xaf6   :  { %v14495_v35 = vpop.eup %14494  ;;  %v9677_v39 = vadd.f32 1.0, %v14493_v31 }
 0xaf7   :  { %v9697_v38 = vadd.f32 1.0, %v14495_v35 }
 0xaf8   :  { %14496 = vrcp.f32 %v9677_v39  ;;  %v9689_v32 = vand.u32 2147483648, %v9677_v39  ;;  %v9687_v47 = vand.u32 2147483647, %v9677_v39  ;;  %vm9683_vm9 = vweird.f32 %v9677_v39 }
 0xaf9   :  { %14498 = vrcp.f32 %v9697_v38  ;;  %v9709_v54 = vand.u32 2147483648, %v9697_v38  ;;  %vm9703_vm13 = vweird.f32 %v9697_v38  ;;  %v9707_v56 = vand.u32 2147483647, %v9697_v38 }
 0xafa   :  { %v9690_v27 = vor.u32 1.1754944e-38, %v9689_v32  ;;  %vm9688_vm11 = vcmp.eq.f32.partialorder %v9687_v47, 8.507059e+37 }
 0xafb   :  { %v9710_v53 = vor.u32 1.1754944e-38, %v9709_v54  ;;  %vm9708_vm15 = vcmp.eq.f32.partialorder %v9707_v56, 8.507059e+37  ;;  %v18210_v54 = vld [vmem:[#allocation59_spill] sm:$0xff] }
 0xafe   :  { %v14497_v22 = vpop.eup %14496 }
 0xaff   :  { %v14499_v46 = vpop.eup %14498  ;;  %v9679_v23 = vmul.f32 %v14497_v22, %v9677_v39  ;;  %vm9684_vm8 = vweird.f32 %v14497_v22 }
 0xb00   :  { %v9699_v44 = vmul.f32 %v14499_v46, %v9697_v38  ;;  %vm9685_vm10 = vmor %vm9683_vm9, %vm9684_vm8  ;;  %vm9704_vm12 = vweird.f32 %v14499_v46 }
 0xb01   :  { %v9680_v40 = vsub.f32 1.0, %v9679_v23  ;;  %vm9705_vm14 = vmor %vm9703_vm13, %vm9704_vm12  ;;  %v18209_v23 = vld [vmem:[#allocation60_spill] sm:$0xff] }
 0xb02   :  { %v9700_v5 = vsub.f32 1.0, %v9699_v44 }
 0xb03   :  { %v9681_v45 = vmul.f32 %v14497_v22, %v9680_v40  ;;  %v9487_v40 = vpop.permute.xlu2 %9486 }
 0xb04   :  { %v9701_v21 = vmul.f32 %v14499_v46, %v9700_v5  ;;  %vm9488_vm12 = vcmp.eq.s32.totalorder %v9487_v40, 1 }
 0xb05   :  { %v9682_v59 = vadd.f32 %v14497_v22, %v9681_v45 }
 0xb06   :  { %v9702_v62 = vadd.f32 %v14499_v46, %v9701_v21 }
 0xb07   :  { %v9686_v37 = vsel %vm9685_vm10, %v14497_v22, %v9682_v59 }
 0xb08   :  { %v9691_v7 = vsel %vm9688_vm11, %v9690_v27, %v9686_v37  ;;  %v9706_v51 = vsel %vm9705_vm14, %v14499_v46, %v9702_v62  ;;  %v18208_v46 = vld [vmem:[#allocation58_spill] sm:$0xff] }
 0xb09   :  { %v9713_v13 = vmul.f32 %v9691_v7, %v9671_v26  ;;  %v9711_v12 = vsel %vm9708_vm15, %v9710_v53, %v9706_v51  ;;  %v8810_v44 = vadd.f32 %v18209_v23, %v18208_v46  ;;  %v8888_v7 = vld [vmem:[#allocation3] sm:$0xff] }
 0xb0a   :  { %v9716_v30 = vsub.f32 1.0, %v9711_v12  ;;  %v9718_v6 = vmul.f32 %v9711_v12, %v17520_v3 }
 0xb0b   :  { %v9714_v0 = vadd.f32 %v9713_v13, %v18205_v1  ;;  %v9606_v13 = vpop.permute.xlu2 %9605 }
 0xb0c   :  { %vm9607_vm13 = vcmp.eq.s32.totalorder %v9606_v13, 1 }
 0xb0d   :  { %14500 = vtanh.f32 %v9714_v0  ;;  %v18211_v0 = vld [vmem:[#allocation61_spill] sm:$0xff] }
 0xb13   :  { %v14501_v15 = vpop.eup %14500 }
 0xb14   :  { %v9717_v61 = vmul.f32 %v14501_v15, %v9716_v30 }
 0xb16   :  { %v17534_v36 = vadd.f32 %v9718_v6, %v9717_v61 }
 0xb18   :  { %9748 = vmatmul.f32.vlgmr.msrb.gmra.mxu1 %v17534_v36  ;;  %9768 = vmatmul.f32.vlgmr.msrb.gmra.mxu2 %v17534_v36 }
 0xb19   :  { %9788 = vmatmul.f32.vlgmr.msrb.gmra.mxu3 %v17534_v36 }
 0xb95   :  { %v9749_v19 = vpop.f32.mrf.mxu1 }
 0xb96   :  { %v9750_v8 = vadd.f32 %v9749_v19, %v18193_v29  ;;  %v9011_v29 = vpop.permute.xlu0 %9010 }
 0xb97   :  { %vm9012_vm7 = vcmp.eq.s32.totalorder %v9011_v29, 1 }
 0xb98   :  { %v9792_v43 = vadd.f32 %v9750_v8, %v18206_v24  ;;  %v9013_v56 = vsel %vm9012_vm7, %v18210_v54, %v8888_v7 }
 0xb9a   :  { %v13517_v41 = vmul.f32 -1.442695, %v9792_v43 }
 0xb9b   :  { %v9769_v28 = vpop.f32.mrf.mxu2 }
 0xb9c   :  { %14502 = vpow2.f32 %v13517_v41  ;;  %v9770_v10 = vadd.f32 %v9769_v28, %v18194_v25  ;;  %v9249_v25 = vpop.permute.xlu1 %9248  ;;  %v9789_v33 = vpop.f32.mrf.mxu3 }
 0xb9d   :  { %v9790_v58 = vadd.f32 %v9789_v33, %v17138_v2  ;;  %vm9250_vm10 = vcmp.eq.s32.totalorder %v9249_v25, 1 }
 0xb9e   :  { %v9812_v48 = vadd.f32 %v9770_v10, %v18207_v17  ;;  %v9130_v5 = vpop.permute.xlu0 %9129 }
 0xb9f   :  { %vm9131_vm9 = vcmp.eq.s32.totalorder %v9130_v5, 1 }
 0xba0   :  { %v13518_v42 = vmul.f32 -1.442695, %v9812_v48  ;;  %v9132_v51 = vsel %vm9131_vm9, %v18211_v0, %v9013_v56 }
 0xba1   :  { %v9251_v30 = vsel %vm9250_vm10, %v17356_v20, %v9132_v51 }
 0xba2   :  { %v14503_v16 = vpop.eup %14502  ;;  %14504 = vpow2.f32 %v13518_v42 }
 0xba3   :  { %v9796_v9 = vadd.f32 1.0, %v14503_v16 }
 0xba4   :  { %v9368_v26 = vpop.permute.xlu1 %9367 }
 0xba5   :  { %14506 = vrcp.f32 %v9796_v9  ;;  %v9808_v4 = vand.u32 2147483648, %v9796_v9  ;;  %v9806_v63 = vand.u32 2147483647, %v9796_v9  ;;  %vm9802_vm1 = vweird.f32 %v9796_v9 }
 0xba6   :  { %vm9369_vm11 = vcmp.eq.s32.totalorder %v9368_v26, 1  ;;  %v9725_v1 = vpop.permute.xlu0 %9724 }
 0xba7   :  { %v9809_v39 = vor.u32 1.1754944e-38, %v9808_v4  ;;  %vm9807_vm3 = vcmp.eq.f32.partialorder %v9806_v63, 8.507059e+37  ;;  %v9370_v15 = vsel %vm9369_vm11, %v17428_v11, %v9251_v30  ;;  %vm9726_vm14 = vcmp.eq.s32.totalorder %v9725_v1, 1 }
 0xba8   :  { %v14505_v52 = vpop.eup %14504  ;;  %v9489_v8 = vsel %vm9488_vm12, %v17490_v50, %v9370_v15 }
 0xba9   :  { %v9816_v55 = vadd.f32 1.0, %v14505_v52  ;;  %v9608_v24 = vsel %vm9607_vm13, %v17520_v3, %v9489_v8 }
 0xbaa   :  { %v9727_v41 = vsel %vm9726_vm14, %v17534_v36, %v9608_v24 }
 0xbab   :  { %v14507_v34 = vpop.eup %14506  ;;  %14508 = vrcp.f32 %v9816_v55  ;;  %v9828_v18 = vand.u32 2147483648, %v9816_v55  ;;  %v9826_v21 = vand.u32 2147483647, %v9816_v55  ;;  %vm9822_vm5 = vweird.f32 %v9816_v55 }
 0xbac   :  { %v9798_v14 = vmul.f32 %v14507_v34, %v9796_v9  ;;  %vm9803_vm0 = vweird.f32 %v14507_v34  ;;  %v9844_v61 = vpop.permute.xlu1 %9843 }
 0xbad   :  { %vm9804_vm2 = vmor %vm9802_vm1, %vm9803_vm0  ;;  %v9829_v37 = vor.u32 1.1754944e-38, %v9828_v18  ;;  %vm9827_vm8 = vcmp.eq.f32.partialorder %v9826_v21, 8.507059e+37  ;;  %vm9845_vm15 = vcmp.eq.s32.totalorder %v9844_v61, 1 }
 0xbae   :  { %v9799_v57 = vsub.f32 1.0, %v9798_v14 }
 0xbb0   :  { %v9800_v49 = vmul.f32 %v14507_v34, %v9799_v57 }
 0xbb1   :  { %v14509_v60 = vpop.eup %14508 }
 0xbb2   :  { %v9818_v31 = vmul.f32 %v14509_v60, %v9816_v55  ;;  %v9801_v35 = vadd.f32 %v14507_v34, %v9800_v49  ;;  %vm9823_vm4 = vweird.f32 %v14509_v60 }
 0xbb3   :  { %vm9824_vm6 = vmor %vm9822_vm5, %vm9823_vm4 }
 0xbb4   :  { %v9819_v38 = vsub.f32 1.0, %v9818_v31  ;;  %v9805_v22 = vsel %vm9804_vm2, %v14507_v34, %v9801_v35 }
 0xbb5   :  { %v9810_v32 = vsel %vm9807_vm3, %v9809_v39, %v9805_v22 }
 0xbb6   :  { %v9832_v45 = vmul.f32 %v9810_v32, %v9790_v58  ;;  %v9820_v47 = vmul.f32 %v14509_v60, %v9819_v38 }
 0xbb8   :  { %v9833_v59 = vadd.f32 %v9832_v45, %v8810_v44  ;;  %v9821_v27 = vadd.f32 %v14509_v60, %v9820_v47 }
 0xbba   :  { %14510 = vtanh.f32 %v9833_v59  ;;  %v9825_v2 = vsel %vm9824_vm6, %v14509_v60, %v9821_v27 }
 0xbbb   :  { %v9830_v62 = vsel %vm9827_vm8, %v9829_v37, %v9825_v2 }
 0xbbc   :  { %v9835_v53 = vsub.f32 1.0, %v9830_v62  ;;  %v9837_v19 = vmul.f32 %v9830_v62, %v17534_v36 }
 0xbc0   :  { %v14511_v12 = vpop.eup %14510 }
 0xbc1   :  { %v9836_v6 = vmul.f32 %v14511_v12, %v9835_v53 }
 0xbc3   :  { %v9838_v43 = vadd.f32 %v9837_v19, %v9836_v6 }
 0xbc5   :  { %v9846_v28 = vsel %vm9845_vm15, %v9838_v43, %v9727_v41  ;;  %9847 = vst [vmem:[#allocation2] sm:$0xff] %v9838_v43 }
 0xbc6   :  { %9848 = vst [vmem:[#allocation3] sm:$0xff] %v9846_v28 }
 0xbc7 PF:  { %v9868_v20 = vld [vmem:[#allocation14 + $0x78] sm:$0xff]  ;;  %v9867_v10 = vld [vmem:[#allocation14 + $0x70] sm:$0xff]  ;;  %v9866_v11 = vld [vmem:[#allocation14 + $0x68] sm:$0xff]  ;;  %v9893_v4 = vlaneseq }
 0xbc8   :  { %9873 = vmatpush.msra.mxu0 %v9868_v20  ;;  %v9865_v17 = vld [vmem:[#allocation14 + $0x60] sm:$0xff]  ;;  %v9864_v48 = vld [vmem:[#allocation14 + $0x58] sm:$0xff]  ;;  %v9863_v50 = vld [vmem:[#allocation14 + $0x50] sm:$0xff] }
 0xbc9   :  { %v9862_v3 = vld [vmem:[#allocation14 + $0x48] sm:$0xff]  ;;  %v9861_v42 = vld [vmem:[#allocation14 + $0x40] sm:$0xff]  ;;  %v9860_v36 = vld [vmem:[#allocation14 + $0x38] sm:$0xff]  ;;  %v9894_v49 = vand.u32 127, %v9893_v4 }
 0xbca   :  { %9874 = vmatpush.msra.mxu0 %v9867_v10  ;;  %v9859_v16 = vld [vmem:[#allocation14 + $0x30] sm:$0xff]  ;;  %v9858_v9 = vld [vmem:[#allocation14 + $0x28] sm:$0xff]  ;;  %v9857_v52 = vld [vmem:[#allocation14 + $0x20] sm:$0xff] }
 0xbcb   :  { %v9856_v55 = vld [vmem:[#allocation14 + $0x18] sm:$0xff]  ;;  %v9855_v34 = vld [vmem:[#allocation14 + $0x10] sm:$0xff]  ;;  %v9854_v14 = vld [vmem:[#allocation14 + $0x8] sm:$0xff]  ;;  %vm9895_vm0 = vcmp.lt.s32.totalorder %v9894_v49, 20 }
 0xbcc   :  { %9875 = vmatpush.msra.mxu0 %v9866_v11  ;;  %v9853_v29 = vld [vmem:[#allocation14] sm:$0xff] }
 0xbcd   :  { %v9852_v57 = vld [vmem:[#allocation3] sm:$0xff]  ;;  %v14562_v63 = vld [vmem:[#allocation15] ss:$0 sm:$0xff] }
 0xbce   :  { %9876 = vmatpush.msra.mxu0 %v9865_v17 }
 0xbd0   :  { %9877 = vmatpush.msra.mxu0 %v9864_v48 }
 0xbd2   :  { %9878 = vmatpush.msra.mxu0 %v9863_v50 }
 0xbd4   :  { %9879 = vmatpush.msra.mxu0 %v9862_v3 }
 0xbd6   :  { %9880 = vmatpush.msra.mxu0 %v9861_v42 }
 0xbd8   :  { %9881 = vmatpush.msra.mxu0 %v9860_v36 }
 0xbda   :  { %9882 = vmatpush.msra.mxu0 %v9859_v16 }
 0xbdc   :  { %9883 = vmatpush.msra.mxu0 %v9858_v9 }
 0xbde   :  { %9884 = vmatpush.msra.mxu0 %v9857_v52 }
 0xbe0   :  { %9885 = vmatpush.msra.mxu0 %v9856_v55 }
 0xbe2   :  { %9886 = vmatpush.msra.mxu0 %v9855_v34 }
 0xbe4   :  { %9887 = vmatpush.msra.mxu0 %v9854_v14 }
 0xbe6   :  { %9888 = vmatpush.msra.mxu0 %v9853_v29 }
 0xbe7   :  { %9889 = vmatmul.f32.vlgmr.msra.gmra.mxu0 %v9852_v57 }
 0xc64   :  { %v9890_v60 = vpop.f32.mrf.mxu0 }
 0xc65   :  { %v9891_v25 = vadd.f32 %v14562_v63, %v9890_v60 }
 0xc67   :  { %v9896_v33 = vsel %vm9895_vm0, %v9891_v25, -1e+30 }
 0xc68   :  { %9897 = vmax.xlane.f32.xlu0 %v9896_v33 }
 0xcdb   :  { %v9898_v31 = vpop.xlane.xlu0 %9897 }
 0xcdc   :  { %v9899_v35 = vsub.f32 %v9896_v33, %v9898_v31 }
 0xcde   :  { %v9900_v39 = vmul.f32 1.442695, %v9899_v35 }
 0xce0   :  { %14563 = vpow2.f32 %v9900_v39 }
 0xce6   :  { %v14564_v38 = vpop.eup %14563 }
 0xce7   :  { %9902 = vadd.xlane.f32.xlu0 %v14564_v38 }
 0xd5a   :  { %v9903_v58 = vpop.xlane.xlu0 %9902 }
 0xd5b   :  { %14565 = vlog2.f32 %v9903_v58 }
 0xd61   :  { %v14566_v22 = vpop.eup %14565 }
 0xd62   :  { %v9905_v46 = vmul.f32 0.6931472, %v14566_v22 }
 0xd64   :  { %v9906_v23 = vsub.f32 %v9899_v35, %v9905_v46 }
 0xd66   :  { %9907 = vst [vmem:[%s17566_s9] sm:$0xff] %v9906_v23 }
 0xd67   :  { %9912 = vsyncpa [#allocation8], 1 }
 0xd68   :  { %9913 = vsyncpa [#allocation10], 1 }
 0xd69   :  { %9914 = vsyncpa [#allocation13], 1 }
 0xd6a   :  { %9915 = vsyncpa [#allocation16], 1 }

</bundles_post_ra>
